<compile_context>
chip_gen: v7x
topology: tpu7x:2x2x1
jax: 0.10.0
libtpu: 0.0.40
codegen_flags: <defaults>
</compile_context>

<pallas_src>
import functools

import jax
import jax.numpy as jnp
from jax import lax
from jax.experimental import pallas as pl
from jax.experimental.pallas import tpu as pltpu

SELU_ALPHA = 1.6732632423543772
SELU_SCALE = 1.0507009873554805
LRELU_SLOPE = 0.01          # PyTorch LeakyReLU default
IN_EPS = 1e-5               # PyTorch InstanceNorm2d default


# ----------------------------- kernel helpers ------------------------------

def _instance_norm_flat(y_flat, n, hw):
    """y_flat: (n*hw, C).  Per-sample, per-channel norm over hw.  -> (n, hw, C)."""
    c = y_flat.shape[-1]
    y = y_flat.reshape(n, hw, c)
    m = jnp.mean(y, axis=1, keepdims=True)
    yc = y - m
    v = jnp.mean(yc * yc, axis=1, keepdims=True)
    return yc * lax.rsqrt(v + IN_EPS)


def _leaky_relu(y):
    return jnp.where(y > 0, y, LRELU_SLOPE * y)


def _selu(y):
    return SELU_SCALE * jnp.where(y > 0, y, SELU_ALPHA * (jnp.exp(y) - 1.0))


# --------------------------------- kernel ----------------------------------

def _resnet_block2_kernel(x_ref, w1_ref, w2_ref, wr_ref, o_ref,
                          pad_s, cmax_s, cavg_s, *, N, H, W, cin, cmid, cout):
    HW = H * W
    M = N * HW
    Ho = H // 2
    taps = [(dh, dw) for dh in range(3) for dw in range(3)]

    def conv3x3(read_patch, w_ref, k_in):
        # 3x3 conv = 9 accumulated flat matmuls: (N*H*W, k_in) @ (k_in, k_out).
        acc = None
        for idx, (dh, dw) in enumerate(taps):
            p = read_patch(dh, dw).reshape(M, k_in)
            t = jnp.dot(p, w_ref[idx], preferred_element_type=jnp.float32)
            acc = t if acc is None else acc + t
        return acc

    # ---- main branch: conv1 (3x3, input pre-padded in wrapper) + IN + LeakyReLU
    # (conv bias omitted: it cancels exactly under the affine-free InstanceNorm)
    acc1 = conv3x3(lambda dh, dw: x_ref[:, dh:dh + H, dw:dw + W, :],
                   w1_ref, cin)
    y1 = _leaky_relu(_instance_norm_flat(acc1, N, HW))            # (N, HW, cmid)

    # ---- stage y1 into a zero-BORDERED scratch for conv2's padding=1 ----
    pad_s[:, 0:1, :, :] = jnp.zeros((N, 1, W + 2, cmid), jnp.float32)
    pad_s[:, H + 1:H + 2, :, :] = jnp.zeros((N, 1, W + 2, cmid), jnp.float32)
    pad_s[:, :, 0:1, :] = jnp.zeros((N, H + 2, 1, cmid), jnp.float32)
    pad_s[:, :, W + 1:W + 2, :] = jnp.zeros((N, H + 2, 1, cmid), jnp.float32)
    pad_s[:, 1:H + 1, 1:W + 1, :] = y1.reshape(N, H, W, cmid)

    # ---- conv2 (3x3) + IN + LeakyReLU
    acc2 = conv3x3(lambda dh, dw: pad_s[:, dh:dh + H, dw:dw + W, :],
                   w2_ref, cmid)
    y2 = _leaky_relu(_instance_norm_flat(acc2, N, HW)).reshape(N, H, W, cout)

    # ---- MaxPool2d(kernel=3, stride=2, padding=1): row (H) direction --------
    neg = jnp.full((N, 1, W, cout), -jnp.inf, jnp.float32)
    yp = jnp.concatenate([neg, y2, neg], axis=1)                  # (N, H+2, W, C)
    a = yp[:, 0:2 * Ho].reshape(N, Ho, 2, W, cout)                # rows 2i, 2i+1
    c = yp[:, 2:2 * Ho + 2].reshape(N, Ho, 2, W, cout)            # rows 2i+2
    rowmax = jnp.maximum(jnp.maximum(a[:, :, 0], a[:, :, 1]), c[:, :, 0])

    # column (W) direction, vectorized: -inf-bordered scratch gives the +-1 shifts
    cmax_s[:, :, 0:1, :] = jnp.full((N, Ho, 1, cout), -jnp.inf, jnp.float32)
    cmax_s[:, :, W + 1:W + 2, :] = jnp.full((N, Ho, 1, cout), -jnp.inf, jnp.float32)
    cmax_s[:, :, 1:W + 1, :] = rowmax
    colmax = jnp.maximum(jnp.maximum(cmax_s[:, :, 0:W, :], rowmax),
                         cmax_s[:, :, 2:W + 2, :])     # (N,Ho,W,C), valid at even w

    # ---- residual branch: conv1x1 + IN (bias cancels) + AvgPool2d(2,2) -------
    xi = x_ref[:, 1:H + 1, 1:W + 1, :].reshape(M, cin)            # unpadded input
    r = jnp.dot(xi, wr_ref[...], preferred_element_type=jnp.float32)
    r = _instance_norm_flat(r, N, HW).reshape(N, H, W, cout)
    ra = r.reshape(N, Ho, 2, W, cout)
    rowavg = (ra[:, :, 0] + ra[:, :, 1]) * 0.5                    # (N, Ho, W, C)

    cavg_s[:, :, W:W + 1, :] = jnp.zeros((N, Ho, 1, cout), jnp.float32)
    cavg_s[:, :, 0:W, :] = rowavg
    colavg = (rowavg + cavg_s[:, :, 1:W + 1, :]) * 0.5            # valid at even w

    # ---- residual add + SELU, one dense full-block store ---------------------
    o_ref[...] = _selu(colmax + colavg)
    # (odd output columns hold finite don't-care values; the wrapper keeps the
    #  even columns, which is the stride-2 pooling output)


# -------------------------------- wrapper ----------------------------------

def init_params(key, cin, cout, cmid):
    ks = jax.random.split(key, 6)
    # Conv weights in HWIO layout.  Biases are kept for API fidelity but are not
    # applied in the kernel (they cancel exactly under affine-free InstanceNorm).
    return dict(
        w1=jax.random.normal(ks[0], (3, 3, cin, cmid), jnp.float32) * 0.2,
        b1=jax.random.normal(ks[1], (1, 1, cmid), jnp.float32) * 0.1,
        w2=jax.random.normal(ks[2], (3, 3, cmid, cout), jnp.float32) * 0.2,
        b2=jax.random.normal(ks[3], (1, 1, cout), jnp.float32) * 0.1,
        wr=jax.random.normal(ks[4], (cin, cout), jnp.float32) * 0.2,
        br=jax.random.normal(ks[5], (1, 1, cout), jnp.float32) * 0.1,
    )


@jax.jit
def resnet_block_2(x_nchw, params):
    N, cin, H, W = x_nchw.shape
    cmid = params['w1'].shape[-1]
    cout = params['w2'].shape[-1]
    Ho = H // 2

    x = jnp.transpose(x_nchw, (0, 2, 3, 1)).astype(jnp.float32)   # NCHW -> NHWC
    x_pad = jnp.pad(x, ((0, 0), (1, 1), (1, 1), (0, 0)))          # conv1 padding
    w1 = params['w1'].reshape(9, cin, cmid)                       # per-tap (cin,cmid)
    w2 = params['w2'].reshape(9, cmid, cout)
    wr = params['wr']

    kernel = functools.partial(_resnet_block2_kernel, N=N, H=H, W=W,
                               cin=cin, cmid=cmid, cout=cout)

    # Whole batch in a single grid step: the matmul M dim is N*H*W.
    # TODO(synk): for large H/W/C, re-tile over H strips (with halo) so the
    # per-step working set also fits v7x's smaller (64 MiB) VMEM.
    out_full = pl.pallas_call(
        kernel,
        out_shape=jax.ShapeDtypeStruct((N, Ho, W, cout), jnp.float32),
        grid_spec=pltpu.PrefetchScalarGridSpec(
            num_scalar_prefetch=0,
            grid=(1,),
            in_specs=[
                pl.BlockSpec((N, H + 2, W + 2, cin), lambda i: (0, 0, 0, 0)),
                pl.BlockSpec((9, cin, cmid), lambda i: (0, 0, 0)),
                pl.BlockSpec((9, cmid, cout), lambda i: (0, 0, 0)),
                pl.BlockSpec((cin, cout), lambda i: (0, 0)),
            ],
            out_specs=pl.BlockSpec((N, Ho, W, cout), lambda i: (0, 0, 0, 0)),
            scratch_shapes=[
                pltpu.VMEM((N, H + 2, W + 2, cmid), jnp.float32),  # conv2 pad stage
                pltpu.VMEM((N, Ho, W + 2, cout), jnp.float32),     # maxpool col shifts
                pltpu.VMEM((N, Ho, W + 1, cout), jnp.float32),     # avgpool col shift
            ]),
        compiler_params=pltpu.CompilerParams(
            dimension_semantics=("arbitrary",),
            vmem_limit_bytes=32 * 1024 * 1024),   # plenty; usage here is ~0.1 MiB
    )(x_pad, w1, w2, wr)

    out = out_full[:, :, 0::2, :]                 # keep even columns (stride-2)
    return jnp.transpose(out, (0, 3, 1, 2))       # NHWC -> NCHW


# ------------------------- pure-JAX reference check ------------------------

def _ref_forward(x_nchw, params):
    x = jnp.transpose(x_nchw, (0, 2, 3, 1)).astype(jnp.float32)
    dn = ('NHWC', 'HWIO', 'NHWC')

    def conv(v, w, b, pad):
        y = lax.conv_general_dilated(v, w, (1, 1), pad, dimension_numbers=dn)
        return y + b.reshape(1, 1, 1, -1)

    def inorm(y, eps=IN_EPS):
        m = jnp.mean(y, axis=(1, 2), keepdims=True)
        v = jnp.mean((y - m) ** 2, axis=(1, 2), keepdims=True)
        return (y - m) * lax.rsqrt(v + eps)

    def leaky(y):
        return jnp.where(y > 0, y, LRELU_SLOPE * y)

    y = leaky(inorm(conv(x, params['w1'], params['b1'], [(1, 1), (1, 1)])))
    y = leaky(inorm(conv(y, params['w2'], params['b2'], [(1, 1), (1, 1)])))
    out = lax.reduce_window(y, -jnp.inf, lax.max, (1, 3, 3, 1), (1, 2, 2, 1),
                            [(0, 0), (1, 1), (1, 1), (0, 0)])
    wr4 = params['wr'].reshape(1, 1, *params['wr'].shape)
    r = inorm(conv(x, wr4, params['br'], [(0, 0), (0, 0)]))
    r = lax.reduce_window(r, 0.0, lax.add, (1, 2, 2, 1), (1, 2, 2, 1),
                          [(0, 0), (0, 0), (0, 0), (0, 0)]) * 0.25
    s = out + r
    s = SELU_SCALE * jnp.where(s > 0, s, SELU_ALPHA * (jnp.exp(s) - 1.0))
    return jnp.transpose(s, (0, 3, 1, 2))


# ----------------------------------- main -----------------------------------

if __name__ == "__main__":
    key = jax.random.PRNGKey(0)
    kx, kp = jax.random.split(key)

    N, ch_in, ch_out, H, W = 2, 4, 8, 16, 16
    ch_between = ch_out // 2

    x = jax.random.normal(kx, (N, ch_in, H, W), jnp.float32)
    params = init_params(kp, ch_in, ch_out, ch_between)

    out = jax.block_until_ready(resnet_block_2(x, params))
    assert out.shape == (N, ch_out, H // 2, W // 2), out.shape

    ref = jax.block_until_ready(_ref_forward(x, params))
    if not jnp.allclose(out, ref, atol=1e-3, rtol=1e-3):
        raise AssertionError(
            f"mismatch vs reference, max abs err = {jnp.max(jnp.abs(out - ref))}")

    print("KERNEL_OK")
</pallas_src>

<mosaic_0001>
module attributes {stable_mosaic.version = 11 : i64} {
  func.func @_resnet_block2_kernel(%arg0: i32, %arg1: memref<2x18x18x4xf32, #tpu.memory_space<vmem>>, %arg2: memref<9x4x4xf32, #tpu.memory_space<vmem>>, %arg3: memref<9x4x8xf32, #tpu.memory_space<vmem>>, %arg4: memref<4x8xf32, #tpu.memory_space<vmem>>, %arg5: memref<2x8x16x8xf32, #tpu.memory_space<vmem>>, %arg6: memref<2x18x18x4xf32, #tpu.memory_space<vmem>>, %arg7: memref<2x8x18x8xf32, #tpu.memory_space<vmem>>, %arg8: memref<2x8x17x8xf32, #tpu.memory_space<vmem>>) attributes {dimension_semantics = [#tpu.dimension_semantics<arbitrary>], iteration_bounds = array<i64: 1>, scalar_prefetch = 0 : i64, scratch_operands = 3 : i64, tpu.core_type = #tpu.core_type<tc>, window_params = [{pipeline_mode = #tpu.pipeline_mode<synchronous>, transform_indices = @transform_0, window_bounds = array<i64: 2, 18, 18, 4>}, {pipeline_mode = #tpu.pipeline_mode<synchronous>, transform_indices = @transform_1, window_bounds = array<i64: 9, 4, 4>}, {pipeline_mode = #tpu.pipeline_mode<synchronous>, transform_indices = @transform_2, window_bounds = array<i64: 9, 4, 8>}, {pipeline_mode = #tpu.pipeline_mode<synchronous>, transform_indices = @transform_3, window_bounds = array<i64: 4, 8>}, {pipeline_mode = #tpu.pipeline_mode<synchronous>, transform_indices = @transform_4, window_bounds = array<i64: 2, 8, 16, 8>}]} {
    %c0 = arith.constant 0 : index
    %c0_0 = arith.constant 0 : index
    %c0_1 = arith.constant 0 : index
    %c0_2 = arith.constant 0 : index
    %0 = vector.load %arg1[%c0, %c0_0, %c0_1, %c0_2] : memref<2x18x18x4xf32, #tpu.memory_space<vmem>>, vector<2x16x16x4xf32>
    %1 = vector.shape_cast %0 : vector<2x16x16x4xf32> to vector<512x4xf32>
    %c0_3 = arith.constant 0 : index
    %c0_4 = arith.constant 0 : index
    %c0_5 = arith.constant 0 : index
    %2 = vector.load %arg2[%c0_3, %c0_4, %c0_5] : memref<9x4x4xf32, #tpu.memory_space<vmem>>, vector<1x4x4xf32>
    %3 = vector.shape_cast %2 : vector<1x4x4xf32> to vector<4x4xf32>
    %cst = arith.constant dense<0.000000e+00> : vector<512x4xf32>
    %4 = tpu.matmul %1, %3, %cst {dimension_numbers = #tpu.dot_dimension_numbers<[1], [0], [0], [1], [0, 0, 1, 1], [], []>} : vector<512x4xf32>, vector<4x4xf32>, vector<512x4xf32> -> vector<512x4xf32>
    %c0_6 = arith.constant 0 : index
    %c0_7 = arith.constant 0 : index
    %c1 = arith.constant 1 : index
    %c0_8 = arith.constant 0 : index
    %5 = vector.load %arg1[%c0_6, %c0_7, %c1, %c0_8] : memref<2x18x18x4xf32, #tpu.memory_space<vmem>>, vector<2x16x16x4xf32>
    %6 = vector.shape_cast %5 : vector<2x16x16x4xf32> to vector<512x4xf32>
    %c1_9 = arith.constant 1 : index
    %c0_10 = arith.constant 0 : index
    %c0_11 = arith.constant 0 : index
    %7 = vector.load %arg2[%c1_9, %c0_10, %c0_11] : memref<9x4x4xf32, #tpu.memory_space<vmem>>, vector<1x4x4xf32>
    %8 = vector.shape_cast %7 : vector<1x4x4xf32> to vector<4x4xf32>
    %cst_12 = arith.constant dense<0.000000e+00> : vector<512x4xf32>
    %9 = tpu.matmul %6, %8, %cst_12 {dimension_numbers = #tpu.dot_dimension_numbers<[1], [0], [0], [1], [0, 0, 1, 1], [], []>} : vector<512x4xf32>, vector<4x4xf32>, vector<512x4xf32> -> vector<512x4xf32>
    %10 = arith.addf %4, %9 : vector<512x4xf32>
    %c0_13 = arith.constant 0 : index
    %c0_14 = arith.constant 0 : index
    %c2 = arith.constant 2 : index
    %c0_15 = arith.constant 0 : index
    %11 = vector.load %arg1[%c0_13, %c0_14, %c2, %c0_15] : memref<2x18x18x4xf32, #tpu.memory_space<vmem>>, vector<2x16x16x4xf32>
    %12 = vector.shape_cast %11 : vector<2x16x16x4xf32> to vector<512x4xf32>
    %c2_16 = arith.constant 2 : index
    %c0_17 = arith.constant 0 : index
    %c0_18 = arith.constant 0 : index
    %13 = vector.load %arg2[%c2_16, %c0_17, %c0_18] : memref<9x4x4xf32, #tpu.memory_space<vmem>>, vector<1x4x4xf32>
    %14 = vector.shape_cast %13 : vector<1x4x4xf32> to vector<4x4xf32>
    %cst_19 = arith.constant dense<0.000000e+00> : vector<512x4xf32>
    %15 = tpu.matmul %12, %14, %cst_19 {dimension_numbers = #tpu.dot_dimension_numbers<[1], [0], [0], [1], [0, 0, 1, 1], [], []>} : vector<512x4xf32>, vector<4x4xf32>, vector<512x4xf32> -> vector<512x4xf32>
    %16 = arith.addf %10, %15 : vector<512x4xf32>
    %c0_20 = arith.constant 0 : index
    %c1_21 = arith.constant 1 : index
    %c0_22 = arith.constant 0 : index
    %c0_23 = arith.constant 0 : index
    %17 = vector.load %arg1[%c0_20, %c1_21, %c0_22, %c0_23] : memref<2x18x18x4xf32, #tpu.memory_space<vmem>>, vector<2x16x16x4xf32>
    %18 = vector.shape_cast %17 : vector<2x16x16x4xf32> to vector<512x4xf32>
    %c3 = arith.constant 3 : index
    %c0_24 = arith.constant 0 : index
    %c0_25 = arith.constant 0 : index
    %19 = vector.load %arg2[%c3, %c0_24, %c0_25] : memref<9x4x4xf32, #tpu.memory_space<vmem>>, vector<1x4x4xf32>
    %20 = vector.shape_cast %19 : vector<1x4x4xf32> to vector<4x4xf32>
    %cst_26 = arith.constant dense<0.000000e+00> : vector<512x4xf32>
    %21 = tpu.matmul %18, %20, %cst_26 {dimension_numbers = #tpu.dot_dimension_numbers<[1], [0], [0], [1], [0, 0, 1, 1], [], []>} : vector<512x4xf32>, vector<4x4xf32>, vector<512x4xf32> -> vector<512x4xf32>
    %22 = arith.addf %16, %21 : vector<512x4xf32>
    %c0_27 = arith.constant 0 : index
    %c1_28 = arith.constant 1 : index
    %c1_29 = arith.constant 1 : index
    %c0_30 = arith.constant 0 : index
    %23 = vector.load %arg1[%c0_27, %c1_28, %c1_29, %c0_30] : memref<2x18x18x4xf32, #tpu.memory_space<vmem>>, vector<2x16x16x4xf32>
    %24 = vector.shape_cast %23 : vector<2x16x16x4xf32> to vector<512x4xf32>
    %c4 = arith.constant 4 : index
    %c0_31 = arith.constant 0 : index
    %c0_32 = arith.constant 0 : index
    %25 = vector.load %arg2[%c4, %c0_31, %c0_32] : memref<9x4x4xf32, #tpu.memory_space<vmem>>, vector<1x4x4xf32>
    %26 = vector.shape_cast %25 : vector<1x4x4xf32> to vector<4x4xf32>
    %cst_33 = arith.constant dense<0.000000e+00> : vector<512x4xf32>
    %27 = tpu.matmul %24, %26, %cst_33 {dimension_numbers = #tpu.dot_dimension_numbers<[1], [0], [0], [1], [0, 0, 1, 1], [], []>} : vector<512x4xf32>, vector<4x4xf32>, vector<512x4xf32> -> vector<512x4xf32>
    %28 = arith.addf %22, %27 : vector<512x4xf32>
    %c0_34 = arith.constant 0 : index
    %c1_35 = arith.constant 1 : index
    %c2_36 = arith.constant 2 : index
    %c0_37 = arith.constant 0 : index
    %29 = vector.load %arg1[%c0_34, %c1_35, %c2_36, %c0_37] : memref<2x18x18x4xf32, #tpu.memory_space<vmem>>, vector<2x16x16x4xf32>
    %30 = vector.shape_cast %29 : vector<2x16x16x4xf32> to vector<512x4xf32>
    %c5 = arith.constant 5 : index
    %c0_38 = arith.constant 0 : index
    %c0_39 = arith.constant 0 : index
    %31 = vector.load %arg2[%c5, %c0_38, %c0_39] : memref<9x4x4xf32, #tpu.memory_space<vmem>>, vector<1x4x4xf32>
    %32 = vector.shape_cast %31 : vector<1x4x4xf32> to vector<4x4xf32>
    %cst_40 = arith.constant dense<0.000000e+00> : vector<512x4xf32>
    %33 = tpu.matmul %30, %32, %cst_40 {dimension_numbers = #tpu.dot_dimension_numbers<[1], [0], [0], [1], [0, 0, 1, 1], [], []>} : vector<512x4xf32>, vector<4x4xf32>, vector<512x4xf32> -> vector<512x4xf32>
    %34 = arith.addf %28, %33 : vector<512x4xf32>
    %c0_41 = arith.constant 0 : index
    %c2_42 = arith.constant 2 : index
    %c0_43 = arith.constant 0 : index
    %c0_44 = arith.constant 0 : index
    %35 = vector.load %arg1[%c0_41, %c2_42, %c0_43, %c0_44] : memref<2x18x18x4xf32, #tpu.memory_space<vmem>>, vector<2x16x16x4xf32>
    %36 = vector.shape_cast %35 : vector<2x16x16x4xf32> to vector<512x4xf32>
    %c6 = arith.constant 6 : index
    %c0_45 = arith.constant 0 : index
    %c0_46 = arith.constant 0 : index
    %37 = vector.load %arg2[%c6, %c0_45, %c0_46] : memref<9x4x4xf32, #tpu.memory_space<vmem>>, vector<1x4x4xf32>
    %38 = vector.shape_cast %37 : vector<1x4x4xf32> to vector<4x4xf32>
    %cst_47 = arith.constant dense<0.000000e+00> : vector<512x4xf32>
    %39 = tpu.matmul %36, %38, %cst_47 {dimension_numbers = #tpu.dot_dimension_numbers<[1], [0], [0], [1], [0, 0, 1, 1], [], []>} : vector<512x4xf32>, vector<4x4xf32>, vector<512x4xf32> -> vector<512x4xf32>
    %40 = arith.addf %34, %39 : vector<512x4xf32>
    %c0_48 = arith.constant 0 : index
    %c2_49 = arith.constant 2 : index
    %c1_50 = arith.constant 1 : index
    %c0_51 = arith.constant 0 : index
    %41 = vector.load %arg1[%c0_48, %c2_49, %c1_50, %c0_51] : memref<2x18x18x4xf32, #tpu.memory_space<vmem>>, vector<2x16x16x4xf32>
    %42 = vector.shape_cast %41 : vector<2x16x16x4xf32> to vector<512x4xf32>
    %c7 = arith.constant 7 : index
    %c0_52 = arith.constant 0 : index
    %c0_53 = arith.constant 0 : index
    %43 = vector.load %arg2[%c7, %c0_52, %c0_53] : memref<9x4x4xf32, #tpu.memory_space<vmem>>, vector<1x4x4xf32>
    %44 = vector.shape_cast %43 : vector<1x4x4xf32> to vector<4x4xf32>
    %cst_54 = arith.constant dense<0.000000e+00> : vector<512x4xf32>
    %45 = tpu.matmul %42, %44, %cst_54 {dimension_numbers = #tpu.dot_dimension_numbers<[1], [0], [0], [1], [0, 0, 1, 1], [], []>} : vector<512x4xf32>, vector<4x4xf32>, vector<512x4xf32> -> vector<512x4xf32>
    %46 = arith.addf %40, %45 : vector<512x4xf32>
    %c0_55 = arith.constant 0 : index
    %c2_56 = arith.constant 2 : index
    %c2_57 = arith.constant 2 : index
    %c0_58 = arith.constant 0 : index
    %47 = vector.load %arg1[%c0_55, %c2_56, %c2_57, %c0_58] : memref<2x18x18x4xf32, #tpu.memory_space<vmem>>, vector<2x16x16x4xf32>
    %48 = vector.shape_cast %47 : vector<2x16x16x4xf32> to vector<512x4xf32>
    %c8 = arith.constant 8 : index
    %c0_59 = arith.constant 0 : index
    %c0_60 = arith.constant 0 : index
    %49 = vector.load %arg2[%c8, %c0_59, %c0_60] : memref<9x4x4xf32, #tpu.memory_space<vmem>>, vector<1x4x4xf32>
    %50 = vector.shape_cast %49 : vector<1x4x4xf32> to vector<4x4xf32>
    %cst_61 = arith.constant dense<0.000000e+00> : vector<512x4xf32>
    %51 = tpu.matmul %48, %50, %cst_61 {dimension_numbers = #tpu.dot_dimension_numbers<[1], [0], [0], [1], [0, 0, 1, 1], [], []>} : vector<512x4xf32>, vector<4x4xf32>, vector<512x4xf32> -> vector<512x4xf32>
    %52 = arith.addf %46, %51 : vector<512x4xf32>
    %53 = vector.shape_cast %52 : vector<512x4xf32> to vector<2x256x4xf32>
    %cst_62 = arith.constant dense<0.000000e+00> : vector<2x4xf32>
    %54 = vector.multi_reduction <add>, %53, %cst_62 [1] : vector<2x256x4xf32> to vector<2x4xf32>
    %55 = vector.shape_cast %54 : vector<2x4xf32> to vector<2x1x4xf32>
    %cst_63 = arith.constant 2.560000e+02 : f32
    %56 = vector.broadcast %cst_63 : f32 to vector<2x1x4xf32>
    %57 = arith.divf %55, %56 : vector<2x1x4xf32>
    %58 = vector.broadcast %57 : vector<2x1x4xf32> to vector<2x256x4xf32>
    %59 = arith.subf %53, %58 : vector<2x256x4xf32>
    %60 = arith.mulf %59, %59 : vector<2x256x4xf32>
    %cst_64 = arith.constant dense<0.000000e+00> : vector<2x4xf32>
    %61 = vector.multi_reduction <add>, %60, %cst_64 [1] : vector<2x256x4xf32> to vector<2x4xf32>
    %62 = vector.shape_cast %61 : vector<2x4xf32> to vector<2x1x4xf32>
    %cst_65 = arith.constant 2.560000e+02 : f32
    %63 = vector.broadcast %cst_65 : f32 to vector<2x1x4xf32>
    %64 = arith.divf %62, %63 : vector<2x1x4xf32>
    %cst_66 = arith.constant 9.99999974E-6 : f32
    %65 = vector.broadcast %cst_66 : f32 to vector<2x1x4xf32>
    %66 = arith.addf %64, %65 : vector<2x1x4xf32>
    %67 = math.rsqrt %66 : vector<2x1x4xf32>
    %68 = vector.broadcast %67 : vector<2x1x4xf32> to vector<2x256x4xf32>
    %69 = arith.mulf %59, %68 : vector<2x256x4xf32>
    %cst_67 = arith.constant 0.000000e+00 : f32
    %70 = vector.broadcast %cst_67 : f32 to vector<2x256x4xf32>
    %71 = arith.cmpf ogt, %69, %70 : vector<2x256x4xf32>
    %cst_68 = arith.constant 0.00999999977 : f32
    %72 = vector.broadcast %cst_68 : f32 to vector<2x256x4xf32>
    %73 = arith.mulf %72, %69 : vector<2x256x4xf32>
    %74 = arith.select %71, %69, %73 : vector<2x256x4xi1>, vector<2x256x4xf32>
    %cst_69 = arith.constant 0.000000e+00 : f32
    %75 = vector.broadcast %cst_69 : f32 to vector<2x1x18x4xf32>
    %c0_70 = arith.constant 0 : index
    %c0_71 = arith.constant 0 : index
    %c0_72 = arith.constant 0 : index
    %c0_73 = arith.constant 0 : index
    %76 = vector.load %arg6[%c0_70, %c0_71, %c0_72, %c0_73] : memref<2x18x18x4xf32, #tpu.memory_space<vmem>>, vector<2x1x18x4xf32>
    tpu.vector_store %arg6[%c0_70, %c0_71, %c0_72, %c0_73], %75 {strides = array<i32>} : memref<2x18x18x4xf32, #tpu.memory_space<vmem>>, vector<2x1x18x4xf32>,
    %cst_74 = arith.constant 0.000000e+00 : f32
    %77 = vector.broadcast %cst_74 : f32 to vector<2x1x18x4xf32>
    %c0_75 = arith.constant 0 : index
    %c17 = arith.constant 17 : index
    %c0_76 = arith.constant 0 : index
    %c0_77 = arith.constant 0 : index
    %78 = vector.load %arg6[%c0_75, %c17, %c0_76, %c0_77] : memref<2x18x18x4xf32, #tpu.memory_space<vmem>>, vector<2x1x18x4xf32>
    tpu.vector_store %arg6[%c0_75, %c17, %c0_76, %c0_77], %77 {strides = array<i32>} : memref<2x18x18x4xf32, #tpu.memory_space<vmem>>, vector<2x1x18x4xf32>,
    %cst_78 = arith.constant 0.000000e+00 : f32
    %79 = vector.broadcast %cst_78 : f32 to vector<2x18x1x4xf32>
    %c0_79 = arith.constant 0 : index
    %c0_80 = arith.constant 0 : index
    %c0_81 = arith.constant 0 : index
    %c0_82 = arith.constant 0 : index
    %80 = vector.load %arg6[%c0_79, %c0_80, %c0_81, %c0_82] : memref<2x18x18x4xf32, #tpu.memory_space<vmem>>, vector<2x18x1x4xf32>
    tpu.vector_store %arg6[%c0_79, %c0_80, %c0_81, %c0_82], %79 {strides = array<i32>} : memref<2x18x18x4xf32, #tpu.memory_space<vmem>>, vector<2x18x1x4xf32>,
    %cst_83 = arith.constant 0.000000e+00 : f32
    %81 = vector.broadcast %cst_83 : f32 to vector<2x18x1x4xf32>
    %c0_84 = arith.constant 0 : index
    %c0_85 = arith.constant 0 : index
    %c17_86 = arith.constant 17 : index
    %c0_87 = arith.constant 0 : index
    %82 = vector.load %arg6[%c0_84, %c0_85, %c17_86, %c0_87] : memref<2x18x18x4xf32, #tpu.memory_space<vmem>>, vector<2x18x1x4xf32>
    tpu.vector_store %arg6[%c0_84, %c0_85, %c17_86, %c0_87], %81 {strides = array<i32>} : memref<2x18x18x4xf32, #tpu.memory_space<vmem>>, vector<2x18x1x4xf32>,
    %83 = vector.shape_cast %74 : vector<2x256x4xf32> to vector<2x16x16x4xf32>
    %c0_88 = arith.constant 0 : index
    %c1_89 = arith.constant 1 : index
    %c1_90 = arith.constant 1 : index
    %c0_91 = arith.constant 0 : index
    %84 = vector.load %arg6[%c0_88, %c1_89, %c1_90, %c0_91] : memref<2x18x18x4xf32, #tpu.memory_space<vmem>>, vector<2x16x16x4xf32>
    tpu.vector_store %arg6[%c0_88, %c1_89, %c1_90, %c0_91], %83 {strides = array<i32>} : memref<2x18x18x4xf32, #tpu.memory_space<vmem>>, vector<2x16x16x4xf32>,
    %c0_92 = arith.constant 0 : index
    %c0_93 = arith.constant 0 : index
    %c0_94 = arith.constant 0 : index
    %c0_95 = arith.constant 0 : index
    %85 = vector.load %arg6[%c0_92, %c0_93, %c0_94, %c0_95] : memref<2x18x18x4xf32, #tpu.memory_space<vmem>>, vector<2x16x16x4xf32>
    %86 = vector.shape_cast %85 : vector<2x16x16x4xf32> to vector<512x4xf32>
    %c0_96 = arith.constant 0 : index
    %c0_97 = arith.constant 0 : index
    %c0_98 = arith.constant 0 : index
    %87 = vector.load %arg3[%c0_96, %c0_97, %c0_98] : memref<9x4x8xf32, #tpu.memory_space<vmem>>, vector<1x4x8xf32>
    %88 = vector.shape_cast %87 : vector<1x4x8xf32> to vector<4x8xf32>
    %cst_99 = arith.constant dense<0.000000e+00> : vector<512x8xf32>
    %89 = tpu.matmul %86, %88, %cst_99 {dimension_numbers = #tpu.dot_dimension_numbers<[1], [0], [0], [1], [0, 0, 1, 1], [], []>} : vector<512x4xf32>, vector<4x8xf32>, vector<512x8xf32> -> vector<512x8xf32>
    %c0_100 = arith.constant 0 : index
    %c0_101 = arith.constant 0 : index
    %c1_102 = arith.constant 1 : index
    %c0_103 = arith.constant 0 : index
    %90 = vector.load %arg6[%c0_100, %c0_101, %c1_102, %c0_103] : memref<2x18x18x4xf32, #tpu.memory_space<vmem>>, vector<2x16x16x4xf32>
    %91 = vector.shape_cast %90 : vector<2x16x16x4xf32> to vector<512x4xf32>
    %c1_104 = arith.constant 1 : index
    %c0_105 = arith.constant 0 : index
    %c0_106 = arith.constant 0 : index
    %92 = vector.load %arg3[%c1_104, %c0_105, %c0_106] : memref<9x4x8xf32, #tpu.memory_space<vmem>>, vector<1x4x8xf32>
    %93 = vector.shape_cast %92 : vector<1x4x8xf32> to vector<4x8xf32>
    %cst_107 = arith.constant dense<0.000000e+00> : vector<512x8xf32>
    %94 = tpu.matmul %91, %93, %cst_107 {dimension_numbers = #tpu.dot_dimension_numbers<[1], [0], [0], [1], [0, 0, 1, 1], [], []>} : vector<512x4xf32>, vector<4x8xf32>, vector<512x8xf32> -> vector<512x8xf32>
    %95 = arith.addf %89, %94 : vector<512x8xf32>
    %c0_108 = arith.constant 0 : index
    %c0_109 = arith.constant 0 : index
    %c2_110 = arith.constant 2 : index
    %c0_111 = arith.constant 0 : index
    %96 = vector.load %arg6[%c0_108, %c0_109, %c2_110, %c0_111] : memref<2x18x18x4xf32, #tpu.memory_space<vmem>>, vector<2x16x16x4xf32>
    %97 = vector.shape_cast %96 : vector<2x16x16x4xf32> to vector<512x4xf32>
    %c2_112 = arith.constant 2 : index
    %c0_113 = arith.constant 0 : index
    %c0_114 = arith.constant 0 : index
    %98 = vector.load %arg3[%c2_112, %c0_113, %c0_114] : memref<9x4x8xf32, #tpu.memory_space<vmem>>, vector<1x4x8xf32>
    %99 = vector.shape_cast %98 : vector<1x4x8xf32> to vector<4x8xf32>
    %cst_115 = arith.constant dense<0.000000e+00> : vector<512x8xf32>
    %100 = tpu.matmul %97, %99, %cst_115 {dimension_numbers = #tpu.dot_dimension_numbers<[1], [0], [0], [1], [0, 0, 1, 1], [], []>} : vector<512x4xf32>, vector<4x8xf32>, vector<512x8xf32> -> vector<512x8xf32>
    %101 = arith.addf %95, %100 : vector<512x8xf32>
    %c0_116 = arith.constant 0 : index
    %c1_117 = arith.constant 1 : index
    %c0_118 = arith.constant 0 : index
    %c0_119 = arith.constant 0 : index
    %102 = vector.load %arg6[%c0_116, %c1_117, %c0_118, %c0_119] : memref<2x18x18x4xf32, #tpu.memory_space<vmem>>, vector<2x16x16x4xf32>
    %103 = vector.shape_cast %102 : vector<2x16x16x4xf32> to vector<512x4xf32>
    %c3_120 = arith.constant 3 : index
    %c0_121 = arith.constant 0 : index
    %c0_122 = arith.constant 0 : index
    %104 = vector.load %arg3[%c3_120, %c0_121, %c0_122] : memref<9x4x8xf32, #tpu.memory_space<vmem>>, vector<1x4x8xf32>
    %105 = vector.shape_cast %104 : vector<1x4x8xf32> to vector<4x8xf32>
    %cst_123 = arith.constant dense<0.000000e+00> : vector<512x8xf32>
    %106 = tpu.matmul %103, %105, %cst_123 {dimension_numbers = #tpu.dot_dimension_numbers<[1], [0], [0], [1], [0, 0, 1, 1], [], []>} : vector<512x4xf32>, vector<4x8xf32>, vector<512x8xf32> -> vector<512x8xf32>
    %107 = arith.addf %101, %106 : vector<512x8xf32>
    %c0_124 = arith.constant 0 : index
    %c1_125 = arith.constant 1 : index
    %c1_126 = arith.constant 1 : index
    %c0_127 = arith.constant 0 : index
    %108 = vector.load %arg6[%c0_124, %c1_125, %c1_126, %c0_127] : memref<2x18x18x4xf32, #tpu.memory_space<vmem>>, vector<2x16x16x4xf32>
    %109 = vector.shape_cast %108 : vector<2x16x16x4xf32> to vector<512x4xf32>
    %c4_128 = arith.constant 4 : index
    %c0_129 = arith.constant 0 : index
    %c0_130 = arith.constant 0 : index
    %110 = vector.load %arg3[%c4_128, %c0_129, %c0_130] : memref<9x4x8xf32, #tpu.memory_space<vmem>>, vector<1x4x8xf32>
    %111 = vector.shape_cast %110 : vector<1x4x8xf32> to vector<4x8xf32>
    %cst_131 = arith.constant dense<0.000000e+00> : vector<512x8xf32>
    %112 = tpu.matmul %109, %111, %cst_131 {dimension_numbers = #tpu.dot_dimension_numbers<[1], [0], [0], [1], [0, 0, 1, 1], [], []>} : vector<512x4xf32>, vector<4x8xf32>, vector<512x8xf32> -> vector<512x8xf32>
    %113 = arith.addf %107, %112 : vector<512x8xf32>
    %c0_132 = arith.constant 0 : index
    %c1_133 = arith.constant 1 : index
    %c2_134 = arith.constant 2 : index
    %c0_135 = arith.constant 0 : index
    %114 = vector.load %arg6[%c0_132, %c1_133, %c2_134, %c0_135] : memref<2x18x18x4xf32, #tpu.memory_space<vmem>>, vector<2x16x16x4xf32>
    %115 = vector.shape_cast %114 : vector<2x16x16x4xf32> to vector<512x4xf32>
    %c5_136 = arith.constant 5 : index
    %c0_137 = arith.constant 0 : index
    %c0_138 = arith.constant 0 : index
    %116 = vector.load %arg3[%c5_136, %c0_137, %c0_138] : memref<9x4x8xf32, #tpu.memory_space<vmem>>, vector<1x4x8xf32>
    %117 = vector.shape_cast %116 : vector<1x4x8xf32> to vector<4x8xf32>
    %cst_139 = arith.constant dense<0.000000e+00> : vector<512x8xf32>
    %118 = tpu.matmul %115, %117, %cst_139 {dimension_numbers = #tpu.dot_dimension_numbers<[1], [0], [0], [1], [0, 0, 1, 1], [], []>} : vector<512x4xf32>, vector<4x8xf32>, vector<512x8xf32> -> vector<512x8xf32>
    %119 = arith.addf %113, %118 : vector<512x8xf32>
    %c0_140 = arith.constant 0 : index
    %c2_141 = arith.constant 2 : index
    %c0_142 = arith.constant 0 : index
    %c0_143 = arith.constant 0 : index
    %120 = vector.load %arg6[%c0_140, %c2_141, %c0_142, %c0_143] : memref<2x18x18x4xf32, #tpu.memory_space<vmem>>, vector<2x16x16x4xf32>
    %121 = vector.shape_cast %120 : vector<2x16x16x4xf32> to vector<512x4xf32>
    %c6_144 = arith.constant 6 : index
    %c0_145 = arith.constant 0 : index
    %c0_146 = arith.constant 0 : index
    %122 = vector.load %arg3[%c6_144, %c0_145, %c0_146] : memref<9x4x8xf32, #tpu.memory_space<vmem>>, vector<1x4x8xf32>
    %123 = vector.shape_cast %122 : vector<1x4x8xf32> to vector<4x8xf32>
    %cst_147 = arith.constant dense<0.000000e+00> : vector<512x8xf32>
    %124 = tpu.matmul %121, %123, %cst_147 {dimension_numbers = #tpu.dot_dimension_numbers<[1], [0], [0], [1], [0, 0, 1, 1], [], []>} : vector<512x4xf32>, vector<4x8xf32>, vector<512x8xf32> -> vector<512x8xf32>
    %125 = arith.addf %119, %124 : vector<512x8xf32>
    %c0_148 = arith.constant 0 : index
    %c2_149 = arith.constant 2 : index
    %c1_150 = arith.constant 1 : index
    %c0_151 = arith.constant 0 : index
    %126 = vector.load %arg6[%c0_148, %c2_149, %c1_150, %c0_151] : memref<2x18x18x4xf32, #tpu.memory_space<vmem>>, vector<2x16x16x4xf32>
    %127 = vector.shape_cast %126 : vector<2x16x16x4xf32> to vector<512x4xf32>
    %c7_152 = arith.constant 7 : index
    %c0_153 = arith.constant 0 : index
    %c0_154 = arith.constant 0 : index
    %128 = vector.load %arg3[%c7_152, %c0_153, %c0_154] : memref<9x4x8xf32, #tpu.memory_space<vmem>>, vector<1x4x8xf32>
    %129 = vector.shape_cast %128 : vector<1x4x8xf32> to vector<4x8xf32>
    %cst_155 = arith.constant dense<0.000000e+00> : vector<512x8xf32>
    %130 = tpu.matmul %127, %129, %cst_155 {dimension_numbers = #tpu.dot_dimension_numbers<[1], [0], [0], [1], [0, 0, 1, 1], [], []>} : vector<512x4xf32>, vector<4x8xf32>, vector<512x8xf32> -> vector<512x8xf32>
    %131 = arith.addf %125, %130 : vector<512x8xf32>
    %c0_156 = arith.constant 0 : index
    %c2_157 = arith.constant 2 : index
    %c2_158 = arith.constant 2 : index
    %c0_159 = arith.constant 0 : index
    %132 = vector.load %arg6[%c0_156, %c2_157, %c2_158, %c0_159] : memref<2x18x18x4xf32, #tpu.memory_space<vmem>>, vector<2x16x16x4xf32>
    %133 = vector.shape_cast %132 : vector<2x16x16x4xf32> to vector<512x4xf32>
    %c8_160 = arith.constant 8 : index
    %c0_161 = arith.constant 0 : index
    %c0_162 = arith.constant 0 : index
    %134 = vector.load %arg3[%c8_160, %c0_161, %c0_162] : memref<9x4x8xf32, #tpu.memory_space<vmem>>, vector<1x4x8xf32>
    %135 = vector.shape_cast %134 : vector<1x4x8xf32> to vector<4x8xf32>
    %cst_163 = arith.constant dense<0.000000e+00> : vector<512x8xf32>
    %136 = tpu.matmul %133, %135, %cst_163 {dimension_numbers = #tpu.dot_dimension_numbers<[1], [0], [0], [1], [0, 0, 1, 1], [], []>} : vector<512x4xf32>, vector<4x8xf32>, vector<512x8xf32> -> vector<512x8xf32>
    %137 = arith.addf %131, %136 : vector<512x8xf32>
    %138 = vector.shape_cast %137 : vector<512x8xf32> to vector<2x256x8xf32>
    %cst_164 = arith.constant dense<0.000000e+00> : vector<2x8xf32>
    %139 = vector.multi_reduction <add>, %138, %cst_164 [1] : vector<2x256x8xf32> to vector<2x8xf32>
    %140 = vector.shape_cast %139 : vector<2x8xf32> to vector<2x1x8xf32>
    %cst_165 = arith.constant 2.560000e+02 : f32
    %141 = vector.broadcast %cst_165 : f32 to vector<2x1x8xf32>
    %142 = arith.divf %140, %141 : vector<2x1x8xf32>
    %143 = vector.broadcast %142 : vector<2x1x8xf32> to vector<2x256x8xf32>
    %144 = arith.subf %138, %143 : vector<2x256x8xf32>
    %145 = arith.mulf %144, %144 : vector<2x256x8xf32>
    %cst_166 = arith.constant dense<0.000000e+00> : vector<2x8xf32>
    %146 = vector.multi_reduction <add>, %145, %cst_166 [1] : vector<2x256x8xf32> to vector<2x8xf32>
    %147 = vector.shape_cast %146 : vector<2x8xf32> to vector<2x1x8xf32>
    %cst_167 = arith.constant 2.560000e+02 : f32
    %148 = vector.broadcast %cst_167 : f32 to vector<2x1x8xf32>
    %149 = arith.divf %147, %148 : vector<2x1x8xf32>
    %cst_168 = arith.constant 9.99999974E-6 : f32
    %150 = vector.broadcast %cst_168 : f32 to vector<2x1x8xf32>
    %151 = arith.addf %149, %150 : vector<2x1x8xf32>
    %152 = math.rsqrt %151 : vector<2x1x8xf32>
    %153 = vector.broadcast %152 : vector<2x1x8xf32> to vector<2x256x8xf32>
    %154 = arith.mulf %144, %153 : vector<2x256x8xf32>
    %cst_169 = arith.constant 0.000000e+00 : f32
    %155 = vector.broadcast %cst_169 : f32 to vector<2x256x8xf32>
    %156 = arith.cmpf ogt, %154, %155 : vector<2x256x8xf32>
    %cst_170 = arith.constant 0.00999999977 : f32
    %157 = vector.broadcast %cst_170 : f32 to vector<2x256x8xf32>
    %158 = arith.mulf %157, %154 : vector<2x256x8xf32>
    %159 = arith.select %156, %154, %158 : vector<2x256x8xi1>, vector<2x256x8xf32>
    %160 = vector.shape_cast %159 : vector<2x256x8xf32> to vector<2x16x16x8xf32>
    %cst_171 = arith.constant 0xFF800000 : f32
    %161 = vector.broadcast %cst_171 : f32 to vector<2x1x16x8xf32>
    %162 = tpu.concatenate %161, %160, %161 in 1 : vector<2x1x16x8xf32>, vector<2x16x16x8xf32>, vector<2x1x16x8xf32> -> vector<2x18x16x8xf32>
    %163 = vector.extract_strided_slice %162 {offsets = [0, 0, 0, 0], sizes = [2, 16, 16, 8], strides = [1, 1, 1, 1]} : vector<2x18x16x8xf32> to vector<2x16x16x8xf32>
    %164 = vector.shape_cast %163 : vector<2x16x16x8xf32> to vector<2x8x2x16x8xf32>
    %165 = vector.extract_strided_slice %162 {offsets = [0, 2, 0, 0], sizes = [2, 16, 16, 8], strides = [1, 1, 1, 1]} : vector<2x18x16x8xf32> to vector<2x16x16x8xf32>
    %166 = vector.shape_cast %165 : vector<2x16x16x8xf32> to vector<2x8x2x16x8xf32>
    %167 = vector.extract_strided_slice %164 {offsets = [0, 0, 0, 0, 0], sizes = [2, 8, 1, 16, 8], strides = [1, 1, 1, 1, 1]} : vector<2x8x2x16x8xf32> to vector<2x8x1x16x8xf32>
    %168 = vector.shape_cast %167 : vector<2x8x1x16x8xf32> to vector<2x8x16x8xf32>
    %169 = vector.extract_strided_slice %164 {offsets = [0, 0, 1, 0, 0], sizes = [2, 8, 1, 16, 8], strides = [1, 1, 1, 1, 1]} : vector<2x8x2x16x8xf32> to vector<2x8x1x16x8xf32>
    %170 = vector.shape_cast %169 : vector<2x8x1x16x8xf32> to vector<2x8x16x8xf32>
    %171 = arith.maximumf %168, %170 : vector<2x8x16x8xf32>
    %172 = vector.extract_strided_slice %166 {offsets = [0, 0, 0, 0, 0], sizes = [2, 8, 1, 16, 8], strides = [1, 1, 1, 1, 1]} : vector<2x8x2x16x8xf32> to vector<2x8x1x16x8xf32>
    %173 = vector.shape_cast %172 : vector<2x8x1x16x8xf32> to vector<2x8x16x8xf32>
    %174 = arith.maximumf %171, %173 : vector<2x8x16x8xf32>
    %cst_172 = arith.constant 0xFF800000 : f32
    %175 = vector.broadcast %cst_172 : f32 to vector<2x8x1x8xf32>
    %c0_173 = arith.constant 0 : index
    %c0_174 = arith.constant 0 : index
    %c0_175 = arith.constant 0 : index
    %c0_176 = arith.constant 0 : index
    %176 = vector.load %arg7[%c0_173, %c0_174, %c0_175, %c0_176] : memref<2x8x18x8xf32, #tpu.memory_space<vmem>>, vector<2x8x1x8xf32>
    tpu.vector_store %arg7[%c0_173, %c0_174, %c0_175, %c0_176], %175 {strides = array<i32>} : memref<2x8x18x8xf32, #tpu.memory_space<vmem>>, vector<2x8x1x8xf32>,
    %cst_177 = arith.constant 0xFF800000 : f32
    %177 = vector.broadcast %cst_177 : f32 to vector<2x8x1x8xf32>
    %c0_178 = arith.constant 0 : index
    %c0_179 = arith.constant 0 : index
    %c17_180 = arith.constant 17 : index
    %c0_181 = arith.constant 0 : index
    %178 = vector.load %arg7[%c0_178, %c0_179, %c17_180, %c0_181] : memref<2x8x18x8xf32, #tpu.memory_space<vmem>>, vector<2x8x1x8xf32>
    tpu.vector_store %arg7[%c0_178, %c0_179, %c17_180, %c0_181], %177 {strides = array<i32>} : memref<2x8x18x8xf32, #tpu.memory_space<vmem>>, vector<2x8x1x8xf32>,
    %c0_182 = arith.constant 0 : index
    %c0_183 = arith.constant 0 : index
    %c1_184 = arith.constant 1 : index
    %c0_185 = arith.constant 0 : index
    %179 = vector.load %arg7[%c0_182, %c0_183, %c1_184, %c0_185] : memref<2x8x18x8xf32, #tpu.memory_space<vmem>>, vector<2x8x16x8xf32>
    tpu.vector_store %arg7[%c0_182, %c0_183, %c1_184, %c0_185], %174 {strides = array<i32>} : memref<2x8x18x8xf32, #tpu.memory_space<vmem>>, vector<2x8x16x8xf32>,
    %c0_186 = arith.constant 0 : index
    %c0_187 = arith.constant 0 : index
    %c0_188 = arith.constant 0 : index
    %c0_189 = arith.constant 0 : index
    %180 = vector.load %arg7[%c0_186, %c0_187, %c0_188, %c0_189] : memref<2x8x18x8xf32, #tpu.memory_space<vmem>>, vector<2x8x16x8xf32>
    %181 = arith.maximumf %180, %174 : vector<2x8x16x8xf32>
    %c0_190 = arith.constant 0 : index
    %c0_191 = arith.constant 0 : index
    %c2_192 = arith.constant 2 : index
    %c0_193 = arith.constant 0 : index
    %182 = vector.load %arg7[%c0_190, %c0_191, %c2_192, %c0_193] : memref<2x8x18x8xf32, #tpu.memory_space<vmem>>, vector<2x8x16x8xf32>
    %183 = arith.maximumf %181, %182 : vector<2x8x16x8xf32>
    %c0_194 = arith.constant 0 : index
    %c1_195 = arith.constant 1 : index
    %c1_196 = arith.constant 1 : index
    %c0_197 = arith.constant 0 : index
    %184 = vector.load %arg1[%c0_194, %c1_195, %c1_196, %c0_197] : memref<2x18x18x4xf32, #tpu.memory_space<vmem>>, vector<2x16x16x4xf32>
    %185 = vector.shape_cast %184 : vector<2x16x16x4xf32> to vector<512x4xf32>
    %c0_198 = arith.constant 0 : index
    %c0_199 = arith.constant 0 : index
    %186 = vector.load %arg4[%c0_198, %c0_199] : memref<4x8xf32, #tpu.memory_space<vmem>>, vector<4x8xf32>
    %cst_200 = arith.constant dense<0.000000e+00> : vector<512x8xf32>
    %187 = tpu.matmul %185, %186, %cst_200 {dimension_numbers = #tpu.dot_dimension_numbers<[1], [0], [0], [1], [0, 0, 1, 1], [], []>} : vector<512x4xf32>, vector<4x8xf32>, vector<512x8xf32> -> vector<512x8xf32>
    %188 = vector.shape_cast %187 : vector<512x8xf32> to vector<2x256x8xf32>
    %cst_201 = arith.constant dense<0.000000e+00> : vector<2x8xf32>
    %189 = vector.multi_reduction <add>, %188, %cst_201 [1] : vector<2x256x8xf32> to vector<2x8xf32>
    %190 = vector.shape_cast %189 : vector<2x8xf32> to vector<2x1x8xf32>
    %cst_202 = arith.constant 2.560000e+02 : f32
    %191 = vector.broadcast %cst_202 : f32 to vector<2x1x8xf32>
    %192 = arith.divf %190, %191 : vector<2x1x8xf32>
    %193 = vector.broadcast %192 : vector<2x1x8xf32> to vector<2x256x8xf32>
    %194 = arith.subf %188, %193 : vector<2x256x8xf32>
    %195 = arith.mulf %194, %194 : vector<2x256x8xf32>
    %cst_203 = arith.constant dense<0.000000e+00> : vector<2x8xf32>
    %196 = vector.multi_reduction <add>, %195, %cst_203 [1] : vector<2x256x8xf32> to vector<2x8xf32>
    %197 = vector.shape_cast %196 : vector<2x8xf32> to vector<2x1x8xf32>
    %cst_204 = arith.constant 2.560000e+02 : f32
    %198 = vector.broadcast %cst_204 : f32 to vector<2x1x8xf32>
    %199 = arith.divf %197, %198 : vector<2x1x8xf32>
    %cst_205 = arith.constant 9.99999974E-6 : f32
    %200 = vector.broadcast %cst_205 : f32 to vector<2x1x8xf32>
    %201 = arith.addf %199, %200 : vector<2x1x8xf32>
    %202 = math.rsqrt %201 : vector<2x1x8xf32>
    %203 = vector.broadcast %202 : vector<2x1x8xf32> to vector<2x256x8xf32>
    %204 = arith.mulf %194, %203 : vector<2x256x8xf32>
    %205 = vector.shape_cast %204 : vector<2x256x8xf32> to vector<2x16x16x8xf32>
    %206 = vector.shape_cast %205 : vector<2x16x16x8xf32> to vector<2x8x2x16x8xf32>
    %207 = vector.extract_strided_slice %206 {offsets = [0, 0, 0, 0, 0], sizes = [2, 8, 1, 16, 8], strides = [1, 1, 1, 1, 1]} : vector<2x8x2x16x8xf32> to vector<2x8x1x16x8xf32>
    %208 = vector.shape_cast %207 : vector<2x8x1x16x8xf32> to vector<2x8x16x8xf32>
    %209 = vector.extract_strided_slice %206 {offsets = [0, 0, 1, 0, 0], sizes = [2, 8, 1, 16, 8], strides = [1, 1, 1, 1, 1]} : vector<2x8x2x16x8xf32> to vector<2x8x1x16x8xf32>
    %210 = vector.shape_cast %209 : vector<2x8x1x16x8xf32> to vector<2x8x16x8xf32>
    %211 = arith.addf %208, %210 : vector<2x8x16x8xf32>
    %cst_206 = arith.constant 5.000000e-01 : f32
    %212 = vector.broadcast %cst_206 : f32 to vector<2x8x16x8xf32>
    %213 = arith.mulf %211, %212 : vector<2x8x16x8xf32>
    %cst_207 = arith.constant 0.000000e+00 : f32
    %214 = vector.broadcast %cst_207 : f32 to vector<2x8x1x8xf32>
    %c0_208 = arith.constant 0 : index
    %c0_209 = arith.constant 0 : index
    %c16 = arith.constant 16 : index
    %c0_210 = arith.constant 0 : index
    %215 = vector.load %arg8[%c0_208, %c0_209, %c16, %c0_210] : memref<2x8x17x8xf32, #tpu.memory_space<vmem>>, vector<2x8x1x8xf32>
    tpu.vector_store %arg8[%c0_208, %c0_209, %c16, %c0_210], %214 {strides = array<i32>} : memref<2x8x17x8xf32, #tpu.memory_space<vmem>>, vector<2x8x1x8xf32>,
    %c0_211 = arith.constant 0 : index
    %c0_212 = arith.constant 0 : index
    %c0_213 = arith.constant 0 : index
    %c0_214 = arith.constant 0 : index
    %216 = vector.load %arg8[%c0_211, %c0_212, %c0_213, %c0_214] : memref<2x8x17x8xf32, #tpu.memory_space<vmem>>, vector<2x8x16x8xf32>
    tpu.vector_store %arg8[%c0_211, %c0_212, %c0_213, %c0_214], %213 {strides = array<i32>} : memref<2x8x17x8xf32, #tpu.memory_space<vmem>>, vector<2x8x16x8xf32>,
    %c0_215 = arith.constant 0 : index
    %c0_216 = arith.constant 0 : index
    %c1_217 = arith.constant 1 : index
    %c0_218 = arith.constant 0 : index
    %217 = vector.load %arg8[%c0_215, %c0_216, %c1_217, %c0_218] : memref<2x8x17x8xf32, #tpu.memory_space<vmem>>, vector<2x8x16x8xf32>
    %218 = arith.addf %213, %217 : vector<2x8x16x8xf32>
    %cst_219 = arith.constant 5.000000e-01 : f32
    %219 = vector.broadcast %cst_219 : f32 to vector<2x8x16x8xf32>
    %220 = arith.mulf %218, %219 : vector<2x8x16x8xf32>
    %221 = arith.addf %183, %220 : vector<2x8x16x8xf32>
    %cst_220 = arith.constant 0.000000e+00 : f32
    %222 = vector.broadcast %cst_220 : f32 to vector<2x8x16x8xf32>
    %223 = arith.cmpf ogt, %221, %222 : vector<2x8x16x8xf32>
    %224 = math.exp %221 : vector<2x8x16x8xf32>
    %cst_221 = arith.constant 1.000000e+00 : f32
    %225 = vector.broadcast %cst_221 : f32 to vector<2x8x16x8xf32>
    %226 = arith.subf %224, %225 : vector<2x8x16x8xf32>
    %cst_222 = arith.constant 1.67326319 : f32
    %227 = vector.broadcast %cst_222 : f32 to vector<2x8x16x8xf32>
    %228 = arith.mulf %227, %226 : vector<2x8x16x8xf32>
    %229 = arith.select %223, %221, %228 : vector<2x8x16x8xi1>, vector<2x8x16x8xf32>
    %cst_223 = arith.constant 1.05070102 : f32
    %230 = vector.broadcast %cst_223 : f32 to vector<2x8x16x8xf32>
    %231 = arith.mulf %230, %229 : vector<2x8x16x8xf32>
    %c0_224 = arith.constant 0 : index
    %c0_225 = arith.constant 0 : index
    %c0_226 = arith.constant 0 : index
    %c0_227 = arith.constant 0 : index
    %232 = vector.load %arg5[%c0_224, %c0_225, %c0_226, %c0_227] : memref<2x8x16x8xf32, #tpu.memory_space<vmem>>, vector<2x8x16x8xf32>
    tpu.vector_store %arg5[%c0_224, %c0_225, %c0_226, %c0_227], %231 {strides = array<i32>} : memref<2x8x16x8xf32, #tpu.memory_space<vmem>>, vector<2x8x16x8xf32>,
    return
  }
  func.func @transform_0(%arg0: i32) -> (i32, i32, i32, i32) {
    %c0_i32 = arith.constant 0 : i32
    %c0_i32_0 = arith.constant 0 : i32
    %c0_i32_1 = arith.constant 0 : i32
    %c0_i32_2 = arith.constant 0 : i32
    %c0_i32_3 = arith.constant 0 : i32
    return %c0_i32, %c0_i32_0, %c0_i32_1, %c0_i32_2 : i32, i32, i32, i32
  }
  func.func @transform_1(%arg0: i32) -> (i32, i32, i32) {
    %c0_i32 = arith.constant 0 : i32
    %c0_i32_0 = arith.constant 0 : i32
    %c0_i32_1 = arith.constant 0 : i32
    %c0_i32_2 = arith.constant 0 : i32
    return %c0_i32, %c0_i32_0, %c0_i32_1 : i32, i32, i32
  }
  func.func @transform_2(%arg0: i32) -> (i32, i32, i32) {
    %c0_i32 = arith.constant 0 : i32
    %c0_i32_0 = arith.constant 0 : i32
    %c0_i32_1 = arith.constant 0 : i32
    %c0_i32_2 = arith.constant 0 : i32
    return %c0_i32, %c0_i32_0, %c0_i32_1 : i32, i32, i32
  }
  func.func @transform_3(%arg0: i32) -> (i32, i32) {
    %c0_i32 = arith.constant 0 : i32
    %c0_i32_0 = arith.constant 0 : i32
    %c0_i32_1 = arith.constant 0 : i32
    return %c0_i32, %c0_i32_0 : i32, i32
  }
  func.func @transform_4(%arg0: i32) -> (i32, i32, i32, i32) {
    %c0_i32 = arith.constant 0 : i32
    %c0_i32_0 = arith.constant 0 : i32
    %c0_i32_1 = arith.constant 0 : i32
    %c0_i32_2 = arith.constant 0 : i32
    %c0_i32_3 = arith.constant 0 : i32
    return %c0_i32, %c0_i32_0, %c0_i32_1, %c0_i32_2 : i32, i32, i32, i32
  }
}

</mosaic_0001>

<bundles_post_ra>
// kernel: resnet_block_2.1
= control target key start
LH: loop header
LB: loop body
LE: loop exit
PB: predicated region body
PF: predicated region fallthrough
CT: control target
= control target key end

     0   :  { %vm30448_vm0 = vcmask 1043456   ;;  %vm148_vm1 = vcmask 31744   ;;  %vm6953_vm2 = vcmask 25600   ;;  %vm6965_vm3 = vcmask 24576   ;;  %s30327_s1 = inlined_call_operand.vmem [shape: f32[9,4,4], index: 1, kind: input, shape index: {}]   ;;  %s30328_s0 = inlined_call_operand.vmem [shape: f32[2,18,18,4], index: 0, kind: input, shape index: {}]   ;;  %s30329_s2 = inlined_call_operand.vmem [shape: f32[9,4,8], index: 2, kind: input, shape index: {}]   ;;  %s30330_s3 = inlined_call_operand.vmem [shape: f32[4,8], index: 3, kind: input, shape index: {}]   ;;  %s30331_s4 = inlined_call_operand.vmem [shape: f32[2,8,16,8], index: 4, kind: output, shape index: {}]  }
   0x1   :  { %v15908_v0 = vld [vmem:[%s30327_s1 + $0x4] sm:$0xf]  ;;  %v83_v2 = vld [vmem:[%s30328_s0 + $0x9] sm:$0xff]  ;;  %v81_v3 = vld [vmem:[%s30327_s1] sm:$0xf] }
   0x2   :  { %v82_v1 = vld [vmem:[%s30328_s0 + $0x1] sm:$0xff]  ;;  %18874 = vmatprep.subr.msk.mxu0 %vm30448_vm0, %v15908_v0  ;;  %v21884_v4 = vld [vmem:[%s30328_s0 + $0x19] sm:$0xff]  ;;  %20736 = vmatprep.subr.msk.mxu1 %vm30448_vm0, %v15908_v0  ;;  %v21901_v6 = vld [vmem:[%s30328_s0 + $0x31] sm:$0xff] }
   0x3   :  { %18876 = vmatprep.mubr.msk.f32.mxu0 %vm148_vm1, %v82_v1  ;;  %30647 = vst [vmem:[#allocation5_spill] sm:$0xff] %v21884_v4  ;;  %18875 = vmatpush3.msk.msra.mxu0 %vm30448_vm0, %v15908_v0  ;;  %v21896_v5 = vld [vmem:[%s30328_s0 + $0x21] sm:$0xff]  ;;  %30649 = vst [vmem:[#allocation7_spill] sm:$0xff] %v21901_v6  ;;  %v21911_v7 = vld [vmem:[%s30328_s0 + $0x39] sm:$0xff] }
   0x4   :  { %18877 = vmatmul.mubr.msk.f32.vlgmr.msra.gmra.mrb[0].mxu0 %vm148_vm1, %v83_v2  ;;  %18972 = vmatprep.subr.msk.mxu0 %vm30448_vm0, %v81_v3  ;;  %30648 = vst [vmem:[#allocation6_spill] sm:$0xff] %v21896_v5  ;;  %30650 = vst [vmem:[#allocation8_spill] sm:$0xff] %v21911_v7  ;;  %v21916_v8 = vld [vmem:[%s30328_s0 + $0x49] sm:$0xff]  ;;  %v21925_v9 = vld [vmem:[%s30328_s0 + $0x51] sm:$0xff] }
   0x5   :  { %18973 = vmatpush3.msk.msra.mxu0 %vm30448_vm0, %v81_v3  ;;  %18879 = vmatprep.mubr.msk.f32.mxu0 %vm148_vm1, %v21884_v4  ;;  %30651 = vst [vmem:[#allocation9_spill] sm:$0xff] %v21916_v8  ;;  %30652 = vst [vmem:[#allocation10_spill] sm:$0xff] %v21925_v9  ;;  %v16039_v10 = vld [vmem:[%s30327_s1 + $0x8] sm:$0xf]  ;;  %v21948_v13 = vld [vmem:[%s30328_s0 + $0x79] sm:$0xff] }
   0x6   :  { %20737 = vmatpush3.msk.msra.mxu1 %vm30448_vm0, %v15908_v0  ;;  %v21933_v11 = vld [vmem:[%s30328_s0 + $0x61] sm:$0xff]  ;;  %19070 = vmatprep.subr.msk.mxu0 %vm30448_vm0, %v16039_v10  ;;  %v21943_v12 = vld [vmem:[%s30328_s0 + $0x69] sm:$0xff]  ;;  %30655 = vst [vmem:[#allocation13_spill] sm:$0xff] %v21948_v13  ;;  %v21962_v15 = vld [vmem:[%s30328_s0 + $0x91] sm:$0xff] }
   0x7   :  { %30653 = vst [vmem:[#allocation11_spill] sm:$0xff] %v21933_v11  ;;  %30654 = vst [vmem:[#allocation12_spill] sm:$0xff] %v21943_v12  ;;  %v21957_v14 = vld [vmem:[%s30328_s0 + $0x81] sm:$0xff]  ;;  %v21971_v16 = vld [vmem:[%s30328_s0 + $0x99] sm:$0xff] }
   0x8   :  { %18880 = vmatmul.mubr.msk.f32.gmra.mrb[2].mxu0 %vm148_vm1, %v21896_v5  ;;  %30656 = vst [vmem:[#allocation14_spill] sm:$0xff] %v21957_v14  ;;  %30657 = vst [vmem:[#allocation15_spill] sm:$0xff] %v21962_v15  ;;  %v21976_v17 = vld [vmem:[%s30328_s0 + $0xa9] sm:$0xff]  ;;  %v21985_v18 = vld [vmem:[%s30328_s0 + $0xb1] sm:$0xff] }
   0x9   :  { %18882 = vmatprep.mubr.msk.f32.mxu0 %vm148_vm1, %v21901_v6  ;;  %30658 = vst [vmem:[#allocation16_spill] sm:$0xff] %v21971_v16  ;;  %30659 = vst [vmem:[#allocation17_spill] sm:$0xff] %v21976_v17  ;;  %v21990_v19 = vld [vmem:[%s30328_s0 + $0xc1] sm:$0xff]  ;;  %v21999_v20 = vld [vmem:[%s30328_s0 + $0xc9] sm:$0xff] }
   0xa   :  { %30660 = vst [vmem:[#allocation18_spill] sm:$0xff] %v21985_v18  ;;  %30661 = vst [vmem:[#allocation19_spill] sm:$0xff] %v21990_v19  ;;  %v22004_v21 = vld [vmem:[%s30328_s0 + $0xd9] sm:$0xff]  ;;  %v22013_v22 = vld [vmem:[%s30328_s0 + $0xe1] sm:$0xff] }
   0xb   :  { %30662 = vst [vmem:[#allocation20_spill] sm:$0xff] %v21999_v20  ;;  %30663 = vst [vmem:[#allocation21_spill] sm:$0xff] %v22004_v21  ;;  %v22018_v23 = vld [vmem:[%s30328_s0 + $0xf1] sm:$0xff]  ;;  %v22027_v24 = vld [vmem:[%s30328_s0 + $0xf9] sm:$0xff] }
   0xc   :  { %18883 = vmatmul.mubr.msk.f32.gmra.mrb[4].mxu0 %vm148_vm1, %v21911_v7  ;;  %30664 = vst [vmem:[#allocation22_spill] sm:$0xff] %v22013_v22  ;;  %30665 = vst [vmem:[#allocation23_spill] sm:$0xff] %v22018_v23  ;;  %v22032_v25 = vld [vmem:[%s30328_s0 + $0x109] sm:$0xff]  ;;  %v22041_v26 = vld [vmem:[%s30328_s0 + $0x111] sm:$0xff] }
   0xd   :  { %18885 = vmatprep.mubr.msk.f32.mxu0 %vm148_vm1, %v21916_v8  ;;  %30666 = vst [vmem:[#allocation24_spill] sm:$0xff] %v22027_v24  ;;  %30667 = vst [vmem:[#allocation25_spill] sm:$0xff] %v22032_v25  ;;  %v22046_v27 = vld [vmem:[%s30328_s0 + $0x121] sm:$0xff]  ;;  %v22055_v28 = vld [vmem:[%s30328_s0 + $0x129] sm:$0xff] }
   0xe   :  { %30668 = vst [vmem:[#allocation26_spill] sm:$0xff] %v22041_v26  ;;  %30669 = vst [vmem:[#allocation27_spill] sm:$0xff] %v22046_v27  ;;  %v22060_v29 = vld [vmem:[%s30328_s0 + $0x139] sm:$0xff]  ;;  %v22069_v30 = vld [vmem:[%s30328_s0 + $0x141] sm:$0xff] }
   0xf   :  { %30670 = vst [vmem:[#allocation28_spill] sm:$0xff] %v22055_v28  ;;  %30671 = vst [vmem:[#allocation29_spill] sm:$0xff] %v22060_v29  ;;  %v22074_v31 = vld [vmem:[%s30328_s0 + $0x151] sm:$0xff]  ;;  %v22083_v32 = vld [vmem:[%s30328_s0 + $0x159] sm:$0xff] }
  0x10   :  { %18886 = vmatmul.mubr.msk.f32.gmra.mrb[6].mxu0 %vm148_vm1, %v21925_v9  ;;  %30672 = vst [vmem:[#allocation30_spill] sm:$0xff] %v22069_v30  ;;  %30673 = vst [vmem:[#allocation31_spill] sm:$0xff] %v22074_v31  ;;  %v22088_v33 = vld [vmem:[%s30328_s0 + $0x169] sm:$0xff]  ;;  %v22097_v34 = vld [vmem:[%s30328_s0 + $0x171] sm:$0xff] }
  0x11   :  { %18888 = vmatprep.mubr.msk.f32.mxu0 %vm148_vm1, %v21933_v11  ;;  %30674 = vst [vmem:[#allocation32_spill] sm:$0xff] %v22083_v32  ;;  %30675 = vst [vmem:[#allocation33_spill] sm:$0xff] %v22088_v33  ;;  %v17_v35 = vld [vmem:[%s30328_s0] sm:$0xff]  ;;  %v18_v36 = vld [vmem:[%s30328_s0 + $0x8] sm:$0xff] }
  0x12   :  { %30676 = vst [vmem:[#allocation34_spill] sm:$0xff] %v22097_v34  ;;  %v22111_v37 = vld [vmem:[%s30328_s0 + $0x18] sm:$0xff]  ;;  %v22117_v38 = vld [vmem:[%s30327_s1 + $0xc] sm:$0xf]  ;;  %v22125_v39 = vld [vmem:[%s30328_s0 + $0x20] sm:$0xff] }
  0x13   :  { %v22130_v40 = vld [vmem:[%s30328_s0 + $0x30] sm:$0xff]  ;;  %v22141_v41 = vld [vmem:[%s30328_s0 + $0x38] sm:$0xff]  ;;  %v22146_v42 = vld [vmem:[%s30328_s0 + $0x48] sm:$0xff] }
  0x14   :  { %18889 = vmatmul.mubr.msk.f32.gmra.mrb[8].mxu0 %vm148_vm1, %v21943_v12  ;;  %v22155_v43 = vld [vmem:[%s30328_s0 + $0x50] sm:$0xff]  ;;  %v22160_v44 = vld [vmem:[%s30328_s0 + $0x60] sm:$0xff]  ;;  %v22169_v45 = vld [vmem:[%s30328_s0 + $0x68] sm:$0xff] }
  0x15   :  { %18891 = vmatprep.mubr.msk.f32.mxu0 %vm148_vm1, %v21948_v13  ;;  %v22174_v46 = vld [vmem:[%s30328_s0 + $0x78] sm:$0xff]  ;;  %v22183_v47 = vld [vmem:[%s30328_s0 + $0x80] sm:$0xff]  ;;  %v22188_v48 = vld [vmem:[%s30328_s0 + $0x90] sm:$0xff] }
  0x16   :  { %v22197_v49 = vld [vmem:[%s30328_s0 + $0x98] sm:$0xff]  ;;  %v22202_v50 = vld [vmem:[%s30328_s0 + $0xa8] sm:$0xff]  ;;  %v22211_v51 = vld [vmem:[%s30328_s0 + $0xb0] sm:$0xff] }
  0x17   :  { %v22216_v52 = vld [vmem:[%s30328_s0 + $0xc0] sm:$0xff]  ;;  %v22225_v53 = vld [vmem:[%s30328_s0 + $0xc8] sm:$0xff]  ;;  %v22230_v54 = vld [vmem:[%s30328_s0 + $0xd8] sm:$0xff] }
  0x18   :  { %18892 = vmatmul.mubr.msk.f32.gmra.mrb[10].mxu0 %vm148_vm1, %v21957_v14  ;;  %v22239_v55 = vld [vmem:[%s30328_s0 + $0xe0] sm:$0xff]  ;;  %v22244_v56 = vld [vmem:[%s30328_s0 + $0xf0] sm:$0xff]  ;;  %v22253_v57 = vld [vmem:[%s30328_s0 + $0xf8] sm:$0xff] }
  0x19   :  { %18894 = vmatprep.mubr.msk.f32.mxu0 %vm148_vm1, %v21962_v15  ;;  %v22258_v58 = vld [vmem:[%s30328_s0 + $0x108] sm:$0xff]  ;;  %v22267_v59 = vld [vmem:[%s30328_s0 + $0x110] sm:$0xff]  ;;  %v22272_v60 = vld [vmem:[%s30328_s0 + $0x120] sm:$0xff] }
  0x1a   :  { %v22281_v61 = vld [vmem:[%s30328_s0 + $0x128] sm:$0xff]  ;;  %v22286_v62 = vld [vmem:[%s30328_s0 + $0x138] sm:$0xff]  ;;  %v22295_v63 = vld [vmem:[%s30328_s0 + $0x140] sm:$0xff] }
  0x1b   :  { %v22300_v0 = vld [vmem:[%s30328_s0 + $0x150] sm:$0xff]  ;;  %v22309_v1 = vld [vmem:[%s30328_s0 + $0x158] sm:$0xff]  ;;  %v22314_v2 = vld [vmem:[%s30328_s0 + $0x168] sm:$0xff] }
  0x1c   :  { %18895 = vmatmul.mubr.msk.f32.gmra.mrb[12].mxu0 %vm148_vm1, %v21971_v16  ;;  %v22323_v3 = vld [vmem:[%s30328_s0 + $0x170] sm:$0xff]  ;;  %v22485_v16 = vld [vmem:[%s30328_s0 + $0x2c0] sm:$0xff]  ;;  %v22499_v14 = vld [vmem:[%s30328_s0 + $0x2d8] sm:$0xff] }
  0x1d   :  { %18897 = vmatprep.mubr.msk.f32.mxu0 %vm148_vm1, %v21976_v17  ;;  %v22476_v17 = vld [vmem:[%s30328_s0 + $0x2b8] sm:$0xff]  ;;  %v22490_v15 = vld [vmem:[%s30328_s0 + $0x2d0] sm:$0xff]  ;;  %v22504_v13 = vld [vmem:[%s30328_s0 + $0x2e8] sm:$0xff] }
  0x1e   :  { %v22513_v12 = vld [vmem:[%s30328_s0 + $0x2f0] sm:$0xff]  ;;  %v22518_v11 = vld [vmem:[%s30328_s0 + $0x300] sm:$0xff]  ;;  %v22527_v9 = vld [vmem:[%s30328_s0 + $0x308] sm:$0xff] }
  0x1f   :  { %v22532_v8 = vld [vmem:[%s30328_s0 + $0x318] sm:$0xff]  ;;  %v22541_v7 = vld [vmem:[%s30328_s0 + $0x320] sm:$0xff]  ;;  %v1311_v5 = vld [vmem:[%s30328_s0 + $0xa] sm:$0xff] }
  0x20   :  { %18898 = vmatmul.mubr.msk.f32.gmra.mrb[14].mxu0 %vm148_vm1, %v21985_v18  ;;  %v22471_v18 = vld [vmem:[%s30328_s0 + $0x2a8] sm:$0xff]  ;;  %30677 = vst [vmem:[#allocation35_spill] sm:$0xff] %v22532_v8  ;;  %v22555_v4 = vld [vmem:[%s30328_s0 + $0x1a] sm:$0xff] }
  0x21   :  { %18900 = vmatprep.mubr.msk.f32.mxu0 %vm148_vm1, %v21990_v19  ;;  %v22462_v19 = vld [vmem:[%s30328_s0 + $0x2a0] sm:$0xff]  ;;  %30678 = vst [vmem:[#allocation36_spill] sm:$0xff] %v22555_v4 }
  0x22   :  { %v1310_v6 = vld [vmem:[%s30328_s0 + $0x2] sm:$0xff] }
  0x24   :  { %18901 = vmatmul.mubr.msk.f32.gmra.mrb[16].mxu0 %vm148_vm1, %v21999_v20  ;;  %v22457_v20 = vld [vmem:[%s30328_s0 + $0x290] sm:$0xff] }
  0x25   :  { %18903 = vmatprep.mubr.msk.f32.mxu0 %vm148_vm1, %v22004_v21  ;;  %v22448_v21 = vld [vmem:[%s30328_s0 + $0x288] sm:$0xff] }
  0x28   :  { %18904 = vmatmul.mubr.msk.f32.gmra.mrb[18].mxu0 %vm148_vm1, %v22013_v22  ;;  %v22443_v22 = vld [vmem:[%s30328_s0 + $0x278] sm:$0xff] }
  0x29   :  { %18906 = vmatprep.mubr.msk.f32.mxu0 %vm148_vm1, %v22018_v23  ;;  %v22434_v23 = vld [vmem:[%s30328_s0 + $0x270] sm:$0xff] }
  0x2c   :  { %18907 = vmatmul.mubr.msk.f32.gmra.mrb[20].mxu0 %vm148_vm1, %v22027_v24  ;;  %v22429_v24 = vld [vmem:[%s30328_s0 + $0x260] sm:$0xff] }
  0x2d   :  { %18909 = vmatprep.mubr.msk.f32.mxu0 %vm148_vm1, %v22032_v25  ;;  %v22420_v25 = vld [vmem:[%s30328_s0 + $0x258] sm:$0xff] }
  0x30   :  { %18910 = vmatmul.mubr.msk.f32.gmra.mrb[22].mxu0 %vm148_vm1, %v22041_v26  ;;  %v22415_v26 = vld [vmem:[%s30328_s0 + $0x248] sm:$0xff] }
  0x31   :  { %18912 = vmatprep.mubr.msk.f32.mxu0 %vm148_vm1, %v22046_v27  ;;  %v22406_v27 = vld [vmem:[%s30328_s0 + $0x240] sm:$0xff] }
  0x34   :  { %18913 = vmatmul.mubr.msk.f32.gmra.mrb[24].mxu0 %vm148_vm1, %v22055_v28  ;;  %v22401_v28 = vld [vmem:[%s30328_s0 + $0x230] sm:$0xff] }
  0x35   :  { %18915 = vmatprep.mubr.msk.f32.mxu0 %vm148_vm1, %v22060_v29  ;;  %v22392_v29 = vld [vmem:[%s30328_s0 + $0x228] sm:$0xff] }
  0x38   :  { %18916 = vmatmul.mubr.msk.f32.gmra.mrb[26].mxu0 %vm148_vm1, %v22069_v30  ;;  %v22387_v30 = vld [vmem:[%s30328_s0 + $0x218] sm:$0xff] }
  0x39   :  { %18918 = vmatprep.mubr.msk.f32.mxu0 %vm148_vm1, %v22074_v31  ;;  %v22378_v31 = vld [vmem:[%s30328_s0 + $0x210] sm:$0xff] }
  0x3c   :  { %18919 = vmatmul.mubr.msk.f32.gmra.mrb[28].mxu0 %vm148_vm1, %v22083_v32  ;;  %v22373_v32 = vld [vmem:[%s30328_s0 + $0x200] sm:$0xff] }
  0x3d   :  { %18921 = vmatprep.mubr.msk.f32.mxu0 %vm148_vm1, %v22088_v33  ;;  %v22364_v33 = vld [vmem:[%s30328_s0 + $0x1f8] sm:$0xff] }
  0x40   :  { %18922 = vmatmul.mubr.msk.f32.gmra.mrb[30].mxu0 %vm148_vm1, %v22097_v34  ;;  %v22345_v34 = vld [vmem:[%s30328_s0 + $0x1d0] sm:$0xff] }
  0x41   :  { %18974 = vmatprep.mubr.msk.f32.mxu0 %vm148_vm1, %v17_v35  ;;  %v50_v35 = vld [vmem:[%s30328_s0 + $0x1b8] sm:$0xff] }
  0x44   :  { %18975 = vmatmul.mubr.msk.f32.vlgmr.msra.gmra.mrb[0].mxu0 %vm148_vm1, %v18_v36  ;;  %v22337_v36 = vld [vmem:[%s30328_s0 + $0x1c8] sm:$0xff] }
  0x45   :  { %19071 = vmatpush3.msk.msra.mxu0 %vm30448_vm0, %v16039_v10  ;;  %18977 = vmatprep.mubr.msk.f32.mxu0 %vm148_vm1, %v22111_v37  ;;  %v49_v10 = vld [vmem:[%s30328_s0 + $0x1b0] sm:$0xff] }
  0x46   :  { %19168 = vmatprep.subr.msk.mxu0 %vm30448_vm0, %v22117_v38 }
  0x48   :  { %18978 = vmatmul.mubr.msk.f32.gmra.mrb[2].mxu0 %vm148_vm1, %v22125_v39 }
  0x49   :  { %18980 = vmatprep.mubr.msk.f32.mxu0 %vm148_vm1, %v22130_v40 }
  0x4c   :  { %18981 = vmatmul.mubr.msk.f32.gmra.mrb[4].mxu0 %vm148_vm1, %v22141_v41 }
  0x4d   :  { %18983 = vmatprep.mubr.msk.f32.mxu0 %vm148_vm1, %v22146_v42 }
  0x50   :  { %18984 = vmatmul.mubr.msk.f32.gmra.mrb[6].mxu0 %vm148_vm1, %v22155_v43 }
  0x51   :  { %18986 = vmatprep.mubr.msk.f32.mxu0 %vm148_vm1, %v22160_v44 }
  0x54   :  { %18987 = vmatmul.mubr.msk.f32.gmra.mrb[8].mxu0 %vm148_vm1, %v22169_v45 }
  0x55   :  { %18989 = vmatprep.mubr.msk.f32.mxu0 %vm148_vm1, %v22174_v46 }
  0x58   :  { %18990 = vmatmul.mubr.msk.f32.gmra.mrb[10].mxu0 %vm148_vm1, %v22183_v47 }
  0x59   :  { %18992 = vmatprep.mubr.msk.f32.mxu0 %vm148_vm1, %v22188_v48 }
  0x5c   :  { %18993 = vmatmul.mubr.msk.f32.gmra.mrb[12].mxu0 %vm148_vm1, %v22197_v49 }
  0x5d   :  { %18995 = vmatprep.mubr.msk.f32.mxu0 %vm148_vm1, %v22202_v50 }
  0x60   :  { %18996 = vmatmul.mubr.msk.f32.gmra.mrb[14].mxu0 %vm148_vm1, %v22211_v51 }
  0x61   :  { %18998 = vmatprep.mubr.msk.f32.mxu0 %vm148_vm1, %v22216_v52 }
  0x64   :  { %18999 = vmatmul.mubr.msk.f32.gmra.mrb[16].mxu0 %vm148_vm1, %v22225_v53 }
  0x65   :  { %19001 = vmatprep.mubr.msk.f32.mxu0 %vm148_vm1, %v22230_v54 }
  0x68   :  { %19002 = vmatmul.mubr.msk.f32.gmra.mrb[18].mxu0 %vm148_vm1, %v22239_v55 }
  0x69   :  { %19004 = vmatprep.mubr.msk.f32.mxu0 %vm148_vm1, %v22244_v56 }
  0x6c   :  { %19005 = vmatmul.mubr.msk.f32.gmra.mrb[20].mxu0 %vm148_vm1, %v22253_v57 }
  0x6d   :  { %19007 = vmatprep.mubr.msk.f32.mxu0 %vm148_vm1, %v22258_v58 }
  0x70   :  { %19008 = vmatmul.mubr.msk.f32.gmra.mrb[22].mxu0 %vm148_vm1, %v22267_v59 }
  0x71   :  { %19010 = vmatprep.mubr.msk.f32.mxu0 %vm148_vm1, %v22272_v60 }
  0x74   :  { %19011 = vmatmul.mubr.msk.f32.gmra.mrb[24].mxu0 %vm148_vm1, %v22281_v61 }
  0x75   :  { %19013 = vmatprep.mubr.msk.f32.mxu0 %vm148_vm1, %v22286_v62 }
  0x78   :  { %19014 = vmatmul.mubr.msk.f32.gmra.mrb[26].mxu0 %vm148_vm1, %v22295_v63 }
  0x79   :  { %19016 = vmatprep.mubr.msk.f32.mxu0 %vm148_vm1, %v22300_v0 }
  0x7c   :  { %19017 = vmatmul.mubr.msk.f32.gmra.mrb[28].mxu0 %vm148_vm1, %v22309_v1 }
  0x7d   :  { %19019 = vmatprep.mubr.msk.f32.mxu0 %vm148_vm1, %v22314_v2 }
  0x80   :  { %19020 = vmatmul.mubr.msk.f32.gmra.mrb[30].mxu0 %vm148_vm1, %v22323_v3 }
  0x81   :  { %19022 = vmatprep.mubr.msk.f32.mxu0 %vm148_vm1, %v49_v10  ;;  %v22350_v10 = vld [vmem:[%s30328_s0 + $0x1e0] sm:$0xff] }
  0x84   :  { %19023 = vmatmul.mubr.msk.f32.gmra.mrb[32].mxu0 %vm148_vm1, %v50_v35  ;;  %v22359_v35 = vld [vmem:[%s30328_s0 + $0x1e8] sm:$0xff] }
  0x85   :  { %19025 = vmatprep.mubr.msk.f32.mxu0 %vm148_vm1, %v22337_v36 }
  0x88   :  { %19026 = vmatmul.mubr.msk.f32.gmra.mrb[34].mxu0 %vm148_vm1, %v22345_v34 }
  0x89   :  { %19028 = vmatprep.mubr.msk.f32.mxu0 %vm148_vm1, %v22350_v10 }
  0x8c   :  { %19029 = vmatmul.mubr.msk.f32.gmra.mrb[36].mxu0 %vm148_vm1, %v22359_v35 }
  0x8d   :  { %19031 = vmatprep.mubr.msk.f32.mxu0 %vm148_vm1, %v22364_v33 }
  0x90   :  { %19032 = vmatmul.mubr.msk.f32.gmra.mrb[38].mxu0 %vm148_vm1, %v22373_v32 }
  0x91   :  { %19034 = vmatprep.mubr.msk.f32.mxu0 %vm148_vm1, %v22378_v31 }
  0x94   :  { %19035 = vmatmul.mubr.msk.f32.gmra.mrb[40].mxu0 %vm148_vm1, %v22387_v30 }
  0x95   :  { %19037 = vmatprep.mubr.msk.f32.mxu0 %vm148_vm1, %v22392_v29 }
  0x98   :  { %19038 = vmatmul.mubr.msk.f32.gmra.mrb[42].mxu0 %vm148_vm1, %v22401_v28 }
  0x99   :  { %19040 = vmatprep.mubr.msk.f32.mxu0 %vm148_vm1, %v22406_v27 }
  0x9c   :  { %19041 = vmatmul.mubr.msk.f32.gmra.mrb[44].mxu0 %vm148_vm1, %v22415_v26 }
  0x9d   :  { %19043 = vmatprep.mubr.msk.f32.mxu0 %vm148_vm1, %v22420_v25 }
  0xa0   :  { %19044 = vmatmul.mubr.msk.f32.gmra.mrb[46].mxu0 %vm148_vm1, %v22429_v24 }
  0xa1   :  { %19046 = vmatprep.mubr.msk.f32.mxu0 %vm148_vm1, %v22434_v23 }
  0xa4   :  { %19047 = vmatmul.mubr.msk.f32.gmra.mrb[48].mxu0 %vm148_vm1, %v22443_v22 }
  0xa5   :  { %19049 = vmatprep.mubr.msk.f32.mxu0 %vm148_vm1, %v22448_v21 }
  0xa8   :  { %19050 = vmatmul.mubr.msk.f32.gmra.mrb[50].mxu0 %vm148_vm1, %v22457_v20 }
  0xa9   :  { %19052 = vmatprep.mubr.msk.f32.mxu0 %vm148_vm1, %v22462_v19 }
  0xac   :  { %19053 = vmatmul.mubr.msk.f32.gmra.mrb[52].mxu0 %vm148_vm1, %v22471_v18 }
  0xad   :  { %19055 = vmatprep.mubr.msk.f32.mxu0 %vm148_vm1, %v22476_v17 }
  0xb0   :  { %19056 = vmatmul.mubr.msk.f32.gmra.mrb[54].mxu0 %vm148_vm1, %v22485_v16 }
  0xb1   :  { %19058 = vmatprep.mubr.msk.f32.mxu0 %vm148_vm1, %v22490_v15 }
  0xb4   :  { %19059 = vmatmul.mubr.msk.f32.gmra.mrb[56].mxu0 %vm148_vm1, %v22499_v14 }
  0xb5   :  { %19061 = vmatprep.mubr.msk.f32.mxu0 %vm148_vm1, %v22504_v13 }
  0xb8   :  { %19062 = vmatmul.mubr.msk.f32.gmra.mrb[58].mxu0 %vm148_vm1, %v22513_v12 }
  0xb9   :  { %19064 = vmatprep.mubr.msk.f32.mxu0 %vm148_vm1, %v22518_v11 }
  0xbc   :  { %19065 = vmatmul.mubr.msk.f32.gmra.mrb[60].mxu0 %vm148_vm1, %v22527_v9 }
  0xbd   :  { %19067 = vmatprep.mubr.msk.f32.mxu0 %vm148_vm1, %v22532_v8  ;;  %v22561_v8 = vld [vmem:[%s30327_s1 + $0x10] sm:$0xf] }
  0xc0   :  { %19068 = vmatmul.mubr.msk.f32.gmra.mrb[62].mxu0 %vm148_vm1, %v22541_v7 }
  0xc1   :  { %19072 = vmatprep.mubr.msk.f32.mxu0 %vm148_vm1, %v1310_v6  ;;  %v22570_v6 = vld [vmem:[%s30328_s0 + $0x22] sm:$0xff] }
  0xc2   :  { %30679 = vst [vmem:[#allocation37_spill] sm:$0xff] %v22570_v6 }
  0xc4   :  { %19073 = vmatmul.mubr.msk.f32.vlgmr.msra.gmra.mrb[0].mxu0 %vm148_vm1, %v1311_v5  ;;  %v22575_v5 = vld [vmem:[%s30328_s0 + $0x32] sm:$0xff] }
  0xc5   :  { %19169 = vmatpush3.msk.msra.mxu0 %vm30448_vm0, %v22117_v38  ;;  %19075 = vmatprep.mubr.msk.f32.mxu0 %vm148_vm1, %v22555_v4  ;;  %30680 = vst [vmem:[#allocation38_spill] sm:$0xff] %v22575_v5  ;;  %v22586_v38 = vld [vmem:[%s30328_s0 + $0x3a] sm:$0xff]  ;;  %v22591_v4 = vld [vmem:[%s30328_s0 + $0x4a] sm:$0xff] }
  0xc6   :  { %19266 = vmatprep.subr.msk.mxu0 %vm30448_vm0, %v22561_v8  ;;  %30681 = vst [vmem:[#allocation39_spill] sm:$0xff] %v22586_v38  ;;  %30682 = vst [vmem:[#allocation40_spill] sm:$0xff] %v22591_v4 }
  0xc8   :  { %19076 = vmatmul.mubr.msk.f32.gmra.mrb[2].mxu0 %vm148_vm1, %v22570_v6  ;;  %v22605_v6 = vld [vmem:[%s30328_s0 + $0x62] sm:$0xff] }
  0xc9   :  { %19078 = vmatprep.mubr.msk.f32.mxu0 %vm148_vm1, %v22575_v5  ;;  %v22600_v5 = vld [vmem:[%s30328_s0 + $0x52] sm:$0xff]  ;;  %30684 = vst [vmem:[#allocation42_spill] sm:$0xff] %v22605_v6 }
  0xca   :  { %30683 = vst [vmem:[#allocation41_spill] sm:$0xff] %v22600_v5 }
  0xcc   :  { %19079 = vmatmul.mubr.msk.f32.gmra.mrb[4].mxu0 %vm148_vm1, %v22586_v38  ;;  %v22619_v38 = vld [vmem:[%s30328_s0 + $0x7a] sm:$0xff] }
  0xcd   :  { %19081 = vmatprep.mubr.msk.f32.mxu0 %vm148_vm1, %v22591_v4  ;;  %v22614_v4 = vld [vmem:[%s30328_s0 + $0x6a] sm:$0xff]  ;;  %30686 = vst [vmem:[#allocation44_spill] sm:$0xff] %v22619_v38 }
  0xce   :  { %30685 = vst [vmem:[#allocation43_spill] sm:$0xff] %v22614_v4 }
  0xd0   :  { %19082 = vmatmul.mubr.msk.f32.gmra.mrb[6].mxu0 %vm148_vm1, %v22600_v5  ;;  %v22633_v5 = vld [vmem:[%s30328_s0 + $0x92] sm:$0xff] }
  0xd1   :  { %19084 = vmatprep.mubr.msk.f32.mxu0 %vm148_vm1, %v22605_v6  ;;  %v22628_v6 = vld [vmem:[%s30328_s0 + $0x82] sm:$0xff]  ;;  %30688 = vst [vmem:[#allocation46_spill] sm:$0xff] %v22633_v5 }
  0xd2   :  { %30687 = vst [vmem:[#allocation45_spill] sm:$0xff] %v22628_v6 }
  0xd4   :  { %19085 = vmatmul.mubr.msk.f32.gmra.mrb[8].mxu0 %vm148_vm1, %v22614_v4  ;;  %v22647_v4 = vld [vmem:[%s30328_s0 + $0xaa] sm:$0xff] }
  0xd5   :  { %19087 = vmatprep.mubr.msk.f32.mxu0 %vm148_vm1, %v22619_v38  ;;  %v22642_v38 = vld [vmem:[%s30328_s0 + $0x9a] sm:$0xff]  ;;  %30690 = vst [vmem:[#allocation48_spill] sm:$0xff] %v22647_v4 }
  0xd6   :  { %30689 = vst [vmem:[#allocation47_spill] sm:$0xff] %v22642_v38 }
  0xd8   :  { %19088 = vmatmul.mubr.msk.f32.gmra.mrb[10].mxu0 %vm148_vm1, %v22628_v6  ;;  %v22661_v6 = vld [vmem:[%s30328_s0 + $0xc2] sm:$0xff] }
  0xd9   :  { %19090 = vmatprep.mubr.msk.f32.mxu0 %vm148_vm1, %v22633_v5  ;;  %v22656_v5 = vld [vmem:[%s30328_s0 + $0xb2] sm:$0xff]  ;;  %30692 = vst [vmem:[#allocation50_spill] sm:$0xff] %v22661_v6 }
  0xda   :  { %30691 = vst [vmem:[#allocation49_spill] sm:$0xff] %v22656_v5 }
  0xdc   :  { %19091 = vmatmul.mubr.msk.f32.gmra.mrb[12].mxu0 %vm148_vm1, %v22642_v38  ;;  %v22675_v38 = vld [vmem:[%s30328_s0 + $0xda] sm:$0xff] }
  0xdd   :  { %19093 = vmatprep.mubr.msk.f32.mxu0 %vm148_vm1, %v22647_v4  ;;  %v22670_v4 = vld [vmem:[%s30328_s0 + $0xca] sm:$0xff]  ;;  %30694 = vst [vmem:[#allocation52_spill] sm:$0xff] %v22675_v38 }
  0xde   :  { %30693 = vst [vmem:[#allocation51_spill] sm:$0xff] %v22670_v4 }
  0xe0   :  { %19094 = vmatmul.mubr.msk.f32.gmra.mrb[14].mxu0 %vm148_vm1, %v22656_v5  ;;  %v22689_v5 = vld [vmem:[%s30328_s0 + $0xf2] sm:$0xff] }
  0xe1   :  { %19096 = vmatprep.mubr.msk.f32.mxu0 %vm148_vm1, %v22661_v6  ;;  %v22684_v6 = vld [vmem:[%s30328_s0 + $0xe2] sm:$0xff]  ;;  %30696 = vst [vmem:[#allocation54_spill] sm:$0xff] %v22689_v5 }
  0xe2   :  { %30695 = vst [vmem:[#allocation53_spill] sm:$0xff] %v22684_v6 }
  0xe4   :  { %19097 = vmatmul.mubr.msk.f32.gmra.mrb[16].mxu0 %vm148_vm1, %v22670_v4  ;;  %v22703_v4 = vld [vmem:[%s30328_s0 + $0x10a] sm:$0xff] }
  0xe5   :  { %19099 = vmatprep.mubr.msk.f32.mxu0 %vm148_vm1, %v22675_v38  ;;  %v22698_v38 = vld [vmem:[%s30328_s0 + $0xfa] sm:$0xff]  ;;  %30698 = vst [vmem:[#allocation56_spill] sm:$0xff] %v22703_v4 }
  0xe6   :  { %30697 = vst [vmem:[#allocation55_spill] sm:$0xff] %v22698_v38 }
  0xe8   :  { %19100 = vmatmul.mubr.msk.f32.gmra.mrb[18].mxu0 %vm148_vm1, %v22684_v6  ;;  %v22717_v6 = vld [vmem:[%s30328_s0 + $0x122] sm:$0xff] }
  0xe9   :  { %19102 = vmatprep.mubr.msk.f32.mxu0 %vm148_vm1, %v22689_v5  ;;  %v22712_v5 = vld [vmem:[%s30328_s0 + $0x112] sm:$0xff]  ;;  %30700 = vst [vmem:[#allocation58_spill] sm:$0xff] %v22717_v6 }
  0xea   :  { %30699 = vst [vmem:[#allocation57_spill] sm:$0xff] %v22712_v5 }
  0xec   :  { %19103 = vmatmul.mubr.msk.f32.gmra.mrb[20].mxu0 %vm148_vm1, %v22698_v38  ;;  %v22731_v38 = vld [vmem:[%s30328_s0 + $0x13a] sm:$0xff] }
  0xed   :  { %19105 = vmatprep.mubr.msk.f32.mxu0 %vm148_vm1, %v22703_v4  ;;  %v22726_v4 = vld [vmem:[%s30328_s0 + $0x12a] sm:$0xff]  ;;  %30702 = vst [vmem:[#allocation60_spill] sm:$0xff] %v22731_v38 }
  0xee   :  { %30701 = vst [vmem:[#allocation59_spill] sm:$0xff] %v22726_v4 }
  0xf0   :  { %19106 = vmatmul.mubr.msk.f32.gmra.mrb[22].mxu0 %vm148_vm1, %v22712_v5  ;;  %v22745_v5 = vld [vmem:[%s30328_s0 + $0x152] sm:$0xff] }
  0xf1   :  { %19108 = vmatprep.mubr.msk.f32.mxu0 %vm148_vm1, %v22717_v6  ;;  %v22740_v6 = vld [vmem:[%s30328_s0 + $0x142] sm:$0xff]  ;;  %30704 = vst [vmem:[#allocation62_spill] sm:$0xff] %v22745_v5 }
  0xf2   :  { %30703 = vst [vmem:[#allocation61_spill] sm:$0xff] %v22740_v6 }
  0xf4   :  { %19109 = vmatmul.mubr.msk.f32.gmra.mrb[24].mxu0 %vm148_vm1, %v22726_v4  ;;  %v22759_v4 = vld [vmem:[%s30328_s0 + $0x16a] sm:$0xff] }
  0xf5   :  { %19111 = vmatprep.mubr.msk.f32.mxu0 %vm148_vm1, %v22731_v38  ;;  %v22754_v38 = vld [vmem:[%s30328_s0 + $0x15a] sm:$0xff]  ;;  %30706 = vst [vmem:[#allocation64_spill] sm:$0xff] %v22759_v4 }
  0xf6   :  { %30705 = vst [vmem:[#allocation63_spill] sm:$0xff] %v22754_v38 }
  0xf8   :  { %19112 = vmatmul.mubr.msk.f32.gmra.mrb[26].mxu0 %vm148_vm1, %v22740_v6  ;;  %v1342_v6 = vld [vmem:[%s30328_s0 + $0x1b2] sm:$0xff] }
  0xf9   :  { %19114 = vmatprep.mubr.msk.f32.mxu0 %vm148_vm1, %v22745_v5  ;;  %v22768_v5 = vld [vmem:[%s30328_s0 + $0x172] sm:$0xff] }
  0xfa   :  { %30707 = vst [vmem:[#allocation65_spill] sm:$0xff] %v22768_v5 }
  0xfc   :  { %19115 = vmatmul.mubr.msk.f32.gmra.mrb[28].mxu0 %vm148_vm1, %v22754_v38  ;;  %v1343_v38 = vld [vmem:[%s30328_s0 + $0x1ba] sm:$0xff] }
  0xfd   :  { %19117 = vmatprep.mubr.msk.f32.mxu0 %vm148_vm1, %v22759_v4  ;;  %v22782_v4 = vld [vmem:[%s30328_s0 + $0x1ca] sm:$0xff] }
  0xfe   :  { %30708 = vst [vmem:[#allocation66_spill] sm:$0xff] %v22782_v4 }
 0x100   :  { %19118 = vmatmul.mubr.msk.f32.gmra.mrb[30].mxu0 %vm148_vm1, %v22768_v5  ;;  %v22790_v5 = vld [vmem:[%s30328_s0 + $0x1d2] sm:$0xff] }
 0x101   :  { %19120 = vmatprep.mubr.msk.f32.mxu0 %vm148_vm1, %v1342_v6  ;;  %30709 = vst [vmem:[#allocation67_spill] sm:$0xff] %v22790_v5  ;;  %v22795_v6 = vld [vmem:[%s30328_s0 + $0x1e2] sm:$0xff] }
 0x102   :  { %30710 = vst [vmem:[#allocation68_spill] sm:$0xff] %v22795_v6 }
 0x104   :  { %19121 = vmatmul.mubr.msk.f32.gmra.mrb[32].mxu0 %vm148_vm1, %v1343_v38  ;;  %v22804_v38 = vld [vmem:[%s30328_s0 + $0x1ea] sm:$0xff] }
 0x105   :  { %19123 = vmatprep.mubr.msk.f32.mxu0 %vm148_vm1, %v22782_v4  ;;  %30711 = vst [vmem:[#allocation69_spill] sm:$0xff] %v22804_v38  ;;  %v22809_v4 = vld [vmem:[%s30328_s0 + $0x1fa] sm:$0xff] }
 0x106   :  { %30712 = vst [vmem:[#allocation70_spill] sm:$0xff] %v22809_v4 }
 0x108   :  { %19124 = vmatmul.mubr.msk.f32.gmra.mrb[34].mxu0 %vm148_vm1, %v22790_v5  ;;  %v22823_v5 = vld [vmem:[%s30328_s0 + $0x212] sm:$0xff] }
 0x109   :  { %19126 = vmatprep.mubr.msk.f32.mxu0 %vm148_vm1, %v22795_v6  ;;  %v22818_v6 = vld [vmem:[%s30328_s0 + $0x202] sm:$0xff]  ;;  %30714 = vst [vmem:[#allocation72_spill] sm:$0xff] %v22823_v5 }
 0x10a   :  { %30713 = vst [vmem:[#allocation71_spill] sm:$0xff] %v22818_v6 }
 0x10c   :  { %19127 = vmatmul.mubr.msk.f32.gmra.mrb[36].mxu0 %vm148_vm1, %v22804_v38  ;;  %v22837_v38 = vld [vmem:[%s30328_s0 + $0x22a] sm:$0xff] }
 0x10d   :  { %19129 = vmatprep.mubr.msk.f32.mxu0 %vm148_vm1, %v22809_v4  ;;  %v22832_v4 = vld [vmem:[%s30328_s0 + $0x21a] sm:$0xff]  ;;  %30716 = vst [vmem:[#allocation74_spill] sm:$0xff] %v22837_v38 }
 0x10e   :  { %30715 = vst [vmem:[#allocation73_spill] sm:$0xff] %v22832_v4 }
 0x110   :  { %19130 = vmatmul.mubr.msk.f32.gmra.mrb[38].mxu0 %vm148_vm1, %v22818_v6  ;;  %v22851_v6 = vld [vmem:[%s30328_s0 + $0x242] sm:$0xff] }
 0x111   :  { %19132 = vmatprep.mubr.msk.f32.mxu0 %vm148_vm1, %v22823_v5  ;;  %v22846_v5 = vld [vmem:[%s30328_s0 + $0x232] sm:$0xff]  ;;  %30718 = vst [vmem:[#allocation76_spill] sm:$0xff] %v22851_v6 }
 0x112   :  { %30717 = vst [vmem:[#allocation75_spill] sm:$0xff] %v22846_v5 }
 0x114   :  { %19133 = vmatmul.mubr.msk.f32.gmra.mrb[40].mxu0 %vm148_vm1, %v22832_v4  ;;  %v22865_v4 = vld [vmem:[%s30328_s0 + $0x25a] sm:$0xff] }
 0x115   :  { %19135 = vmatprep.mubr.msk.f32.mxu0 %vm148_vm1, %v22837_v38  ;;  %v22860_v38 = vld [vmem:[%s30328_s0 + $0x24a] sm:$0xff]  ;;  %30720 = vst [vmem:[#allocation78_spill] sm:$0xff] %v22865_v4 }
 0x116   :  { %30719 = vst [vmem:[#allocation77_spill] sm:$0xff] %v22860_v38 }
 0x118   :  { %19136 = vmatmul.mubr.msk.f32.gmra.mrb[42].mxu0 %vm148_vm1, %v22846_v5  ;;  %v22879_v5 = vld [vmem:[%s30328_s0 + $0x272] sm:$0xff] }
 0x119   :  { %19138 = vmatprep.mubr.msk.f32.mxu0 %vm148_vm1, %v22851_v6  ;;  %v22874_v6 = vld [vmem:[%s30328_s0 + $0x262] sm:$0xff]  ;;  %30722 = vst [vmem:[#allocation80_spill] sm:$0xff] %v22879_v5 }
 0x11a   :  { %30721 = vst [vmem:[#allocation79_spill] sm:$0xff] %v22874_v6 }
 0x11c   :  { %19139 = vmatmul.mubr.msk.f32.gmra.mrb[44].mxu0 %vm148_vm1, %v22860_v38  ;;  %v22893_v38 = vld [vmem:[%s30328_s0 + $0x28a] sm:$0xff] }
 0x11d   :  { %19141 = vmatprep.mubr.msk.f32.mxu0 %vm148_vm1, %v22865_v4  ;;  %v22888_v4 = vld [vmem:[%s30328_s0 + $0x27a] sm:$0xff]  ;;  %30724 = vst [vmem:[#allocation82_spill] sm:$0xff] %v22893_v38 }
 0x11e   :  { %30723 = vst [vmem:[#allocation81_spill] sm:$0xff] %v22888_v4 }
 0x120   :  { %19142 = vmatmul.mubr.msk.f32.gmra.mrb[46].mxu0 %vm148_vm1, %v22874_v6  ;;  %v22907_v6 = vld [vmem:[%s30328_s0 + $0x2a2] sm:$0xff] }
 0x121   :  { %19144 = vmatprep.mubr.msk.f32.mxu0 %vm148_vm1, %v22879_v5  ;;  %v22902_v5 = vld [vmem:[%s30328_s0 + $0x292] sm:$0xff]  ;;  %30726 = vst [vmem:[#allocation84_spill] sm:$0xff] %v22907_v6 }
 0x122   :  { %30725 = vst [vmem:[#allocation83_spill] sm:$0xff] %v22902_v5 }
 0x124   :  { %19145 = vmatmul.mubr.msk.f32.gmra.mrb[48].mxu0 %vm148_vm1, %v22888_v4  ;;  %v22921_v4 = vld [vmem:[%s30328_s0 + $0x2ba] sm:$0xff] }
 0x125   :  { %19147 = vmatprep.mubr.msk.f32.mxu0 %vm148_vm1, %v22893_v38  ;;  %v22916_v38 = vld [vmem:[%s30328_s0 + $0x2aa] sm:$0xff]  ;;  %30728 = vst [vmem:[#allocation86_spill] sm:$0xff] %v22921_v4 }
 0x126   :  { %30727 = vst [vmem:[#allocation85_spill] sm:$0xff] %v22916_v38 }
 0x128   :  { %19148 = vmatmul.mubr.msk.f32.gmra.mrb[50].mxu0 %vm148_vm1, %v22902_v5  ;;  %v22935_v5 = vld [vmem:[%s30328_s0 + $0x2d2] sm:$0xff] }
 0x129   :  { %19150 = vmatprep.mubr.msk.f32.mxu0 %vm148_vm1, %v22907_v6  ;;  %v22930_v6 = vld [vmem:[%s30328_s0 + $0x2c2] sm:$0xff]  ;;  %30730 = vst [vmem:[#allocation88_spill] sm:$0xff] %v22935_v5 }
 0x12a   :  { %30729 = vst [vmem:[#allocation87_spill] sm:$0xff] %v22930_v6 }
 0x12c   :  { %19151 = vmatmul.mubr.msk.f32.gmra.mrb[52].mxu0 %vm148_vm1, %v22916_v38  ;;  %v22949_v38 = vld [vmem:[%s30328_s0 + $0x2ea] sm:$0xff] }
 0x12d   :  { %19153 = vmatprep.mubr.msk.f32.mxu0 %vm148_vm1, %v22921_v4  ;;  %v22944_v4 = vld [vmem:[%s30328_s0 + $0x2da] sm:$0xff]  ;;  %30732 = vst [vmem:[#allocation90_spill] sm:$0xff] %v22949_v38 }
 0x12e   :  { %30731 = vst [vmem:[#allocation89_spill] sm:$0xff] %v22944_v4 }
 0x130   :  { %19154 = vmatmul.mubr.msk.f32.gmra.mrb[54].mxu0 %vm148_vm1, %v22930_v6  ;;  %v22963_v6 = vld [vmem:[%s30328_s0 + $0x302] sm:$0xff] }
 0x131   :  { %19156 = vmatprep.mubr.msk.f32.mxu0 %vm148_vm1, %v22935_v5  ;;  %v22958_v5 = vld [vmem:[%s30328_s0 + $0x2f2] sm:$0xff]  ;;  %30733 = vst [vmem:[#allocation91_spill] sm:$0xff] %v22963_v6 }
 0x134   :  { %19157 = vmatmul.mubr.msk.f32.gmra.mrb[56].mxu0 %vm148_vm1, %v22944_v4  ;;  %v22977_v4 = vld [vmem:[%s30328_s0 + $0x31a] sm:$0xff] }
 0x135   :  { %19159 = vmatprep.mubr.msk.f32.mxu0 %vm148_vm1, %v22949_v38  ;;  %v22972_v38 = vld [vmem:[%s30328_s0 + $0x30a] sm:$0xff] }
 0x136   :  { %30734 = vst [vmem:[#allocation92_spill] sm:$0xff] %v22972_v38 }
 0x138   :  { %19160 = vmatmul.mubr.msk.f32.gmra.mrb[58].mxu0 %vm148_vm1, %v22958_v5 }
 0x139   :  { %19162 = vmatprep.mubr.msk.f32.mxu0 %vm148_vm1, %v22963_v6  ;;  %v22986_v6 = vld [vmem:[%s30328_s0 + $0x322] sm:$0xff] }
 0x13c   :  { %19163 = vmatmul.mubr.msk.f32.gmra.mrb[60].mxu0 %vm148_vm1, %v22972_v38  ;;  %v22997_v38 = vld [vmem:[%s30327_s1 + $0x14] sm:$0xf] }
 0x13d   :  { %19165 = vmatprep.mubr.msk.f32.mxu0 %vm148_vm1, %v22977_v4 }
 0x140   :  { %19166 = vmatmul.mubr.msk.f32.gmra.mrb[62].mxu0 %vm148_vm1, %v22986_v6 }
 0x141   :  { %19170 = vmatprep.mubr.msk.f32.mxu0 %vm148_vm1, %v22111_v37  ;;  %v23069_v37 = vld [vmem:[%s30328_s0 + $0x188] sm:$0xff] }
 0x144   :  { %19171 = vmatmul.mubr.msk.f32.vlgmr.msra.gmra.mrb[0].mxu0 %vm148_vm1, %v22125_v39  ;;  %v30758_v39 = vld [vmem:[#allocation27_spill] sm:$0xff] }
 0x145   :  { %19267 = vmatpush3.msk.msra.mxu0 %vm30448_vm0, %v22561_v8  ;;  %19173 = vmatprep.mubr.msk.f32.mxu0 %vm148_vm1, %v22130_v40  ;;  %v23060_v8 = vld [vmem:[%s30328_s0 + $0x180] sm:$0xff]  ;;  %v30759_v40 = vld [vmem:[#allocation28_spill] sm:$0xff] }
 0x146   :  { %19364 = vmatprep.subr.msk.mxu0 %vm30448_vm0, %v22997_v38 }
 0x148   :  { %19174 = vmatmul.mubr.msk.f32.gmra.mrb[2].mxu0 %vm148_vm1, %v22141_v41  ;;  %v30760_v41 = vld [vmem:[#allocation29_spill] sm:$0xff] }
 0x149   :  { %19176 = vmatprep.mubr.msk.f32.mxu0 %vm148_vm1, %v22146_v42  ;;  %v30761_v42 = vld [vmem:[#allocation30_spill] sm:$0xff] }
 0x14c   :  { %19177 = vmatmul.mubr.msk.f32.gmra.mrb[4].mxu0 %vm148_vm1, %v22155_v43  ;;  %v30762_v43 = vld [vmem:[#allocation31_spill] sm:$0xff] }
 0x14d   :  { %19179 = vmatprep.mubr.msk.f32.mxu0 %vm148_vm1, %v22160_v44  ;;  %v30763_v44 = vld [vmem:[#allocation32_spill] sm:$0xff] }
 0x150   :  { %19180 = vmatmul.mubr.msk.f32.gmra.mrb[6].mxu0 %vm148_vm1, %v22169_v45  ;;  %v30764_v45 = vld [vmem:[#allocation33_spill] sm:$0xff] }
 0x151   :  { %19182 = vmatprep.mubr.msk.f32.mxu0 %vm148_vm1, %v22174_v46  ;;  %v23217_v46 = vld [vmem:[%s30328_s0 + $0x181] sm:$0xff] }
 0x154   :  { %19183 = vmatmul.mubr.msk.f32.gmra.mrb[8].mxu0 %vm148_vm1, %v22183_v47  ;;  %v30765_v47 = vld [vmem:[#allocation34_spill] sm:$0xff] }
 0x155   :  { %19185 = vmatprep.mubr.msk.f32.mxu0 %vm148_vm1, %v22188_v48  ;;  %v23226_v48 = vld [vmem:[%s30328_s0 + $0x189] sm:$0xff] }
 0x158   :  { %19186 = vmatmul.mubr.msk.f32.gmra.mrb[10].mxu0 %vm148_vm1, %v22197_v49  ;;  %v16267_v49 = vld [vmem:[%s30328_s0 + $0x1c9] sm:$0xff] }
 0x159   :  { %19188 = vmatprep.mubr.msk.f32.mxu0 %vm148_vm1, %v22202_v50  ;;  %v16268_v50 = vld [vmem:[%s30328_s0 + $0x1d1] sm:$0xff] }
 0x15c   :  { %19189 = vmatmul.mubr.msk.f32.gmra.mrb[12].mxu0 %vm148_vm1, %v22211_v51  ;;  %v23240_v51 = vld [vmem:[%s30328_s0 + $0x1e1] sm:$0xff] }
 0x15d   :  { %19191 = vmatprep.mubr.msk.f32.mxu0 %vm148_vm1, %v22216_v52  ;;  %v23248_v52 = vld [vmem:[%s30328_s0 + $0x1e9] sm:$0xff] }
 0x160   :  { %19192 = vmatmul.mubr.msk.f32.gmra.mrb[14].mxu0 %vm148_vm1, %v22225_v53  ;;  %v23253_v53 = vld [vmem:[%s30328_s0 + $0x1f9] sm:$0xff] }
 0x161   :  { %19194 = vmatprep.mubr.msk.f32.mxu0 %vm148_vm1, %v22230_v54  ;;  %v23262_v54 = vld [vmem:[%s30328_s0 + $0x201] sm:$0xff] }
 0x164   :  { %19195 = vmatmul.mubr.msk.f32.gmra.mrb[16].mxu0 %vm148_vm1, %v22239_v55  ;;  %v23267_v55 = vld [vmem:[%s30328_s0 + $0x211] sm:$0xff] }
 0x165   :  { %19197 = vmatprep.mubr.msk.f32.mxu0 %vm148_vm1, %v22244_v56  ;;  %v23276_v56 = vld [vmem:[%s30328_s0 + $0x219] sm:$0xff] }
 0x168   :  { %19198 = vmatmul.mubr.msk.f32.gmra.mrb[18].mxu0 %vm148_vm1, %v22253_v57  ;;  %v23281_v57 = vld [vmem:[%s30328_s0 + $0x229] sm:$0xff] }
 0x169   :  { %19200 = vmatprep.mubr.msk.f32.mxu0 %vm148_vm1, %v22258_v58  ;;  %v23290_v58 = vld [vmem:[%s30328_s0 + $0x231] sm:$0xff] }
 0x16c   :  { %19201 = vmatmul.mubr.msk.f32.gmra.mrb[20].mxu0 %vm148_vm1, %v22267_v59  ;;  %v23295_v59 = vld [vmem:[%s30328_s0 + $0x241] sm:$0xff] }
 0x16d   :  { %19203 = vmatprep.mubr.msk.f32.mxu0 %vm148_vm1, %v22272_v60  ;;  %v23304_v60 = vld [vmem:[%s30328_s0 + $0x249] sm:$0xff] }
 0x170   :  { %19204 = vmatmul.mubr.msk.f32.gmra.mrb[22].mxu0 %vm148_vm1, %v22281_v61  ;;  %v23309_v61 = vld [vmem:[%s30328_s0 + $0x259] sm:$0xff] }
 0x171   :  { %19206 = vmatprep.mubr.msk.f32.mxu0 %vm148_vm1, %v22286_v62  ;;  %v23318_v62 = vld [vmem:[%s30328_s0 + $0x261] sm:$0xff] }
 0x174   :  { %19207 = vmatmul.mubr.msk.f32.gmra.mrb[24].mxu0 %vm148_vm1, %v22295_v63  ;;  %v23323_v63 = vld [vmem:[%s30328_s0 + $0x271] sm:$0xff] }
 0x175   :  { %19209 = vmatprep.mubr.msk.f32.mxu0 %vm148_vm1, %v22300_v0  ;;  %v23332_v0 = vld [vmem:[%s30328_s0 + $0x279] sm:$0xff] }
 0x178   :  { %19210 = vmatmul.mubr.msk.f32.gmra.mrb[26].mxu0 %vm148_vm1, %v22309_v1  ;;  %v23337_v1 = vld [vmem:[%s30328_s0 + $0x289] sm:$0xff] }
 0x179   :  { %19212 = vmatprep.mubr.msk.f32.mxu0 %vm148_vm1, %v22314_v2  ;;  %v23346_v2 = vld [vmem:[%s30328_s0 + $0x291] sm:$0xff] }
 0x17c   :  { %19213 = vmatmul.mubr.msk.f32.gmra.mrb[28].mxu0 %vm148_vm1, %v22323_v3  ;;  %v23351_v3 = vld [vmem:[%s30328_s0 + $0x2a1] sm:$0xff] }
 0x17d   :  { %19215 = vmatprep.mubr.msk.f32.mxu0 %vm148_vm1, %v23060_v8 }
 0x180   :  { %19216 = vmatmul.mubr.msk.f32.gmra.mrb[30].mxu0 %vm148_vm1, %v23069_v37 }
 0x181   :  { %19218 = vmatprep.mubr.msk.f32.mxu0 %vm148_vm1, %v22337_v36  ;;  %v23360_v36 = vld [vmem:[%s30328_s0 + $0x2a9] sm:$0xff] }
 0x184   :  { %19219 = vmatmul.mubr.msk.f32.gmra.mrb[32].mxu0 %vm148_vm1, %v22345_v34  ;;  %v30757_v34 = vld [vmem:[#allocation26_spill] sm:$0xff] }
 0x185   :  { %19221 = vmatprep.mubr.msk.f32.mxu0 %vm148_vm1, %v22350_v10  ;;  %v23365_v10 = vld [vmem:[%s30328_s0 + $0x2b9] sm:$0xff] }
 0x188   :  { %19222 = vmatmul.mubr.msk.f32.gmra.mrb[34].mxu0 %vm148_vm1, %v22359_v35  ;;  %v23374_v35 = vld [vmem:[%s30328_s0 + $0x2c1] sm:$0xff] }
 0x189   :  { %19224 = vmatprep.mubr.msk.f32.mxu0 %vm148_vm1, %v22364_v33  ;;  %v30756_v33 = vld [vmem:[#allocation25_spill] sm:$0xff] }
 0x18c   :  { %19225 = vmatmul.mubr.msk.f32.gmra.mrb[36].mxu0 %vm148_vm1, %v22373_v32  ;;  %v30755_v32 = vld [vmem:[#allocation24_spill] sm:$0xff] }
 0x18d   :  { %19227 = vmatprep.mubr.msk.f32.mxu0 %vm148_vm1, %v22378_v31  ;;  %v30754_v31 = vld [vmem:[#allocation23_spill] sm:$0xff] }
 0x190   :  { %19228 = vmatmul.mubr.msk.f32.gmra.mrb[38].mxu0 %vm148_vm1, %v22387_v30  ;;  %v30753_v30 = vld [vmem:[#allocation22_spill] sm:$0xff] }
 0x191   :  { %19230 = vmatprep.mubr.msk.f32.mxu0 %vm148_vm1, %v22392_v29  ;;  %v30752_v29 = vld [vmem:[#allocation21_spill] sm:$0xff] }
 0x194   :  { %19231 = vmatmul.mubr.msk.f32.gmra.mrb[40].mxu0 %vm148_vm1, %v22401_v28  ;;  %v30751_v28 = vld [vmem:[#allocation20_spill] sm:$0xff] }
 0x195   :  { %19233 = vmatprep.mubr.msk.f32.mxu0 %vm148_vm1, %v22406_v27  ;;  %v30750_v27 = vld [vmem:[#allocation19_spill] sm:$0xff] }
 0x198   :  { %19234 = vmatmul.mubr.msk.f32.gmra.mrb[42].mxu0 %vm148_vm1, %v22415_v26  ;;  %v30749_v26 = vld [vmem:[#allocation18_spill] sm:$0xff] }
 0x199   :  { %19236 = vmatprep.mubr.msk.f32.mxu0 %vm148_vm1, %v22420_v25  ;;  %v30748_v25 = vld [vmem:[#allocation17_spill] sm:$0xff] }
 0x19c   :  { %19237 = vmatmul.mubr.msk.f32.gmra.mrb[44].mxu0 %vm148_vm1, %v22429_v24  ;;  %v30747_v24 = vld [vmem:[#allocation16_spill] sm:$0xff] }
 0x19d   :  { %19239 = vmatprep.mubr.msk.f32.mxu0 %vm148_vm1, %v22434_v23  ;;  %v30746_v23 = vld [vmem:[#allocation15_spill] sm:$0xff] }
 0x1a0   :  { %19240 = vmatmul.mubr.msk.f32.gmra.mrb[46].mxu0 %vm148_vm1, %v22443_v22  ;;  %v30745_v22 = vld [vmem:[#allocation14_spill] sm:$0xff] }
 0x1a1   :  { %19242 = vmatprep.mubr.msk.f32.mxu0 %vm148_vm1, %v22448_v21  ;;  %v30744_v21 = vld [vmem:[#allocation13_spill] sm:$0xff] }
 0x1a4   :  { %19243 = vmatmul.mubr.msk.f32.gmra.mrb[48].mxu0 %vm148_vm1, %v22457_v20  ;;  %v30743_v20 = vld [vmem:[#allocation12_spill] sm:$0xff] }
 0x1a5   :  { %19245 = vmatprep.mubr.msk.f32.mxu0 %vm148_vm1, %v22462_v19  ;;  %v30742_v19 = vld [vmem:[#allocation11_spill] sm:$0xff] }
 0x1a8   :  { %19246 = vmatmul.mubr.msk.f32.gmra.mrb[50].mxu0 %vm148_vm1, %v22471_v18  ;;  %v30741_v18 = vld [vmem:[#allocation10_spill] sm:$0xff] }
 0x1a9   :  { %19248 = vmatprep.mubr.msk.f32.mxu0 %vm148_vm1, %v22476_v17  ;;  %v30735_v17 = vld [vmem:[#allocation35_spill] sm:$0xff] }
 0x1ac   :  { %19249 = vmatmul.mubr.msk.f32.gmra.mrb[52].mxu0 %vm148_vm1, %v22485_v16  ;;  %v30740_v16 = vld [vmem:[#allocation9_spill] sm:$0xff] }
 0x1ad   :  { %19251 = vmatprep.mubr.msk.f32.mxu0 %vm148_vm1, %v22490_v15  ;;  %v23134_v15 = vld [vmem:[%s30328_s0 + $0x330] sm:$0xff] }
 0x1b0   :  { %19252 = vmatmul.mubr.msk.f32.gmra.mrb[54].mxu0 %vm148_vm1, %v22499_v14  ;;  %v30739_v14 = vld [vmem:[#allocation8_spill] sm:$0xff] }
 0x1b1   :  { %19254 = vmatprep.mubr.msk.f32.mxu0 %vm148_vm1, %v22504_v13  ;;  %v30738_v13 = vld [vmem:[#allocation7_spill] sm:$0xff] }
 0x1b4   :  { %19255 = vmatmul.mubr.msk.f32.gmra.mrb[56].mxu0 %vm148_vm1, %v22513_v12  ;;  %v30737_v12 = vld [vmem:[#allocation6_spill] sm:$0xff] }
 0x1b5   :  { %19257 = vmatprep.mubr.msk.f32.mxu0 %vm148_vm1, %v22518_v11  ;;  %v23143_v11 = vld [vmem:[%s30328_s0 + $0x338] sm:$0xff] }
 0x1b8   :  { %19258 = vmatmul.mubr.msk.f32.gmra.mrb[58].mxu0 %vm148_vm1, %v22527_v9  ;;  %v30736_v9 = vld [vmem:[#allocation5_spill] sm:$0xff] }
 0x1b9   :  { %19260 = vmatprep.mubr.msk.f32.mxu0 %vm148_vm1, %v30735_v17  ;;  %v23388_v17 = vld [vmem:[%s30328_s0 + $0x2d9] sm:$0xff] }
 0x1bc   :  { %19261 = vmatmul.mubr.msk.f32.gmra.mrb[60].mxu0 %vm148_vm1, %v22541_v7  ;;  %v23154_v7 = vld [vmem:[%s30327_s1 + $0x18] sm:$0xf] }
 0x1bd   :  { %19263 = vmatprep.mubr.msk.f32.mxu0 %vm148_vm1, %v23134_v15 }
 0x1c0   :  { %19264 = vmatmul.mubr.msk.f32.gmra.mrb[62].mxu0 %vm148_vm1, %v23143_v11 }
 0x1c1   :  { %19268 = vmatprep.mubr.msk.f32.mxu0 %vm148_vm1, %v30736_v9  ;;  %v23393_v9 = vld [vmem:[%s30328_s0 + $0x2e9] sm:$0xff] }
 0x1c4   :  { %19269 = vmatmul.mubr.msk.f32.vlgmr.msra.gmra.mrb[0].mxu0 %vm148_vm1, %v30737_v12  ;;  %v23402_v12 = vld [vmem:[%s30328_s0 + $0x2f1] sm:$0xff] }
 0x1c5   :  { %19365 = vmatpush3.msk.msra.mxu0 %vm30448_vm0, %v22997_v38  ;;  %19271 = vmatprep.mubr.msk.f32.mxu0 %vm148_vm1, %v30738_v13  ;;  %v23379_v38 = vld [vmem:[%s30328_s0 + $0x2d1] sm:$0xff]  ;;  %v23407_v13 = vld [vmem:[%s30328_s0 + $0x301] sm:$0xff] }
 0x1c6   :  { %19462 = vmatprep.subr.msk.mxu0 %vm30448_vm0, %v23154_v7 }
 0x1c8   :  { %19272 = vmatmul.mubr.msk.f32.gmra.mrb[2].mxu0 %vm148_vm1, %v30739_v14  ;;  %v23416_v14 = vld [vmem:[%s30328_s0 + $0x309] sm:$0xff] }
 0x1c9   :  { %19274 = vmatprep.mubr.msk.f32.mxu0 %vm148_vm1, %v30740_v16  ;;  %v23421_v16 = vld [vmem:[%s30328_s0 + $0x319] sm:$0xff] }
 0x1cc   :  { %19275 = vmatmul.mubr.msk.f32.gmra.mrb[4].mxu0 %vm148_vm1, %v30741_v18  ;;  %v23430_v18 = vld [vmem:[%s30328_s0 + $0x321] sm:$0xff] }
 0x1cd   :  { %19277 = vmatprep.mubr.msk.f32.mxu0 %vm148_vm1, %v30742_v19  ;;  %v23435_v19 = vld [vmem:[%s30328_s0 + $0x331] sm:$0xff] }
 0x1d0   :  { %19278 = vmatmul.mubr.msk.f32.gmra.mrb[6].mxu0 %vm148_vm1, %v30743_v20  ;;  %v23444_v20 = vld [vmem:[%s30328_s0 + $0x339] sm:$0xff] }
 0x1d1   :  { %19280 = vmatprep.mubr.msk.f32.mxu0 %vm148_vm1, %v30744_v21  ;;  %v30766_v21 = vld [vmem:[#allocation36_spill] sm:$0xff] }
 0x1d4   :  { %19281 = vmatmul.mubr.msk.f32.gmra.mrb[8].mxu0 %vm148_vm1, %v30745_v22  ;;  %v30767_v22 = vld [vmem:[#allocation37_spill] sm:$0xff] }
 0x1d5   :  { %19283 = vmatprep.mubr.msk.f32.mxu0 %vm148_vm1, %v30746_v23  ;;  %v23455_v23 = vld [vmem:[%s30327_s1 + $0x1c] sm:$0xf] }
 0x1d8   :  { %19284 = vmatmul.mubr.msk.f32.gmra.mrb[10].mxu0 %vm148_vm1, %v30747_v24  ;;  %v30768_v24 = vld [vmem:[#allocation38_spill] sm:$0xff] }
 0x1d9   :  { %19286 = vmatprep.mubr.msk.f32.mxu0 %vm148_vm1, %v30748_v25  ;;  %v30769_v25 = vld [vmem:[#allocation39_spill] sm:$0xff] }
 0x1dc   :  { %19287 = vmatmul.mubr.msk.f32.gmra.mrb[12].mxu0 %vm148_vm1, %v30749_v26  ;;  %v30770_v26 = vld [vmem:[#allocation40_spill] sm:$0xff] }
 0x1dd   :  { %19289 = vmatprep.mubr.msk.f32.mxu0 %vm148_vm1, %v30750_v27  ;;  %v30771_v27 = vld [vmem:[#allocation41_spill] sm:$0xff] }
 0x1e0   :  { %19290 = vmatmul.mubr.msk.f32.gmra.mrb[14].mxu0 %vm148_vm1, %v30751_v28  ;;  %v30772_v28 = vld [vmem:[#allocation42_spill] sm:$0xff] }
 0x1e1   :  { %19292 = vmatprep.mubr.msk.f32.mxu0 %vm148_vm1, %v30752_v29  ;;  %v30773_v29 = vld [vmem:[#allocation43_spill] sm:$0xff] }
 0x1e4   :  { %19293 = vmatmul.mubr.msk.f32.gmra.mrb[16].mxu0 %vm148_vm1, %v30753_v30  ;;  %v30775_v30 = vld [vmem:[#allocation45_spill] sm:$0xff] }
 0x1e5   :  { %19295 = vmatprep.mubr.msk.f32.mxu0 %vm148_vm1, %v30754_v31  ;;  %v30776_v31 = vld [vmem:[#allocation46_spill] sm:$0xff] }
 0x1e8   :  { %19296 = vmatmul.mubr.msk.f32.gmra.mrb[18].mxu0 %vm148_vm1, %v30755_v32  ;;  %v30777_v32 = vld [vmem:[#allocation47_spill] sm:$0xff] }
 0x1e9   :  { %19298 = vmatprep.mubr.msk.f32.mxu0 %vm148_vm1, %v30756_v33  ;;  %v30778_v33 = vld [vmem:[#allocation48_spill] sm:$0xff] }
 0x1ec   :  { %19299 = vmatmul.mubr.msk.f32.gmra.mrb[20].mxu0 %vm148_vm1, %v30757_v34  ;;  %v30779_v34 = vld [vmem:[#allocation49_spill] sm:$0xff] }
 0x1ed   :  { %19301 = vmatprep.mubr.msk.f32.mxu0 %vm148_vm1, %v30758_v39  ;;  %v30780_v39 = vld [vmem:[#allocation50_spill] sm:$0xff] }
 0x1f0   :  { %19302 = vmatmul.mubr.msk.f32.gmra.mrb[22].mxu0 %vm148_vm1, %v30759_v40  ;;  %v30781_v40 = vld [vmem:[#allocation51_spill] sm:$0xff] }
 0x1f1   :  { %19304 = vmatprep.mubr.msk.f32.mxu0 %vm148_vm1, %v30760_v41  ;;  %v30782_v41 = vld [vmem:[#allocation52_spill] sm:$0xff] }
 0x1f4   :  { %19305 = vmatmul.mubr.msk.f32.gmra.mrb[24].mxu0 %vm148_vm1, %v30761_v42  ;;  %v30783_v42 = vld [vmem:[#allocation53_spill] sm:$0xff] }
 0x1f5   :  { %19307 = vmatprep.mubr.msk.f32.mxu0 %vm148_vm1, %v30762_v43  ;;  %v30784_v43 = vld [vmem:[#allocation54_spill] sm:$0xff] }
 0x1f8   :  { %19308 = vmatmul.mubr.msk.f32.gmra.mrb[26].mxu0 %vm148_vm1, %v30763_v44  ;;  %v30785_v44 = vld [vmem:[#allocation55_spill] sm:$0xff] }
 0x1f9   :  { %19310 = vmatprep.mubr.msk.f32.mxu0 %vm148_vm1, %v30764_v45  ;;  %v30786_v45 = vld [vmem:[#allocation56_spill] sm:$0xff] }
 0x1fc   :  { %19311 = vmatmul.mubr.msk.f32.gmra.mrb[28].mxu0 %vm148_vm1, %v30765_v47  ;;  %v30787_v47 = vld [vmem:[#allocation57_spill] sm:$0xff] }
 0x1fd   :  { %19313 = vmatprep.mubr.msk.f32.mxu0 %vm148_vm1, %v23217_v46 }
 0x200   :  { %19314 = vmatmul.mubr.msk.f32.gmra.mrb[30].mxu0 %vm148_vm1, %v23226_v48 }
 0x201   :  { %19316 = vmatprep.mubr.msk.f32.mxu0 %vm148_vm1, %v16267_v49  ;;  %v30788_v49 = vld [vmem:[#allocation58_spill] sm:$0xff] }
 0x204   :  { %19317 = vmatmul.mubr.msk.f32.gmra.mrb[32].mxu0 %vm148_vm1, %v16268_v50  ;;  %v30789_v50 = vld [vmem:[#allocation59_spill] sm:$0xff] }
 0x205   :  { %19319 = vmatprep.mubr.msk.f32.mxu0 %vm148_vm1, %v23240_v51 }
 0x208   :  { %19320 = vmatmul.mubr.msk.f32.gmra.mrb[34].mxu0 %vm148_vm1, %v23248_v52 }
 0x209   :  { %19322 = vmatprep.mubr.msk.f32.mxu0 %vm148_vm1, %v23253_v53 }
 0x20c   :  { %19323 = vmatmul.mubr.msk.f32.gmra.mrb[36].mxu0 %vm148_vm1, %v23262_v54 }
 0x20d   :  { %19325 = vmatprep.mubr.msk.f32.mxu0 %vm148_vm1, %v23267_v55 }
 0x210   :  { %19326 = vmatmul.mubr.msk.f32.gmra.mrb[38].mxu0 %vm148_vm1, %v23276_v56 }
 0x211   :  { %19328 = vmatprep.mubr.msk.f32.mxu0 %vm148_vm1, %v23281_v57 }
 0x214   :  { %19329 = vmatmul.mubr.msk.f32.gmra.mrb[40].mxu0 %vm148_vm1, %v23290_v58 }
 0x215   :  { %19331 = vmatprep.mubr.msk.f32.mxu0 %vm148_vm1, %v23295_v59 }
 0x218   :  { %19332 = vmatmul.mubr.msk.f32.gmra.mrb[42].mxu0 %vm148_vm1, %v23304_v60 }
 0x219   :  { %19334 = vmatprep.mubr.msk.f32.mxu0 %vm148_vm1, %v23309_v61 }
 0x21c   :  { %19335 = vmatmul.mubr.msk.f32.gmra.mrb[44].mxu0 %vm148_vm1, %v23318_v62 }
 0x21d   :  { %19337 = vmatprep.mubr.msk.f32.mxu0 %vm148_vm1, %v23323_v63 }
 0x220   :  { %19338 = vmatmul.mubr.msk.f32.gmra.mrb[46].mxu0 %vm148_vm1, %v23332_v0 }
 0x221   :  { %19340 = vmatprep.mubr.msk.f32.mxu0 %vm148_vm1, %v23337_v1 }
 0x224   :  { %19341 = vmatmul.mubr.msk.f32.gmra.mrb[48].mxu0 %vm148_vm1, %v23346_v2 }
 0x225   :  { %19343 = vmatprep.mubr.msk.f32.mxu0 %vm148_vm1, %v23351_v3 }
 0x228   :  { %19344 = vmatmul.mubr.msk.f32.gmra.mrb[50].mxu0 %vm148_vm1, %v23360_v36 }
 0x229   :  { %19346 = vmatprep.mubr.msk.f32.mxu0 %vm148_vm1, %v23365_v10 }
 0x22c   :  { %19347 = vmatmul.mubr.msk.f32.gmra.mrb[52].mxu0 %vm148_vm1, %v23374_v35 }
 0x22d   :  { %19349 = vmatprep.mubr.msk.f32.mxu0 %vm148_vm1, %v23379_v38 }
 0x230   :  { %19350 = vmatmul.mubr.msk.f32.gmra.mrb[54].mxu0 %vm148_vm1, %v23388_v17 }
 0x231   :  { %19352 = vmatprep.mubr.msk.f32.mxu0 %vm148_vm1, %v23393_v9 }
 0x234   :  { %19353 = vmatmul.mubr.msk.f32.gmra.mrb[56].mxu0 %vm148_vm1, %v23402_v12 }
 0x235   :  { %19355 = vmatprep.mubr.msk.f32.mxu0 %vm148_vm1, %v23407_v13 }
 0x238   :  { %19356 = vmatmul.mubr.msk.f32.gmra.mrb[58].mxu0 %vm148_vm1, %v23416_v14 }
 0x239   :  { %19358 = vmatprep.mubr.msk.f32.mxu0 %vm148_vm1, %v23421_v16 }
 0x23c   :  { %19359 = vmatmul.mubr.msk.f32.gmra.mrb[60].mxu0 %vm148_vm1, %v23430_v18 }
 0x23d   :  { %19361 = vmatprep.mubr.msk.f32.mxu0 %vm148_vm1, %v23435_v19 }
 0x240   :  { %19362 = vmatmul.mubr.msk.f32.gmra.mrb[62].mxu0 %vm148_vm1, %v23444_v20 }
 0x241   :  { %19366 = vmatprep.mubr.msk.f32.mxu0 %vm148_vm1, %v30766_v21  ;;  %v30790_v21 = vld [vmem:[#allocation60_spill] sm:$0xff] }
 0x244   :  { %19367 = vmatmul.mubr.msk.f32.vlgmr.msra.gmra.mrb[0].mxu0 %vm148_vm1, %v30767_v22  ;;  %v30791_v22 = vld [vmem:[#allocation61_spill] sm:$0xff] }
 0x245   :  { %19463 = vmatpush3.msk.msra.mxu0 %vm30448_vm0, %v23154_v7  ;;  %19369 = vmatprep.mubr.msk.f32.mxu0 %vm148_vm1, %v30768_v24  ;;  %v30774_v7 = vld [vmem:[#allocation44_spill] sm:$0xff]  ;;  %v30792_v24 = vld [vmem:[#allocation62_spill] sm:$0xff] }
 0x246   :  { %19560 = vmatprep.subr.msk.mxu0 %vm30448_vm0, %v23455_v23 }
 0x248   :  { %19370 = vmatmul.mubr.msk.f32.gmra.mrb[2].mxu0 %vm148_vm1, %v30769_v25  ;;  %v30793_v25 = vld [vmem:[#allocation63_spill] sm:$0xff] }
 0x249   :  { %19372 = vmatprep.mubr.msk.f32.mxu0 %vm148_vm1, %v30770_v26  ;;  %v30794_v26 = vld [vmem:[#allocation64_spill] sm:$0xff] }
 0x24c   :  { %19373 = vmatmul.mubr.msk.f32.gmra.mrb[4].mxu0 %vm148_vm1, %v30771_v27  ;;  %v23518_v27 = vld [vmem:[%s30328_s0 + $0x182] sm:$0xff] }
 0x24d   :  { %19375 = vmatprep.mubr.msk.f32.mxu0 %vm148_vm1, %v30772_v28  ;;  %v30795_v28 = vld [vmem:[#allocation65_spill] sm:$0xff] }
 0x250   :  { %19376 = vmatmul.mubr.msk.f32.gmra.mrb[6].mxu0 %vm148_vm1, %v30773_v29  ;;  %v23527_v29 = vld [vmem:[%s30328_s0 + $0x18a] sm:$0xff] }
 0x251   :  { %19378 = vmatprep.mubr.msk.f32.mxu0 %vm148_vm1, %v30774_v7  ;;  %v30796_v7 = vld [vmem:[#allocation66_spill] sm:$0xff] }
 0x254   :  { %19379 = vmatmul.mubr.msk.f32.gmra.mrb[8].mxu0 %vm148_vm1, %v30775_v30  ;;  %v30797_v30 = vld [vmem:[#allocation67_spill] sm:$0xff] }
 0x255   :  { %19381 = vmatprep.mubr.msk.f32.mxu0 %vm148_vm1, %v30776_v31  ;;  %v30798_v31 = vld [vmem:[#allocation68_spill] sm:$0xff] }
 0x258   :  { %19382 = vmatmul.mubr.msk.f32.gmra.mrb[10].mxu0 %vm148_vm1, %v30777_v32  ;;  %v30799_v32 = vld [vmem:[#allocation69_spill] sm:$0xff] }
 0x259   :  { %19384 = vmatprep.mubr.msk.f32.mxu0 %vm148_vm1, %v30778_v33  ;;  %v30800_v33 = vld [vmem:[#allocation70_spill] sm:$0xff] }
 0x25c   :  { %19385 = vmatmul.mubr.msk.f32.gmra.mrb[12].mxu0 %vm148_vm1, %v30779_v34  ;;  %v30801_v34 = vld [vmem:[#allocation71_spill] sm:$0xff] }
 0x25d   :  { %19387 = vmatprep.mubr.msk.f32.mxu0 %vm148_vm1, %v30780_v39  ;;  %v30802_v39 = vld [vmem:[#allocation72_spill] sm:$0xff] }
 0x260   :  { %19388 = vmatmul.mubr.msk.f32.gmra.mrb[14].mxu0 %vm148_vm1, %v30781_v40  ;;  %v30803_v40 = vld [vmem:[#allocation73_spill] sm:$0xff] }
 0x261   :  { %19390 = vmatprep.mubr.msk.f32.mxu0 %vm148_vm1, %v30782_v41  ;;  %v30804_v41 = vld [vmem:[#allocation74_spill] sm:$0xff] }
 0x264   :  { %19391 = vmatmul.mubr.msk.f32.gmra.mrb[16].mxu0 %vm148_vm1, %v30783_v42  ;;  %v30805_v42 = vld [vmem:[#allocation75_spill] sm:$0xff] }
 0x265   :  { %19393 = vmatprep.mubr.msk.f32.mxu0 %vm148_vm1, %v30784_v43  ;;  %v30806_v43 = vld [vmem:[#allocation76_spill] sm:$0xff] }
 0x268   :  { %19394 = vmatmul.mubr.msk.f32.gmra.mrb[18].mxu0 %vm148_vm1, %v30785_v44  ;;  %v30807_v44 = vld [vmem:[#allocation77_spill] sm:$0xff] }
 0x269   :  { %19396 = vmatprep.mubr.msk.f32.mxu0 %vm148_vm1, %v30786_v45  ;;  %v30808_v45 = vld [vmem:[#allocation78_spill] sm:$0xff] }
 0x26c   :  { %19397 = vmatmul.mubr.msk.f32.gmra.mrb[20].mxu0 %vm148_vm1, %v30787_v47  ;;  %v30809_v47 = vld [vmem:[#allocation79_spill] sm:$0xff] }
 0x26d   :  { %19399 = vmatprep.mubr.msk.f32.mxu0 %vm148_vm1, %v30788_v49  ;;  %v30810_v49 = vld [vmem:[#allocation80_spill] sm:$0xff] }
 0x270   :  { %19400 = vmatmul.mubr.msk.f32.gmra.mrb[22].mxu0 %vm148_vm1, %v30789_v50  ;;  %v30811_v50 = vld [vmem:[#allocation81_spill] sm:$0xff] }
 0x271   :  { %19402 = vmatprep.mubr.msk.f32.mxu0 %vm148_vm1, %v30790_v21  ;;  %v30812_v21 = vld [vmem:[#allocation82_spill] sm:$0xff] }
 0x274   :  { %19403 = vmatmul.mubr.msk.f32.gmra.mrb[24].mxu0 %vm148_vm1, %v30791_v22  ;;  %v30813_v22 = vld [vmem:[#allocation83_spill] sm:$0xff] }
 0x275   :  { %19405 = vmatprep.mubr.msk.f32.mxu0 %vm148_vm1, %v30792_v24  ;;  %v30814_v24 = vld [vmem:[#allocation84_spill] sm:$0xff] }
 0x278   :  { %19406 = vmatmul.mubr.msk.f32.gmra.mrb[26].mxu0 %vm148_vm1, %v30793_v25  ;;  %v30815_v25 = vld [vmem:[#allocation85_spill] sm:$0xff] }
 0x279   :  { %19408 = vmatprep.mubr.msk.f32.mxu0 %vm148_vm1, %v30794_v26  ;;  %v30816_v26 = vld [vmem:[#allocation86_spill] sm:$0xff] }
 0x27c   :  { %19409 = vmatmul.mubr.msk.f32.gmra.mrb[28].mxu0 %vm148_vm1, %v30795_v28  ;;  %v30817_v28 = vld [vmem:[#allocation87_spill] sm:$0xff] }
 0x27d   :  { %19411 = vmatprep.mubr.msk.f32.mxu0 %vm148_vm1, %v23518_v27 }
 0x280   :  { %19412 = vmatmul.mubr.msk.f32.gmra.mrb[30].mxu0 %vm148_vm1, %v23527_v29 }
 0x281   :  { %19414 = vmatprep.mubr.msk.f32.mxu0 %vm148_vm1, %v30796_v7  ;;  %v30818_v7 = vld [vmem:[#allocation88_spill] sm:$0xff] }
 0x284   :  { %19415 = vmatmul.mubr.msk.f32.gmra.mrb[32].mxu0 %vm148_vm1, %v30797_v30  ;;  %v30819_v30 = vld [vmem:[#allocation89_spill] sm:$0xff] }
 0x285   :  { %19417 = vmatprep.mubr.msk.f32.mxu0 %vm148_vm1, %v30798_v31  ;;  %v30820_v31 = vld [vmem:[#allocation90_spill] sm:$0xff] }
 0x288   :  { %19418 = vmatmul.mubr.msk.f32.gmra.mrb[34].mxu0 %vm148_vm1, %v30799_v32  ;;  %v30821_v32 = vld [vmem:[#allocation91_spill] sm:$0xff] }
 0x289   :  { %19420 = vmatprep.mubr.msk.f32.mxu0 %vm148_vm1, %v30800_v33  ;;  %v30822_v33 = vld [vmem:[#allocation92_spill] sm:$0xff] }
 0x28c   :  { %19421 = vmatmul.mubr.msk.f32.gmra.mrb[36].mxu0 %vm148_vm1, %v30801_v34  ;;  %v23592_v34 = vld [vmem:[%s30328_s0 + $0x332] sm:$0xff] }
 0x28d   :  { %19423 = vmatprep.mubr.msk.f32.mxu0 %vm148_vm1, %v30802_v39  ;;  %v16497_v39 = vld [vmem:[%s30328_s0 + $0x48] sm:$0xff] }
 0x290   :  { %19424 = vmatmul.mubr.msk.f32.gmra.mrb[38].mxu0 %vm148_vm1, %v30803_v40  ;;  %v23619_v40 = vld [vmem:[%s30327_s1 + $0x20] sm:$0xf] }
 0x291   :  { %19426 = vmatprep.mubr.msk.f32.mxu0 %vm148_vm1, %v30804_v41  ;;  %v16498_v41 = vld [vmem:[%s30328_s0 + $0x50] sm:$0xff] }
 0x294   :  { %19427 = vmatmul.mubr.msk.f32.gmra.mrb[40].mxu0 %vm148_vm1, %v30805_v42  ;;  %v16499_v42 = vld [vmem:[%s30328_s0 + $0x60] sm:$0xff] }
 0x295   :  { %19429 = vmatprep.mubr.msk.f32.mxu0 %vm148_vm1, %v30806_v43  ;;  %v16501_v43 = vld [vmem:[%s30328_s0 + $0x78] sm:$0xff] }
 0x298   :  { %19430 = vmatmul.mubr.msk.f32.gmra.mrb[42].mxu0 %vm148_vm1, %v30807_v44  ;;  %v16502_v44 = vld [vmem:[%s30328_s0 + $0x80] sm:$0xff] }
 0x299   :  { %19432 = vmatprep.mubr.msk.f32.mxu0 %vm148_vm1, %v30808_v45  ;;  %v16503_v45 = vld [vmem:[%s30328_s0 + $0x90] sm:$0xff] }
 0x29c   :  { %19433 = vmatmul.mubr.msk.f32.gmra.mrb[44].mxu0 %vm148_vm1, %v30809_v47  ;;  %v16504_v47 = vld [vmem:[%s30328_s0 + $0x98] sm:$0xff] }
 0x29d   :  { %19435 = vmatprep.mubr.msk.f32.mxu0 %vm148_vm1, %v30810_v49  ;;  %v16505_v49 = vld [vmem:[%s30328_s0 + $0xa8] sm:$0xff] }
 0x2a0   :  { %19436 = vmatmul.mubr.msk.f32.gmra.mrb[46].mxu0 %vm148_vm1, %v30811_v50  ;;  %v16506_v50 = vld [vmem:[%s30328_s0 + $0xb0] sm:$0xff] }
 0x2a1   :  { %19438 = vmatprep.mubr.msk.f32.mxu0 %vm148_vm1, %v30812_v21  ;;  %v16507_v21 = vld [vmem:[%s30328_s0 + $0xc0] sm:$0xff] }
 0x2a4   :  { %19439 = vmatmul.mubr.msk.f32.gmra.mrb[48].mxu0 %vm148_vm1, %v30813_v22  ;;  %v16508_v22 = vld [vmem:[%s30328_s0 + $0xc8] sm:$0xff] }
 0x2a5   :  { %19441 = vmatprep.mubr.msk.f32.mxu0 %vm148_vm1, %v30814_v24  ;;  %v16509_v24 = vld [vmem:[%s30328_s0 + $0xd8] sm:$0xff] }
 0x2a8   :  { %19442 = vmatmul.mubr.msk.f32.gmra.mrb[50].mxu0 %vm148_vm1, %v30815_v25  ;;  %v16510_v25 = vld [vmem:[%s30328_s0 + $0xe0] sm:$0xff] }
 0x2a9   :  { %19444 = vmatprep.mubr.msk.f32.mxu0 %vm148_vm1, %v30816_v26  ;;  %v16511_v26 = vld [vmem:[%s30328_s0 + $0xf0] sm:$0xff] }
 0x2ac   :  { %19445 = vmatmul.mubr.msk.f32.gmra.mrb[52].mxu0 %vm148_vm1, %v30817_v28  ;;  %v16512_v28 = vld [vmem:[%s30328_s0 + $0xf8] sm:$0xff] }
 0x2ad   :  { %19447 = vmatprep.mubr.msk.f32.mxu0 %vm148_vm1, %v30818_v7  ;;  %v16513_v7 = vld [vmem:[%s30328_s0 + $0x108] sm:$0xff] }
 0x2b0   :  { %19448 = vmatmul.mubr.msk.f32.gmra.mrb[54].mxu0 %vm148_vm1, %v30819_v30  ;;  %v16514_v30 = vld [vmem:[%s30328_s0 + $0x110] sm:$0xff] }
 0x2b1   :  { %19450 = vmatprep.mubr.msk.f32.mxu0 %vm148_vm1, %v30820_v31  ;;  %v16515_v31 = vld [vmem:[%s30328_s0 + $0x120] sm:$0xff] }
 0x2b4   :  { %19451 = vmatmul.mubr.msk.f32.gmra.mrb[56].mxu0 %vm148_vm1, %v22958_v5  ;;  %v23601_v5 = vld [vmem:[%s30328_s0 + $0x33a] sm:$0xff] }
 0x2b5   :  { %19453 = vmatprep.mubr.msk.f32.mxu0 %vm148_vm1, %v30821_v32  ;;  %v16516_v32 = vld [vmem:[%s30328_s0 + $0x128] sm:$0xff] }
 0x2b8   :  { %19454 = vmatmul.mubr.msk.f32.gmra.mrb[58].mxu0 %vm148_vm1, %v30822_v33  ;;  %v16517_v33 = vld [vmem:[%s30328_s0 + $0x138] sm:$0xff] }
 0x2b9   :  { %19456 = vmatprep.mubr.msk.f32.mxu0 %vm148_vm1, %v22977_v4  ;;  %v16495_v4 = vld [vmem:[%s30328_s0 + $0x30] sm:$0xff] }
 0x2bc   :  { %19457 = vmatmul.mubr.msk.f32.gmra.mrb[60].mxu0 %vm148_vm1, %v22986_v6  ;;  %v16496_v6 = vld [vmem:[%s30328_s0 + $0x38] sm:$0xff] }
 0x2bd   :  { %19459 = vmatprep.mubr.msk.f32.mxu0 %vm148_vm1, %v23592_v34 }
 0x2c0   :  { %19460 = vmatmul.mubr.msk.f32.gmra.mrb[62].mxu0 %vm148_vm1, %v23601_v5 }
 0x2c1   :  { %19464 = vmatprep.mubr.msk.f32.mxu0 %vm148_vm1, %v16495_v4  ;;  %v16518_v4 = vld [vmem:[%s30328_s0 + $0x140] sm:$0xff] }
 0x2c4   :  { %19465 = vmatmul.mubr.msk.f32.vlgmr.msra.gmra.mrb[0].mxu0 %vm148_vm1, %v16496_v6  ;;  %v16519_v6 = vld [vmem:[%s30328_s0 + $0x150] sm:$0xff] }
 0x2c5   :  { %19561 = vmatpush3.msk.msra.mxu0 %vm30448_vm0, %v23455_v23  ;;  %19467 = vmatprep.mubr.msk.f32.mxu0 %vm148_vm1, %v16497_v39  ;;  %v16500_v23 = vld [vmem:[%s30328_s0 + $0x68] sm:$0xff]  ;;  %v16520_v39 = vld [vmem:[%s30328_s0 + $0x158] sm:$0xff] }
 0x2c6   :  { %19658 = vmatprep.subr.msk.mxu0 %vm30448_vm0, %v23619_v40 }
 0x2c8   :  { %19468 = vmatmul.mubr.msk.f32.gmra.mrb[2].mxu0 %vm148_vm1, %v16498_v41  ;;  %v16521_v41 = vld [vmem:[%s30328_s0 + $0x168] sm:$0xff] }
 0x2c9   :  { %19470 = vmatprep.mubr.msk.f32.mxu0 %vm148_vm1, %v16499_v42  ;;  %v16522_v42 = vld [vmem:[%s30328_s0 + $0x170] sm:$0xff] }
 0x2cc   :  { %19471 = vmatmul.mubr.msk.f32.gmra.mrb[4].mxu0 %vm148_vm1, %v16500_v23  ;;  %v16525_v23 = vld [vmem:[%s30328_s0 + $0x198] sm:$0xff] }
 0x2cd   :  { %19473 = vmatprep.mubr.msk.f32.mxu0 %vm148_vm1, %v16501_v43  ;;  %v16526_v43 = vld [vmem:[%s30328_s0 + $0x1a0] sm:$0xff] }
 0x2d0   :  { %19474 = vmatmul.mubr.msk.f32.gmra.mrb[6].mxu0 %vm148_vm1, %v16502_v44  ;;  %v16527_v44 = vld [vmem:[%s30328_s0 + $0x1e0] sm:$0xff] }
 0x2d1   :  { %19476 = vmatprep.mubr.msk.f32.mxu0 %vm148_vm1, %v16503_v45  ;;  %v16530_v45 = vld [vmem:[%s30328_s0 + $0x200] sm:$0xff] }
 0x2d4   :  { %19477 = vmatmul.mubr.msk.f32.gmra.mrb[8].mxu0 %vm148_vm1, %v16504_v47  ;;  %v16531_v47 = vld [vmem:[%s30328_s0 + $0x210] sm:$0xff] }
 0x2d5   :  { %19479 = vmatprep.mubr.msk.f32.mxu0 %vm148_vm1, %v16505_v49  ;;  %v16532_v49 = vld [vmem:[%s30328_s0 + $0x218] sm:$0xff] }
 0x2d8   :  { %19480 = vmatmul.mubr.msk.f32.gmra.mrb[10].mxu0 %vm148_vm1, %v16506_v50  ;;  %v16533_v50 = vld [vmem:[%s30328_s0 + $0x228] sm:$0xff] }
 0x2d9   :  { %19482 = vmatprep.mubr.msk.f32.mxu0 %vm148_vm1, %v16507_v21  ;;  %v16534_v21 = vld [vmem:[%s30328_s0 + $0x230] sm:$0xff] }
 0x2dc   :  { %19483 = vmatmul.mubr.msk.f32.gmra.mrb[12].mxu0 %vm148_vm1, %v16508_v22  ;;  %v16535_v22 = vld [vmem:[%s30328_s0 + $0x240] sm:$0xff] }
 0x2dd   :  { %19485 = vmatprep.mubr.msk.f32.mxu0 %vm148_vm1, %v16509_v24  ;;  %v16536_v24 = vld [vmem:[%s30328_s0 + $0x248] sm:$0xff] }
 0x2e0   :  { %19486 = vmatmul.mubr.msk.f32.gmra.mrb[14].mxu0 %vm148_vm1, %v16510_v25  ;;  %v16537_v25 = vld [vmem:[%s30328_s0 + $0x258] sm:$0xff] }
 0x2e1   :  { %19488 = vmatprep.mubr.msk.f32.mxu0 %vm148_vm1, %v16511_v26  ;;  %v16538_v26 = vld [vmem:[%s30328_s0 + $0x260] sm:$0xff] }
 0x2e4   :  { %19489 = vmatmul.mubr.msk.f32.gmra.mrb[16].mxu0 %vm148_vm1, %v16512_v28  ;;  %v16539_v28 = vld [vmem:[%s30328_s0 + $0x270] sm:$0xff] }
 0x2e5   :  { %19491 = vmatprep.mubr.msk.f32.mxu0 %vm148_vm1, %v16513_v7  ;;  %v16540_v7 = vld [vmem:[%s30328_s0 + $0x278] sm:$0xff] }
 0x2e8   :  { %19492 = vmatmul.mubr.msk.f32.gmra.mrb[18].mxu0 %vm148_vm1, %v16514_v30  ;;  %v16541_v30 = vld [vmem:[%s30328_s0 + $0x288] sm:$0xff] }
 0x2e9   :  { %19494 = vmatprep.mubr.msk.f32.mxu0 %vm148_vm1, %v16515_v31  ;;  %v16542_v31 = vld [vmem:[%s30328_s0 + $0x290] sm:$0xff] }
 0x2ec   :  { %19495 = vmatmul.mubr.msk.f32.gmra.mrb[20].mxu0 %vm148_vm1, %v16516_v32  ;;  %v16543_v32 = vld [vmem:[%s30328_s0 + $0x2a0] sm:$0xff] }
 0x2ed   :  { %19497 = vmatprep.mubr.msk.f32.mxu0 %vm148_vm1, %v16517_v33  ;;  %v16544_v33 = vld [vmem:[%s30328_s0 + $0x2a8] sm:$0xff] }
 0x2f0   :  { %19498 = vmatmul.mubr.msk.f32.gmra.mrb[22].mxu0 %vm148_vm1, %v16518_v4  ;;  %v16545_v4 = vld [vmem:[%s30328_s0 + $0x2b8] sm:$0xff] }
 0x2f1   :  { %19500 = vmatprep.mubr.msk.f32.mxu0 %vm148_vm1, %v16519_v6  ;;  %v16546_v6 = vld [vmem:[%s30328_s0 + $0x2c0] sm:$0xff] }
 0x2f4   :  { %19501 = vmatmul.mubr.msk.f32.gmra.mrb[24].mxu0 %vm148_vm1, %v16520_v39  ;;  %v16547_v39 = vld [vmem:[%s30328_s0 + $0x2d0] sm:$0xff] }
 0x2f5   :  { %19503 = vmatprep.mubr.msk.f32.mxu0 %vm148_vm1, %v16521_v41  ;;  %v16548_v41 = vld [vmem:[%s30328_s0 + $0x2d8] sm:$0xff] }
 0x2f8   :  { %19504 = vmatmul.mubr.msk.f32.gmra.mrb[26].mxu0 %vm148_vm1, %v16522_v42  ;;  %v16549_v42 = vld [vmem:[%s30328_s0 + $0x2e8] sm:$0xff] }
 0x2f9   :  { %19506 = vmatprep.mubr.msk.f32.mxu0 %vm148_vm1, %v23060_v8  ;;  %v16528_v8 = vld [vmem:[%s30328_s0 + $0x1e8] sm:$0xff] }
 0x2fc   :  { %19507 = vmatmul.mubr.msk.f32.gmra.mrb[28].mxu0 %vm148_vm1, %v23069_v37  ;;  %v16529_v37 = vld [vmem:[%s30328_s0 + $0x1f8] sm:$0xff] }
 0x2fd   :  { %19509 = vmatprep.mubr.msk.f32.mxu0 %vm148_vm1, %v16525_v23  ;;  %v16550_v23 = vld [vmem:[%s30328_s0 + $0x2f0] sm:$0xff] }
 0x300   :  { %19510 = vmatmul.mubr.msk.f32.gmra.mrb[30].mxu0 %vm148_vm1, %v16526_v43  ;;  %v16551_v43 = vld [vmem:[%s30328_s0 + $0x300] sm:$0xff] }
 0x301   :  { %19512 = vmatprep.mubr.msk.f32.mxu0 %vm148_vm1, %v16527_v44  ;;  %v16552_v44 = vld [vmem:[%s30328_s0 + $0x308] sm:$0xff] }
 0x304   :  { %19513 = vmatmul.mubr.msk.f32.gmra.mrb[32].mxu0 %vm148_vm1, %v16528_v8  ;;  %v16553_v8 = vld [vmem:[%s30328_s0 + $0x318] sm:$0xff] }
 0x305   :  { %19515 = vmatprep.mubr.msk.f32.mxu0 %vm148_vm1, %v16529_v37  ;;  %v16554_v37 = vld [vmem:[%s30328_s0 + $0x320] sm:$0xff] }
 0x308   :  { %19516 = vmatmul.mubr.msk.f32.gmra.mrb[34].mxu0 %vm148_vm1, %v16530_v45  ;;  %v16557_v45 = vld [vmem:[%s30328_s0 + $0x348] sm:$0xff] }
 0x309   :  { %19518 = vmatprep.mubr.msk.f32.mxu0 %vm148_vm1, %v16531_v47  ;;  %v16558_v47 = vld [vmem:[%s30328_s0 + $0x350] sm:$0xff] }
 0x30c   :  { %19519 = vmatmul.mubr.msk.f32.gmra.mrb[36].mxu0 %vm148_vm1, %v16532_v49  ;;  %v16625_v49 = vld [vmem:[%s30328_s0 + $0x31] sm:$0xff] }
 0x30d   :  { %19521 = vmatprep.mubr.msk.f32.mxu0 %vm148_vm1, %v16533_v50  ;;  %v16628_v50 = vld [vmem:[%s30328_s0 + $0x51] sm:$0xff] }
 0x310   :  { %19522 = vmatmul.mubr.msk.f32.gmra.mrb[38].mxu0 %vm148_vm1, %v16534_v21  ;;  %v16629_v21 = vld [vmem:[%s30328_s0 + $0x61] sm:$0xff] }
 0x311   :  { %19524 = vmatprep.mubr.msk.f32.mxu0 %vm148_vm1, %v16535_v22  ;;  %v16630_v22 = vld [vmem:[%s30328_s0 + $0x69] sm:$0xff] }
 0x314   :  { %19525 = vmatmul.mubr.msk.f32.gmra.mrb[40].mxu0 %vm148_vm1, %v16536_v24  ;;  %v16632_v24 = vld [vmem:[%s30328_s0 + $0x81] sm:$0xff] }
 0x315   :  { %19527 = vmatprep.mubr.msk.f32.mxu0 %vm148_vm1, %v16537_v25  ;;  %v16633_v25 = vld [vmem:[%s30328_s0 + $0x91] sm:$0xff] }
 0x318   :  { %19528 = vmatmul.mubr.msk.f32.gmra.mrb[42].mxu0 %vm148_vm1, %v16538_v26  ;;  %v16634_v26 = vld [vmem:[%s30328_s0 + $0x99] sm:$0xff] }
 0x319   :  { %19530 = vmatprep.mubr.msk.f32.mxu0 %vm148_vm1, %v16539_v28  ;;  %v16635_v28 = vld [vmem:[%s30328_s0 + $0xa9] sm:$0xff] }
 0x31c   :  { %19531 = vmatmul.mubr.msk.f32.gmra.mrb[44].mxu0 %vm148_vm1, %v16540_v7  ;;  %v16636_v7 = vld [vmem:[%s30328_s0 + $0xb1] sm:$0xff] }
 0x31d   :  { %19533 = vmatprep.mubr.msk.f32.mxu0 %vm148_vm1, %v16541_v30  ;;  %v16637_v30 = vld [vmem:[%s30328_s0 + $0xc1] sm:$0xff] }
 0x320   :  { %19534 = vmatmul.mubr.msk.f32.gmra.mrb[46].mxu0 %vm148_vm1, %v16542_v31  ;;  %v16638_v31 = vld [vmem:[%s30328_s0 + $0xc9] sm:$0xff] }
 0x321   :  { %19536 = vmatprep.mubr.msk.f32.mxu0 %vm148_vm1, %v16543_v32  ;;  %v16639_v32 = vld [vmem:[%s30328_s0 + $0xd9] sm:$0xff] }
 0x324   :  { %19537 = vmatmul.mubr.msk.f32.gmra.mrb[48].mxu0 %vm148_vm1, %v16544_v33  ;;  %v16640_v33 = vld [vmem:[%s30328_s0 + $0xe1] sm:$0xff] }
 0x325   :  { %19539 = vmatprep.mubr.msk.f32.mxu0 %vm148_vm1, %v16545_v4  ;;  %v16641_v4 = vld [vmem:[%s30328_s0 + $0xf1] sm:$0xff] }
 0x328   :  { %19540 = vmatmul.mubr.msk.f32.gmra.mrb[50].mxu0 %vm148_vm1, %v16546_v6  ;;  %v16642_v6 = vld [vmem:[%s30328_s0 + $0xf9] sm:$0xff] }
 0x329   :  { %19542 = vmatprep.mubr.msk.f32.mxu0 %vm148_vm1, %v16547_v39  ;;  %v16643_v39 = vld [vmem:[%s30328_s0 + $0x109] sm:$0xff] }
 0x32c   :  { %19543 = vmatmul.mubr.msk.f32.gmra.mrb[52].mxu0 %vm148_vm1, %v16548_v41  ;;  %v16644_v41 = vld [vmem:[%s30328_s0 + $0x111] sm:$0xff] }
 0x32d   :  { %19545 = vmatprep.mubr.msk.f32.mxu0 %vm148_vm1, %v16549_v42  ;;  %v16645_v42 = vld [vmem:[%s30328_s0 + $0x121] sm:$0xff] }
 0x330   :  { %19546 = vmatmul.mubr.msk.f32.gmra.mrb[54].mxu0 %vm148_vm1, %v16550_v23  ;;  %v16646_v23 = vld [vmem:[%s30328_s0 + $0x129] sm:$0xff] }
 0x331   :  { %19548 = vmatprep.mubr.msk.f32.mxu0 %vm148_vm1, %v16551_v43  ;;  %v16647_v43 = vld [vmem:[%s30328_s0 + $0x139] sm:$0xff] }
 0x334   :  { %19549 = vmatmul.mubr.msk.f32.gmra.mrb[56].mxu0 %vm148_vm1, %v16552_v44  ;;  %v16648_v44 = vld [vmem:[%s30328_s0 + $0x141] sm:$0xff] }
 0x335   :  { %19551 = vmatprep.mubr.msk.f32.mxu0 %vm148_vm1, %v16553_v8  ;;  %v16649_v8 = vld [vmem:[%s30328_s0 + $0x151] sm:$0xff] }
 0x338   :  { %19552 = vmatmul.mubr.msk.f32.gmra.mrb[58].mxu0 %vm148_vm1, %v16554_v37  ;;  %v16650_v37 = vld [vmem:[%s30328_s0 + $0x159] sm:$0xff] }
 0x339   :  { %19554 = vmatprep.mubr.msk.f32.mxu0 %vm148_vm1, %v23134_v15  ;;  %v16626_v15 = vld [vmem:[%s30328_s0 + $0x39] sm:$0xff] }
 0x33c   :  { %19555 = vmatmul.mubr.msk.f32.gmra.mrb[60].mxu0 %vm148_vm1, %v23143_v11  ;;  %v16627_v11 = vld [vmem:[%s30328_s0 + $0x49] sm:$0xff] }
 0x33d   :  { %19557 = vmatprep.mubr.msk.f32.mxu0 %vm148_vm1, %v16557_v45  ;;  %v16651_v45 = vld [vmem:[%s30328_s0 + $0x169] sm:$0xff] }
 0x340   :  { %19558 = vmatmul.mubr.msk.f32.gmra.mrb[62].mxu0 %vm148_vm1, %v16558_v47  ;;  %v16652_v47 = vld [vmem:[%s30328_s0 + $0x171] sm:$0xff] }
 0x341   :  { %19562 = vmatprep.mubr.msk.f32.mxu0 %vm148_vm1, %v16625_v49  ;;  %v16655_v49 = vld [vmem:[%s30328_s0 + $0x199] sm:$0xff] }
 0x344   :  { %19563 = vmatmul.mubr.msk.f32.vlgmr.msra.gmra.mrb[0].mxu0 %vm148_vm1, %v16626_v15  ;;  %v16656_v15 = vld [vmem:[%s30328_s0 + $0x1a1] sm:$0xff] }
 0x345   :  { %19659 = vmatpush3.msk.msra.mxu0 %vm30448_vm0, %v23619_v40  ;;  %19565 = vmatprep.mubr.msk.f32.mxu0 %vm148_vm1, %v16627_v11  ;;  %v16631_v40 = vld [vmem:[%s30328_s0 + $0x79] sm:$0xff]  ;;  %v114_v11 = vld [vmem:[%s30328_s0 + $0x1b1] sm:$0xff] }
 0x346   :  { %18924 = vmatprep.mubr.msk.f32.mxu1 %vm148_vm1, %v114_v11  ;;  %v16781_v11 = vld [vmem:[%s30328_s0 + $0x16a] sm:$0xff] }
 0x348   :  { %19566 = vmatmul.mubr.msk.f32.gmra.mrb[2].mxu0 %vm148_vm1, %v16628_v50  ;;  %v16687_v50 = vld [vmem:[%s30328_s0 + $0x349] sm:$0xff] }
 0x349   :  { %19568 = vmatprep.mubr.msk.f32.mxu0 %vm148_vm1, %v16629_v21  ;;  %v145_v21 = vld [vmem:[%s30328_s0 + $0x321] sm:$0xff] }
 0x34c   :  { %19569 = vmatmul.mubr.msk.f32.gmra.mrb[4].mxu0 %vm148_vm1, %v16630_v22  ;;  %v16756_v22 = vld [vmem:[%s30328_s0 + $0x3a] sm:$0xff] }
 0x34d   :  { %19571 = vmatprep.mubr.msk.f32.mxu0 %vm148_vm1, %v16631_v40  ;;  %v16757_v40 = vld [vmem:[%s30328_s0 + $0x4a] sm:$0xff] }
 0x350   :  { %19572 = vmatmul.mubr.msk.f32.gmra.mrb[6].mxu0 %vm148_vm1, %v16632_v24  ;;  %v16758_v24 = vld [vmem:[%s30328_s0 + $0x52] sm:$0xff] }
 0x351   :  { %19574 = vmatprep.mubr.msk.f32.mxu0 %vm148_vm1, %v16633_v25  ;;  %v16759_v25 = vld [vmem:[%s30328_s0 + $0x62] sm:$0xff] }
 0x354   :  { %19575 = vmatmul.mubr.msk.f32.gmra.mrb[8].mxu0 %vm148_vm1, %v16634_v26  ;;  %v16760_v26 = vld [vmem:[%s30328_s0 + $0x6a] sm:$0xff] }
 0x355   :  { %19577 = vmatprep.mubr.msk.f32.mxu0 %vm148_vm1, %v16635_v28  ;;  %v16761_v28 = vld [vmem:[%s30328_s0 + $0x7a] sm:$0xff] }
 0x358   :  { %19578 = vmatmul.mubr.msk.f32.gmra.mrb[10].mxu0 %vm148_vm1, %v16636_v7  ;;  %v16762_v7 = vld [vmem:[%s30328_s0 + $0x82] sm:$0xff] }
 0x359   :  { %19580 = vmatprep.mubr.msk.f32.mxu0 %vm148_vm1, %v16637_v30  ;;  %v16763_v30 = vld [vmem:[%s30328_s0 + $0x92] sm:$0xff] }
 0x35c   :  { %19581 = vmatmul.mubr.msk.f32.gmra.mrb[12].mxu0 %vm148_vm1, %v16638_v31  ;;  %v16764_v31 = vld [vmem:[%s30328_s0 + $0x9a] sm:$0xff] }
 0x35d   :  { %19583 = vmatprep.mubr.msk.f32.mxu0 %vm148_vm1, %v16639_v32  ;;  %v16765_v32 = vld [vmem:[%s30328_s0 + $0xaa] sm:$0xff] }
 0x360   :  { %19584 = vmatmul.mubr.msk.f32.gmra.mrb[14].mxu0 %vm148_vm1, %v16640_v33  ;;  %v16766_v33 = vld [vmem:[%s30328_s0 + $0xb2] sm:$0xff] }
 0x361   :  { %19586 = vmatprep.mubr.msk.f32.mxu0 %vm148_vm1, %v16641_v4  ;;  %v16767_v4 = vld [vmem:[%s30328_s0 + $0xc2] sm:$0xff] }
 0x364   :  { %19587 = vmatmul.mubr.msk.f32.gmra.mrb[16].mxu0 %vm148_vm1, %v16642_v6  ;;  %v16768_v6 = vld [vmem:[%s30328_s0 + $0xca] sm:$0xff] }
 0x365   :  { %19589 = vmatprep.mubr.msk.f32.mxu0 %vm148_vm1, %v16643_v39  ;;  %v16769_v39 = vld [vmem:[%s30328_s0 + $0xda] sm:$0xff] }
 0x368   :  { %19590 = vmatmul.mubr.msk.f32.gmra.mrb[18].mxu0 %vm148_vm1, %v16644_v41  ;;  %v16770_v41 = vld [vmem:[%s30328_s0 + $0xe2] sm:$0xff] }
 0x369   :  { %19592 = vmatprep.mubr.msk.f32.mxu0 %vm148_vm1, %v16645_v42  ;;  %v16771_v42 = vld [vmem:[%s30328_s0 + $0xf2] sm:$0xff] }
 0x36c   :  { %19593 = vmatmul.mubr.msk.f32.gmra.mrb[20].mxu0 %vm148_vm1, %v16646_v23  ;;  %v16772_v23 = vld [vmem:[%s30328_s0 + $0xfa] sm:$0xff] }
 0x36d   :  { %19595 = vmatprep.mubr.msk.f32.mxu0 %vm148_vm1, %v16647_v43  ;;  %v16773_v43 = vld [vmem:[%s30328_s0 + $0x10a] sm:$0xff] }
 0x370   :  { %19596 = vmatmul.mubr.msk.f32.gmra.mrb[22].mxu0 %vm148_vm1, %v16648_v44  ;;  %v16774_v44 = vld [vmem:[%s30328_s0 + $0x112] sm:$0xff] }
 0x371   :  { %19598 = vmatprep.mubr.msk.f32.mxu0 %vm148_vm1, %v16649_v8  ;;  %v16775_v8 = vld [vmem:[%s30328_s0 + $0x122] sm:$0xff] }
 0x374   :  { %19599 = vmatmul.mubr.msk.f32.gmra.mrb[24].mxu0 %vm148_vm1, %v16650_v37  ;;  %v16776_v37 = vld [vmem:[%s30328_s0 + $0x12a] sm:$0xff] }
 0x375   :  { %19601 = vmatprep.mubr.msk.f32.mxu0 %vm148_vm1, %v16651_v45  ;;  %v16777_v45 = vld [vmem:[%s30328_s0 + $0x13a] sm:$0xff] }
 0x378   :  { %19602 = vmatmul.mubr.msk.f32.gmra.mrb[26].mxu0 %vm148_vm1, %v16652_v47  ;;  %v16778_v47 = vld [vmem:[%s30328_s0 + $0x142] sm:$0xff] }
 0x379   :  { %19604 = vmatprep.mubr.msk.f32.mxu0 %vm148_vm1, %v23217_v46  ;;  %v115_v46 = vld [vmem:[%s30328_s0 + $0x1b9] sm:$0xff] }
 0x37a   :  { %18925 = vmatmul.mubr.msk.f32.vlgmr.msra.gmra.mrb[0].mxu1 %vm148_vm1, %v115_v46  ;;  %v16782_v46 = vld [vmem:[%s30328_s0 + $0x172] sm:$0xff] }
 0x37c   :  { %19605 = vmatmul.mubr.msk.f32.gmra.mrb[28].mxu0 %vm148_vm1, %v23226_v48  ;;  %v116_v48 = vld [vmem:[%s30328_s0 + $0x1c9] sm:$0xff] }
 0x37d   :  { %19607 = vmatprep.mubr.msk.f32.mxu0 %vm148_vm1, %v16655_v49  ;;  %18927 = vmatprep.mubr.msk.f32.mxu1 %vm148_vm1, %v116_v48  ;;  %v16779_v49 = vld [vmem:[%s30328_s0 + $0x152] sm:$0xff]  ;;  %v16785_v48 = vld [vmem:[%s30328_s0 + $0x19a] sm:$0xff] }
 0x380   :  { %19608 = vmatmul.mubr.msk.f32.gmra.mrb[30].mxu0 %vm148_vm1, %v16656_v15  ;;  %v16780_v15 = vld [vmem:[%s30328_s0 + $0x15a] sm:$0xff] }
 0x381   :  { %19610 = vmatprep.mubr.msk.f32.mxu0 %vm148_vm1, %v23240_v51  ;;  %v117_v51 = vld [vmem:[%s30328_s0 + $0x1d1] sm:$0xff] }
 0x382   :  { %18928 = vmatmul.mubr.msk.f32.gmra.mrb[2].mxu1 %vm148_vm1, %v117_v51  ;;  %v16786_v51 = vld [vmem:[%s30328_s0 + $0x1a2] sm:$0xff] }
 0x384   :  { %19611 = vmatmul.mubr.msk.f32.gmra.mrb[32].mxu0 %vm148_vm1, %v23248_v52  ;;  %v118_v52 = vld [vmem:[%s30328_s0 + $0x1e1] sm:$0xff] }
 0x385   :  { %19613 = vmatprep.mubr.msk.f32.mxu0 %vm148_vm1, %v23253_v53  ;;  %18930 = vmatprep.mubr.msk.f32.mxu1 %vm148_vm1, %v118_v52  ;;  %v119_v53 = vld [vmem:[%s30328_s0 + $0x1e9] sm:$0xff] }
 0x386   :  { %18931 = vmatmul.mubr.msk.f32.gmra.mrb[4].mxu1 %vm148_vm1, %v119_v53  ;;  %v16787_v52 = vld [vmem:[%s30328_s0 + $0x1e2] sm:$0xff] }
 0x387   :  { %v16790_v53 = vld [vmem:[%s30328_s0 + $0x202] sm:$0xff] }
 0x388   :  { %19614 = vmatmul.mubr.msk.f32.gmra.mrb[34].mxu0 %vm148_vm1, %v23262_v54  ;;  %v120_v54 = vld [vmem:[%s30328_s0 + $0x1f9] sm:$0xff] }
 0x389   :  { %19616 = vmatprep.mubr.msk.f32.mxu0 %vm148_vm1, %v23267_v55  ;;  %18933 = vmatprep.mubr.msk.f32.mxu1 %vm148_vm1, %v120_v54  ;;  %v121_v55 = vld [vmem:[%s30328_s0 + $0x201] sm:$0xff]  ;;  %v16791_v54 = vld [vmem:[%s30328_s0 + $0x212] sm:$0xff] }
 0x38a   :  { %18934 = vmatmul.mubr.msk.f32.gmra.mrb[6].mxu1 %vm148_vm1, %v121_v55  ;;  %v16792_v55 = vld [vmem:[%s30328_s0 + $0x21a] sm:$0xff] }
 0x38c   :  { %19617 = vmatmul.mubr.msk.f32.gmra.mrb[36].mxu0 %vm148_vm1, %v23276_v56  ;;  %v122_v56 = vld [vmem:[%s30328_s0 + $0x211] sm:$0xff] }
 0x38d   :  { %19619 = vmatprep.mubr.msk.f32.mxu0 %vm148_vm1, %v23281_v57  ;;  %18936 = vmatprep.mubr.msk.f32.mxu1 %vm148_vm1, %v122_v56  ;;  %v123_v57 = vld [vmem:[%s30328_s0 + $0x219] sm:$0xff]  ;;  %v16793_v56 = vld [vmem:[%s30328_s0 + $0x22a] sm:$0xff] }
 0x38e   :  { %18937 = vmatmul.mubr.msk.f32.gmra.mrb[8].mxu1 %vm148_vm1, %v123_v57  ;;  %v16794_v57 = vld [vmem:[%s30328_s0 + $0x232] sm:$0xff] }
 0x390   :  { %19620 = vmatmul.mubr.msk.f32.gmra.mrb[38].mxu0 %vm148_vm1, %v23290_v58  ;;  %v124_v58 = vld [vmem:[%s30328_s0 + $0x229] sm:$0xff] }
 0x391   :  { %19622 = vmatprep.mubr.msk.f32.mxu0 %vm148_vm1, %v23295_v59  ;;  %18939 = vmatprep.mubr.msk.f32.mxu1 %vm148_vm1, %v124_v58  ;;  %v125_v59 = vld [vmem:[%s30328_s0 + $0x231] sm:$0xff]  ;;  %v16795_v58 = vld [vmem:[%s30328_s0 + $0x242] sm:$0xff] }
 0x392   :  { %18940 = vmatmul.mubr.msk.f32.gmra.mrb[10].mxu1 %vm148_vm1, %v125_v59  ;;  %v16796_v59 = vld [vmem:[%s30328_s0 + $0x24a] sm:$0xff] }
 0x394   :  { %19623 = vmatmul.mubr.msk.f32.gmra.mrb[40].mxu0 %vm148_vm1, %v23304_v60  ;;  %v126_v60 = vld [vmem:[%s30328_s0 + $0x241] sm:$0xff] }
 0x395   :  { %19625 = vmatprep.mubr.msk.f32.mxu0 %vm148_vm1, %v23309_v61  ;;  %18942 = vmatprep.mubr.msk.f32.mxu1 %vm148_vm1, %v126_v60  ;;  %v127_v61 = vld [vmem:[%s30328_s0 + $0x249] sm:$0xff]  ;;  %v16797_v60 = vld [vmem:[%s30328_s0 + $0x25a] sm:$0xff] }
 0x396   :  { %18943 = vmatmul.mubr.msk.f32.gmra.mrb[12].mxu1 %vm148_vm1, %v127_v61  ;;  %v16798_v61 = vld [vmem:[%s30328_s0 + $0x262] sm:$0xff] }
 0x398   :  { %19626 = vmatmul.mubr.msk.f32.gmra.mrb[42].mxu0 %vm148_vm1, %v23318_v62  ;;  %v128_v62 = vld [vmem:[%s30328_s0 + $0x259] sm:$0xff] }
 0x399   :  { %19628 = vmatprep.mubr.msk.f32.mxu0 %vm148_vm1, %v23323_v63  ;;  %18945 = vmatprep.mubr.msk.f32.mxu1 %vm148_vm1, %v128_v62  ;;  %v129_v63 = vld [vmem:[%s30328_s0 + $0x261] sm:$0xff]  ;;  %v16799_v62 = vld [vmem:[%s30328_s0 + $0x272] sm:$0xff] }
 0x39a   :  { %18946 = vmatmul.mubr.msk.f32.gmra.mrb[14].mxu1 %vm148_vm1, %v129_v63  ;;  %v16800_v63 = vld [vmem:[%s30328_s0 + $0x27a] sm:$0xff] }
 0x39c   :  { %19629 = vmatmul.mubr.msk.f32.gmra.mrb[44].mxu0 %vm148_vm1, %v23332_v0  ;;  %v130_v0 = vld [vmem:[%s30328_s0 + $0x271] sm:$0xff] }
 0x39d   :  { %19631 = vmatprep.mubr.msk.f32.mxu0 %vm148_vm1, %v23337_v1  ;;  %18948 = vmatprep.mubr.msk.f32.mxu1 %vm148_vm1, %v130_v0  ;;  %v131_v1 = vld [vmem:[%s30328_s0 + $0x279] sm:$0xff]  ;;  %v16801_v0 = vld [vmem:[%s30328_s0 + $0x28a] sm:$0xff] }
 0x39e   :  { %18949 = vmatmul.mubr.msk.f32.gmra.mrb[16].mxu1 %vm148_vm1, %v131_v1  ;;  %v16802_v1 = vld [vmem:[%s30328_s0 + $0x292] sm:$0xff] }
 0x3a0   :  { %19632 = vmatmul.mubr.msk.f32.gmra.mrb[46].mxu0 %vm148_vm1, %v23346_v2  ;;  %v132_v2 = vld [vmem:[%s30328_s0 + $0x289] sm:$0xff] }
 0x3a1   :  { %19634 = vmatprep.mubr.msk.f32.mxu0 %vm148_vm1, %v23351_v3  ;;  %18951 = vmatprep.mubr.msk.f32.mxu1 %vm148_vm1, %v132_v2  ;;  %v133_v3 = vld [vmem:[%s30328_s0 + $0x291] sm:$0xff]  ;;  %v16803_v2 = vld [vmem:[%s30328_s0 + $0x2a2] sm:$0xff] }
 0x3a2   :  { %18952 = vmatmul.mubr.msk.f32.gmra.mrb[18].mxu1 %vm148_vm1, %v133_v3  ;;  %v16804_v3 = vld [vmem:[%s30328_s0 + $0x2aa] sm:$0xff] }
 0x3a4   :  { %19635 = vmatmul.mubr.msk.f32.gmra.mrb[48].mxu0 %vm148_vm1, %v23360_v36  ;;  %v134_v36 = vld [vmem:[%s30328_s0 + $0x2a1] sm:$0xff] }
 0x3a5   :  { %19637 = vmatprep.mubr.msk.f32.mxu0 %vm148_vm1, %v23365_v10  ;;  %18954 = vmatprep.mubr.msk.f32.mxu1 %vm148_vm1, %v134_v36  ;;  %v135_v10 = vld [vmem:[%s30328_s0 + $0x2a9] sm:$0xff]  ;;  %v16805_v36 = vld [vmem:[%s30328_s0 + $0x2ba] sm:$0xff] }
 0x3a6   :  { %18955 = vmatmul.mubr.msk.f32.gmra.mrb[20].mxu1 %vm148_vm1, %v135_v10  ;;  %v16806_v10 = vld [vmem:[%s30328_s0 + $0x2c2] sm:$0xff] }
 0x3a8   :  { %19638 = vmatmul.mubr.msk.f32.gmra.mrb[50].mxu0 %vm148_vm1, %v23374_v35  ;;  %v136_v35 = vld [vmem:[%s30328_s0 + $0x2b9] sm:$0xff] }
 0x3a9   :  { %19640 = vmatprep.mubr.msk.f32.mxu0 %vm148_vm1, %v23379_v38  ;;  %18957 = vmatprep.mubr.msk.f32.mxu1 %vm148_vm1, %v136_v35  ;;  %v137_v38 = vld [vmem:[%s30328_s0 + $0x2c1] sm:$0xff]  ;;  %v16807_v35 = vld [vmem:[%s30328_s0 + $0x2d2] sm:$0xff] }
 0x3aa   :  { %18958 = vmatmul.mubr.msk.f32.gmra.mrb[22].mxu1 %vm148_vm1, %v137_v38  ;;  %v16808_v38 = vld [vmem:[%s30328_s0 + $0x2da] sm:$0xff] }
 0x3ac   :  { %19641 = vmatmul.mubr.msk.f32.gmra.mrb[52].mxu0 %vm148_vm1, %v23388_v17  ;;  %v138_v17 = vld [vmem:[%s30328_s0 + $0x2d1] sm:$0xff] }
 0x3ad   :  { %19643 = vmatprep.mubr.msk.f32.mxu0 %vm148_vm1, %v23393_v9  ;;  %18960 = vmatprep.mubr.msk.f32.mxu1 %vm148_vm1, %v138_v17  ;;  %v139_v9 = vld [vmem:[%s30328_s0 + $0x2d9] sm:$0xff]  ;;  %v16809_v17 = vld [vmem:[%s30328_s0 + $0x2ea] sm:$0xff] }
 0x3ae   :  { %18961 = vmatmul.mubr.msk.f32.gmra.mrb[24].mxu1 %vm148_vm1, %v139_v9  ;;  %v16810_v9 = vld [vmem:[%s30328_s0 + $0x2f2] sm:$0xff] }
 0x3b0   :  { %19644 = vmatmul.mubr.msk.f32.gmra.mrb[54].mxu0 %vm148_vm1, %v23402_v12  ;;  %v140_v12 = vld [vmem:[%s30328_s0 + $0x2e9] sm:$0xff] }
 0x3b1   :  { %19646 = vmatprep.mubr.msk.f32.mxu0 %vm148_vm1, %v23407_v13  ;;  %18963 = vmatprep.mubr.msk.f32.mxu1 %vm148_vm1, %v140_v12  ;;  %v141_v13 = vld [vmem:[%s30328_s0 + $0x2f1] sm:$0xff]  ;;  %v16811_v12 = vld [vmem:[%s30328_s0 + $0x302] sm:$0xff] }
 0x3b2   :  { %18964 = vmatmul.mubr.msk.f32.gmra.mrb[26].mxu1 %vm148_vm1, %v141_v13  ;;  %v16812_v13 = vld [vmem:[%s30328_s0 + $0x30a] sm:$0xff] }
 0x3b4   :  { %19647 = vmatmul.mubr.msk.f32.gmra.mrb[56].mxu0 %vm148_vm1, %v23416_v14  ;;  %v142_v14 = vld [vmem:[%s30328_s0 + $0x301] sm:$0xff] }
 0x3b5   :  { %19649 = vmatprep.mubr.msk.f32.mxu0 %vm148_vm1, %v23421_v16  ;;  %18966 = vmatprep.mubr.msk.f32.mxu1 %vm148_vm1, %v142_v14  ;;  %v143_v16 = vld [vmem:[%s30328_s0 + $0x309] sm:$0xff]  ;;  %v16813_v14 = vld [vmem:[%s30328_s0 + $0x31a] sm:$0xff] }
 0x3b6   :  { %18967 = vmatmul.mubr.msk.f32.gmra.mrb[28].mxu1 %vm148_vm1, %v143_v16  ;;  %v16814_v16 = vld [vmem:[%s30328_s0 + $0x322] sm:$0xff] }
 0x3b8   :  { %19650 = vmatmul.mubr.msk.f32.gmra.mrb[58].mxu0 %vm148_vm1, %v23430_v18  ;;  %v144_v18 = vld [vmem:[%s30328_s0 + $0x319] sm:$0xff] }
 0x3b9   :  { %19652 = vmatprep.mubr.msk.f32.mxu0 %vm148_vm1, %v23435_v19  ;;  %v16688_v19 = vld [vmem:[%s30328_s0 + $0x351] sm:$0xff]  ;;  %18969 = vmatprep.mubr.msk.f32.mxu1 %vm148_vm1, %v144_v18 }
 0x3ba   :  { %18970 = vmatmul.mubr.msk.f32.gmra.mrb[30].mxu1 %vm148_vm1, %v145_v21  ;;  %v16818_v18 = vld [vmem:[%s30328_s0 + $0x352] sm:$0xff] }
 0x3bc   :  { %19653 = vmatmul.mubr.msk.f32.gmra.mrb[60].mxu0 %vm148_vm1, %v23444_v20  ;;  %v16755_v20 = vld [vmem:[%s30328_s0 + $0x32] sm:$0xff] }
 0x3bd   :  { %19655 = vmatprep.mubr.msk.f32.mxu0 %vm148_vm1, %v16687_v50  ;;  %v16817_v50 = vld [vmem:[%s30328_s0 + $0x34a] sm:$0xff] }
 0x3c0   :  { %19656 = vmatmul.mubr.msk.f32.gmra.mrb[62].mxu0 %vm148_vm1, %v16688_v19 }
 0x3c1   :  { %19660 = vmatprep.mubr.msk.f32.mxu0 %vm148_vm1, %v16755_v20 }
 0x3c4   :  { %19661 = vmatmul.mubr.msk.f32.vlgmr.msra.gmra.mrb[0].mxu0 %vm148_vm1, %v16756_v22 }
 0x3c5   :  { %19663 = vmatprep.mubr.msk.f32.mxu0 %vm148_vm1, %v16757_v40 }
 0x3c8   :  { %19664 = vmatmul.mubr.msk.f32.gmra.mrb[2].mxu0 %vm148_vm1, %v16758_v24 }
 0x3c9   :  { %19666 = vmatprep.mubr.msk.f32.mxu0 %vm148_vm1, %v16759_v25 }
 0x3cc   :  { %19667 = vmatmul.mubr.msk.f32.gmra.mrb[4].mxu0 %vm148_vm1, %v16760_v26 }
 0x3cd   :  { %19669 = vmatprep.mubr.msk.f32.mxu0 %vm148_vm1, %v16761_v28 }
 0x3d0   :  { %19670 = vmatmul.mubr.msk.f32.gmra.mrb[6].mxu0 %vm148_vm1, %v16762_v7 }
 0x3d1   :  { %19672 = vmatprep.mubr.msk.f32.mxu0 %vm148_vm1, %v16763_v30 }
 0x3d4   :  { %19673 = vmatmul.mubr.msk.f32.gmra.mrb[8].mxu0 %vm148_vm1, %v16764_v31 }
 0x3d5   :  { %19675 = vmatprep.mubr.msk.f32.mxu0 %vm148_vm1, %v16765_v32 }
 0x3d8   :  { %19676 = vmatmul.mubr.msk.f32.gmra.mrb[10].mxu0 %vm148_vm1, %v16766_v33 }
 0x3d9   :  { %19678 = vmatprep.mubr.msk.f32.mxu0 %vm148_vm1, %v16767_v4 }
 0x3dc   :  { %19679 = vmatmul.mubr.msk.f32.gmra.mrb[12].mxu0 %vm148_vm1, %v16768_v6 }
 0x3dd   :  { %19681 = vmatprep.mubr.msk.f32.mxu0 %vm148_vm1, %v16769_v39 }
 0x3e0   :  { %19682 = vmatmul.mubr.msk.f32.gmra.mrb[14].mxu0 %vm148_vm1, %v16770_v41 }
 0x3e1   :  { %19684 = vmatprep.mubr.msk.f32.mxu0 %vm148_vm1, %v16771_v42 }
 0x3e4   :  { %19685 = vmatmul.mubr.msk.f32.gmra.mrb[16].mxu0 %vm148_vm1, %v16772_v23 }
 0x3e5   :  { %19687 = vmatprep.mubr.msk.f32.mxu0 %vm148_vm1, %v16773_v43 }
 0x3e8   :  { %19688 = vmatmul.mubr.msk.f32.gmra.mrb[18].mxu0 %vm148_vm1, %v16774_v44 }
 0x3e9   :  { %19690 = vmatprep.mubr.msk.f32.mxu0 %vm148_vm1, %v16775_v8 }
 0x3ec   :  { %19691 = vmatmul.mubr.msk.f32.gmra.mrb[20].mxu0 %vm148_vm1, %v16776_v37 }
 0x3ed   :  { %19693 = vmatprep.mubr.msk.f32.mxu0 %vm148_vm1, %v16777_v45 }
 0x3f0   :  { %19694 = vmatmul.mubr.msk.f32.gmra.mrb[22].mxu0 %vm148_vm1, %v16778_v47 }
 0x3f1   :  { %19696 = vmatprep.mubr.msk.f32.mxu0 %vm148_vm1, %v16779_v49 }
 0x3f4   :  { %19697 = vmatmul.mubr.msk.f32.gmra.mrb[24].mxu0 %vm148_vm1, %v16780_v15 }
 0x3f5   :  { %19699 = vmatprep.mubr.msk.f32.mxu0 %vm148_vm1, %v16781_v11 }
 0x3f8   :  { %19700 = vmatmul.mubr.msk.f32.gmra.mrb[26].mxu0 %vm148_vm1, %v16782_v46 }
 0x3f9   :  { %19702 = vmatprep.mubr.msk.f32.mxu0 %vm148_vm1, %v23518_v27  ;;  %v16788_v27 = vld [vmem:[%s30328_s0 + $0x1ea] sm:$0xff] }
 0x3fc   :  { %19703 = vmatmul.mubr.msk.f32.gmra.mrb[28].mxu0 %vm148_vm1, %v23527_v29  ;;  %v16789_v29 = vld [vmem:[%s30328_s0 + $0x1fa] sm:$0xff] }
 0x3fd   :  { %19705 = vmatprep.mubr.msk.f32.mxu0 %vm148_vm1, %v16785_v48 }
 0x400   :  { %19706 = vmatmul.mubr.msk.f32.gmra.mrb[30].mxu0 %vm148_vm1, %v16786_v51 }
 0x401   :  { %19708 = vmatprep.mubr.msk.f32.mxu0 %vm148_vm1, %v16787_v52 }
 0x404   :  { %19709 = vmatmul.mubr.msk.f32.gmra.mrb[32].mxu0 %vm148_vm1, %v16788_v27 }
 0x405   :  { %19711 = vmatprep.mubr.msk.f32.mxu0 %vm148_vm1, %v16789_v29 }
 0x408   :  { %19712 = vmatmul.mubr.msk.f32.gmra.mrb[34].mxu0 %vm148_vm1, %v16790_v53 }
 0x409   :  { %19714 = vmatprep.mubr.msk.f32.mxu0 %vm148_vm1, %v16791_v54 }
 0x40c   :  { %19715 = vmatmul.mubr.msk.f32.gmra.mrb[36].mxu0 %vm148_vm1, %v16792_v55 }
 0x40d   :  { %19717 = vmatprep.mubr.msk.f32.mxu0 %vm148_vm1, %v16793_v56 }
 0x410   :  { %19718 = vmatmul.mubr.msk.f32.gmra.mrb[38].mxu0 %vm148_vm1, %v16794_v57 }
 0x411   :  { %19720 = vmatprep.mubr.msk.f32.mxu0 %vm148_vm1, %v16795_v58 }
 0x414   :  { %19721 = vmatmul.mubr.msk.f32.gmra.mrb[40].mxu0 %vm148_vm1, %v16796_v59 }
 0x415   :  { %19723 = vmatprep.mubr.msk.f32.mxu0 %vm148_vm1, %v16797_v60 }
 0x418   :  { %19724 = vmatmul.mubr.msk.f32.gmra.mrb[42].mxu0 %vm148_vm1, %v16798_v61 }
 0x419   :  { %19726 = vmatprep.mubr.msk.f32.mxu0 %vm148_vm1, %v16799_v62 }
 0x41c   :  { %19727 = vmatmul.mubr.msk.f32.gmra.mrb[44].mxu0 %vm148_vm1, %v16800_v63 }
 0x41d   :  { %19729 = vmatprep.mubr.msk.f32.mxu0 %vm148_vm1, %v16801_v0 }
 0x420   :  { %19730 = vmatmul.mubr.msk.f32.gmra.mrb[46].mxu0 %vm148_vm1, %v16802_v1 }
 0x421   :  { %19732 = vmatprep.mubr.msk.f32.mxu0 %vm148_vm1, %v16803_v2 }
 0x424   :  { %19733 = vmatmul.mubr.msk.f32.gmra.mrb[48].mxu0 %vm148_vm1, %v16804_v3 }
 0x425   :  { %19735 = vmatprep.mubr.msk.f32.mxu0 %vm148_vm1, %v16805_v36 }
 0x428   :  { %19736 = vmatmul.mubr.msk.f32.gmra.mrb[50].mxu0 %vm148_vm1, %v16806_v10 }
 0x429   :  { %19738 = vmatprep.mubr.msk.f32.mxu0 %vm148_vm1, %v16807_v35 }
 0x42c   :  { %19739 = vmatmul.mubr.msk.f32.gmra.mrb[52].mxu0 %vm148_vm1, %v16808_v38 }
 0x42d   :  { %19741 = vmatprep.mubr.msk.f32.mxu0 %vm148_vm1, %v16809_v17 }
 0x430   :  { %19742 = vmatmul.mubr.msk.f32.gmra.mrb[54].mxu0 %vm148_vm1, %v16810_v9 }
 0x431   :  { %19744 = vmatprep.mubr.msk.f32.mxu0 %vm148_vm1, %v16811_v12 }
 0x434   :  { %19745 = vmatmul.mubr.msk.f32.gmra.mrb[56].mxu0 %vm148_vm1, %v16812_v13 }
 0x435   :  { %19747 = vmatprep.mubr.msk.f32.mxu0 %vm148_vm1, %v16813_v14 }
 0x438   :  { %19748 = vmatmul.mubr.msk.f32.gmra.mrb[58].mxu0 %vm148_vm1, %v16814_v16 }
 0x439   :  { %19750 = vmatprep.mubr.msk.f32.mxu0 %vm148_vm1, %v23592_v34 }
 0x43c   :  { %19751 = vmatmul.mubr.msk.f32.gmra.mrb[60].mxu0 %vm148_vm1, %v23601_v5 }
 0x43d   :  { %19753 = vmatprep.mubr.msk.f32.mxu0 %vm148_vm1, %v16817_v50 }
 0x440   :  { %19754 = vmatmul.mubr.msk.f32.gmra.mrb[62].mxu0 %vm148_vm1, %v16818_v18 }
 0x44d   :  { %v24432_v19 = vpop.f32.mrb[0].mxu1 }
 0x44e   :  { %v24434_v21 = vpop.f32.mrb[1].mxu1 }
 0x455   :  { %v24436_v34 = vpop.f32.mrb[2].mxu1 }
 0x456   :  { %v24438_v20 = vpop.f32.mrb[3].mxu1 }
 0x459   :  { %v24440_v22 = vpop.f32.mrb[4].mxu1 }
 0x45a   :  { %v24442_v40 = vpop.f32.mrb[5].mxu1 }
 0x45d   :  { %v24444_v5 = vpop.f32.mrb[6].mxu1 }
 0x45e   :  { %v24446_v24 = vpop.f32.mrb[7].mxu1 }
 0x461   :  { %v24448_v25 = vpop.f32.mrb[8].mxu1 }
 0x462   :  { %v24450_v26 = vpop.f32.mrb[9].mxu1 }
 0x465   :  { %v24452_v28 = vpop.f32.mrb[10].mxu1 }
 0x466   :  { %v24454_v7 = vpop.f32.mrb[11].mxu1 }
 0x469   :  { %v24456_v30 = vpop.f32.mrb[12].mxu1 }
 0x46a   :  { %v24460_v32 = vpop.f32.mrb[13].mxu1 }
 0x46d   :  { %v24468_v41 = vpop.f32.mrb[14].mxu1 }
 0x46e   :  { %v24472_v23 = vpop.f32.mrb[15].mxu1 }
 0x471   :  { %v24478_v37 = vpop.f32.mrb[16].mxu1 }
 0x472   :  { %v24484_v49 = vpop.f32.mrb[17].mxu1 }
 0x473   :  { %30823 = vst [vmem:[#allocation35_spill] sm:$0xff] %v24484_v49 }
 0x475   :  { %v24490_v51 = vpop.f32.mrb[18].mxu1 }
 0x476   :  { %30824 = vst [vmem:[#allocation5_spill] sm:$0xff] %v24490_v51  ;;  %v24496_v29 = vpop.f32.mrb[19].mxu1 }
 0x477   :  { %30825 = vst [vmem:[#allocation6_spill] sm:$0xff] %v24496_v29 }
 0x479   :  { %v24502_v57 = vpop.f32.mrb[20].mxu1 }
 0x47a   :  { %30826 = vst [vmem:[#allocation7_spill] sm:$0xff] %v24502_v57  ;;  %v24508_v60 = vpop.f32.mrb[21].mxu1 }
 0x47b   :  { %30827 = vst [vmem:[#allocation8_spill] sm:$0xff] %v24508_v60 }
 0x47d   :  { %v24514_v1 = vpop.f32.mrb[22].mxu1 }
 0x47e   :  { %30828 = vst [vmem:[#allocation9_spill] sm:$0xff] %v24514_v1  ;;  %v24520_v36 = vpop.f32.mrb[23].mxu1 }
 0x47f   :  { %30829 = vst [vmem:[#allocation10_spill] sm:$0xff] %v24520_v36 }
 0x481   :  { %v24526_v9 = vpop.f32.mrb[24].mxu1 }
 0x482   :  { %30830 = vst [vmem:[#allocation11_spill] sm:$0xff] %v24526_v9  ;;  %v24532_v14 = vpop.f32.mrb[25].mxu1 }
 0x483   :  { %30831 = vst [vmem:[#allocation12_spill] sm:$0xff] %v24532_v14 }
 0x497   :  { %v24458_v31 = vpop.f32.mrb[0].mxu0 }
 0x498   :  { %v6283_v33 = vsel %vm148_vm1, %v24458_v31, 0.0  ;;  %v24464_v4 = vpop.f32.mrb[1].mxu0 }
 0x499   :  { %v6282_v6 = vsel %vm148_vm1, %v24464_v4, 0.0 }
 0x49a   :  { %v6284_v39 = vadd.f32 %v6283_v33, %v6282_v6  ;;  %v24538_v6 = vpop.f32.mrb[26].mxu1 }
 0x49b   :  { %v24470_v42 = vpop.f32.mrb[2].mxu0  ;;  %30832 = vst [vmem:[#allocation13_spill] sm:$0xff] %v24538_v6 }
 0x49c   :  { %v24474_v43 = vpop.f32.mrb[3].mxu0  ;;  %v6287_v45 = vsel %vm148_vm1, %v24470_v42, 0.0 }
 0x49d   :  { %v6285_v44 = vsel %vm148_vm1, %v24474_v43, 0.0 }
 0x49e   :  { %v6286_v8 = vadd.f32 %v6285_v44, %v6284_v39 }
 0x49f   :  { %v24482_v47 = vpop.f32.mrb[4].mxu0 }
 0x4a0   :  { %v24486_v15 = vpop.f32.mrb[5].mxu0  ;;  %v6288_v11 = vadd.f32 %v6287_v45, %v6286_v8  ;;  %v6291_v52 = vsel %vm148_vm1, %v24482_v47, 0.0  ;;  %v24544_v8 = vpop.f32.mrb[27].mxu1 }
 0x4a1   :  { %v6289_v46 = vsel %vm148_vm1, %v24486_v15, 0.0  ;;  %30833 = vst [vmem:[#allocation14_spill] sm:$0xff] %v24544_v8 }
 0x4a2   :  { %v6290_v48 = vadd.f32 %v6289_v46, %v6288_v11 }
 0x4a3   :  { %v24494_v27 = vpop.f32.mrb[6].mxu0 }
 0x4a4   :  { %v24498_v53 = vpop.f32.mrb[7].mxu0  ;;  %v6292_v54 = vadd.f32 %v6291_v52, %v6290_v48  ;;  %v6295_v58 = vsel %vm148_vm1, %v24494_v27, 0.0  ;;  %v24550_v52 = vpop.f32.mrb[28].mxu1 }
 0x4a5   :  { %v6293_v55 = vsel %vm148_vm1, %v24498_v53, 0.0  ;;  %30834 = vst [vmem:[#allocation15_spill] sm:$0xff] %v24550_v52 }
 0x4a6   :  { %v6294_v56 = vadd.f32 %v6293_v55, %v6292_v54 }
 0x4a7   :  { %v24506_v59 = vpop.f32.mrb[8].mxu0 }
 0x4a8   :  { %v24510_v61 = vpop.f32.mrb[9].mxu0  ;;  %v6296_v62 = vadd.f32 %v6295_v58, %v6294_v56  ;;  %v6299_v2 = vsel %vm148_vm1, %v24506_v59, 0.0  ;;  %v24556_v56 = vpop.f32.mrb[29].mxu1 }
 0x4a9   :  { %v6297_v63 = vsel %vm148_vm1, %v24510_v61, 0.0  ;;  %30835 = vst [vmem:[#allocation16_spill] sm:$0xff] %v24556_v56 }
 0x4aa   :  { %v6298_v0 = vadd.f32 %v6297_v63, %v6296_v62 }
 0x4ab   :  { %v24518_v3 = vpop.f32.mrb[10].mxu0 }
 0x4ac   :  { %v24522_v10 = vpop.f32.mrb[11].mxu0  ;;  %v6300_v35 = vadd.f32 %v6299_v2, %v6298_v0  ;;  %v6303_v12 = vsel %vm148_vm1, %v24518_v3, 0.0  ;;  %v24562_v2 = vpop.f32.mrb[30].mxu1 }
 0x4ad   :  { %v6301_v38 = vsel %vm148_vm1, %v24522_v10, 0.0  ;;  %30836 = vst [vmem:[#allocation17_spill] sm:$0xff] %v24562_v2 }
 0x4ae   :  { %v6302_v17 = vadd.f32 %v6301_v38, %v6300_v35 }
 0x4af   :  { %v24530_v13 = vpop.f32.mrb[12].mxu0 }
 0x4b0   :  { %v24534_v16 = vpop.f32.mrb[13].mxu0  ;;  %v6304_v50 = vadd.f32 %v6303_v12, %v6302_v17  ;;  %v6307_v39 = vsel %vm148_vm1, %v24530_v13, 0.0  ;;  %v24568_v17 = vpop.f32.mrb[31].mxu1 }
 0x4b1   :  { %v6305_v18 = vsel %vm148_vm1, %v24534_v16, 0.0  ;;  %30837 = vst [vmem:[#allocation18_spill] sm:$0xff] %v24568_v17 }
 0x4b2   :  { %v6306_v33 = vadd.f32 %v6305_v18, %v6304_v50 }
 0x4b3   :  { %v24542_v44 = vpop.f32.mrb[14].mxu0 }
 0x4b4   :  { %v24546_v45 = vpop.f32.mrb[15].mxu0  ;;  %v6308_v11 = vadd.f32 %v6307_v39, %v6306_v33  ;;  %v6311_v54 = vsel %vm148_vm1, %v24542_v44, 0.0 }
 0x4b5   :  { %v6309_v46 = vsel %vm148_vm1, %v24546_v45, 0.0 }
 0x4b6   :  { %v6310_v48 = vadd.f32 %v6309_v46, %v6308_v11 }
 0x4b7   :  { %v24554_v55 = vpop.f32.mrb[16].mxu0 }
 0x4b8   :  { %v24558_v58 = vpop.f32.mrb[17].mxu0  ;;  %v6312_v62 = vadd.f32 %v6311_v54, %v6310_v48  ;;  %v6315_v35 = vsel %vm148_vm1, %v24554_v55, 0.0 }
 0x4b9   :  { %v6313_v63 = vsel %vm148_vm1, %v24558_v58, 0.0 }
 0x4ba   :  { %v6314_v0 = vadd.f32 %v6313_v63, %v6312_v62 }
 0x4bb   :  { %v24566_v38 = vpop.f32.mrb[18].mxu0 }
 0x4bc   :  { %v24570_v12 = vpop.f32.mrb[19].mxu0  ;;  %v6316_v50 = vadd.f32 %v6315_v35, %v6314_v0  ;;  %v6319_v39 = vsel %vm148_vm1, %v24566_v38, 0.0 }
 0x4bd   :  { %v6317_v18 = vsel %vm148_vm1, %v24570_v12, 0.0 }
 0x4be   :  { %v6318_v33 = vadd.f32 %v6317_v18, %v6316_v50 }
 0x4bf   :  { %v24576_v11 = vpop.f32.mrb[20].mxu0 }
 0x4c0   :  { %v24578_v46 = vpop.f32.mrb[21].mxu0  ;;  %v6320_v48 = vadd.f32 %v6319_v39, %v6318_v33  ;;  %v6323_v63 = vsel %vm148_vm1, %v24576_v11, 0.0 }
 0x4c1   :  { %v6321_v54 = vsel %vm148_vm1, %v24578_v46, 0.0 }
 0x4c2   :  { %v6322_v62 = vadd.f32 %v6321_v54, %v6320_v48 }
 0x4c3   :  { %v24584_v0 = vpop.f32.mrb[22].mxu0 }
 0x4c4   :  { %v24586_v35 = vpop.f32.mrb[23].mxu0  ;;  %v6324_v50 = vadd.f32 %v6323_v63, %v6322_v62  ;;  %v6327_v2 = vsel %vm148_vm1, %v24584_v0, 0.0 }
 0x4c5   :  { %v6325_v18 = vsel %vm148_vm1, %v24586_v35, 0.0 }
 0x4c6   :  { %v6326_v17 = vadd.f32 %v6325_v18, %v6324_v50 }
 0x4c7   :  { %v24592_v33 = vpop.f32.mrb[24].mxu0 }
 0x4c8   :  { %v24594_v39 = vpop.f32.mrb[25].mxu0  ;;  %v6328_v48 = vadd.f32 %v6327_v2, %v6326_v17  ;;  %v6331_v52 = vsel %vm148_vm1, %v24592_v33, 0.0 }
 0x4c9   :  { %v6329_v54 = vsel %vm148_vm1, %v24594_v39, 0.0 }
 0x4ca   :  { %v6330_v56 = vadd.f32 %v6329_v54, %v6328_v48 }
 0x4cb   :  { %v24600_v62 = vpop.f32.mrb[26].mxu0 }
 0x4cc   :  { %v24602_v63 = vpop.f32.mrb[27].mxu0  ;;  %v6332_v50 = vadd.f32 %v6331_v52, %v6330_v56  ;;  %v6335_v6 = vsel %vm148_vm1, %v24600_v62, 0.0 }
 0x4cd   :  { %v6333_v18 = vsel %vm148_vm1, %v24602_v63, 0.0 }
 0x4ce   :  { %v6334_v8 = vadd.f32 %v6333_v18, %v6332_v50 }
 0x4cf   :  { %v24608_v2 = vpop.f32.mrb[28].mxu0 }
 0x4d0   :  { %v24610_v17 = vpop.f32.mrb[29].mxu0  ;;  %v6336_v48 = vadd.f32 %v6335_v6, %v6334_v8  ;;  %v6339_v9 = vsel %vm148_vm1, %v24608_v2, 0.0 }
 0x4d1   :  { %v6337_v54 = vsel %vm148_vm1, %v24610_v17, 0.0 }
 0x4d2   :  { %v6338_v14 = vadd.f32 %v6337_v54, %v6336_v48 }
 0x4d3   :  { %v24616_v52 = vpop.f32.mrb[30].mxu0 }
 0x4d4   :  { %v24618_v56 = vpop.f32.mrb[31].mxu0  ;;  %v6340_v50 = vadd.f32 %v6339_v9, %v6338_v14  ;;  %v6343_v1 = vsel %vm148_vm1, %v24616_v52, 0.0 }
 0x4d5   :  { %v6341_v18 = vsel %vm148_vm1, %v24618_v56, 0.0 }
 0x4d6   :  { %v6342_v36 = vadd.f32 %v6341_v18, %v6340_v50 }
 0x4d7   :  { %v19710_v6 = vpop.f32.mrb[32].mxu0 }
 0x4d8   :  { %v6344_v8 = vadd.f32 %v6343_v1, %v6342_v36  ;;  %v24625_v60 = vadd.f32 %v19710_v6, %v24432_v19  ;;  %v6059_v48 = vpop.f32.mrb[33].mxu0 }
 0x4d9   :  { %v24628_v54 = vadd.f32 %v6059_v48, %v24434_v21 }
 0x4da   :  { %30838 = vst [vmem:[#allocation19_spill] sm:$0xff] %v24625_v60  ;;  %v6345_v57 = vrot.slane %v6344_v8, 4 }
 0x4db   :  { %30839 = vst [vmem:[#allocation20_spill] sm:$0xff] %v24628_v54  ;;  %v19713_v29 = vpop.f32.mrb[34].mxu0 }
 0x4dc   :  { %v6346_v51 = vadd.f32 %v6345_v57, %v6344_v8  ;;  %v24631_v9 = vadd.f32 %v19713_v29, %v24436_v34  ;;  %v6069_v14 = vpop.f32.mrb[35].mxu0  ;;  %v6352_v34 = vsel %vm148_vm1, %v24625_v60, 0.0 }
 0x4dd   :  { %v24634_v50 = vadd.f32 %v6069_v14, %v24438_v20  ;;  %v6351_v20 = vsel %vm148_vm1, %v24628_v54, 0.0 }
 0x4de   :  { %30840 = vst [vmem:[#allocation21_spill] sm:$0xff] %v24631_v9  ;;  %v6347_v18 = vrot.slane %v6346_v51, 2  ;;  %v6353_v8 = vadd.f32 %v6352_v34, %v6351_v20 }
 0x4df   :  { %30841 = vst [vmem:[#allocation22_spill] sm:$0xff] %v24634_v50  ;;  %v19716_v49 = vpop.f32.mrb[36].mxu0 }
 0x4e0   :  { %v6348_v1 = vadd.f32 %v6347_v18, %v6346_v51  ;;  %v24637_v19 = vadd.f32 %v19716_v49, %v24440_v22  ;;  %v6079_v36 = vpop.f32.mrb[37].mxu0 }
 0x4e1   :  { %v24640_v21 = vadd.f32 %v6079_v36, %v24442_v40  ;;  %v6354_v40 = vsel %vm148_vm1, %v24634_v50, 0.0 }
 0x4e2   :  { %30842 = vst [vmem:[#allocation23_spill] sm:$0xff] %v24637_v19  ;;  %v6349_v6 = vrot.slane %v6348_v1, 1  ;;  %v6355_v50 = vadd.f32 %v6354_v40, %v6353_v8 }
 0x4e3   :  { %30843 = vst [vmem:[#allocation24_spill] sm:$0xff] %v24640_v21  ;;  %v19719_v48 = vpop.f32.mrb[38].mxu0  ;;  %v6358_v8 = vsel %vm148_vm1, %v24640_v21, 0.0 }
 0x4e4   :  { %v6350_v57 = vadd.f32 %v6349_v6, %v6348_v1  ;;  %v24647_v29 = vadd.f32 %v19719_v48, %v24444_v5  ;;  %v6089_v51 = vpop.f32.mrb[39].mxu0 }
 0x4e5   :  { %v24650_v22 = vadd.f32 %v6089_v51, %v24446_v24 }
 0x4e6   :  { %30844 = vst [vmem:[#allocation25_spill] sm:$0xff] %v24647_v29  ;;  %v6421_v49 = vmul.f32 0.00390625, %v6350_v57 }
 0x4e7   :  { %30845 = vst [vmem:[#allocation26_spill] sm:$0xff] %v24650_v22  ;;  %v24654_v14 = vpop.f32.mrb[40].mxu0 }
 0x4e8   :  { %v24657_v18 = vsub.f32 %v24464_v4, %v6421_v49  ;;  %v24660_v1 = vsub.f32 %v24458_v31, %v6421_v49  ;;  %v24663_v5 = vsub.f32 %v24474_v43, %v6421_v49  ;;  %v24666_v36 = vsub.f32 %v24470_v42, %v6421_v49  ;;  %v24668_v24 = vpop.f32.mrb[41].mxu0 }
 0x4e9   :  { %v24671_v6 = vsub.f32 %v24486_v15, %v6421_v49  ;;  %v24674_v48 = vsub.f32 %v24482_v47, %v6421_v49  ;;  %v24677_v4 = vsub.f32 %v24498_v53, %v6421_v49  ;;  %v24680_v31 = vsub.f32 %v24494_v27, %v6421_v49 }
 0x4ea   :  { %30846 = vst [vmem:[#allocation27_spill] sm:$0xff] %v24657_v18  ;;  %30847 = vst [vmem:[#allocation28_spill] sm:$0xff] %v24660_v1  ;;  %v24683_v43 = vsub.f32 %v24510_v61, %v6421_v49  ;;  %v24686_v42 = vsub.f32 %v24506_v59, %v6421_v49  ;;  %v24689_v57 = vsub.f32 %v24522_v10, %v6421_v49 }
 0x4eb   :  { %30848 = vst [vmem:[#allocation29_spill] sm:$0xff] %v24663_v5  ;;  %30849 = vst [vmem:[#allocation30_spill] sm:$0xff] %v24666_v36  ;;  %v24692_v15 = vsub.f32 %v24518_v3, %v6421_v49  ;;  %v24695_v47 = vsub.f32 %v24534_v16, %v6421_v49  ;;  %v24698_v53 = vsub.f32 %v24530_v13, %v6421_v49  ;;  %v24706_v59 = vpop.f32.mrb[42].mxu0 }
 0x4ec   :  { %30850 = vst [vmem:[#allocation31_spill] sm:$0xff] %v24674_v48  ;;  %30851 = vst [vmem:[#allocation32_spill] sm:$0xff] %v24677_v4  ;;  %v24701_v27 = vsub.f32 %v24546_v45, %v6421_v49  ;;  %v24704_v61 = vsub.f32 %v24542_v44, %v6421_v49  ;;  %v24709_v10 = vsub.f32 %v24558_v58, %v6421_v49  ;;  %v6109_v34 = vpop.f32.mrb[43].mxu0 }
 0x4ed   :  { %v24712_v3 = vsub.f32 %v24554_v55, %v6421_v49  ;;  %v24715_v16 = vsub.f32 %v24570_v12, %v6421_v49  ;;  %v24718_v13 = vsub.f32 %v24566_v38, %v6421_v49  ;;  %v24721_v45 = vsub.f32 %v24578_v46, %v6421_v49 }
 0x4ee   :  { %v24724_v44 = vsub.f32 %v24576_v11, %v6421_v49  ;;  %v24727_v20 = vsub.f32 %v24586_v35, %v6421_v49  ;;  %v24730_v58 = vsub.f32 %v24584_v0, %v6421_v49  ;;  %v24733_v55 = vsub.f32 %v24594_v39, %v6421_v49 }
 0x4ef   :  { %v24736_v12 = vsub.f32 %v24592_v33, %v6421_v49  ;;  %v24739_v38 = vsub.f32 %v24602_v63, %v6421_v49  ;;  %v24742_v46 = vsub.f32 %v24600_v62, %v6421_v49  ;;  %v24745_v11 = vsub.f32 %v24610_v17, %v6421_v49  ;;  %v19728_v33 = vpop.f32.mrb[44].mxu0 }
 0x4f0   :  { %v24748_v35 = vsub.f32 %v24608_v2, %v6421_v49  ;;  %v24751_v0 = vsub.f32 %v24618_v56, %v6421_v49  ;;  %v24754_v39 = vsub.f32 %v24616_v52, %v6421_v49  ;;  %v6119_v51 = vpop.f32.mrb[45].mxu0  ;;  %v6487_v62 = vmul.f32 %v24657_v18, %v24657_v18  ;;  %v16885_v56 = vld [vmem:[%s30329_s2 + $0x4] sm:$0xf] }
 0x4f1   :  { %30852 = vst [vmem:[#allocation33_spill] sm:$0xff] %v24736_v12  ;;  %30853 = vst [vmem:[#allocation34_spill] sm:$0xff] %v24739_v38  ;;  %v6488_v17 = vmul.f32 %v24660_v1, %v24660_v1  ;;  %v6356_v2 = vsel %vm148_vm1, %v24631_v9, 0.0  ;;  %19756 = vmatprep.subr.msk.mxu1 %vm30448_vm0, %v16885_v56  ;;  %v6489_v49 = vmul.f32 %v24663_v5, %v24663_v5 }
 0x4f2   :  { %30854 = vst [vmem:[#allocation36_spill] sm:$0xff] %v24742_v46  ;;  %30855 = vst [vmem:[#allocation37_spill] sm:$0xff] %v24745_v11  ;;  %v6357_v52 = vadd.f32 %v6356_v2, %v6355_v50  ;;  %19757 = vmatpush3.msk.msra.mxu1 %vm30448_vm0, %v16885_v56  ;;  %v6490_v1 = vmul.f32 %v24666_v36, %v24666_v36  ;;  %v6551_v9 = vsel %vm148_vm1, %v6487_v62, 0.0 }
 0x4f3   :  { %30856 = vst [vmem:[#allocation38_spill] sm:$0xff] %v24751_v0  ;;  %30857 = vst [vmem:[#allocation39_spill] sm:$0xff] %v24754_v39  ;;  %v19731_v63 = vpop.f32.mrb[46].mxu0  ;;  %v6552_v18 = vsel %vm148_vm1, %v6488_v17, 0.0  ;;  %v6491_v39 = vmul.f32 %v24671_v6, %v24671_v6  ;;  %v6554_v5 = vsel %vm148_vm1, %v6489_v49, 0.0  ;;  %v6492_v56 = vmul.f32 %v24674_v48, %v24674_v48 }
 0x4f4   :  { %v6129_v60 = vpop.f32.mrb[47].mxu0  ;;  %v6553_v50 = vadd.f32 %v6552_v18, %v6551_v9  ;;  %v6359_v2 = vadd.f32 %v6358_v8, %v6357_v52  ;;  %v6493_v36 = vmul.f32 %v24677_v4, %v24677_v4  ;;  %v6556_v62 = vsel %vm148_vm1, %v6490_v1, 0.0 }
 0x4f5   :  { %v6360_v17 = vsel %vm148_vm1, %v24637_v19, 0.0  ;;  %v6558_v8 = vsel %vm148_vm1, %v6491_v39, 0.0  ;;  %v6494_v49 = vmul.f32 %v24680_v31, %v24680_v31  ;;  %v6364_v4 = vsel %vm148_vm1, %v24647_v29, 0.0 }
 0x4f6   :  { %v6555_v0 = vadd.f32 %v6554_v5, %v6553_v50  ;;  %v6361_v52 = vadd.f32 %v6360_v17, %v6359_v2  ;;  %v6362_v5 = vsel %vm148_vm1, %v24650_v22, 0.0  ;;  %v6495_v1 = vmul.f32 %v24683_v43, %v24683_v43 }
 0x4f7   :  { %v19734_v40 = vpop.f32.mrb[48].mxu0  ;;  %v6560_v2 = vsel %vm148_vm1, %v6492_v56, 0.0  ;;  %v6562_v39 = vsel %vm148_vm1, %v6493_v36, 0.0  ;;  %v24808_v29 = vadd.f32 %v24706_v59, %v24452_v28  ;;  %v24811_v19 = vadd.f32 %v6109_v34, %v24454_v7 }
 0x4f8   :  { %v6139_v54 = vpop.f32.mrb[49].mxu0  ;;  %v6557_v18 = vadd.f32 %v6556_v62, %v6555_v0  ;;  %v6496_v0 = vmul.f32 %v24686_v42, %v24686_v42  ;;  %v6363_v22 = vadd.f32 %v6362_v5, %v6361_v52  ;;  %v24814_v36 = vadd.f32 %v19728_v33, %v24456_v30  ;;  %v30864_v5 = vld [vmem:[#allocation35_spill] sm:$0xff] }
 0x4f9   :  { %30860 = vst [vmem:[#allocation42_spill] sm:$0xff] %v24808_v29  ;;  %30861 = vst [vmem:[#allocation43_spill] sm:$0xff] %v24811_v19  ;;  %v24817_v56 = vadd.f32 %v6119_v51, %v24460_v32  ;;  %v6564_v28 = vsel %vm148_vm1, %v6494_v49, 0.0  ;;  %v6566_v7 = vsel %vm148_vm1, %v6495_v1, 0.0  ;;  %v6370_v32 = vsel %vm148_vm1, %v24811_v19, 0.0 }
 0x4fa   :  { %v6559_v50 = vadd.f32 %v6558_v8, %v6557_v18  ;;  %v24800_v18 = vadd.f32 %v24654_v14, %v24448_v25  ;;  %v24804_v8 = vadd.f32 %v24668_v24, %v24450_v26  ;;  %30862 = vst [vmem:[#allocation44_spill] sm:$0xff] %v24814_v36  ;;  %v6497_v25 = vmul.f32 %v24689_v57, %v24689_v57 }
 0x4fb   :  { %v19737_v21 = vpop.f32.mrb[50].mxu0  ;;  %30863 = vst [vmem:[#allocation45_spill] sm:$0xff] %v24817_v56  ;;  %v6365_v52 = vadd.f32 %v6364_v4, %v6363_v22  ;;  %v24830_v51 = vadd.f32 %v19731_v63, %v24468_v41  ;;  %v24833_v22 = vadd.f32 %v6129_v60, %v24472_v23  ;;  %v24836_v4 = vadd.f32 %v19734_v40, %v24478_v37 }
 0x4fc   :  { %v6149_v9 = vpop.f32.mrb[51].mxu0  ;;  %v6561_v17 = vadd.f32 %v6560_v2, %v6559_v50  ;;  %30858 = vst [vmem:[#allocation40_spill] sm:$0xff] %v24800_v18  ;;  %30859 = vst [vmem:[#allocation41_spill] sm:$0xff] %v24804_v8  ;;  %v6366_v26 = vsel %vm148_vm1, %v24804_v8, 0.0  ;;  %v6368_v30 = vsel %vm148_vm1, %v24800_v18, 0.0  ;;  %v24839_v49 = vadd.f32 %v6139_v54, %v30864_v5  ;;  %v30865_v50 = vld [vmem:[#allocation5_spill] sm:$0xff] }
 0x4fd   :  { %v6367_v33 = vadd.f32 %v6366_v26, %v6365_v52  ;;  %v24842_v1 = vadd.f32 %v19737_v21, %v30865_v50  ;;  %v30866_v2 = vld [vmem:[#allocation6_spill] sm:$0xff]  ;;  %v6499_v41 = vmul.f32 %v24695_v47, %v24695_v47  ;;  %v6568_v37 = vsel %vm148_vm1, %v6496_v0, 0.0  ;;  %v30867_v26 = vld [vmem:[#allocation7_spill] sm:$0xff]  ;;  %v30868_v5 = vld [vmem:[#allocation8_spill] sm:$0xff] }
 0x4fe   :  { %v6563_v14 = vadd.f32 %v6562_v39, %v6561_v17  ;;  %v24845_v39 = vadd.f32 %v6149_v9, %v30866_v2  ;;  %v6498_v17 = vmul.f32 %v24692_v15, %v24692_v15  ;;  %v6570_v54 = vsel %vm148_vm1, %v6497_v25, 0.0  ;;  %v30870_v0 = vld [vmem:[#allocation10_spill] sm:$0xff]  ;;  %v30872_v2 = vld [vmem:[#allocation12_spill] sm:$0xff] }
 0x4ff   :  { %v19740_v48 = vpop.f32.mrb[52].mxu0  ;;  %v6369_v60 = vadd.f32 %v6368_v30, %v6367_v33  ;;  %v6372_v21 = vsel %vm148_vm1, %v24808_v29, 0.0  ;;  %v6374_v40 = vsel %vm148_vm1, %v24817_v56, 0.0  ;;  %v30869_v30 = vld [vmem:[#allocation9_spill] sm:$0xff]  ;;  %v30871_v33 = vld [vmem:[#allocation11_spill] sm:$0xff] }
 0x500   :  { %v6159_v62 = vpop.f32.mrb[53].mxu0  ;;  %v6565_v34 = vadd.f32 %v6564_v28, %v6563_v14  ;;  %v24858_v28 = vadd.f32 %v19740_v48, %v30867_v26  ;;  %v6500_v48 = vmul.f32 %v24698_v53, %v24698_v53 }
 0x501   :  { %v6371_v52 = vadd.f32 %v6370_v32, %v6369_v60 }
 0x502   :  { %v6567_v23 = vadd.f32 %v6566_v7, %v6565_v34  ;;  %v24861_v7 = vadd.f32 %v6159_v62, %v30868_v5  ;;  %v6572_v62 = vsel %vm148_vm1, %v6498_v17, 0.0  ;;  %v30873_v5 = vld [vmem:[#allocation13_spill] sm:$0xff]  ;;  %v6378_v17 = vsel %vm148_vm1, %v24833_v22, 0.0 }
 0x503   :  { %v19743_v24 = vpop.f32.mrb[54].mxu0  ;;  %v6373_v32 = vadd.f32 %v6372_v21, %v6371_v52  ;;  %v6376_v21 = vsel %vm148_vm1, %v24814_v36, 0.0  ;;  %v6505_v36 = vmul.f32 %v24715_v16, %v24715_v16 }
 0x504   :  { %v6169_v59 = vpop.f32.mrb[55].mxu0  ;;  %v6569_v14 = vadd.f32 %v6568_v37, %v6567_v23  ;;  %v24864_v34 = vadd.f32 %v19743_v24, %v30869_v30  ;;  %v30874_v30 = vld [vmem:[#allocation14_spill] sm:$0xff] }
 0x505   :  { %v24867_v25 = vadd.f32 %v6169_v59, %v30870_v0  ;;  %v6375_v26 = vadd.f32 %v6374_v40, %v6373_v32  ;;  %v6502_v0 = vmul.f32 %v24704_v61, %v24704_v61 }
 0x506   :  { %v6571_v23 = vadd.f32 %v6570_v54, %v6569_v14  ;;  %v6574_v54 = vsel %vm148_vm1, %v6499_v41, 0.0 }
 0x507   :  { %v19746_v63 = vpop.f32.mrb[56].mxu0  ;;  %v6377_v52 = vadd.f32 %v6376_v21, %v6375_v26  ;;  %v6380_v26 = vsel %vm148_vm1, %v24830_v51, 0.0 }
 0x508   :  { %v6179_v9 = vpop.f32.mrb[57].mxu0  ;;  %v24870_v50 = vadd.f32 %v19746_v63, %v30871_v33  ;;  %v6573_v24 = vadd.f32 %v6572_v62, %v6571_v23  ;;  %v6576_v33 = vsel %vm148_vm1, %v6500_v48, 0.0  ;;  %v30876_v62 = vld [vmem:[#allocation16_spill] sm:$0xff]  ;;  %v6382_v48 = vsel %vm148_vm1, %v24839_v49, 0.0 }
 0x509   :  { %v24873_v56 = vadd.f32 %v6179_v9, %v30872_v2  ;;  %v6501_v9 = vmul.f32 %v24701_v27, %v24701_v27  ;;  %v30875_v2 = vld [vmem:[#allocation15_spill] sm:$0xff]  ;;  %v6379_v41 = vadd.f32 %v6378_v17, %v6377_v52  ;;  %v6504_v17 = vmul.f32 %v24712_v3, %v24712_v3  ;;  %v30877_v52 = vld [vmem:[#allocation17_spill] sm:$0xff] }
 0x50a   :  { %v6575_v14 = vadd.f32 %v6574_v54, %v6573_v24 }
 0x50b   :  { %v19749_v60 = vpop.f32.mrb[58].mxu0  ;;  %v6578_v24 = vsel %vm148_vm1, %v6501_v9, 0.0  ;;  %v6381_v54 = vadd.f32 %v6380_v26, %v6379_v41  ;;  %v6384_v41 = vsel %vm148_vm1, %v24836_v4, 0.0 }
 0x50c   :  { %v6189_v37 = vpop.f32.mrb[59].mxu0  ;;  %v24879_v59 = vadd.f32 %v19749_v60, %v30873_v5  ;;  %v6577_v60 = vadd.f32 %v6576_v33, %v6575_v14  ;;  %v6503_v5 = vmul.f32 %v24709_v10, %v24709_v10  ;;  %v6580_v14 = vsel %vm148_vm1, %v6502_v0, 0.0 }
 0x50d   :  { %v24882_v63 = vadd.f32 %v6189_v37, %v30874_v30  ;;  %v6383_v9 = vadd.f32 %v6382_v48, %v6381_v54  ;;  %v6386_v0 = vsel %vm148_vm1, %v24845_v39, 0.0  ;;  %v6584_v48 = vsel %vm148_vm1, %v6504_v17, 0.0 }
 0x50e   :  { %v6579_v30 = vadd.f32 %v6578_v24, %v6577_v60  ;;  %v6582_v60 = vsel %vm148_vm1, %v6503_v5, 0.0  ;;  %v6586_v5 = vsel %vm148_vm1, %v6505_v36, 0.0 }
 0x50f   :  { %v19752_v40 = vpop.f32.mrb[60].mxu0  ;;  %v6385_v26 = vadd.f32 %v6384_v41, %v6383_v9 }
 0x510   :  { %v24895_v23 = vadd.f32 %v19752_v40, %v30875_v2  ;;  %v6199_v32 = vpop.f32.mrb[61].mxu0  ;;  %v6581_v2 = vadd.f32 %v6580_v14, %v6579_v30  ;;  %v6506_v30 = vmul.f32 %v24718_v13, %v24718_v13  ;;  %v6507_v14 = vmul.f32 %v24721_v45, %v24721_v45 }
 0x511   :  { %v24898_v37 = vadd.f32 %v6199_v32, %v30876_v62  ;;  %v30878_v32 = vld [vmem:[#allocation18_spill] sm:$0xff] }
 0x512   :  { %v6583_v24 = vadd.f32 %v6582_v60, %v6581_v2  ;;  %v6588_v17 = vsel %vm148_vm1, %v6506_v30, 0.0  ;;  %v6590_v36 = vsel %vm148_vm1, %v6507_v14, 0.0 }
 0x513   :  { %v19755_v21 = vpop.f32.mrb[62].mxu0 }
 0x514   :  { %v24911_v40 = vadd.f32 %v19755_v21, %v30877_v52  ;;  %v6209_v33 = vpop.f32.mrb[63].mxu0  ;;  %v6585_v54 = vadd.f32 %v6584_v48, %v6583_v24  ;;  %v6387_v21 = vadd.f32 %v6386_v0, %v6385_v26  ;;  %v6388_v52 = vsel %vm148_vm1, %v24842_v1, 0.0 }
 0x515   :  { %v24914_v62 = vadd.f32 %v6209_v33, %v30878_v32  ;;  %v6390_v33 = vsel %vm148_vm1, %v24861_v7, 0.0  ;;  %v6508_v32 = vmul.f32 %v24724_v44, %v24724_v44  ;;  %v6509_v0 = vmul.f32 %v24727_v20, %v24727_v20 }
 0x516   :  { %v6587_v2 = vadd.f32 %v6586_v5, %v6585_v54  ;;  %v6389_v9 = vadd.f32 %v6388_v52, %v6387_v21  ;;  %v6392_v24 = vsel %vm148_vm1, %v24858_v28, 0.0  ;;  %v6394_v26 = vsel %vm148_vm1, %v24867_v25, 0.0 }
 0x517   :  { %v6510_v21 = vmul.f32 %v24730_v58, %v24730_v58  ;;  %v6592_v30 = vsel %vm148_vm1, %v6508_v32, 0.0  ;;  %v6594_v14 = vsel %vm148_vm1, %v6509_v0, 0.0 }
 0x518   :  { %v6589_v60 = vadd.f32 %v6588_v17, %v6587_v2  ;;  %v6391_v41 = vadd.f32 %v6390_v33, %v6389_v9  ;;  %v6511_v33 = vmul.f32 %v24733_v55, %v24733_v55  ;;  %v6396_v2 = vsel %vm148_vm1, %v24864_v34, 0.0 }
 0x519   :  { %v6398_v9 = vsel %vm148_vm1, %v24873_v56, 0.0  ;;  %v6596_v32 = vsel %vm148_vm1, %v6510_v21, 0.0 }
 0x51a   :  { %v6591_v48 = vadd.f32 %v6590_v36, %v6589_v60  ;;  %v6393_v54 = vadd.f32 %v6392_v24, %v6391_v41  ;;  %v6512_v41 = vmul.f32 %v24736_v12, %v24736_v12  ;;  %v6598_v0 = vsel %vm148_vm1, %v6511_v33, 0.0 }
 0x51b   :  { %v6515_v33 = vmul.f32 %v24745_v11, %v24745_v11 }
 0x51c   :  { %v6593_v5 = vadd.f32 %v6592_v30, %v6591_v48  ;;  %v6395_v52 = vadd.f32 %v6394_v26, %v6393_v54  ;;  %v6513_v26 = vmul.f32 %v24739_v38, %v24739_v38  ;;  %v6400_v48 = vsel %vm148_vm1, %v24870_v50, 0.0 }
 0x51d   :  { %v6402_v54 = vsel %vm148_vm1, %v24882_v63, 0.0  ;;  %v6600_v21 = vsel %vm148_vm1, %v6512_v41, 0.0  ;;  %v6406_v41 = vsel %vm148_vm1, %v24898_v37, 0.0 }
 0x51e   :  { %v6595_v17 = vadd.f32 %v6594_v14, %v6593_v5  ;;  %v6397_v60 = vadd.f32 %v6396_v2, %v6395_v52  ;;  %v6514_v52 = vmul.f32 %v24742_v46, %v24742_v46 }
 0x520   :  { %v6597_v36 = vadd.f32 %v6596_v32, %v6595_v17  ;;  %v6399_v24 = vadd.f32 %v6398_v9, %v6397_v60  ;;  %v30438_v9 = vmov 0.0   ;;  %v6602_v17 = vsel %vm148_vm1, %v6513_v26, 0.0 }
 0x521   :  { %6951 = vst.msk [vmem:[#allocation2] sm:$0xff] %vm148_vm1, %v30438_v9  ;;  %6952 = vst.msk [vmem:[#allocation2 + $0x8] sm:$0xff] %vm148_vm1, %v30438_v9  ;;  %v6404_v60 = vsel %vm148_vm1, %v24879_v59, 0.0  ;;  %v6604_v26 = vsel %vm148_vm1, %v6514_v52, 0.0 }
 0x522   :  { %v6599_v30 = vadd.f32 %v6598_v0, %v6597_v36  ;;  %v6401_v5 = vadd.f32 %v6400_v48, %v6399_v24  ;;  %6955 = vst.msk [vmem:[#allocation2 + $0x1b0] sm:$0xff] %vm148_vm1, %v30438_v9  ;;  %6956 = vst.msk [vmem:[#allocation2 + $0x1b8] sm:$0xff] %vm148_vm1, %v30438_v9  ;;  %v24995_v24 = vmul.f32 %v24748_v35, %v24748_v35 }
 0x523   :  { %6959 = vst.msk [vmem:[#allocation2 + $0x198] sm:$0xff] %vm148_vm1, %v30438_v9  ;;  %6960 = vst.msk [vmem:[#allocation2 + $0x1a0] sm:$0xff] %vm148_vm1, %v30438_v9 }
 0x524   :  { %v6601_v14 = vadd.f32 %v6600_v21, %v6599_v30  ;;  %v6403_v2 = vadd.f32 %v6402_v54, %v6401_v5  ;;  %6962 = vst.msk [vmem:[#allocation2 + $0x348] sm:$0xff] %vm148_vm1, %v30438_v9  ;;  %6963 = vst.msk [vmem:[#allocation2 + $0x350] sm:$0xff] %vm148_vm1, %v30438_v9  ;;  %v30879_v54 = vld [vmem:[#allocation38_spill] sm:$0xff]  ;;  %v25007_v5 = vsel %vm148_vm1, %v6515_v33, 0.0  ;;  %v25011_v21 = vsel %vm148_vm1, %v24895_v23, 0.0  ;;  %v30880_v33 = vld [vmem:[#allocation39_spill] sm:$0xff] }
 0x525   :  { %6954 = vst.msk [vmem:[#allocation2 + $0x10] sm:$0x3] %vm6953_vm2, %v30438_v9  ;;  %6957 = vst.msk [vmem:[#allocation2 + $0x1c0] sm:$0x3] %vm6953_vm2, %v30438_v9  ;;  %v25004_v30 = vmul.f32 %v30879_v54, %v30879_v54 }
 0x526   :  { %6961 = vst.msk [vmem:[#allocation2 + $0x1a8] sm:$0x3] %vm6953_vm2, %v30438_v9  ;;  %6964 = vst.msk [vmem:[#allocation2 + $0x358] sm:$0x3] %vm6953_vm2, %v30438_v9  ;;  %v6603_v32 = vadd.f32 %v6602_v17, %v6601_v14  ;;  %v6405_v36 = vadd.f32 %v6404_v60, %v6403_v2  ;;  %v25015_v14 = vsel %vm148_vm1, %v24914_v62, 0.0  ;;  %v6518_v17 = vmul.f32 %v30880_v33, %v30880_v33 }
 0x527   :  { %6966 = vst.msk [vmem:[#allocation2] sm:$0x1] %vm6965_vm3, %v30438_v9  ;;  %6967 = vst.msk [vmem:[#allocation2 + $0x18] sm:$0x1] %vm6965_vm3, %v30438_v9  ;;  %v6608_v60 = vsel %vm148_vm1, %v24995_v24, 0.0 }
 0x528   :  { %v24998_v0 = vadd.f32 %v6604_v26, %v6603_v32  ;;  %v25000_v48 = vadd.f32 %v6406_v41, %v6405_v36  ;;  %6968 = vst.msk [vmem:[#allocation2 + $0x30] sm:$0x1] %vm6965_vm3, %v30438_v9  ;;  %6969 = vst.msk [vmem:[#allocation2 + $0x48] sm:$0x1] %vm6965_vm3, %v30438_v9  ;;  %v7168_v41 = vld [vmem:[#allocation2 + $0x1] sm:$0xff] }
 0x529   :  { %6970 = vst.msk [vmem:[#allocation2 + $0x60] sm:$0x1] %vm6965_vm3, %v30438_v9  ;;  %6971 = vst.msk [vmem:[#allocation2 + $0x78] sm:$0x1] %vm6965_vm3, %v30438_v9  ;;  %19758 = vmatprep.mubr.msk.f32.mxu1 %vm148_vm1, %v7168_v41 }
 0x52a   :  { %6972 = vst.msk [vmem:[#allocation2 + $0x90] sm:$0x1] %vm6965_vm3, %v30438_v9  ;;  %6973 = vst.msk [vmem:[#allocation2 + $0xa8] sm:$0x1] %vm6965_vm3, %v30438_v9  ;;  %v6607_v52 = vadd.f32 %v25007_v5, %v24998_v0  ;;  %v6409_v2 = vadd.f32 %v25011_v21, %v25000_v48  ;;  %v6412_v0 = vsel %vm148_vm1, %v24911_v40, 0.0  ;;  %v6612_v21 = vsel %vm148_vm1, %v6518_v17, 0.0 }
 0x52b   :  { %6974 = vst.msk [vmem:[#allocation2 + $0xc0] sm:$0x1] %vm6965_vm3, %v30438_v9  ;;  %6975 = vst.msk [vmem:[#allocation2 + $0xd8] sm:$0x1] %vm6965_vm3, %v30438_v9 }
 0x52c   :  { %6976 = vst.msk [vmem:[#allocation2 + $0xf0] sm:$0x1] %vm6965_vm3, %v30438_v9  ;;  %6977 = vst.msk [vmem:[#allocation2 + $0x108] sm:$0x1] %vm6965_vm3, %v30438_v9  ;;  %v6609_v32 = vadd.f32 %v6608_v60, %v6607_v52  ;;  %v6411_v36 = vadd.f32 %v25015_v14, %v6409_v2  ;;  %v7169_v26 = vld [vmem:[#allocation2 + $0x9] sm:$0xff] }
 0x52d   :  { %6978 = vst.msk [vmem:[#allocation2 + $0x120] sm:$0x1] %vm6965_vm3, %v30438_v9  ;;  %6979 = vst.msk [vmem:[#allocation2 + $0x138] sm:$0x1] %vm6965_vm3, %v30438_v9  ;;  %19759 = vmatmul.mubr.msk.f32.vlgmr.msra.gmra.mrb[32].mxu1 %vm148_vm1, %v7169_v26 }
 0x52e   :  { %6980 = vst.msk [vmem:[#allocation2 + $0x150] sm:$0x1] %vm6965_vm3, %v30438_v9  ;;  %6981 = vst.msk [vmem:[#allocation2 + $0x168] sm:$0x1] %vm6965_vm3, %v30438_v9  ;;  %v6413_v5 = vadd.f32 %v6412_v0, %v6411_v36 }
 0x52f   :  { %6982 = vst.msk [vmem:[#allocation2 + $0x180] sm:$0x1] %vm6965_vm3, %v30438_v9  ;;  %6983 = vst.msk [vmem:[#allocation2 + $0x198] sm:$0x1] %vm6965_vm3, %v30438_v9 }
 0x530   :  { %6984 = vst.msk [vmem:[#allocation2 + $0x1b0] sm:$0x1] %vm6965_vm3, %v30438_v9  ;;  %6985 = vst.msk [vmem:[#allocation2 + $0x1c8] sm:$0x1] %vm6965_vm3, %v30438_v9  ;;  %v6414_v29 = vrot.slane %v6413_v5, 4 }
 0x531   :  { %6986 = vst.msk [vmem:[#allocation2 + $0x1e0] sm:$0x1] %vm6965_vm3, %v30438_v9  ;;  %6987 = vst.msk [vmem:[#allocation2 + $0x1f8] sm:$0x1] %vm6965_vm3, %v30438_v9 }
 0x532   :  { %6988 = vst.msk [vmem:[#allocation2 + $0x210] sm:$0x1] %vm6965_vm3, %v30438_v9  ;;  %6989 = vst.msk [vmem:[#allocation2 + $0x228] sm:$0x1] %vm6965_vm3, %v30438_v9  ;;  %v6415_v60 = vadd.f32 %v6414_v29, %v6413_v5 }
 0x533   :  { %6990 = vst.msk [vmem:[#allocation2 + $0x240] sm:$0x1] %vm6965_vm3, %v30438_v9  ;;  %6991 = vst.msk [vmem:[#allocation2 + $0x258] sm:$0x1] %vm6965_vm3, %v30438_v9 }
 0x534   :  { %6992 = vst.msk [vmem:[#allocation2 + $0x270] sm:$0x1] %vm6965_vm3, %v30438_v9  ;;  %6993 = vst.msk [vmem:[#allocation2 + $0x288] sm:$0x1] %vm6965_vm3, %v30438_v9  ;;  %v6416_v2 = vrot.slane %v6415_v60, 2 }
 0x535   :  { %6994 = vst.msk [vmem:[#allocation2 + $0x2a0] sm:$0x1] %vm6965_vm3, %v30438_v9  ;;  %6995 = vst.msk [vmem:[#allocation2 + $0x2b8] sm:$0x1] %vm6965_vm3, %v30438_v9 }
 0x536   :  { %6996 = vst.msk [vmem:[#allocation2 + $0x2d0] sm:$0x1] %vm6965_vm3, %v30438_v9  ;;  %6997 = vst.msk [vmem:[#allocation2 + $0x2e8] sm:$0x1] %vm6965_vm3, %v30438_v9  ;;  %v6417_v19 = vadd.f32 %v6416_v2, %v6415_v60 }
 0x537   :  { %6998 = vst.msk [vmem:[#allocation2 + $0x300] sm:$0x1] %vm6965_vm3, %v30438_v9  ;;  %6999 = vst.msk [vmem:[#allocation2 + $0x318] sm:$0x1] %vm6965_vm3, %v30438_v9 }
 0x538   :  { %7000 = vst.msk [vmem:[#allocation2 + $0x330] sm:$0x1] %vm6965_vm3, %v30438_v9  ;;  %7001 = vst.msk [vmem:[#allocation2 + $0x348] sm:$0x1] %vm6965_vm3, %v30438_v9  ;;  %v6418_v8 = vrot.slane %v6417_v19, 1 }
 0x539   :  { %7002 = vst.msk [vmem:[#allocation2 + $0x11] sm:$0x1] %vm6965_vm3, %v30438_v9  ;;  %7003 = vst.msk [vmem:[#allocation2 + $0x29] sm:$0x1] %vm6965_vm3, %v30438_v9 }
 0x53a   :  { %7004 = vst.msk [vmem:[#allocation2 + $0x41] sm:$0x1] %vm6965_vm3, %v30438_v9  ;;  %7005 = vst.msk [vmem:[#allocation2 + $0x59] sm:$0x1] %vm6965_vm3, %v30438_v9  ;;  %v6419_v11 = vadd.f32 %v6418_v8, %v6417_v19 }
 0x53b   :  { %7006 = vst.msk [vmem:[#allocation2 + $0x71] sm:$0x1] %vm6965_vm3, %v30438_v9  ;;  %7007 = vst.msk [vmem:[#allocation2 + $0x89] sm:$0x1] %vm6965_vm3, %v30438_v9 }
 0x53c   :  { %7008 = vst.msk [vmem:[#allocation2 + $0xa1] sm:$0x1] %vm6965_vm3, %v30438_v9  ;;  %7009 = vst.msk [vmem:[#allocation2 + $0xb9] sm:$0x1] %vm6965_vm3, %v30438_v9  ;;  %v25177_v12 = vmul.f32 0.00390625, %v6419_v11 }
 0x53d   :  { %7010 = vst.msk [vmem:[#allocation2 + $0xd1] sm:$0x1] %vm6965_vm3, %v30438_v9  ;;  %7011 = vst.msk [vmem:[#allocation2 + $0xe9] sm:$0x1] %vm6965_vm3, %v30438_v9 }
 0x53e   :  { %7012 = vst.msk [vmem:[#allocation2 + $0x101] sm:$0x1] %vm6965_vm3, %v30438_v9  ;;  %7013 = vst.msk [vmem:[#allocation2 + $0x119] sm:$0x1] %vm6965_vm3, %v30438_v9  ;;  %v25181_v17 = vsub.f32 %v24833_v22, %v25177_v12  ;;  %v25185_v29 = vsub.f32 %v24830_v51, %v25177_v12  ;;  %v25193_v19 = vsub.f32 %v24836_v4, %v25177_v12 }
 0x53f   :  { %7014 = vst.msk [vmem:[#allocation2 + $0x131] sm:$0x1] %vm6965_vm3, %v30438_v9  ;;  %7015 = vst.msk [vmem:[#allocation2 + $0x149] sm:$0x1] %vm6965_vm3, %v30438_v9  ;;  %v25205_v11 = vsub.f32 %v24861_v7, %v25177_v12  ;;  %v25213_v8 = vsub.f32 %v24867_v25, %v25177_v12  ;;  %v25217_v51 = vsub.f32 %v24864_v34, %v25177_v12 }
 0x540   :  { %7016 = vst.msk [vmem:[#allocation2 + $0x161] sm:$0x1] %vm6965_vm3, %v30438_v9  ;;  %7017 = vst.msk [vmem:[#allocation2 + $0x179] sm:$0x1] %vm6965_vm3, %v30438_v9  ;;  %v25221_v22 = vsub.f32 %v24873_v56, %v25177_v12  ;;  %v25225_v4 = vsub.f32 %v24870_v50, %v25177_v12  ;;  %v25241_v56 = vsub.f32 %v24895_v23, %v25177_v12  ;;  %v30893_v50 = vld [vmem:[#allocation20_spill] sm:$0xff]  ;;  %v30895_v23 = vld [vmem:[#allocation19_spill] sm:$0xff] }
 0x541   :  { %7018 = vst.msk [vmem:[#allocation2 + $0x191] sm:$0x1] %vm6965_vm3, %v30438_v9  ;;  %7019 = vst.msk [vmem:[#allocation2 + $0x1a9] sm:$0x1] %vm6965_vm3, %v30438_v9  ;;  %v25249_v7 = vsub.f32 %v24911_v40, %v25177_v12  ;;  %v25258_v36 = vsub.f32 %v30895_v23, %v25177_v12  ;;  %v30898_v40 = vld [vmem:[#allocation22_spill] sm:$0xff] }
 0x542   :  { %7020 = vst.msk [vmem:[#allocation2 + $0x1c1] sm:$0x1] %vm6965_vm3, %v30438_v9  ;;  %7021 = vst.msk [vmem:[#allocation2 + $0x1d9] sm:$0x1] %vm6965_vm3, %v30438_v9  ;;  %v25266_v0 = vsub.f32 %v30898_v40, %v25177_v12 }
 0x543   :  { %7022 = vst.msk [vmem:[#allocation2 + $0x1f1] sm:$0x1] %vm6965_vm3, %v30438_v9  ;;  %7023 = vst.msk [vmem:[#allocation2 + $0x209] sm:$0x1] %vm6965_vm3, %v30438_v9 }
 0x544   :  { %7024 = vst.msk [vmem:[#allocation2 + $0x221] sm:$0x1] %vm6965_vm3, %v30438_v9  ;;  %7025 = vst.msk [vmem:[#allocation2 + $0x239] sm:$0x1] %vm6965_vm3, %v30438_v9 }
 0x545   :  { %7026 = vst.msk [vmem:[#allocation2 + $0x251] sm:$0x1] %vm6965_vm3, %v30438_v9  ;;  %7027 = vst.msk [vmem:[#allocation2 + $0x269] sm:$0x1] %vm6965_vm3, %v30438_v9 }
 0x546   :  { %7028 = vst.msk [vmem:[#allocation2 + $0x281] sm:$0x1] %vm6965_vm3, %v30438_v9  ;;  %7029 = vst.msk [vmem:[#allocation2 + $0x299] sm:$0x1] %vm6965_vm3, %v30438_v9 }
 0x547   :  { %7030 = vst.msk [vmem:[#allocation2 + $0x2b1] sm:$0x1] %vm6965_vm3, %v30438_v9  ;;  %7031 = vst.msk [vmem:[#allocation2 + $0x2c9] sm:$0x1] %vm6965_vm3, %v30438_v9 }
 0x548   :  { %7032 = vst.msk [vmem:[#allocation2 + $0x2e1] sm:$0x1] %vm6965_vm3, %v30438_v9  ;;  %7033 = vst.msk [vmem:[#allocation2 + $0x2f9] sm:$0x1] %vm6965_vm3, %v30438_v9 }
 0x549   :  { %7034 = vst.msk [vmem:[#allocation2 + $0x311] sm:$0x1] %vm6965_vm3, %v30438_v9  ;;  %7035 = vst.msk [vmem:[#allocation2 + $0x329] sm:$0x1] %vm6965_vm3, %v30438_v9 }
 0x54a   :  { %7036 = vst.msk [vmem:[#allocation2 + $0x341] sm:$0x1] %vm6965_vm3, %v30438_v9  ;;  %7037 = vst.msk [vmem:[#allocation2 + $0x359] sm:$0x1] %vm6965_vm3, %v30438_v9  ;;  %v6610_v9 = vsel %vm148_vm1, %v25004_v30, 0.0 }
 0x54b   :  { %v6611_v48 = vadd.f32 %v6610_v9, %v6609_v32  ;;  %v25189_v32 = vsub.f32 %v24839_v49, %v25177_v12  ;;  %30881 = vst [vmem:[#allocation46_spill] sm:$0xff] %v25205_v11  ;;  %30883 = vst [vmem:[#allocation48_spill] sm:$0xff] %v25213_v8  ;;  %v25229_v49 = vsub.f32 %v24882_v63, %v25177_v12 }
 0x54c   :  { %30884 = vst [vmem:[#allocation49_spill] sm:$0xff] %v25217_v51  ;;  %30885 = vst [vmem:[#allocation50_spill] sm:$0xff] %v25221_v22 }
 0x54d   :  { %v6613_v24 = vadd.f32 %v6612_v21, %v6611_v48  ;;  %30886 = vst [vmem:[#allocation51_spill] sm:$0xff] %v25225_v4  ;;  %30887 = vst [vmem:[#allocation52_spill] sm:$0xff] %v25229_v49  ;;  %v30900_v21 = vld [vmem:[#allocation28_spill] sm:$0xff] }
 0x54e   :  { %30890 = vst [vmem:[#allocation55_spill] sm:$0xff] %v25241_v56  ;;  %30892 = vst [vmem:[#allocation57_spill] sm:$0xff] %v25249_v7 }
 0x54f   :  { %v6614_v52 = vrot.slane %v6613_v24, 4  ;;  %30896 = vst [vmem:[#allocation59_spill] sm:$0xff] %v25258_v36 }
 0x551   :  { %v6615_v14 = vadd.f32 %v6614_v52, %v6613_v24  ;;  %v30901_v52 = vld [vmem:[#allocation29_spill] sm:$0xff] }
 0x553   :  { %v6616_v41 = vrot.slane %v6615_v14, 2 }
 0x555   :  { %v6617_v18 = vadd.f32 %v6616_v41, %v6615_v14  ;;  %v30902_v14 = vld [vmem:[#allocation30_spill] sm:$0xff] }
 0x557   :  { %v6618_v30 = vrot.slane %v6617_v18, 1 }
 0x559   :  { %v6619_v46 = vadd.f32 %v6618_v30, %v6617_v18  ;;  %v25209_v18 = vsub.f32 %v24858_v28, %v25177_v12  ;;  %v25245_v28 = vsub.f32 %v24914_v62, %v25177_v12  ;;  %v30897_v62 = vld [vmem:[#allocation27_spill] sm:$0xff] }
 0x55a   :  { %v30903_v30 = vld [vmem:[#allocation31_spill] sm:$0xff] }
 0x55b   :  { %v6689_v38 = vmul.f32 0.00390625, %v6619_v46  ;;  %v25201_v46 = vsub.f32 %v24842_v1, %v25177_v12  ;;  %30882 = vst [vmem:[#allocation47_spill] sm:$0xff] %v25209_v18  ;;  %v25233_v1 = vsub.f32 %v24879_v59, %v25177_v12  ;;  %30891 = vst [vmem:[#allocation56_spill] sm:$0xff] %v25245_v28  ;;  %v25254_v59 = vsub.f32 %v30893_v50, %v25177_v12 }
 0x55d   :  { %v6691_v9 = vadd.f32 1e-05, %v6689_v38  ;;  %v25197_v38 = vsub.f32 %v24845_v39, %v25177_v12  ;;  %30888 = vst [vmem:[#allocation53_spill] sm:$0xff] %v25233_v1  ;;  %v25237_v39 = vsub.f32 %v24898_v37, %v25177_v12  ;;  %30894 = vst [vmem:[#allocation58_spill] sm:$0xff] %v25254_v59  ;;  %v25274_v5 = vmul.f32 %v25254_v59, %v25254_v59 }
 0x55f   :  { %21764 = vrsqrt.f32 %v6691_v9  ;;  %30889 = vst [vmem:[#allocation54_spill] sm:$0xff] %v25237_v39 }
 0x569   :  { %v21765_v34 = vpop.eup %21764 }
 0x56a   :  { %v6725_v25 = vmul.f32 %v21765_v34, %v30879_v54  ;;  %v25262_v26 = vmul.f32 %v21765_v34, %v30897_v62  ;;  %v30899_v54 = vld [vmem:[#allocation21_spill] sm:$0xff]  ;;  %v25277_v24 = vmul.f32 %v21765_v34, %v30900_v21  ;;  %v25280_v60 = vmul.f32 %v21765_v34, %v30901_v52 }
 0x56b   :  { %v25270_v48 = vsub.f32 %v30899_v54, %v25177_v12  ;;  %v25283_v2 = vmul.f32 %v21765_v34, %v30902_v14  ;;  %v25286_v41 = vmul.f32 %v21765_v34, %v24671_v6  ;;  %v25289_v9 = vmul.f32 %v21765_v34, %v30903_v30 }
 0x56c   :  { %vm6789_vm4 = vcmp.gt.f32.partialorder %v6725_v25, 0.0  ;;  %v6853_v63 = vmul.f32 0.01, %v6725_v25  ;;  %v25301_v23 = vmul.f32 %v21765_v34, %v24686_v42  ;;  %v25304_v62 = vmul.f32 %v21765_v34, %v24689_v57 }
 0x56d   :  { %v25307_v6 = vmul.f32 %v21765_v34, %v24748_v35  ;;  %v25310_v40 = vmul.f32 %v21765_v34, %v30880_v33  ;;  %v25313_v54 = vmul.f32 %v21765_v34, %v24692_v15  ;;  %v25322_v42 = vmul.f32 %v21765_v34, %v24701_v27 }
 0x56e   :  { %v6917_v37 = vsel %vm6789_vm4, %v6725_v25, %v6853_v63  ;;  %v30904_v25 = vld [vmem:[#allocation32_spill] sm:$0xff]  ;;  %v25295_v63 = vmul.f32 %v21765_v34, %v24680_v31  ;;  %v25316_v31 = vmul.f32 %v21765_v34, %v24695_v47  ;;  %v25325_v57 = vmul.f32 %v21765_v34, %v24704_v61 }
 0x56f   :  { %7069 = vst.msk [vmem:[#allocation2 + $0x181] sm:$0xff] %vm148_vm1, %v6917_v37  ;;  %v25292_v50 = vmul.f32 %v21765_v34, %v30904_v25  ;;  %v25298_v37 = vmul.f32 %v21765_v34, %v24683_v43  ;;  %v25319_v43 = vmul.f32 %v21765_v34, %v24698_v53  ;;  %v25328_v35 = vmul.f32 %v21765_v34, %v24709_v10 }
 0x570   :  { %v25331_v33 = vmul.f32 %v21765_v34, %v24712_v3  ;;  %v25334_v15 = vmul.f32 %v21765_v34, %v24715_v16  ;;  %v25337_v47 = vmul.f32 %v21765_v34, %v24718_v13  ;;  %v25340_v53 = vmul.f32 %v21765_v34, %v24721_v45  ;;  %v30905_v16 = vld [vmem:[#allocation33_spill] sm:$0xff]  ;;  %v30906_v13 = vld [vmem:[#allocation34_spill] sm:$0xff]  ;;  %v30907_v45 = vld [vmem:[#allocation36_spill] sm:$0xff] }
 0x571   :  { %v25343_v27 = vmul.f32 %v21765_v34, %v24724_v44  ;;  %v25346_v61 = vmul.f32 %v21765_v34, %v24727_v20  ;;  %v25349_v10 = vmul.f32 %v21765_v34, %v24730_v58  ;;  %v25352_v3 = vmul.f32 %v21765_v34, %v24733_v55  ;;  %v30908_v44 = vld [vmem:[#allocation37_spill] sm:$0xff] }
 0x572   :  { %v25355_v21 = vmul.f32 %v21765_v34, %v30905_v16  ;;  %v25358_v52 = vmul.f32 %v21765_v34, %v30906_v13  ;;  %v25361_v14 = vmul.f32 %v21765_v34, %v30907_v45  ;;  %v25364_v30 = vmul.f32 %v21765_v34, %v30908_v44 }
 0x573   :  { %vm6759_vm5 = vcmp.gt.f32.partialorder %v25262_v26, 0.0  ;;  %vm6760_vm6 = vcmp.gt.f32.partialorder %v25277_v24, 0.0  ;;  %vm6761_vm7 = vcmp.gt.f32.partialorder %v25280_v60, 0.0  ;;  %vm6762_vm8 = vcmp.gt.f32.partialorder %v25283_v2, 0.0 }
 0x574   :  { %vm6763_vm9 = vcmp.gt.f32.partialorder %v25286_v41, 0.0  ;;  %vm6764_vm10 = vcmp.gt.f32.partialorder %v25289_v9, 0.0  ;;  %vm6765_vm11 = vcmp.gt.f32.partialorder %v25292_v50, 0.0  ;;  %vm6769_vm15 = vcmp.gt.f32.partialorder %v25304_v62, 0.0 }
 0x575   :  { %vm6770_vm2 = vcmp.gt.f32.partialorder %v25313_v54, 0.0  ;;  %vm6771_vm3 = vcmp.gt.f32.partialorder %v25316_v31, 0.0  ;;  %v6823_v20 = vmul.f32 0.01, %v25262_v26  ;;  %v6824_v58 = vmul.f32 0.01, %v25277_v24 }
 0x576   :  { %v6825_v55 = vmul.f32 0.01, %v25280_v60  ;;  %v6826_v34 = vmul.f32 0.01, %v25283_v2  ;;  %v6827_v25 = vmul.f32 0.01, %v25286_v41  ;;  %v25391_v16 = vmul.f32 %v25258_v36, %v25258_v36 }
 0x577   :  { %vm6780_vm13 = vcmp.gt.f32.partialorder %v25343_v27, 0.0  ;;  %v6828_v13 = vmul.f32 0.01, %v25289_v9  ;;  %v6829_v45 = vmul.f32 0.01, %v25292_v50  ;;  %v6887_v59 = vsel %vm6759_vm5, %v25262_v26, %v6823_v20 }
 0x578   :  { %v6830_v44 = vmul.f32 0.01, %v25295_v63  ;;  %vm6781_vm14 = vcmp.gt.f32.partialorder %v25346_v61, 0.0  ;;  %v6831_v36 = vmul.f32 0.01, %v25298_v37  ;;  %v6888_v56 = vsel %vm6760_vm6, %v25277_v24, %v6824_v58  ;;  %7039 = vst.msk [vmem:[#allocation2 + $0x19] sm:$0xff] %vm148_vm1, %v6887_v59 }
 0x579   :  { %v6832_v7 = vmul.f32 0.01, %v25301_v23  ;;  %v6833_v28 = vmul.f32 0.01, %v25304_v62  ;;  %vm6785_vm5 = vcmp.gt.f32.partialorder %v25358_v52, 0.0  ;;  %vm6786_vm4 = vcmp.gt.f32.partialorder %v25361_v14, 0.0 }
 0x57a   :  { %vm6787_vm0 = vcmp.gt.f32.partialorder %v25364_v30, 0.0  ;;  %vm6788_vm12 = vcmp.gt.f32.partialorder %v25307_v6, 0.0  ;;  %v6834_v26 = vmul.f32 0.01, %v25313_v54  ;;  %v6835_v20 = vmul.f32 0.01, %v25316_v31 }
 0x57b   :  { %v6836_v39 = vmul.f32 0.01, %v25319_v43  ;;  %v6889_v24 = vsel %vm6761_vm7, %v25280_v60, %v6825_v55  ;;  %7040 = vst.msk [vmem:[#allocation2 + $0x21] sm:$0xff] %vm148_vm1, %v6888_v56  ;;  %vm6790_vm6 = vcmp.gt.f32.partialorder %v25310_v40, 0.0  ;;  %v6837_v59 = vmul.f32 0.01, %v25322_v42 }
 0x57c   :  { %v6838_v58 = vmul.f32 0.01, %v25325_v57  ;;  %v6839_v1 = vmul.f32 0.01, %v25328_v35  ;;  %v6890_v49 = vsel %vm6762_vm8, %v25283_v2, %v6826_v34  ;;  %7041 = vst.msk [vmem:[#allocation2 + $0x31] sm:$0xff] %vm148_vm1, %v6889_v24  ;;  %v6891_v55 = vsel %vm6763_vm9, %v25286_v41, %v6827_v25 }
 0x57d   :  { %v6840_v4 = vmul.f32 0.01, %v25331_v33  ;;  %v6841_v60 = vmul.f32 0.01, %v25334_v15  ;;  %v6842_v56 = vmul.f32 0.01, %v25337_v47  ;;  %v6892_v34 = vsel %vm6764_vm10, %v25289_v9, %v6828_v13 }
 0x57e   :  { %7042 = vst.msk [vmem:[#allocation2 + $0x39] sm:$0xff] %vm148_vm1, %v6890_v49  ;;  %v6843_v22 = vmul.f32 0.01, %v25340_v53  ;;  %v6844_v51 = vmul.f32 0.01, %v25343_v27  ;;  %7043 = vst.msk [vmem:[#allocation2 + $0x49] sm:$0xff] %vm148_vm1, %v6891_v55  ;;  %v6893_v49 = vsel %vm6765_vm11, %v25292_v50, %v6829_v45 }
 0x57f   :  { %v6845_v2 = vmul.f32 0.01, %v25346_v61  ;;  %v6846_v24 = vmul.f32 0.01, %v25349_v10  ;;  %v6847_v8 = vmul.f32 0.01, %v25352_v3 }
 0x580   :  { %v6848_v41 = vmul.f32 0.01, %v25355_v21  ;;  %7044 = vst.msk [vmem:[#allocation2 + $0x51] sm:$0xff] %vm148_vm1, %v6892_v34  ;;  %v6849_v25 = vmul.f32 0.01, %v25358_v52  ;;  %vm30909_vm7 = vcmp.gt.f32.partialorder %v25295_v63, 0.0 }
 0x581   :  { %v6850_v18 = vmul.f32 0.01, %v25361_v14  ;;  %v6851_v9 = vmul.f32 0.01, %v25364_v30  ;;  %v6894_v13 = vsel %vm30909_vm7, %v25295_v63, %v6830_v44  ;;  %7045 = vst.msk [vmem:[#allocation2 + $0x61] sm:$0xff] %vm148_vm1, %v6893_v49  ;;  %vm30910_vm8 = vcmp.gt.f32.partialorder %v25298_v37, 0.0 }
 0x582   :  { %v6852_v55 = vmul.f32 0.01, %v25307_v6  ;;  %v6854_v11 = vmul.f32 0.01, %v25310_v40  ;;  %v6895_v50 = vsel %vm30910_vm8, %v25298_v37, %v6831_v36  ;;  %vm30911_vm9 = vcmp.gt.f32.partialorder %v25301_v23, 0.0  ;;  %7046 = vst.msk [vmem:[#allocation2 + $0x69] sm:$0xff] %vm148_vm1, %v6894_v13 }
 0x583   :  { %v6896_v45 = vsel %vm30911_vm9, %v25301_v23, %v6832_v7  ;;  %v7170_v34 = vld [vmem:[#allocation2 + $0x19] sm:$0xff]  ;;  %v6897_v63 = vsel %vm6769_vm15, %v25304_v62, %v6833_v28  ;;  %v6898_v44 = vsel %vm6770_vm2, %v25313_v54, %v6834_v26  ;;  %v6899_v49 = vsel %vm6771_vm3, %v25316_v31, %v6835_v20  ;;  %7047 = vst.msk [vmem:[#allocation2 + $0x79] sm:$0xff] %vm148_vm1, %v6895_v50  ;;  %v7171_v7 = vld [vmem:[#allocation2 + $0x21] sm:$0xff]  ;;  %v7172_v62 = vld [vmem:[#allocation2 + $0x31] sm:$0xff] }
 0x584   :  { %vm30912_vm10 = vcmp.gt.f32.partialorder %v25319_v43, 0.0  ;;  %7048 = vst.msk [vmem:[#allocation2 + $0x81] sm:$0xff] %vm148_vm1, %v6896_v45  ;;  %19761 = vmatprep.mubr.msk.f32.mxu1 %vm148_vm1, %v7170_v34  ;;  %vm30913_vm11 = vcmp.gt.f32.partialorder %v25322_v42, 0.0  ;;  %vm30914_vm15 = vcmp.gt.f32.partialorder %v25325_v57, 0.0  ;;  %vm30915_vm2 = vcmp.gt.f32.partialorder %v25328_v35, 0.0  ;;  %7049 = vst.msk [vmem:[#allocation2 + $0x91] sm:$0xff] %vm148_vm1, %v6897_v63 }
 0x585   :  { %v6900_v36 = vsel %vm30912_vm10, %v25319_v43, %v6836_v39  ;;  %v6901_v28 = vsel %vm30913_vm11, %v25322_v42, %v6837_v59  ;;  %v6902_v37 = vsel %vm30914_vm15, %v25325_v57, %v6838_v58  ;;  %v6903_v23 = vsel %vm30915_vm2, %v25328_v35, %v6839_v1  ;;  %7050 = vst.msk [vmem:[#allocation2 + $0x99] sm:$0xff] %vm148_vm1, %v6898_v44  ;;  %v7167_v43 = vld [vmem:[%s30329_s2] sm:$0xf]  ;;  %v30930_v34 = vld [vmem:[#allocation40_spill] sm:$0xff] }
 0x586   :  { %vm30916_vm3 = vcmp.gt.f32.partialorder %v25331_v33, 0.0  ;;  %7051 = vst.msk [vmem:[#allocation2 + $0xa9] sm:$0xff] %vm148_vm1, %v6899_v49  ;;  %7052 = vst.msk [vmem:[#allocation2 + $0xb1] sm:$0xff] %vm148_vm1, %v6900_v36  ;;  %19762 = vmatmul.mubr.msk.f32.gmra.mrb[34].mxu1 %vm148_vm1, %v7171_v7  ;;  %vm30917_vm7 = vcmp.gt.f32.partialorder %v25334_v15, 0.0  ;;  %vm30918_vm8 = vcmp.gt.f32.partialorder %v25337_v47, 0.0  ;;  %vm30919_vm9 = vcmp.gt.f32.partialorder %v25340_v53, 0.0 }
 0x587   :  { %v6904_v39 = vsel %vm30916_vm3, %v25331_v33, %v6840_v4  ;;  %v6905_v54 = vsel %vm30917_vm7, %v25334_v15, %v6841_v60  ;;  %v6906_v1 = vsel %vm30918_vm8, %v25337_v47, %v6842_v56  ;;  %v6907_v4 = vsel %vm30919_vm9, %v25340_v53, %v6843_v22  ;;  %7053 = vst.msk [vmem:[#allocation2 + $0xc1] sm:$0xff] %vm148_vm1, %v6901_v28  ;;  %v7173_v47 = vld [vmem:[#allocation2 + $0x39] sm:$0xff]  ;;  %v30931_v28 = vld [vmem:[#allocation43_spill] sm:$0xff] }
 0x588   :  { %v6908_v31 = vsel %vm6780_vm13, %v25343_v27, %v6844_v51  ;;  %7054 = vst.msk [vmem:[#allocation2 + $0xc9] sm:$0xff] %vm148_vm1, %v6902_v37  ;;  %7055 = vst.msk [vmem:[#allocation2 + $0xd9] sm:$0xff] %vm148_vm1, %v6903_v23  ;;  %19764 = vmatprep.mubr.msk.f32.mxu1 %vm148_vm1, %v7172_v62  ;;  %v6909_v22 = vsel %vm6781_vm14, %v25346_v61, %v6845_v2  ;;  %vm30920_vm13 = vcmp.gt.f32.partialorder %v25349_v10, 0.0  ;;  %vm30921_vm10 = vcmp.gt.f32.partialorder %v25352_v3, 0.0  ;;  %v7174_v61 = vld [vmem:[#allocation2 + $0x49] sm:$0xff]  ;;  %v7176_v59 = vld [vmem:[#allocation2 + $0x61] sm:$0xff] }
 0x589   :  { %7056 = vst.msk [vmem:[#allocation2 + $0xe1] sm:$0xff] %vm148_vm1, %v6904_v39  ;;  %v6910_v51 = vsel %vm30920_vm13, %v25349_v10, %v6846_v24  ;;  %v6911_v42 = vsel %vm30921_vm10, %v25352_v3, %v6847_v8  ;;  %vm30922_vm11 = vcmp.gt.f32.partialorder %v25355_v21, 0.0  ;;  %7057 = vst.msk [vmem:[#allocation2 + $0xf1] sm:$0xff] %vm148_vm1, %v6905_v54  ;;  %vm30923_vm14 = vcmask 1043456   ;;  %v30928_v60 = vld [vmem:[#allocation25_spill] sm:$0xff] }
 0x58a   :  { %v6912_v57 = vsel %vm30922_vm11, %v25355_v21, %v6848_v41  ;;  %7058 = vst.msk [vmem:[#allocation2 + $0xf9] sm:$0xff] %vm148_vm1, %v6906_v1  ;;  %7059 = vst.msk [vmem:[#allocation2 + $0x109] sm:$0xff] %vm148_vm1, %v6907_v4  ;;  %19854 = vmatprep.subr.msk.mxu1 %vm30923_vm14, %v7167_v43  ;;  %v6913_v35 = vsel %vm6785_vm5, %v25358_v52, %v6849_v25  ;;  %v6914_v8 = vsel %vm6786_vm4, %v25361_v14, %v6850_v18  ;;  %v7175_v14 = vld [vmem:[#allocation2 + $0x51] sm:$0xff]  ;;  %v7177_v41 = vld [vmem:[#allocation2 + $0x69] sm:$0xff] }
 0x58b   :  { %7060 = vst.msk [vmem:[#allocation2 + $0x111] sm:$0xff] %vm148_vm1, %v6908_v31  ;;  %v6915_v33 = vsel %vm6787_vm0, %v25364_v30, %v6851_v9  ;;  %v6916_v15 = vsel %vm6788_vm12, %v25307_v6, %v6852_v55  ;;  %7061 = vst.msk [vmem:[#allocation2 + $0x121] sm:$0xff] %vm148_vm1, %v6909_v22  ;;  %v6918_v18 = vsel %vm6790_vm6, %v25310_v40, %v6854_v11  ;;  %v30925_v6 = vld [vmem:[#allocation24_spill] sm:$0xff]  ;;  %19765 = vmatmul.mubr.msk.f32.gmra.mrb[36].mxu1 %vm148_vm1, %v7173_v47  ;;  %v30926_v40 = vld [vmem:[#allocation23_spill] sm:$0xff] }
 0x58c   :  { %7062 = vst.msk [vmem:[#allocation2 + $0x129] sm:$0xff] %vm148_vm1, %v6910_v51  ;;  %7063 = vst.msk [vmem:[#allocation2 + $0x139] sm:$0xff] %vm148_vm1, %v6911_v42  ;;  %v25565_v53 = vsub.f32 %v30925_v6, %v25177_v12  ;;  %v6521_v27 = vmul.f32 %v25266_v0, %v25266_v0  ;;  %v6620_v11 = vsel %vm148_vm1, %v25274_v5, 0.0  ;;  %19767 = vmatprep.mubr.msk.f32.mxu1 %vm148_vm1, %v7174_v61  ;;  %v6621_v21 = vsel %vm148_vm1, %v25391_v16, 0.0  ;;  %v30927_v30 = vld [vmem:[#allocation26_spill] sm:$0xff]  ;;  %v30929_v25 = vld [vmem:[#allocation41_spill] sm:$0xff] }
 0x58d   :  { %7064 = vst.msk [vmem:[#allocation2 + $0x141] sm:$0xff] %vm148_vm1, %v6912_v57  ;;  %vm30924_vm5 = vmmov %vm30923_vm14  ;;  %v25576_v10 = vsub.f32 %v30926_v40, %v25177_v12  ;;  %v6522_v3 = vmul.f32 %v25270_v48, %v25270_v48  ;;  %v6622_v52 = vadd.f32 %v6621_v21, %v6620_v11  ;;  %v25584_v26 = vsub.f32 %v30927_v30, %v25177_v12  ;;  %v7178_v50 = vld [vmem:[#allocation2 + $0x79] sm:$0xff]  ;;  %v7179_v7 = vld [vmem:[#allocation2 + $0x81] sm:$0xff] }
 0x58e   :  { %19855 = vmatpush3.msk.msra.mxu1 %vm30924_vm5, %v7167_v43  ;;  %7065 = vst.msk [vmem:[#allocation2 + $0x151] sm:$0xff] %vm148_vm1, %v6913_v35  ;;  %7066 = vst.msk [vmem:[#allocation2 + $0x159] sm:$0xff] %vm148_vm1, %v6914_v8  ;;  %v6523_v5 = vmul.f32 %v25565_v53, %v25565_v53  ;;  %v6623_v20 = vsel %vm148_vm1, %v6521_v27, 0.0  ;;  %v25593_v16 = vsub.f32 %v30928_v60, %v25177_v12  ;;  %v7180_v62 = vld [vmem:[#allocation2 + $0x91] sm:$0xff]  ;;  %v30932_v1 = vld [vmem:[#allocation42_spill] sm:$0xff] }
 0x58f   :  { %7067 = vst.msk [vmem:[#allocation2 + $0x169] sm:$0xff] %vm148_vm1, %v6915_v33  ;;  %7068 = vst.msk [vmem:[#allocation2 + $0x171] sm:$0xff] %vm148_vm1, %v6916_v15  ;;  %19768 = vmatmul.mubr.msk.f32.gmra.mrb[38].mxu1 %vm148_vm1, %v7175_v14  ;;  %v6624_v58 = vadd.f32 %v6623_v20, %v6622_v52  ;;  %v6524_v56 = vmul.f32 %v25576_v10, %v25576_v10  ;;  %v6625_v2 = vsel %vm148_vm1, %v6522_v3, 0.0  ;;  %v7181_v51 = vld [vmem:[#allocation2 + $0x99] sm:$0xff]  ;;  %v7182_v33 = vld [vmem:[#allocation2 + $0xa9] sm:$0xff] }
 0x590   :  { %7070 = vst.msk [vmem:[#allocation2 + $0x189] sm:$0xff] %vm148_vm1, %v6918_v18  ;;  %19770 = vmatprep.mubr.msk.f32.mxu1 %vm148_vm1, %v7176_v59  ;;  %v25600_v9 = vsub.f32 %v30929_v25, %v25177_v12  ;;  %v6525_v13 = vmul.f32 %v25584_v26, %v25584_v26  ;;  %v6627_v55 = vsel %vm148_vm1, %v6523_v5, 0.0  ;;  %v25609_v63 = vsub.f32 %v30930_v34, %v25177_v12  ;;  %v30933_v42 = vld [vmem:[#allocation45_spill] sm:$0xff]  ;;  %v30934_v47 = vld [vmem:[#allocation44_spill] sm:$0xff]  ;;  %v7185_v5 = vld [vmem:[#allocation2 + $0xc9] sm:$0xff] }
 0x591   :  { %v6626_v24 = vadd.f32 %v6625_v2, %v6624_v58  ;;  %v6526_v44 = vmul.f32 %v25593_v16, %v25593_v16  ;;  %v6629_v49 = vsel %vm148_vm1, %v6524_v56, 0.0  ;;  %v25616_v37 = vsub.f32 %v30931_v28, %v25177_v12  ;;  %v7183_v11 = vld [vmem:[#allocation2 + $0xb1] sm:$0xff]  ;;  %v7184_v21 = vld [vmem:[#allocation2 + $0xc1] sm:$0xff]  ;;  %v7186_v58 = vld [vmem:[#allocation2 + $0xd9] sm:$0xff] }
 0x592   :  { %v6527_v23 = vmul.f32 %v25600_v9, %v25600_v9  ;;  %v6631_v39 = vsel %vm148_vm1, %v6525_v13, 0.0  ;;  %v25625_v4 = vsub.f32 %v30932_v1, %v25177_v12  ;;  %v6528_v31 = vmul.f32 %v25609_v63, %v25609_v63  ;;  %v7190_v28 = vld [vmem:[#allocation2 + $0x109] sm:$0xff]  ;;  %v7191_v1 = vld [vmem:[#allocation2 + $0x111] sm:$0xff]  ;;  %vm30944_vm0 = vmmov %vm30924_vm5 }
 0x593   :  { %19771 = vmatmul.mubr.msk.f32.gmra.mrb[40].mxu1 %vm148_vm1, %v7177_v41  ;;  %v6628_v45 = vadd.f32 %v6627_v55, %v6626_v24  ;;  %v6633_v43 = vsel %vm148_vm1, %v6526_v44, 0.0  ;;  %v25632_v57 = vsub.f32 %v30933_v42, %v25177_v12  ;;  %v6529_v35 = vmul.f32 %v25616_v37, %v25616_v37  ;;  %v7187_v41 = vld [vmem:[#allocation2 + $0xe1] sm:$0xff]  ;;  %v7188_v55 = vld [vmem:[#allocation2 + $0xf1] sm:$0xff] }
 0x594   :  { %19773 = vmatprep.mubr.msk.f32.mxu1 %vm148_vm1, %v7178_v50  ;;  %v6635_v8 = vsel %vm148_vm1, %v6527_v23, 0.0  ;;  %v25641_v18 = vsub.f32 %v30934_v47, %v25177_v12  ;;  %v6530_v6 = vmul.f32 %v25625_v4, %v25625_v4  ;;  %v6637_v27 = vsel %vm148_vm1, %v6528_v31, 0.0  ;;  %v30935_v31 = vld [vmem:[#allocation46_spill] sm:$0xff] }
 0x595   :  { %v6630_v36 = vadd.f32 %v6629_v49, %v6628_v45  ;;  %v6531_v40 = vmul.f32 %v25632_v57, %v25632_v57  ;;  %v6639_v3 = vsel %vm148_vm1, %v6529_v35, 0.0  ;;  %v6533_v20 = vmul.f32 %v25181_v17, %v25181_v17  ;;  %v7189_v49 = vld [vmem:[#allocation2 + $0xf9] sm:$0xff]  ;;  %v30936_v35 = vld [vmem:[#allocation47_spill] sm:$0xff] }
 0x596   :  { %v6532_v12 = vmul.f32 %v25641_v18, %v25641_v18  ;;  %v6641_v14 = vsel %vm148_vm1, %v6530_v6, 0.0  ;;  %v6534_v56 = vmul.f32 %v25185_v29, %v25185_v29  ;;  %v6535_v25 = vmul.f32 %v25189_v32, %v25189_v32  ;;  %v7193_v47 = vld [vmem:[#allocation2 + $0x129] sm:$0xff]  ;;  %v30937_v6 = vld [vmem:[#allocation48_spill] sm:$0xff] }
 0x597   :  { %19774 = vmatmul.mubr.msk.f32.gmra.mrb[42].mxu1 %vm148_vm1, %v7179_v7  ;;  %v6632_v54 = vadd.f32 %v6631_v39, %v6630_v36  ;;  %v6643_v59 = vsel %vm148_vm1, %v6531_v40, 0.0  ;;  %v6647_v13 = vsel %vm148_vm1, %v6533_v20, 0.0  ;;  %v6536_v45 = vmul.f32 %v25193_v19, %v25193_v19 }
 0x598   :  { %19776 = vmatprep.mubr.msk.f32.mxu1 %vm148_vm1, %v7180_v62  ;;  %v6645_v2 = vsel %vm148_vm1, %v6532_v12, 0.0  ;;  %v6649_v34 = vsel %vm148_vm1, %v6534_v56, 0.0  ;;  %v6537_v36 = vmul.f32 %v25197_v38, %v25197_v38  ;;  %v6651_v7 = vsel %vm148_vm1, %v6535_v25, 0.0  ;;  %v30941_v25 = vld [vmem:[#allocation52_spill] sm:$0xff] }
 0x599   :  { %v6634_v22 = vadd.f32 %v6633_v43, %v6632_v54  ;;  %v6538_v39 = vmul.f32 %v25201_v46, %v25201_v46  ;;  %v6653_v62 = vsel %vm148_vm1, %v6536_v45, 0.0  ;;  %v6539_v43 = vmul.f32 %v30935_v31, %v30935_v31 }
 0x59b   :  { %19777 = vmatmul.mubr.msk.f32.gmra.mrb[44].mxu1 %vm148_vm1, %v7181_v51  ;;  %v6636_v15 = vadd.f32 %v6635_v8, %v6634_v22  ;;  %v6655_v22 = vsel %vm148_vm1, %v6537_v36, 0.0  ;;  %v7192_v51 = vld [vmem:[#allocation2 + $0x121] sm:$0xff]  ;;  %v6540_v8 = vmul.f32 %v30936_v35, %v30936_v35  ;;  %v7200_v36 = vld [vmem:[#allocation2 + $0x1b1] sm:$0xff] }
 0x59c   :  { %19779 = vmatprep.mubr.msk.f32.mxu1 %vm148_vm1, %v7182_v33  ;;  %v6657_v33 = vsel %vm148_vm1, %v6538_v39, 0.0 }
 0x59d   :  { %v6638_v61 = vadd.f32 %v6637_v27, %v6636_v15  ;;  %v6541_v27 = vmul.f32 %v30937_v6, %v30937_v6 }
 0x59f   :  { %19780 = vmatmul.mubr.msk.f32.gmra.mrb[46].mxu1 %vm148_vm1, %v7183_v11  ;;  %v6640_v52 = vadd.f32 %v6639_v3, %v6638_v61  ;;  %v6659_v61 = vsel %vm148_vm1, %v6539_v43, 0.0  ;;  %v7194_v11 = vld [vmem:[#allocation2 + $0x139] sm:$0xff]  ;;  %v6663_v20 = vsel %vm148_vm1, %v6541_v27, 0.0 }
 0x5a0   :  { %19782 = vmatprep.mubr.msk.f32.mxu1 %vm148_vm1, %v7184_v21  ;;  %v30938_v3 = vld [vmem:[#allocation49_spill] sm:$0xff] }
 0x5a1   :  { %v6642_v30 = vadd.f32 %v6641_v14, %v6640_v52  ;;  %v6542_v21 = vmul.f32 %v30938_v3, %v30938_v3  ;;  %v6661_v52 = vsel %vm148_vm1, %v6540_v8, 0.0  ;;  %v7195_v14 = vld [vmem:[#allocation2 + $0x141] sm:$0xff]  ;;  %v7201_v43 = vld [vmem:[#allocation2 + $0x1b9] sm:$0xff] }
 0x5a3   :  { %19783 = vmatmul.mubr.msk.f32.gmra.mrb[48].mxu1 %vm148_vm1, %v7185_v5  ;;  %v6644_v60 = vadd.f32 %v6643_v59, %v6642_v30  ;;  %v30939_v30 = vld [vmem:[#allocation50_spill] sm:$0xff]  ;;  %v7196_v59 = vld [vmem:[#allocation2 + $0x151] sm:$0xff] }
 0x5a4   :  { %19785 = vmatprep.mubr.msk.f32.mxu1 %vm148_vm1, %v7186_v58  ;;  %v6543_v5 = vmul.f32 %v30939_v30, %v30939_v30 }
 0x5a5   :  { %v6646_v24 = vadd.f32 %v6645_v2, %v6644_v60  ;;  %v30940_v60 = vld [vmem:[#allocation51_spill] sm:$0xff]  ;;  %v6665_v2 = vsel %vm148_vm1, %v6542_v21, 0.0 }
 0x5a6   :  { %v6544_v56 = vmul.f32 %v30940_v60, %v30940_v60 }
 0x5a7   :  { %19786 = vmatmul.mubr.msk.f32.gmra.mrb[50].mxu1 %vm148_vm1, %v7187_v41  ;;  %v6648_v50 = vadd.f32 %v6647_v13, %v6646_v24  ;;  %v7197_v41 = vld [vmem:[#allocation2 + $0x159] sm:$0xff]  ;;  %v6545_v13 = vmul.f32 %v30941_v25, %v30941_v25 }
 0x5a8   :  { %19788 = vmatprep.mubr.msk.f32.mxu1 %vm148_vm1, %v7188_v55  ;;  %v6667_v55 = vsel %vm148_vm1, %v6543_v5, 0.0 }
 0x5a9   :  { %v6650_v44 = vadd.f32 %v6649_v34, %v6648_v50  ;;  %v7198_v50 = vld [vmem:[#allocation2 + $0x169] sm:$0xff]  ;;  %v30942_v34 = vld [vmem:[#allocation53_spill] sm:$0xff] }
 0x5ab   :  { %19789 = vmatmul.mubr.msk.f32.gmra.mrb[52].mxu1 %vm148_vm1, %v7189_v49  ;;  %v6652_v23 = vadd.f32 %v6651_v7, %v6650_v44  ;;  %v6546_v44 = vmul.f32 %v30942_v34, %v30942_v34  ;;  %v6669_v49 = vsel %vm148_vm1, %v6544_v56, 0.0 }
 0x5ac   :  { %19791 = vmatprep.mubr.msk.f32.mxu1 %vm148_vm1, %v7190_v28  ;;  %v7199_v28 = vld [vmem:[#allocation2 + $0x171] sm:$0xff] }
 0x5ad   :  { %v6654_v54 = vadd.f32 %v6653_v62, %v6652_v23  ;;  %v30943_v23 = vld [vmem:[#allocation54_spill] sm:$0xff]  ;;  %v6671_v62 = vsel %vm148_vm1, %v6545_v13, 0.0 }
 0x5ae   :  { %v6547_v39 = vmul.f32 %v30943_v23, %v30943_v23 }
 0x5af   :  { %19792 = vmatmul.mubr.msk.f32.gmra.mrb[54].mxu1 %vm148_vm1, %v7191_v1  ;;  %v6656_v42 = vadd.f32 %v6655_v22, %v6654_v54  ;;  %v25717_v54 = vld [vmem:[%s30329_s2 + $0x8] sm:$0xf]  ;;  %v30945_v22 = vld [vmem:[#allocation55_spill] sm:$0xff] }
 0x5b0   :  { %19794 = vmatprep.mubr.msk.f32.mxu1 %vm148_vm1, %v7192_v51  ;;  %19952 = vmatprep.subr.msk.mxu1 %vm30944_vm0, %v25717_v54  ;;  %v6548_v51 = vmul.f32 %v30945_v22, %v30945_v22 }
 0x5b1   :  { %v6658_v15 = vadd.f32 %v6657_v33, %v6656_v42  ;;  %v6673_v42 = vsel %vm148_vm1, %v6546_v44, 0.0  ;;  %v30946_v33 = vld [vmem:[#allocation56_spill] sm:$0xff] }
 0x5b3   :  { %19795 = vmatmul.mubr.msk.f32.gmra.mrb[56].mxu1 %vm148_vm1, %v7193_v47  ;;  %v6660_v40 = vadd.f32 %v6659_v61, %v6658_v15  ;;  %v6549_v15 = vmul.f32 %v30946_v33, %v30946_v33  ;;  %v6675_v47 = vsel %vm148_vm1, %v6547_v39, 0.0  ;;  %v30947_v61 = vld [vmem:[#allocation57_spill] sm:$0xff] }
 0x5b4   :  { %19797 = vmatprep.mubr.msk.f32.mxu1 %vm148_vm1, %v7194_v11  ;;  %v6550_v11 = vmul.f32 %v30947_v61, %v30947_v61 }
 0x5b5   :  { %v6662_v12 = vadd.f32 %v6661_v52, %v6660_v40  ;;  %v6677_v40 = vsel %vm148_vm1, %v6548_v51, 0.0  ;;  %v6679_v52 = vsel %vm148_vm1, %v6549_v15, 0.0 }
 0x5b7   :  { %19798 = vmatmul.mubr.msk.f32.gmra.mrb[58].mxu1 %vm148_vm1, %v7195_v14  ;;  %v6664_v58 = vadd.f32 %v6663_v20, %v6662_v12  ;;  %v6681_v14 = vsel %vm148_vm1, %v6550_v11, 0.0 }
 0x5b8   :  { %19800 = vmatprep.mubr.msk.f32.mxu1 %vm148_vm1, %v7196_v59 }
 0x5b9   :  { %v6666_v24 = vadd.f32 %v6665_v2, %v6664_v58 }
 0x5bb   :  { %19801 = vmatmul.mubr.msk.f32.gmra.mrb[60].mxu1 %vm148_vm1, %v7197_v41  ;;  %v6668_v45 = vadd.f32 %v6667_v55, %v6666_v24 }
 0x5bc   :  { %19803 = vmatprep.mubr.msk.f32.mxu1 %vm148_vm1, %v7198_v50 }
 0x5bd   :  { %v6670_v7 = vadd.f32 %v6669_v49, %v6668_v45  ;;  %v30948_v49 = vld [vmem:[#allocation58_spill] sm:$0xff] }
 0x5bf   :  { %19804 = vmatmul.mubr.msk.f32.gmra.mrb[62].mxu1 %vm148_vm1, %v7199_v28  ;;  %v6672_v1 = vadd.f32 %v6671_v62, %v6670_v7  ;;  %v30949_v7 = vld [vmem:[#allocation59_spill] sm:$0xff] }
 0x5c0   :  { %19806 = vmatprep.mubr.msk.f32.mxu1 %vm148_vm1, %v7200_v36 }
 0x5c1   :  { %v6674_v8 = vadd.f32 %v6673_v42, %v6672_v1 }
 0x5c3   :  { %19807 = vmatmul.mubr.msk.f32.gmra.mrb[64].mxu1 %vm148_vm1, %v7201_v43  ;;  %v6676_v27 = vadd.f32 %v6675_v47, %v6674_v8 }
 0x5c5   :  { %v6678_v21 = vadd.f32 %v6677_v40, %v6676_v27 }
 0x5c7   :  { %v6680_v12 = vadd.f32 %v6679_v52, %v6678_v21 }
 0x5c9   :  { %v6682_v5 = vadd.f32 %v6681_v14, %v6680_v12 }
 0x5cb   :  { %v6683_v20 = vrot.slane %v6682_v5, 4 }
 0x5cd   :  { %v6684_v59 = vadd.f32 %v6683_v20, %v6682_v5 }
 0x5cf   :  { %v6685_v58 = vrot.slane %v6684_v59, 2 }
 0x5d1   :  { %v6686_v56 = vadd.f32 %v6685_v58, %v6684_v59 }
 0x5d3   :  { %v6687_v2 = vrot.slane %v6686_v56, 1 }
 0x5d5   :  { %v6688_v24 = vadd.f32 %v6687_v2, %v6686_v56 }
 0x5d7   :  { %v6690_v41 = vmul.f32 0.00390625, %v6688_v24 }
 0x5d9   :  { %v6692_v13 = vadd.f32 1e-05, %v6690_v41 }
 0x5db   :  { %21766 = vrsqrt.f32 %v6692_v13 }
 0x5e5   :  { %v21767_v55 = vpop.eup %21766 }
 0x5e6   :  { %v6757_v50 = vmul.f32 %v21767_v55, %v30946_v33  ;;  %v6727_v36 = vmul.f32 %v21767_v55, %v30948_v49  ;;  %v25738_v28 = vmul.f32 %v21767_v55, %v30949_v7  ;;  %v25741_v39 = vmul.f32 %v21767_v55, %v25266_v0 }
 0x5e7   :  { %v25744_v62 = vmul.f32 %v21767_v55, %v25270_v48  ;;  %v25747_v1 = vmul.f32 %v21767_v55, %v25565_v53  ;;  %v25750_v43 = vmul.f32 %v21767_v55, %v25576_v10  ;;  %v25753_v51 = vmul.f32 %v21767_v55, %v25584_v26 }
 0x5e8   :  { %vm6821_vm12 = vcmp.gt.f32.partialorder %v6757_v50, 0.0  ;;  %v6885_v45 = vmul.f32 0.01, %v6757_v50  ;;  %v25756_v42 = vmul.f32 %v21767_v55, %v25593_v16  ;;  %v25759_v8 = vmul.f32 %v21767_v55, %v25600_v9 }
 0x5e9   :  { %v25762_v0 = vmul.f32 %v21767_v55, %v25609_v63  ;;  %v25765_v48 = vmul.f32 %v21767_v55, %v25616_v37  ;;  %v25768_v53 = vmul.f32 %v21767_v55, %v30945_v22  ;;  %v25771_v10 = vmul.f32 %v21767_v55, %v30947_v61 }
 0x5ea   :  { %v6949_v44 = vsel %vm6821_vm12, %v6757_v50, %v6885_v45  ;;  %v25774_v26 = vmul.f32 %v21767_v55, %v25625_v4  ;;  %v25777_v16 = vmul.f32 %v21767_v55, %v25632_v57  ;;  %v25780_v9 = vmul.f32 %v21767_v55, %v25641_v18 }
 0x5eb   :  { %7101 = vst.msk [vmem:[#allocation2 + $0x331] sm:$0xff] %vm148_vm1, %v6949_v44  ;;  %v25783_v63 = vmul.f32 %v21767_v55, %v25181_v17  ;;  %v25786_v37 = vmul.f32 %v21767_v55, %v25185_v29  ;;  %v25789_v22 = vmul.f32 %v21767_v55, %v25189_v32  ;;  %v25792_v33 = vmul.f32 %v21767_v55, %v25193_v19 }
 0x5ec   :  { %v25795_v4 = vmul.f32 %v21767_v55, %v25197_v38  ;;  %v25798_v57 = vmul.f32 %v21767_v55, %v25201_v46  ;;  %v25801_v18 = vmul.f32 %v21767_v55, %v30935_v31  ;;  %v25804_v17 = vmul.f32 %v21767_v55, %v30936_v35 }
 0x5ed   :  { %v25807_v29 = vmul.f32 %v21767_v55, %v30937_v6  ;;  %v25810_v32 = vmul.f32 %v21767_v55, %v30938_v3  ;;  %v25813_v19 = vmul.f32 %v21767_v55, %v30939_v30  ;;  %v25816_v38 = vmul.f32 %v21767_v55, %v30940_v60 }
 0x5ee   :  { %v25819_v46 = vmul.f32 %v21767_v55, %v30941_v25  ;;  %v25822_v31 = vmul.f32 %v21767_v55, %v30942_v34  ;;  %v25825_v35 = vmul.f32 %v21767_v55, %v30943_v23  ;;  %vm6791_vm4 = vcmp.gt.f32.partialorder %v6727_v36, 0.0 }
 0x5ef   :  { %vm6792_vm6 = vcmp.gt.f32.partialorder %v25738_v28, 0.0  ;;  %vm6793_vm15 = vcmp.gt.f32.partialorder %v25741_v39, 0.0  ;;  %vm6794_vm2 = vcmp.gt.f32.partialorder %v25744_v62, 0.0  ;;  %vm6795_vm3 = vcmp.gt.f32.partialorder %v25747_v1, 0.0 }
 0x5f0   :  { %vm6796_vm7 = vcmp.gt.f32.partialorder %v25750_v43, 0.0  ;;  %vm6800_vm10 = vcmp.gt.f32.partialorder %v25762_v0, 0.0  ;;  %vm6801_vm11 = vcmp.gt.f32.partialorder %v25765_v48, 0.0  ;;  %v6855_v6 = vmul.f32 0.01, %v6727_v36 }
 0x5f1   :  { %v6856_v3 = vmul.f32 0.01, %v25738_v28  ;;  %vm6806_vm8 = vcmp.gt.f32.partialorder %v25786_v37, 0.0  ;;  %v6857_v30 = vmul.f32 0.01, %v25741_v39  ;;  %vm6811_vm14 = vcmp.gt.f32.partialorder %v25801_v18, 0.0 }
 0x5f2   :  { %v6858_v60 = vmul.f32 0.01, %v25744_v62  ;;  %v6859_v25 = vmul.f32 0.01, %v25747_v1  ;;  %vm6812_vm12 = vcmp.gt.f32.partialorder %v25804_v17, 0.0  ;;  %v6919_v47 = vsel %vm6791_vm4, %v6727_v36, %v6855_v6 }
 0x5f3   :  { %v6860_v34 = vmul.f32 0.01, %v25750_v43  ;;  %v6861_v23 = vmul.f32 0.01, %v25753_v51  ;;  %v6862_v15 = vmul.f32 0.01, %v25756_v42  ;;  %v6920_v40 = vsel %vm6792_vm6, %v25738_v28, %v6856_v3 }
 0x5f4   :  { %vm6813_vm13 = vcmp.gt.f32.partialorder %v25807_v29, 0.0  ;;  %v6863_v27 = vmul.f32 0.01, %v25759_v8  ;;  %v6864_v61 = vmul.f32 0.01, %v25762_v0  ;;  %7071 = vst.msk [vmem:[#allocation2 + $0x1c9] sm:$0xff] %vm148_vm1, %v6919_v47  ;;  %v6921_v14 = vsel %vm6793_vm15, %v25741_v39, %v6857_v30 }
 0x5f5   :  { %v6865_v11 = vmul.f32 0.01, %v25765_v48  ;;  %vm6817_vm4 = vcmp.gt.f32.partialorder %v25819_v46, 0.0  ;;  %vm6818_vm9 = vcmp.gt.f32.partialorder %v25822_v31, 0.0  ;;  %vm6819_vm5 = vcmp.gt.f32.partialorder %v25825_v35, 0.0  ;;  %7072 = vst.msk [vmem:[#allocation2 + $0x1d1] sm:$0xff] %vm148_vm1, %v6920_v40 }
 0x5f6   :  { %vm6820_vm0 = vcmp.gt.f32.partialorder %v25768_v53, 0.0  ;;  %v6866_v21 = vmul.f32 0.01, %v25774_v26  ;;  %v6867_v52 = vmul.f32 0.01, %v25777_v16  ;;  %vm6822_vm6 = vcmp.gt.f32.partialorder %v25771_v10, 0.0 }
 0x5f7   :  { %v6868_v12 = vmul.f32 0.01, %v25780_v9  ;;  %v6869_v5 = vmul.f32 0.01, %v25783_v63  ;;  %v6870_v20 = vmul.f32 0.01, %v25786_v37  ;;  %v6922_v58 = vsel %vm6794_vm2, %v25744_v62, %v6858_v60 }
 0x5f8   :  { %v6871_v59 = vmul.f32 0.01, %v25789_v22  ;;  %7073 = vst.msk [vmem:[#allocation2 + $0x1e1] sm:$0xff] %vm148_vm1, %v6921_v14  ;;  %v6872_v56 = vmul.f32 0.01, %v25792_v33  ;;  %v6923_v41 = vsel %vm6795_vm3, %v25747_v1, %v6859_v25  ;;  %7074 = vst.msk [vmem:[#allocation2 + $0x1e9] sm:$0xff] %vm148_vm1, %v6922_v58  ;;  %v6924_v45 = vsel %vm6796_vm7, %v25750_v43, %v6860_v34 }
 0x5f9   :  { %v6873_v2 = vmul.f32 0.01, %v25795_v4  ;;  %v6874_v24 = vmul.f32 0.01, %v25798_v57  ;;  %v6875_v13 = vmul.f32 0.01, %v25801_v18  ;;  %v6928_v3 = vsel %vm6800_vm10, %v25762_v0, %v6864_v61 }
 0x5fa   :  { %v6876_v55 = vmul.f32 0.01, %v25804_v17  ;;  %v6877_v50 = vmul.f32 0.01, %v25807_v29  ;;  %7075 = vst.msk [vmem:[#allocation2 + $0x1f9] sm:$0xff] %vm148_vm1, %v6923_v41  ;;  %vm30950_vm15 = vcmp.gt.f32.partialorder %v25753_v51, 0.0 }
 0x5fb   :  { %v6878_v44 = vmul.f32 0.01, %v25810_v32  ;;  %v6879_v49 = vmul.f32 0.01, %v25813_v19  ;;  %v6880_v36 = vmul.f32 0.01, %v25816_v38  ;;  %v6925_v7 = vsel %vm30950_vm15, %v25753_v51, %v6861_v23 }
 0x5fc   :  { %7076 = vst.msk [vmem:[#allocation2 + $0x201] sm:$0xff] %vm148_vm1, %v6924_v45  ;;  %v6881_v28 = vmul.f32 0.01, %v25819_v46  ;;  %v6882_v39 = vmul.f32 0.01, %v25822_v31  ;;  %vm30951_vm2 = vcmp.gt.f32.partialorder %v25756_v42, 0.0  ;;  %v6940_v34 = vsel %vm6812_vm12, %v25804_v17, %v6876_v55 }
 0x5fd   :  { %v6883_v62 = vmul.f32 0.01, %v25825_v35  ;;  %v6926_v1 = vsel %vm30951_vm2, %v25756_v42, %v6862_v15  ;;  %7077 = vst.msk [vmem:[#allocation2 + $0x211] sm:$0xff] %vm148_vm1, %v6925_v7  ;;  %v6884_v43 = vmul.f32 0.01, %v25768_v53  ;;  %vm30952_vm3 = vcmp.gt.f32.partialorder %v25759_v8, 0.0 }
 0x5fe   :  { %v6886_v6 = vmul.f32 0.01, %v25771_v10  ;;  %v6927_v51 = vsel %vm30952_vm3, %v25759_v8, %v6863_v27  ;;  %7078 = vst.msk [vmem:[#allocation2 + $0x219] sm:$0xff] %vm148_vm1, %v6926_v1  ;;  %v7202_v30 = vld [vmem:[#allocation2 + $0x1c9] sm:$0xff]  ;;  %v6929_v42 = vsel %vm6801_vm11, %v25765_v48, %v6865_v11  ;;  %vm30953_vm7 = vcmp.gt.f32.partialorder %v25774_v26, 0.0  ;;  %7080 = vst.msk [vmem:[#allocation2 + $0x231] sm:$0xff] %vm148_vm1, %v6928_v3 }
 0x5ff   :  { %v6930_v60 = vsel %vm30953_vm7, %v25774_v26, %v6866_v21  ;;  %vm30954_vm15 = vcmp.gt.f32.partialorder %v25777_v16, 0.0  ;;  %vm30955_vm2 = vcmp.gt.f32.partialorder %v25780_v9, 0.0  ;;  %7079 = vst.msk [vmem:[#allocation2 + $0x229] sm:$0xff] %vm148_vm1, %v6927_v51  ;;  %19809 = vmatprep.mubr.msk.f32.mxu1 %vm148_vm1, %v7202_v30  ;;  %v7203_v0 = vld [vmem:[#allocation2 + $0x1d1] sm:$0xff]  ;;  %vm30956_vm10 = vcmp.gt.f32.partialorder %v25783_v63, 0.0  ;;  %7081 = vst.msk [vmem:[#allocation2 + $0x241] sm:$0xff] %vm148_vm1, %v6929_v42 }
 0x600   :  { %v6931_v25 = vsel %vm30954_vm15, %v25777_v16, %v6867_v52  ;;  %v6932_v8 = vsel %vm30955_vm2, %v25780_v9, %v6868_v12  ;;  %v6933_v48 = vsel %vm30956_vm10, %v25783_v63, %v6869_v5  ;;  %v6934_v26 = vsel %vm6806_vm8, %v25786_v37, %v6870_v20  ;;  %7082 = vst.msk [vmem:[#allocation2 + $0x249] sm:$0xff] %vm148_vm1, %v6930_v60  ;;  %v7204_v63 = vld [vmem:[#allocation2 + $0x1e1] sm:$0xff]  ;;  %v26046_v7 = vld [vmem:[%s30329_s2 + $0xc] sm:$0xf]  ;;  %v26082_v51 = vld [vmem:[#allocation2 + $0x78] sm:$0xff] }
 0x601   :  { %vm30957_vm11 = vcmp.gt.f32.partialorder %v25789_v22, 0.0  ;;  %vm30958_vm3 = vcmp.gt.f32.partialorder %v25792_v33, 0.0  ;;  %7083 = vst.msk [vmem:[#allocation2 + $0x259] sm:$0xff] %vm148_vm1, %v6931_v25  ;;  %7084 = vst.msk [vmem:[#allocation2 + $0x261] sm:$0xff] %vm148_vm1, %v6932_v8  ;;  %19810 = vmatmul.mubr.msk.f32.gmra.mrb[66].mxu1 %vm148_vm1, %v7203_v0  ;;  %vm30959_vm8 = vcmp.gt.f32.partialorder %v25795_v4, 0.0  ;;  %vm30960_vm7 = vcmp.gt.f32.partialorder %v25798_v57, 0.0 }
 0x602   :  { %v6935_v16 = vsel %vm30957_vm11, %v25789_v22, %v6871_v59  ;;  %v6936_v9 = vsel %vm30958_vm3, %v25792_v33, %v6872_v56  ;;  %v6937_v37 = vsel %vm30959_vm8, %v25795_v4, %v6873_v2  ;;  %v6938_v22 = vsel %vm30960_vm7, %v25798_v57, %v6874_v24  ;;  %7085 = vst.msk [vmem:[#allocation2 + $0x271] sm:$0xff] %vm148_vm1, %v6933_v48  ;;  %v7103_v45 = vld [vmem:[#allocation2] sm:$0xff]  ;;  %v26066_v1 = vld [vmem:[#allocation2 + $0x48] sm:$0xff]  ;;  %v26090_v30 = vld [vmem:[#allocation2 + $0x90] sm:$0xff] }
 0x603   :  { %v6939_v33 = vsel %vm6811_vm14, %v25801_v18, %v6875_v13  ;;  %7086 = vst.msk [vmem:[#allocation2 + $0x279] sm:$0xff] %vm148_vm1, %v6934_v26  ;;  %7087 = vst.msk [vmem:[#allocation2 + $0x289] sm:$0xff] %vm148_vm1, %v6935_v16  ;;  %19812 = vmatprep.mubr.msk.f32.mxu1 %vm148_vm1, %v7204_v63  ;;  %v6941_v4 = vsel %vm6813_vm13, %v25807_v29, %v6877_v50  ;;  %vm30961_vm14 = vcmp.gt.f32.partialorder %v25810_v32, 0.0  ;;  %vm30962_vm12 = vcmp.gt.f32.partialorder %v25813_v19, 0.0  ;;  %v26086_v3 = vld [vmem:[#allocation2 + $0x80] sm:$0xff]  ;;  %v26094_v42 = vld [vmem:[#allocation2 + $0x98] sm:$0xff] }
 0x604   :  { %7088 = vst.msk [vmem:[#allocation2 + $0x291] sm:$0xff] %vm148_vm1, %v6936_v9  ;;  %v6942_v57 = vsel %vm30961_vm14, %v25810_v32, %v6878_v44  ;;  %v6943_v18 = vsel %vm30962_vm12, %v25813_v19, %v6879_v49  ;;  %vm30963_vm15 = vcmp.gt.f32.partialorder %v25816_v38, 0.0  ;;  %7089 = vst.msk [vmem:[#allocation2 + $0x2a1] sm:$0xff] %vm148_vm1, %v6937_v37  ;;  %v6945_v29 = vsel %vm6817_vm4, %v25819_v46, %v6881_v28  ;;  %v7205_v46 = vld [vmem:[#allocation2 + $0x1e9] sm:$0xff]  ;;  %v7208_v23 = vld [vmem:[#allocation2 + $0x211] sm:$0xff] }
 0x605   :  { %v6944_v17 = vsel %vm30963_vm15, %v25816_v38, %v6880_v36  ;;  %7090 = vst.msk [vmem:[#allocation2 + $0x2a9] sm:$0xff] %vm148_vm1, %v6938_v22  ;;  %7091 = vst.msk [vmem:[#allocation2 + $0x2b9] sm:$0xff] %vm148_vm1, %v6939_v33  ;;  %v6946_v32 = vsel %vm6818_vm9, %v25822_v31, %v6882_v39  ;;  %v6947_v19 = vsel %vm6819_vm5, %v25825_v35, %v6883_v62  ;;  %19813 = vmatmul.mubr.msk.f32.gmra.mrb[68].mxu1 %vm148_vm1, %v7205_v46  ;;  %v7207_v35 = vld [vmem:[#allocation2 + $0x201] sm:$0xff]  ;;  %v7211_v47 = vld [vmem:[#allocation2 + $0x231] sm:$0xff]  ;;  %vm30964_vm9 = vcmask 1043456  }
 0x606   :  { %7092 = vst.msk [vmem:[#allocation2 + $0x2c1] sm:$0xff] %vm148_vm1, %v6940_v34  ;;  %v6948_v38 = vsel %vm6820_vm0, %v25768_v53, %v6884_v43  ;;  %7093 = vst.msk [vmem:[#allocation2 + $0x2d1] sm:$0xff] %vm148_vm1, %v6941_v4  ;;  %v6950_v31 = vsel %vm6822_vm6, %v25771_v10, %v6886_v6  ;;  %v7206_v53 = vld [vmem:[#allocation2 + $0x1f9] sm:$0xff]  ;;  %v7210_v15 = vld [vmem:[#allocation2 + $0x229] sm:$0xff] }
 0x607   :  { %7094 = vst.msk [vmem:[#allocation2 + $0x2d9] sm:$0xff] %vm148_vm1, %v6942_v57  ;;  %7095 = vst.msk [vmem:[#allocation2 + $0x2e9] sm:$0xff] %vm148_vm1, %v6943_v18  ;;  %19815 = vmatprep.mubr.msk.f32.mxu1 %vm148_vm1, %v7206_v53  ;;  %v7209_v10 = vld [vmem:[#allocation2 + $0x219] sm:$0xff]  ;;  %v7212_v27 = vld [vmem:[#allocation2 + $0x241] sm:$0xff] }
 0x608   :  { %7096 = vst.msk [vmem:[#allocation2 + $0x2f1] sm:$0xff] %vm148_vm1, %v6944_v17  ;;  %7097 = vst.msk [vmem:[#allocation2 + $0x301] sm:$0xff] %vm148_vm1, %v6945_v29  ;;  %v7213_v61 = vld [vmem:[#allocation2 + $0x249] sm:$0xff]  ;;  %v7214_v11 = vld [vmem:[#allocation2 + $0x259] sm:$0xff] }
 0x609   :  { %7098 = vst.msk [vmem:[#allocation2 + $0x309] sm:$0xff] %vm148_vm1, %v6946_v32  ;;  %7099 = vst.msk [vmem:[#allocation2 + $0x319] sm:$0xff] %vm148_vm1, %v6947_v19  ;;  %19816 = vmatmul.mubr.msk.f32.gmra.mrb[70].mxu1 %vm148_vm1, %v7207_v35  ;;  %v7215_v40 = vld [vmem:[#allocation2 + $0x261] sm:$0xff]  ;;  %v7216_v21 = vld [vmem:[#allocation2 + $0x271] sm:$0xff] }
 0x60a   :  { %7100 = vst.msk [vmem:[#allocation2 + $0x321] sm:$0xff] %vm148_vm1, %v6948_v38  ;;  %7102 = vst.msk [vmem:[#allocation2 + $0x339] sm:$0xff] %vm148_vm1, %v6950_v31  ;;  %19818 = vmatprep.mubr.msk.f32.mxu1 %vm148_vm1, %v7208_v23  ;;  %v7217_v52 = vld [vmem:[#allocation2 + $0x279] sm:$0xff]  ;;  %v7218_v12 = vld [vmem:[#allocation2 + $0x289] sm:$0xff] }
 0x60b   :  { %v7219_v14 = vld [vmem:[#allocation2 + $0x291] sm:$0xff]  ;;  %v7220_v5 = vld [vmem:[#allocation2 + $0x2a1] sm:$0xff]  ;;  %vm30965_vm13 = vmmov %vm30964_vm9 }
 0x60c   :  { %v7221_v20 = vld [vmem:[#allocation2 + $0x2a9] sm:$0xff]  ;;  %v7222_v59 = vld [vmem:[#allocation2 + $0x2b9] sm:$0xff]  ;;  %vm30970_vm5 = vmmov %vm30964_vm9 }
 0x60d   :  { %19819 = vmatmul.mubr.msk.f32.gmra.mrb[72].mxu1 %vm148_vm1, %v7209_v10  ;;  %v7223_v58 = vld [vmem:[#allocation2 + $0x2c1] sm:$0xff]  ;;  %v7224_v56 = vld [vmem:[#allocation2 + $0x2d1] sm:$0xff]  ;;  %vm30971_vm0 = vmmov %vm30970_vm5 }
 0x60e   :  { %19821 = vmatprep.mubr.msk.f32.mxu1 %vm148_vm1, %v7210_v15  ;;  %v7225_v2 = vld [vmem:[#allocation2 + $0x2d9] sm:$0xff]  ;;  %v7226_v24 = vld [vmem:[#allocation2 + $0x2e9] sm:$0xff]  ;;  %vm31026_vm4 = vmmov %vm30971_vm0 }
 0x60f   :  { %v7227_v41 = vld [vmem:[#allocation2 + $0x2f1] sm:$0xff]  ;;  %v7228_v13 = vld [vmem:[#allocation2 + $0x301] sm:$0xff]  ;;  %vm31027_vm6 = vmmov %vm30971_vm0 }
 0x610   :  { %v7229_v55 = vld [vmem:[#allocation2 + $0x309] sm:$0xff]  ;;  %v7230_v50 = vld [vmem:[#allocation2 + $0x319] sm:$0xff]  ;;  %vm31031_vm2 = vmmov %vm30971_vm0 }
 0x611   :  { %19822 = vmatmul.mubr.msk.f32.gmra.mrb[74].mxu1 %vm148_vm1, %v7211_v47  ;;  %v7231_v44 = vld [vmem:[#allocation2 + $0x321] sm:$0xff]  ;;  %v26041_v36 = vld [vmem:[#allocation2 + $0x18] sm:$0xff]  ;;  %v26058_v39 = vld [vmem:[#allocation2 + $0x30] sm:$0xff] }
 0x612   :  { %19824 = vmatprep.mubr.msk.f32.mxu1 %vm148_vm1, %v7212_v27  ;;  %v7104_v49 = vld [vmem:[#allocation2 + $0x8] sm:$0xff]  ;;  %v26054_v28 = vld [vmem:[#allocation2 + $0x20] sm:$0xff]  ;;  %v26062_v62 = vld [vmem:[#allocation2 + $0x38] sm:$0xff] }
 0x613   :  { %v26074_v43 = vld [vmem:[#allocation2 + $0x60] sm:$0xff]  ;;  %v26078_v6 = vld [vmem:[#allocation2 + $0x68] sm:$0xff]  ;;  %v26102_v25 = vld [vmem:[#allocation2 + $0xb0] sm:$0xff] }
 0x614   :  { %v26098_v60 = vld [vmem:[#allocation2 + $0xa8] sm:$0xff]  ;;  %v26106_v8 = vld [vmem:[#allocation2 + $0xc0] sm:$0xff]  ;;  %v26114_v48 = vld [vmem:[#allocation2 + $0xd8] sm:$0xff] }
 0x615   :  { %19825 = vmatmul.mubr.msk.f32.gmra.mrb[76].mxu1 %vm148_vm1, %v7213_v61  ;;  %v26110_v0 = vld [vmem:[#allocation2 + $0xc8] sm:$0xff]  ;;  %v26118_v26 = vld [vmem:[#allocation2 + $0xe0] sm:$0xff]  ;;  %v26122_v16 = vld [vmem:[#allocation2 + $0xf0] sm:$0xff] }
 0x616   :  { %19827 = vmatprep.mubr.msk.f32.mxu1 %vm148_vm1, %v7214_v11  ;;  %v26126_v9 = vld [vmem:[#allocation2 + $0xf8] sm:$0xff]  ;;  %v26130_v63 = vld [vmem:[#allocation2 + $0x108] sm:$0xff]  ;;  %v26134_v37 = vld [vmem:[#allocation2 + $0x110] sm:$0xff] }
 0x617   :  { %v26138_v22 = vld [vmem:[#allocation2 + $0x120] sm:$0xff]  ;;  %v26142_v33 = vld [vmem:[#allocation2 + $0x128] sm:$0xff]  ;;  %v26146_v34 = vld [vmem:[#allocation2 + $0x138] sm:$0xff] }
 0x618   :  { %v26150_v4 = vld [vmem:[#allocation2 + $0x140] sm:$0xff]  ;;  %v26154_v57 = vld [vmem:[#allocation2 + $0x150] sm:$0xff]  ;;  %v26158_v18 = vld [vmem:[#allocation2 + $0x158] sm:$0xff] }
 0x619   :  { %19828 = vmatmul.mubr.msk.f32.gmra.mrb[78].mxu1 %vm148_vm1, %v7215_v40  ;;  %v26162_v17 = vld [vmem:[#allocation2 + $0x168] sm:$0xff]  ;;  %v7135_v29 = vld [vmem:[#allocation2 + $0x1b0] sm:$0xff]  ;;  %v7136_v19 = vld [vmem:[#allocation2 + $0x1b8] sm:$0xff] }
 0x61a   :  { %19830 = vmatprep.mubr.msk.f32.mxu1 %vm148_vm1, %v7216_v21  ;;  %v26166_v32 = vld [vmem:[#allocation2 + $0x170] sm:$0xff]  ;;  %v26172_v38 = vld [vmem:[#allocation2 + $0x1c8] sm:$0xff]  ;;  %v26180_v31 = vld [vmem:[#allocation2 + $0x1e0] sm:$0xff] }
 0x61b   :  { %v26176_v46 = vld [vmem:[#allocation2 + $0x1d0] sm:$0xff]  ;;  %v26184_v53 = vld [vmem:[#allocation2 + $0x1e8] sm:$0xff]  ;;  %v26188_v35 = vld [vmem:[#allocation2 + $0x1f8] sm:$0xff] }
 0x61c   :  { %v26192_v23 = vld [vmem:[#allocation2 + $0x200] sm:$0xff]  ;;  %v26196_v10 = vld [vmem:[#allocation2 + $0x210] sm:$0xff]  ;;  %v26200_v15 = vld [vmem:[#allocation2 + $0x218] sm:$0xff] }
 0x61d   :  { %19831 = vmatmul.mubr.msk.f32.gmra.mrb[80].mxu1 %vm148_vm1, %v7217_v52  ;;  %v26204_v47 = vld [vmem:[#allocation2 + $0x228] sm:$0xff]  ;;  %v26208_v27 = vld [vmem:[#allocation2 + $0x230] sm:$0xff]  ;;  %v26212_v61 = vld [vmem:[#allocation2 + $0x240] sm:$0xff] }
 0x61e   :  { %19833 = vmatprep.mubr.msk.f32.mxu1 %vm148_vm1, %v7218_v12  ;;  %v26216_v11 = vld [vmem:[#allocation2 + $0x248] sm:$0xff]  ;;  %v26220_v40 = vld [vmem:[#allocation2 + $0x258] sm:$0xff]  ;;  %v26224_v21 = vld [vmem:[#allocation2 + $0x260] sm:$0xff] }
 0x61f   :  { %v26228_v52 = vld [vmem:[#allocation2 + $0x270] sm:$0xff]  ;;  %v26232_v12 = vld [vmem:[#allocation2 + $0x278] sm:$0xff]  ;;  %vm31032_vm10 = vmmov %vm30971_vm0 }
 0x620   :  { %vm31036_vm11 = vmmov %vm30971_vm0 }
 0x621   :  { %19834 = vmatmul.mubr.msk.f32.gmra.mrb[82].mxu1 %vm148_vm1, %v7219_v14  ;;  %v26236_v14 = vld [vmem:[#allocation2 + $0x288] sm:$0xff]  ;;  %vm31037_vm3 = vmmov %vm30971_vm0 }
 0x622   :  { %19836 = vmatprep.mubr.msk.f32.mxu1 %vm148_vm1, %v7220_v5  ;;  %v26240_v5 = vld [vmem:[#allocation2 + $0x290] sm:$0xff]  ;;  %vm31073_vm8 = vmmov %vm30971_vm0 }
 0x623   :  { %vm31075_vm7 = vmmov %vm30971_vm0 }
 0x624   :  { %vm31092_vm14 = vmmov %vm30971_vm0 }
 0x625   :  { %19837 = vmatmul.mubr.msk.f32.gmra.mrb[84].mxu1 %vm148_vm1, %v7221_v20  ;;  %v26244_v20 = vld [vmem:[#allocation2 + $0x2a0] sm:$0xff]  ;;  %vm31093_vm12 = vmmov %vm30971_vm0 }
 0x626   :  { %19839 = vmatprep.mubr.msk.f32.mxu1 %vm148_vm1, %v7222_v59  ;;  %v26248_v59 = vld [vmem:[#allocation2 + $0x2a8] sm:$0xff]  ;;  %vm31094_vm15 = vmmov %vm30971_vm0 }
 0x629   :  { %19840 = vmatmul.mubr.msk.f32.gmra.mrb[86].mxu1 %vm148_vm1, %v7223_v58  ;;  %v26252_v58 = vld [vmem:[#allocation2 + $0x2b8] sm:$0xff] }
 0x62a   :  { %19842 = vmatprep.mubr.msk.f32.mxu1 %vm148_vm1, %v7224_v56  ;;  %v26256_v56 = vld [vmem:[#allocation2 + $0x2c0] sm:$0xff] }
 0x62d   :  { %19843 = vmatmul.mubr.msk.f32.gmra.mrb[88].mxu1 %vm148_vm1, %v7225_v2  ;;  %v26260_v2 = vld [vmem:[#allocation2 + $0x2d0] sm:$0xff] }
 0x62e   :  { %19845 = vmatprep.mubr.msk.f32.mxu1 %vm148_vm1, %v7226_v24  ;;  %v26264_v24 = vld [vmem:[#allocation2 + $0x2d8] sm:$0xff] }
 0x631   :  { %19846 = vmatmul.mubr.msk.f32.gmra.mrb[90].mxu1 %vm148_vm1, %v7227_v41  ;;  %v26268_v41 = vld [vmem:[#allocation2 + $0x2e8] sm:$0xff] }
 0x632   :  { %19848 = vmatprep.mubr.msk.f32.mxu1 %vm148_vm1, %v7228_v13  ;;  %v26272_v13 = vld [vmem:[#allocation2 + $0x2f0] sm:$0xff] }
 0x635   :  { %19849 = vmatmul.mubr.msk.f32.gmra.mrb[92].mxu1 %vm148_vm1, %v7229_v55  ;;  %v26276_v55 = vld [vmem:[#allocation2 + $0x300] sm:$0xff] }
 0x636   :  { %19851 = vmatprep.mubr.msk.f32.mxu1 %vm148_vm1, %v7230_v50  ;;  %v26280_v50 = vld [vmem:[#allocation2 + $0x308] sm:$0xff] }
 0x637   :  { %30966 = vst [vmem:[#allocation60_spill] sm:$0xff] %v26280_v50 }
 0x639   :  { %19852 = vmatmul.mubr.msk.f32.gmra.mrb[94].mxu1 %vm148_vm1, %v7231_v44  ;;  %v8394_v44 = vld [vmem:[#allocation2 + $0x2] sm:$0xff] }
 0x63a   :  { %19856 = vmatprep.mubr.msk.f32.mxu1 %vm148_vm1, %v7103_v45  ;;  %v26284_v45 = vld [vmem:[#allocation2 + $0x318] sm:$0xff] }
 0x63b   :  { %30967 = vst [vmem:[#allocation61_spill] sm:$0xff] %v26284_v45 }
 0x63d   :  { %19857 = vmatmul.mubr.msk.f32.vlgmr.msra.gmra.mrb[32].mxu1 %vm148_vm1, %v7104_v49  ;;  %v26288_v49 = vld [vmem:[#allocation2 + $0x320] sm:$0xff] }
 0x63e   :  { %19859 = vmatprep.mubr.msk.f32.mxu1 %vm148_vm1, %v26041_v36  ;;  %19953 = vmatpush3.msk.msra.mxu1 %vm30964_vm9, %v25717_v54  ;;  %v26070_v54 = vld [vmem:[#allocation2 + $0x50] sm:$0xff]  ;;  %30968 = vst [vmem:[#allocation62_spill] sm:$0xff] %v26288_v49  ;;  %vm30632_vm9 = vcmask 64512  }
 0x63f   :  { %20050 = vmatprep.subr.msk.mxu1 %vm30965_vm13, %v26046_v7  ;;  %vm14094_vm13 = vcmask 57344  }
 0x641   :  { %19860 = vmatmul.mubr.msk.f32.gmra.mrb[34].mxu1 %vm148_vm1, %v26054_v28 }
 0x642   :  { %19862 = vmatprep.mubr.msk.f32.mxu1 %vm148_vm1, %v26058_v39 }
 0x645   :  { %19863 = vmatmul.mubr.msk.f32.gmra.mrb[36].mxu1 %vm148_vm1, %v26062_v62 }
 0x646   :  { %19865 = vmatprep.mubr.msk.f32.mxu1 %vm148_vm1, %v26066_v1 }
 0x649   :  { %19866 = vmatmul.mubr.msk.f32.gmra.mrb[38].mxu1 %vm148_vm1, %v26070_v54 }
 0x64a   :  { %19868 = vmatprep.mubr.msk.f32.mxu1 %vm148_vm1, %v26074_v43 }
 0x64d   :  { %19869 = vmatmul.mubr.msk.f32.gmra.mrb[40].mxu1 %vm148_vm1, %v26078_v6 }
 0x64e   :  { %19871 = vmatprep.mubr.msk.f32.mxu1 %vm148_vm1, %v26082_v51 }
 0x651   :  { %19872 = vmatmul.mubr.msk.f32.gmra.mrb[42].mxu1 %vm148_vm1, %v26086_v3 }
 0x652   :  { %19874 = vmatprep.mubr.msk.f32.mxu1 %vm148_vm1, %v26090_v30 }
 0x655   :  { %19875 = vmatmul.mubr.msk.f32.gmra.mrb[44].mxu1 %vm148_vm1, %v26094_v42 }
 0x656   :  { %19877 = vmatprep.mubr.msk.f32.mxu1 %vm148_vm1, %v26098_v60 }
 0x659   :  { %19878 = vmatmul.mubr.msk.f32.gmra.mrb[46].mxu1 %vm148_vm1, %v26102_v25 }
 0x65a   :  { %19880 = vmatprep.mubr.msk.f32.mxu1 %vm148_vm1, %v26106_v8 }
 0x65d   :  { %19881 = vmatmul.mubr.msk.f32.gmra.mrb[48].mxu1 %vm148_vm1, %v26110_v0 }
 0x65e   :  { %19883 = vmatprep.mubr.msk.f32.mxu1 %vm148_vm1, %v26114_v48 }
 0x661   :  { %19884 = vmatmul.mubr.msk.f32.gmra.mrb[50].mxu1 %vm148_vm1, %v26118_v26 }
 0x662   :  { %19886 = vmatprep.mubr.msk.f32.mxu1 %vm148_vm1, %v26122_v16 }
 0x665   :  { %19887 = vmatmul.mubr.msk.f32.gmra.mrb[52].mxu1 %vm148_vm1, %v26126_v9 }
 0x666   :  { %19889 = vmatprep.mubr.msk.f32.mxu1 %vm148_vm1, %v26130_v63 }
 0x669   :  { %19890 = vmatmul.mubr.msk.f32.gmra.mrb[54].mxu1 %vm148_vm1, %v26134_v37 }
 0x66a   :  { %19892 = vmatprep.mubr.msk.f32.mxu1 %vm148_vm1, %v26138_v22 }
 0x66d   :  { %19893 = vmatmul.mubr.msk.f32.gmra.mrb[56].mxu1 %vm148_vm1, %v26142_v33 }
 0x66e   :  { %19895 = vmatprep.mubr.msk.f32.mxu1 %vm148_vm1, %v26146_v34 }
 0x671   :  { %19896 = vmatmul.mubr.msk.f32.gmra.mrb[58].mxu1 %vm148_vm1, %v26150_v4 }
 0x672   :  { %19898 = vmatprep.mubr.msk.f32.mxu1 %vm148_vm1, %v26154_v57 }
 0x675   :  { %19899 = vmatmul.mubr.msk.f32.gmra.mrb[60].mxu1 %vm148_vm1, %v26158_v18 }
 0x676   :  { %19901 = vmatprep.mubr.msk.f32.mxu1 %vm148_vm1, %v26162_v17 }
 0x679   :  { %19902 = vmatmul.mubr.msk.f32.gmra.mrb[62].mxu1 %vm148_vm1, %v26166_v32 }
 0x67a   :  { %19904 = vmatprep.mubr.msk.f32.mxu1 %vm148_vm1, %v7135_v29  ;;  %v8395_v29 = vld [vmem:[#allocation2 + $0xa] sm:$0xff] }
 0x67d   :  { %19905 = vmatmul.mubr.msk.f32.gmra.mrb[64].mxu1 %vm148_vm1, %v7136_v19  ;;  %v26294_v19 = vld [vmem:[#allocation2 + $0x1a] sm:$0xff] }
 0x67e   :  { %19907 = vmatprep.mubr.msk.f32.mxu1 %vm148_vm1, %v26172_v38  ;;  %30969 = vst [vmem:[#allocation63_spill] sm:$0xff] %v26294_v19 }
 0x681   :  { %19908 = vmatmul.mubr.msk.f32.gmra.mrb[66].mxu1 %vm148_vm1, %v26176_v46 }
 0x682   :  { %19910 = vmatprep.mubr.msk.f32.mxu1 %vm148_vm1, %v26180_v31 }
 0x685   :  { %19911 = vmatmul.mubr.msk.f32.gmra.mrb[68].mxu1 %vm148_vm1, %v26184_v53 }
 0x686   :  { %19913 = vmatprep.mubr.msk.f32.mxu1 %vm148_vm1, %v26188_v35 }
 0x689   :  { %19914 = vmatmul.mubr.msk.f32.gmra.mrb[70].mxu1 %vm148_vm1, %v26192_v23 }
 0x68a   :  { %19916 = vmatprep.mubr.msk.f32.mxu1 %vm148_vm1, %v26196_v10 }
 0x68d   :  { %19917 = vmatmul.mubr.msk.f32.gmra.mrb[72].mxu1 %vm148_vm1, %v26200_v15 }
 0x68e   :  { %19919 = vmatprep.mubr.msk.f32.mxu1 %vm148_vm1, %v26204_v47 }
 0x691   :  { %19920 = vmatmul.mubr.msk.f32.gmra.mrb[74].mxu1 %vm148_vm1, %v26208_v27 }
 0x692   :  { %19922 = vmatprep.mubr.msk.f32.mxu1 %vm148_vm1, %v26212_v61 }
 0x695   :  { %19923 = vmatmul.mubr.msk.f32.gmra.mrb[76].mxu1 %vm148_vm1, %v26216_v11 }
 0x696   :  { %19925 = vmatprep.mubr.msk.f32.mxu1 %vm148_vm1, %v26220_v40 }
 0x699   :  { %19926 = vmatmul.mubr.msk.f32.gmra.mrb[78].mxu1 %vm148_vm1, %v26224_v21 }
 0x69a   :  { %19928 = vmatprep.mubr.msk.f32.mxu1 %vm148_vm1, %v26228_v52 }
 0x69d   :  { %19929 = vmatmul.mubr.msk.f32.gmra.mrb[80].mxu1 %vm148_vm1, %v26232_v12 }
 0x69e   :  { %19931 = vmatprep.mubr.msk.f32.mxu1 %vm148_vm1, %v26236_v14 }
 0x6a1   :  { %19932 = vmatmul.mubr.msk.f32.gmra.mrb[82].mxu1 %vm148_vm1, %v26240_v5 }
 0x6a2   :  { %19934 = vmatprep.mubr.msk.f32.mxu1 %vm148_vm1, %v26244_v20 }
 0x6a5   :  { %19935 = vmatmul.mubr.msk.f32.gmra.mrb[84].mxu1 %vm148_vm1, %v26248_v59 }
 0x6a6   :  { %19937 = vmatprep.mubr.msk.f32.mxu1 %vm148_vm1, %v26252_v58 }
 0x6a9   :  { %19938 = vmatmul.mubr.msk.f32.gmra.mrb[86].mxu1 %vm148_vm1, %v26256_v56 }
 0x6aa   :  { %19940 = vmatprep.mubr.msk.f32.mxu1 %vm148_vm1, %v26260_v2 }
 0x6ad   :  { %19941 = vmatmul.mubr.msk.f32.gmra.mrb[88].mxu1 %vm148_vm1, %v26264_v24 }
 0x6ae   :  { %19943 = vmatprep.mubr.msk.f32.mxu1 %vm148_vm1, %v26268_v41 }
 0x6b1   :  { %19944 = vmatmul.mubr.msk.f32.gmra.mrb[90].mxu1 %vm148_vm1, %v26272_v13 }
 0x6b2   :  { %19946 = vmatprep.mubr.msk.f32.mxu1 %vm148_vm1, %v26276_v55 }
 0x6b5   :  { %19947 = vmatmul.mubr.msk.f32.gmra.mrb[92].mxu1 %vm148_vm1, %v26280_v50  ;;  %v26299_v50 = vld [vmem:[%s30329_s2 + $0x10] sm:$0xf] }
 0x6b6   :  { %19949 = vmatprep.mubr.msk.f32.mxu1 %vm148_vm1, %v26284_v45  ;;  %v26419_v45 = vld [vmem:[#allocation2 + $0x172] sm:$0xff] }
 0x6b7   :  { %31000 = vst [vmem:[#allocation92_spill] sm:$0xff] %v26419_v45 }
 0x6b9   :  { %19950 = vmatmul.mubr.msk.f32.gmra.mrb[94].mxu1 %vm148_vm1, %v26288_v49  ;;  %v26315_v49 = vld [vmem:[#allocation2 + $0x3a] sm:$0xff] }
 0x6ba   :  { %19954 = vmatprep.mubr.msk.f32.mxu1 %vm148_vm1, %v8394_v44  ;;  %v26307_v44 = vld [vmem:[#allocation2 + $0x22] sm:$0xff]  ;;  %30974 = vst [vmem:[#allocation66_spill] sm:$0xff] %v26315_v49 }
 0x6bb   :  { %30972 = vst [vmem:[#allocation64_spill] sm:$0xff] %v26307_v44 }
 0x6bd   :  { %19955 = vmatmul.mubr.msk.f32.vlgmr.msra.gmra.mrb[32].mxu1 %vm148_vm1, %v8395_v29  ;;  %v26311_v29 = vld [vmem:[#allocation2 + $0x32] sm:$0xff] }
 0x6be   :  { %19957 = vmatprep.mubr.msk.f32.mxu1 %vm148_vm1, %v26294_v19  ;;  %20051 = vmatpush3.msk.msra.mxu1 %vm30970_vm5, %v26046_v7  ;;  %30973 = vst [vmem:[#allocation65_spill] sm:$0xff] %v26311_v29  ;;  %v26319_v19 = vld [vmem:[#allocation2 + $0x4a] sm:$0xff]  ;;  %v26323_v7 = vld [vmem:[#allocation2 + $0x52] sm:$0xff] }
 0x6bf   :  { %20148 = vmatprep.subr.msk.mxu1 %vm30971_vm0, %v26299_v50  ;;  %30975 = vst [vmem:[#allocation67_spill] sm:$0xff] %v26319_v19  ;;  %30976 = vst [vmem:[#allocation68_spill] sm:$0xff] %v26323_v7 }
 0x6c1   :  { %19958 = vmatmul.mubr.msk.f32.gmra.mrb[34].mxu1 %vm148_vm1, %v26307_v44  ;;  %v26327_v44 = vld [vmem:[#allocation2 + $0x62] sm:$0xff] }
 0x6c2   :  { %19960 = vmatprep.mubr.msk.f32.mxu1 %vm148_vm1, %v26311_v29  ;;  %30977 = vst [vmem:[#allocation69_spill] sm:$0xff] %v26327_v44  ;;  %v26331_v29 = vld [vmem:[#allocation2 + $0x6a] sm:$0xff] }
 0x6c3   :  { %30978 = vst [vmem:[#allocation70_spill] sm:$0xff] %v26331_v29 }
 0x6c5   :  { %19961 = vmatmul.mubr.msk.f32.gmra.mrb[36].mxu1 %vm148_vm1, %v26315_v49  ;;  %v26335_v49 = vld [vmem:[#allocation2 + $0x7a] sm:$0xff] }
 0x6c6   :  { %19963 = vmatprep.mubr.msk.f32.mxu1 %vm148_vm1, %v26319_v19  ;;  %30979 = vst [vmem:[#allocation71_spill] sm:$0xff] %v26335_v49  ;;  %v26339_v19 = vld [vmem:[#allocation2 + $0x82] sm:$0xff] }
 0x6c7   :  { %30980 = vst [vmem:[#allocation72_spill] sm:$0xff] %v26339_v19 }
 0x6c9   :  { %19964 = vmatmul.mubr.msk.f32.gmra.mrb[38].mxu1 %vm148_vm1, %v26323_v7  ;;  %v26343_v7 = vld [vmem:[#allocation2 + $0x92] sm:$0xff] }
 0x6ca   :  { %19966 = vmatprep.mubr.msk.f32.mxu1 %vm148_vm1, %v26327_v44  ;;  %30981 = vst [vmem:[#allocation73_spill] sm:$0xff] %v26343_v7  ;;  %v26347_v44 = vld [vmem:[#allocation2 + $0x9a] sm:$0xff] }
 0x6cb   :  { %30982 = vst [vmem:[#allocation74_spill] sm:$0xff] %v26347_v44 }
 0x6cd   :  { %19967 = vmatmul.mubr.msk.f32.gmra.mrb[40].mxu1 %vm148_vm1, %v26331_v29  ;;  %v26351_v29 = vld [vmem:[#allocation2 + $0xaa] sm:$0xff] }
 0x6ce   :  { %19969 = vmatprep.mubr.msk.f32.mxu1 %vm148_vm1, %v26335_v49  ;;  %30983 = vst [vmem:[#allocation75_spill] sm:$0xff] %v26351_v29  ;;  %v26355_v49 = vld [vmem:[#allocation2 + $0xb2] sm:$0xff] }
 0x6cf   :  { %30984 = vst [vmem:[#allocation76_spill] sm:$0xff] %v26355_v49 }
 0x6d1   :  { %19970 = vmatmul.mubr.msk.f32.gmra.mrb[42].mxu1 %vm148_vm1, %v26339_v19  ;;  %v26359_v19 = vld [vmem:[#allocation2 + $0xc2] sm:$0xff] }
 0x6d2   :  { %19972 = vmatprep.mubr.msk.f32.mxu1 %vm148_vm1, %v26343_v7  ;;  %30985 = vst [vmem:[#allocation77_spill] sm:$0xff] %v26359_v19  ;;  %v26363_v7 = vld [vmem:[#allocation2 + $0xca] sm:$0xff] }
 0x6d3   :  { %30986 = vst [vmem:[#allocation78_spill] sm:$0xff] %v26363_v7 }
 0x6d5   :  { %19973 = vmatmul.mubr.msk.f32.gmra.mrb[44].mxu1 %vm148_vm1, %v26347_v44  ;;  %v26367_v44 = vld [vmem:[#allocation2 + $0xda] sm:$0xff] }
 0x6d6   :  { %19975 = vmatprep.mubr.msk.f32.mxu1 %vm148_vm1, %v26351_v29  ;;  %30987 = vst [vmem:[#allocation79_spill] sm:$0xff] %v26367_v44  ;;  %v26371_v29 = vld [vmem:[#allocation2 + $0xe2] sm:$0xff] }
 0x6d7   :  { %30988 = vst [vmem:[#allocation80_spill] sm:$0xff] %v26371_v29 }
 0x6d9   :  { %19976 = vmatmul.mubr.msk.f32.gmra.mrb[46].mxu1 %vm148_vm1, %v26355_v49  ;;  %v26375_v49 = vld [vmem:[#allocation2 + $0xf2] sm:$0xff] }
 0x6da   :  { %19978 = vmatprep.mubr.msk.f32.mxu1 %vm148_vm1, %v26359_v19  ;;  %30989 = vst [vmem:[#allocation81_spill] sm:$0xff] %v26375_v49  ;;  %v26379_v19 = vld [vmem:[#allocation2 + $0xfa] sm:$0xff] }
 0x6db   :  { %30990 = vst [vmem:[#allocation82_spill] sm:$0xff] %v26379_v19 }
 0x6dd   :  { %19979 = vmatmul.mubr.msk.f32.gmra.mrb[48].mxu1 %vm148_vm1, %v26363_v7  ;;  %v26383_v7 = vld [vmem:[#allocation2 + $0x10a] sm:$0xff] }
 0x6de   :  { %19981 = vmatprep.mubr.msk.f32.mxu1 %vm148_vm1, %v26367_v44  ;;  %30991 = vst [vmem:[#allocation83_spill] sm:$0xff] %v26383_v7  ;;  %v26387_v44 = vld [vmem:[#allocation2 + $0x112] sm:$0xff] }
 0x6df   :  { %30992 = vst [vmem:[#allocation84_spill] sm:$0xff] %v26387_v44 }
 0x6e1   :  { %19982 = vmatmul.mubr.msk.f32.gmra.mrb[50].mxu1 %vm148_vm1, %v26371_v29  ;;  %v26391_v29 = vld [vmem:[#allocation2 + $0x122] sm:$0xff] }
 0x6e2   :  { %19984 = vmatprep.mubr.msk.f32.mxu1 %vm148_vm1, %v26375_v49  ;;  %30993 = vst [vmem:[#allocation85_spill] sm:$0xff] %v26391_v29  ;;  %v26395_v49 = vld [vmem:[#allocation2 + $0x12a] sm:$0xff] }
 0x6e3   :  { %30994 = vst [vmem:[#allocation86_spill] sm:$0xff] %v26395_v49 }
 0x6e5   :  { %19985 = vmatmul.mubr.msk.f32.gmra.mrb[52].mxu1 %vm148_vm1, %v26379_v19  ;;  %v26399_v19 = vld [vmem:[#allocation2 + $0x13a] sm:$0xff] }
 0x6e6   :  { %19987 = vmatprep.mubr.msk.f32.mxu1 %vm148_vm1, %v26383_v7  ;;  %30995 = vst [vmem:[#allocation87_spill] sm:$0xff] %v26399_v19  ;;  %v26403_v7 = vld [vmem:[#allocation2 + $0x142] sm:$0xff] }
 0x6e7   :  { %30996 = vst [vmem:[#allocation88_spill] sm:$0xff] %v26403_v7 }
 0x6e9   :  { %19988 = vmatmul.mubr.msk.f32.gmra.mrb[54].mxu1 %vm148_vm1, %v26387_v44  ;;  %v26407_v44 = vld [vmem:[#allocation2 + $0x152] sm:$0xff] }
 0x6ea   :  { %19990 = vmatprep.mubr.msk.f32.mxu1 %vm148_vm1, %v26391_v29  ;;  %30997 = vst [vmem:[#allocation89_spill] sm:$0xff] %v26407_v44  ;;  %v26411_v29 = vld [vmem:[#allocation2 + $0x15a] sm:$0xff] }
 0x6eb   :  { %30998 = vst [vmem:[#allocation90_spill] sm:$0xff] %v26411_v29 }
 0x6ed   :  { %19991 = vmatmul.mubr.msk.f32.gmra.mrb[56].mxu1 %vm148_vm1, %v26395_v49  ;;  %v26415_v49 = vld [vmem:[#allocation2 + $0x16a] sm:$0xff] }
 0x6ee   :  { %19993 = vmatprep.mubr.msk.f32.mxu1 %vm148_vm1, %v26399_v19  ;;  %30999 = vst [vmem:[#allocation91_spill] sm:$0xff] %v26415_v49  ;;  %v8426_v19 = vld [vmem:[#allocation2 + $0x1b2] sm:$0xff] }
 0x6f1   :  { %19994 = vmatmul.mubr.msk.f32.gmra.mrb[58].mxu1 %vm148_vm1, %v26403_v7  ;;  %v8427_v7 = vld [vmem:[#allocation2 + $0x1ba] sm:$0xff] }
 0x6f2   :  { %19996 = vmatprep.mubr.msk.f32.mxu1 %vm148_vm1, %v26407_v44  ;;  %v26425_v44 = vld [vmem:[#allocation2 + $0x1ca] sm:$0xff] }
 0x6f5   :  { %19997 = vmatmul.mubr.msk.f32.gmra.mrb[60].mxu1 %vm148_vm1, %v26411_v29  ;;  %v26429_v29 = vld [vmem:[#allocation2 + $0x1d2] sm:$0xff] }
 0x6f6   :  { %19999 = vmatprep.mubr.msk.f32.mxu1 %vm148_vm1, %v26415_v49  ;;  %31001 = vst [vmem:[#allocation35_spill] sm:$0xff] %v26429_v29  ;;  %v26433_v49 = vld [vmem:[#allocation2 + $0x1e2] sm:$0xff] }
 0x6f7   :  { %31002 = vst [vmem:[#allocation5_spill] sm:$0xff] %v26433_v49 }
 0x6f9   :  { %20000 = vmatmul.mubr.msk.f32.gmra.mrb[62].mxu1 %vm148_vm1, %v26419_v45  ;;  %v26437_v45 = vld [vmem:[#allocation2 + $0x1ea] sm:$0xff] }
 0x6fa   :  { %20002 = vmatprep.mubr.msk.f32.mxu1 %vm148_vm1, %v8426_v19  ;;  %31003 = vst [vmem:[#allocation6_spill] sm:$0xff] %v26437_v45  ;;  %v26441_v19 = vld [vmem:[#allocation2 + $0x1fa] sm:$0xff] }
 0x6fb   :  { %31004 = vst [vmem:[#allocation7_spill] sm:$0xff] %v26441_v19 }
 0x6fd   :  { %20003 = vmatmul.mubr.msk.f32.gmra.mrb[64].mxu1 %vm148_vm1, %v8427_v7  ;;  %v26445_v7 = vld [vmem:[#allocation2 + $0x202] sm:$0xff] }
 0x6fe   :  { %20005 = vmatprep.mubr.msk.f32.mxu1 %vm148_vm1, %v26425_v44  ;;  %31005 = vst [vmem:[#allocation8_spill] sm:$0xff] %v26445_v7 }
 0x701   :  { %20006 = vmatmul.mubr.msk.f32.gmra.mrb[66].mxu1 %vm148_vm1, %v26429_v29  ;;  %v26449_v29 = vld [vmem:[#allocation2 + $0x212] sm:$0xff] }
 0x702   :  { %20008 = vmatprep.mubr.msk.f32.mxu1 %vm148_vm1, %v26433_v49  ;;  %31006 = vst [vmem:[#allocation9_spill] sm:$0xff] %v26449_v29  ;;  %v26453_v49 = vld [vmem:[#allocation2 + $0x21a] sm:$0xff] }
 0x703   :  { %31007 = vst [vmem:[#allocation10_spill] sm:$0xff] %v26453_v49 }
 0x705   :  { %20009 = vmatmul.mubr.msk.f32.gmra.mrb[68].mxu1 %vm148_vm1, %v26437_v45  ;;  %v26457_v45 = vld [vmem:[#allocation2 + $0x22a] sm:$0xff] }
 0x706   :  { %20011 = vmatprep.mubr.msk.f32.mxu1 %vm148_vm1, %v26441_v19  ;;  %31008 = vst [vmem:[#allocation11_spill] sm:$0xff] %v26457_v45  ;;  %v26461_v19 = vld [vmem:[#allocation2 + $0x232] sm:$0xff] }
 0x707   :  { %31009 = vst [vmem:[#allocation12_spill] sm:$0xff] %v26461_v19 }
 0x709   :  { %20012 = vmatmul.mubr.msk.f32.gmra.mrb[70].mxu1 %vm148_vm1, %v26445_v7  ;;  %v26465_v7 = vld [vmem:[#allocation2 + $0x242] sm:$0xff] }
 0x70a   :  { %20014 = vmatprep.mubr.msk.f32.mxu1 %vm148_vm1, %v26449_v29  ;;  %31010 = vst [vmem:[#allocation13_spill] sm:$0xff] %v26465_v7  ;;  %v26469_v29 = vld [vmem:[#allocation2 + $0x24a] sm:$0xff] }
 0x70b   :  { %31011 = vst [vmem:[#allocation14_spill] sm:$0xff] %v26469_v29 }
 0x70d   :  { %20015 = vmatmul.mubr.msk.f32.gmra.mrb[72].mxu1 %vm148_vm1, %v26453_v49  ;;  %v26473_v49 = vld [vmem:[#allocation2 + $0x25a] sm:$0xff] }
 0x70e   :  { %20017 = vmatprep.mubr.msk.f32.mxu1 %vm148_vm1, %v26457_v45  ;;  %31012 = vst [vmem:[#allocation15_spill] sm:$0xff] %v26473_v49  ;;  %v26477_v45 = vld [vmem:[#allocation2 + $0x262] sm:$0xff] }
 0x70f   :  { %31013 = vst [vmem:[#allocation16_spill] sm:$0xff] %v26477_v45 }
 0x711   :  { %20018 = vmatmul.mubr.msk.f32.gmra.mrb[74].mxu1 %vm148_vm1, %v26461_v19  ;;  %v26481_v19 = vld [vmem:[#allocation2 + $0x272] sm:$0xff] }
 0x712   :  { %20020 = vmatprep.mubr.msk.f32.mxu1 %vm148_vm1, %v26465_v7  ;;  %31014 = vst [vmem:[#allocation17_spill] sm:$0xff] %v26481_v19  ;;  %v26485_v7 = vld [vmem:[#allocation2 + $0x27a] sm:$0xff] }
 0x713   :  { %31015 = vst [vmem:[#allocation18_spill] sm:$0xff] %v26485_v7 }
 0x715   :  { %20021 = vmatmul.mubr.msk.f32.gmra.mrb[76].mxu1 %vm148_vm1, %v26469_v29  ;;  %v26489_v29 = vld [vmem:[#allocation2 + $0x28a] sm:$0xff] }
 0x716   :  { %20023 = vmatprep.mubr.msk.f32.mxu1 %vm148_vm1, %v26473_v49  ;;  %31016 = vst [vmem:[#allocation38_spill] sm:$0xff] %v26489_v29  ;;  %v26493_v49 = vld [vmem:[#allocation2 + $0x292] sm:$0xff] }
 0x717   :  { %31017 = vst [vmem:[#allocation39_spill] sm:$0xff] %v26493_v49 }
 0x719   :  { %20024 = vmatmul.mubr.msk.f32.gmra.mrb[78].mxu1 %vm148_vm1, %v26477_v45  ;;  %v26497_v45 = vld [vmem:[#allocation2 + $0x2a2] sm:$0xff] }
 0x71a   :  { %20026 = vmatprep.mubr.msk.f32.mxu1 %vm148_vm1, %v26481_v19  ;;  %31018 = vst [vmem:[#allocation20_spill] sm:$0xff] %v26497_v45  ;;  %v26501_v19 = vld [vmem:[#allocation2 + $0x2aa] sm:$0xff] }
 0x71b   :  { %31019 = vst [vmem:[#allocation19_spill] sm:$0xff] %v26501_v19 }
 0x71d   :  { %20027 = vmatmul.mubr.msk.f32.gmra.mrb[80].mxu1 %vm148_vm1, %v26485_v7  ;;  %v26505_v7 = vld [vmem:[#allocation2 + $0x2ba] sm:$0xff] }
 0x71e   :  { %20029 = vmatprep.mubr.msk.f32.mxu1 %vm148_vm1, %v26489_v29  ;;  %31020 = vst [vmem:[#allocation27_spill] sm:$0xff] %v26505_v7  ;;  %v26509_v29 = vld [vmem:[#allocation2 + $0x2c2] sm:$0xff] }
 0x71f   :  { %31021 = vst [vmem:[#allocation22_spill] sm:$0xff] %v26509_v29 }
 0x721   :  { %20030 = vmatmul.mubr.msk.f32.gmra.mrb[82].mxu1 %vm148_vm1, %v26493_v49  ;;  %v26513_v49 = vld [vmem:[#allocation2 + $0x2d2] sm:$0xff] }
 0x722   :  { %20032 = vmatprep.mubr.msk.f32.mxu1 %vm148_vm1, %v26497_v45  ;;  %31022 = vst [vmem:[#allocation21_spill] sm:$0xff] %v26513_v49  ;;  %v26517_v45 = vld [vmem:[#allocation2 + $0x2da] sm:$0xff] }
 0x723   :  { %31023 = vst [vmem:[#allocation28_spill] sm:$0xff] %v26517_v45 }
 0x725   :  { %20033 = vmatmul.mubr.msk.f32.gmra.mrb[84].mxu1 %vm148_vm1, %v26501_v19  ;;  %v26521_v19 = vld [vmem:[#allocation2 + $0x2ea] sm:$0xff] }
 0x726   :  { %20035 = vmatprep.mubr.msk.f32.mxu1 %vm148_vm1, %v26505_v7  ;;  %31024 = vst [vmem:[#allocation29_spill] sm:$0xff] %v26521_v19  ;;  %v26525_v7 = vld [vmem:[#allocation2 + $0x2f2] sm:$0xff] }
 0x729   :  { %20036 = vmatmul.mubr.msk.f32.gmra.mrb[86].mxu1 %vm148_vm1, %v26509_v29  ;;  %v26529_v29 = vld [vmem:[#allocation2 + $0x302] sm:$0xff] }
 0x72a   :  { %20038 = vmatprep.mubr.msk.f32.mxu1 %vm148_vm1, %v26513_v49  ;;  %v26533_v49 = vld [vmem:[#allocation2 + $0x30a] sm:$0xff] }
 0x72b   :  { %31025 = vst [vmem:[#allocation30_spill] sm:$0xff] %v26533_v49 }
 0x72d   :  { %20039 = vmatmul.mubr.msk.f32.gmra.mrb[88].mxu1 %vm148_vm1, %v26517_v45  ;;  %v26537_v45 = vld [vmem:[#allocation2 + $0x31a] sm:$0xff] }
 0x72e   :  { %20041 = vmatprep.mubr.msk.f32.mxu1 %vm148_vm1, %v26521_v19  ;;  %v26541_v19 = vld [vmem:[#allocation2 + $0x322] sm:$0xff] }
 0x731   :  { %20042 = vmatmul.mubr.msk.f32.gmra.mrb[90].mxu1 %vm148_vm1, %v26525_v7 }
 0x732   :  { %20044 = vmatprep.mubr.msk.f32.mxu1 %vm148_vm1, %v26529_v29 }
 0x735   :  { %20045 = vmatmul.mubr.msk.f32.gmra.mrb[92].mxu1 %vm148_vm1, %v26533_v49  ;;  %v26552_v49 = vld [vmem:[%s30329_s2 + $0x14] sm:$0xf] }
 0x736   :  { %20047 = vmatprep.mubr.msk.f32.mxu1 %vm148_vm1, %v26537_v45 }
 0x739   :  { %20048 = vmatmul.mubr.msk.f32.gmra.mrb[94].mxu1 %vm148_vm1, %v26541_v19 }
 0x73a   :  { %20052 = vmatprep.mubr.msk.f32.mxu1 %vm148_vm1, %v26041_v36  ;;  %v26614_v36 = vld [vmem:[#allocation2 + $0x180] sm:$0xff] }
 0x73d   :  { %20053 = vmatmul.mubr.msk.f32.vlgmr.msra.gmra.mrb[32].mxu1 %vm148_vm1, %v26054_v28  ;;  %v26618_v28 = vld [vmem:[#allocation2 + $0x188] sm:$0xff] }
 0x73e   :  { %20055 = vmatprep.mubr.msk.f32.mxu1 %vm148_vm1, %v26058_v39  ;;  %20149 = vmatpush3.msk.msra.mxu1 %vm31026_vm4, %v26299_v50  ;;  %v31028_v39 = vld [vmem:[#allocation60_spill] sm:$0xff] }
 0x73f   :  { %20246 = vmatprep.subr.msk.mxu1 %vm31027_vm6, %v26552_v49  ;;  %v9863_v50 = vld [vmem:[#allocation2 + $0x291] sm:$0xff] }
 0x741   :  { %20056 = vmatmul.mubr.msk.f32.gmra.mrb[34].mxu1 %vm148_vm1, %v26062_v62  ;;  %v31029_v62 = vld [vmem:[#allocation61_spill] sm:$0xff] }
 0x742   :  { %20058 = vmatprep.mubr.msk.f32.mxu1 %vm148_vm1, %v26066_v1  ;;  %v31030_v1 = vld [vmem:[#allocation62_spill] sm:$0xff] }
 0x745   :  { %20059 = vmatmul.mubr.msk.f32.gmra.mrb[36].mxu1 %vm148_vm1, %v26070_v54  ;;  %v26682_v54 = vld [vmem:[#allocation2 + $0x330] sm:$0xff] }
 0x746   :  { %20061 = vmatprep.mubr.msk.f32.mxu1 %vm148_vm1, %v26074_v43  ;;  %v26686_v43 = vld [vmem:[#allocation2 + $0x338] sm:$0xff] }
 0x749   :  { %20062 = vmatmul.mubr.msk.f32.gmra.mrb[38].mxu1 %vm148_vm1, %v26078_v6  ;;  %v9814_v6 = vld [vmem:[#allocation2 + $0x19] sm:$0xff] }
 0x74a   :  { %20064 = vmatprep.mubr.msk.f32.mxu1 %vm148_vm1, %v26082_v51  ;;  %v9815_v51 = vld [vmem:[#allocation2 + $0x21] sm:$0xff] }
 0x74d   :  { %20065 = vmatmul.mubr.msk.f32.gmra.mrb[40].mxu1 %vm148_vm1, %v26086_v3  ;;  %v26692_v3 = vld [vmem:[#allocation2 + $0x31] sm:$0xff] }
 0x74e   :  { %20067 = vmatprep.mubr.msk.f32.mxu1 %vm148_vm1, %v26090_v30  ;;  %v26697_v30 = vld [vmem:[%s30329_s2 + $0x18] sm:$0xf] }
 0x751   :  { %20068 = vmatmul.mubr.msk.f32.gmra.mrb[42].mxu1 %vm148_vm1, %v26094_v42  ;;  %v26705_v42 = vld [vmem:[#allocation2 + $0x39] sm:$0xff] }
 0x752   :  { %20070 = vmatprep.mubr.msk.f32.mxu1 %vm148_vm1, %v26098_v60  ;;  %v26709_v60 = vld [vmem:[#allocation2 + $0x49] sm:$0xff] }
 0x755   :  { %20071 = vmatmul.mubr.msk.f32.gmra.mrb[44].mxu1 %vm148_vm1, %v26102_v25  ;;  %v26713_v25 = vld [vmem:[#allocation2 + $0x51] sm:$0xff] }
 0x756   :  { %20073 = vmatprep.mubr.msk.f32.mxu1 %vm148_vm1, %v26106_v8  ;;  %v26717_v8 = vld [vmem:[#allocation2 + $0x61] sm:$0xff] }
 0x759   :  { %20074 = vmatmul.mubr.msk.f32.gmra.mrb[46].mxu1 %vm148_vm1, %v26110_v0  ;;  %v26721_v0 = vld [vmem:[#allocation2 + $0x69] sm:$0xff] }
 0x75a   :  { %20076 = vmatprep.mubr.msk.f32.mxu1 %vm148_vm1, %v26114_v48  ;;  %v26725_v48 = vld [vmem:[#allocation2 + $0x79] sm:$0xff] }
 0x75d   :  { %20077 = vmatmul.mubr.msk.f32.gmra.mrb[48].mxu1 %vm148_vm1, %v26118_v26  ;;  %v26729_v26 = vld [vmem:[#allocation2 + $0x81] sm:$0xff] }
 0x75e   :  { %20079 = vmatprep.mubr.msk.f32.mxu1 %vm148_vm1, %v26122_v16  ;;  %v26733_v16 = vld [vmem:[#allocation2 + $0x91] sm:$0xff] }
 0x761   :  { %20080 = vmatmul.mubr.msk.f32.gmra.mrb[50].mxu1 %vm148_vm1, %v26126_v9  ;;  %v26737_v9 = vld [vmem:[#allocation2 + $0x99] sm:$0xff] }
 0x762   :  { %20082 = vmatprep.mubr.msk.f32.mxu1 %vm148_vm1, %v26130_v63  ;;  %v26741_v63 = vld [vmem:[#allocation2 + $0xa9] sm:$0xff] }
 0x765   :  { %20083 = vmatmul.mubr.msk.f32.gmra.mrb[52].mxu1 %vm148_vm1, %v26134_v37  ;;  %v26745_v37 = vld [vmem:[#allocation2 + $0xb1] sm:$0xff] }
 0x766   :  { %20085 = vmatprep.mubr.msk.f32.mxu1 %vm148_vm1, %v26138_v22  ;;  %v26749_v22 = vld [vmem:[#allocation2 + $0xc1] sm:$0xff] }
 0x769   :  { %20086 = vmatmul.mubr.msk.f32.gmra.mrb[54].mxu1 %vm148_vm1, %v26142_v33  ;;  %v26753_v33 = vld [vmem:[#allocation2 + $0xc9] sm:$0xff] }
 0x76a   :  { %20088 = vmatprep.mubr.msk.f32.mxu1 %vm148_vm1, %v26146_v34  ;;  %v26757_v34 = vld [vmem:[#allocation2 + $0xd9] sm:$0xff] }
 0x76d   :  { %20089 = vmatmul.mubr.msk.f32.gmra.mrb[56].mxu1 %vm148_vm1, %v26150_v4  ;;  %v26761_v4 = vld [vmem:[#allocation2 + $0xe1] sm:$0xff] }
 0x76e   :  { %20091 = vmatprep.mubr.msk.f32.mxu1 %vm148_vm1, %v26154_v57  ;;  %v26765_v57 = vld [vmem:[#allocation2 + $0xf1] sm:$0xff] }
 0x771   :  { %20092 = vmatmul.mubr.msk.f32.gmra.mrb[58].mxu1 %vm148_vm1, %v26158_v18  ;;  %v26769_v18 = vld [vmem:[#allocation2 + $0xf9] sm:$0xff] }
 0x772   :  { %20094 = vmatprep.mubr.msk.f32.mxu1 %vm148_vm1, %v26162_v17  ;;  %v26773_v17 = vld [vmem:[#allocation2 + $0x109] sm:$0xff] }
 0x775   :  { %20095 = vmatmul.mubr.msk.f32.gmra.mrb[60].mxu1 %vm148_vm1, %v26166_v32  ;;  %v26777_v32 = vld [vmem:[#allocation2 + $0x111] sm:$0xff] }
 0x776   :  { %20097 = vmatprep.mubr.msk.f32.mxu1 %vm148_vm1, %v26614_v36 }
 0x779   :  { %20098 = vmatmul.mubr.msk.f32.gmra.mrb[62].mxu1 %vm148_vm1, %v26618_v28 }
 0x77a   :  { %20100 = vmatprep.mubr.msk.f32.mxu1 %vm148_vm1, %v26172_v38  ;;  %v26781_v38 = vld [vmem:[#allocation2 + $0x121] sm:$0xff] }
 0x77d   :  { %20101 = vmatmul.mubr.msk.f32.gmra.mrb[64].mxu1 %vm148_vm1, %v26176_v46  ;;  %v26785_v46 = vld [vmem:[#allocation2 + $0x129] sm:$0xff] }
 0x77e   :  { %20103 = vmatprep.mubr.msk.f32.mxu1 %vm148_vm1, %v26180_v31  ;;  %v26789_v31 = vld [vmem:[#allocation2 + $0x139] sm:$0xff] }
 0x781   :  { %20104 = vmatmul.mubr.msk.f32.gmra.mrb[66].mxu1 %vm148_vm1, %v26184_v53  ;;  %v26793_v53 = vld [vmem:[#allocation2 + $0x141] sm:$0xff] }
 0x782   :  { %20106 = vmatprep.mubr.msk.f32.mxu1 %vm148_vm1, %v26188_v35  ;;  %v26797_v35 = vld [vmem:[#allocation2 + $0x151] sm:$0xff] }
 0x785   :  { %20107 = vmatmul.mubr.msk.f32.gmra.mrb[68].mxu1 %vm148_vm1, %v26192_v23  ;;  %v26801_v23 = vld [vmem:[#allocation2 + $0x159] sm:$0xff] }
 0x786   :  { %20109 = vmatprep.mubr.msk.f32.mxu1 %vm148_vm1, %v26196_v10  ;;  %v26805_v10 = vld [vmem:[#allocation2 + $0x169] sm:$0xff] }
 0x789   :  { %20110 = vmatmul.mubr.msk.f32.gmra.mrb[70].mxu1 %vm148_vm1, %v26200_v15  ;;  %v26809_v15 = vld [vmem:[#allocation2 + $0x171] sm:$0xff] }
 0x78a   :  { %20112 = vmatprep.mubr.msk.f32.mxu1 %vm148_vm1, %v26204_v47  ;;  %v26813_v47 = vld [vmem:[#allocation2 + $0x181] sm:$0xff] }
 0x78d   :  { %20113 = vmatmul.mubr.msk.f32.gmra.mrb[72].mxu1 %vm148_vm1, %v26208_v27  ;;  %v26817_v27 = vld [vmem:[#allocation2 + $0x189] sm:$0xff] }
 0x78e   :  { %20115 = vmatprep.mubr.msk.f32.mxu1 %vm148_vm1, %v26212_v61  ;;  %v9846_v61 = vld [vmem:[#allocation2 + $0x1c9] sm:$0xff] }
 0x791   :  { %20116 = vmatmul.mubr.msk.f32.gmra.mrb[74].mxu1 %vm148_vm1, %v26216_v11  ;;  %v9847_v11 = vld [vmem:[#allocation2 + $0x1d1] sm:$0xff] }
 0x792   :  { %20118 = vmatprep.mubr.msk.f32.mxu1 %vm148_vm1, %v26220_v40  ;;  %v26823_v40 = vld [vmem:[#allocation2 + $0x1e1] sm:$0xff] }
 0x795   :  { %20119 = vmatmul.mubr.msk.f32.gmra.mrb[76].mxu1 %vm148_vm1, %v26224_v21  ;;  %v26827_v21 = vld [vmem:[#allocation2 + $0x1e9] sm:$0xff] }
 0x796   :  { %20121 = vmatprep.mubr.msk.f32.mxu1 %vm148_vm1, %v26228_v52  ;;  %v26831_v52 = vld [vmem:[#allocation2 + $0x1f9] sm:$0xff] }
 0x799   :  { %20122 = vmatmul.mubr.msk.f32.gmra.mrb[78].mxu1 %vm148_vm1, %v26232_v12  ;;  %v26835_v12 = vld [vmem:[#allocation2 + $0x201] sm:$0xff] }
 0x79a   :  { %20124 = vmatprep.mubr.msk.f32.mxu1 %vm148_vm1, %v26236_v14  ;;  %v9852_v14 = vld [vmem:[#allocation2 + $0x211] sm:$0xff] }
 0x79d   :  { %20125 = vmatmul.mubr.msk.f32.gmra.mrb[80].mxu1 %vm148_vm1, %v26240_v5  ;;  %v9853_v5 = vld [vmem:[#allocation2 + $0x219] sm:$0xff] }
 0x79e   :  { %20127 = vmatprep.mubr.msk.f32.mxu1 %vm148_vm1, %v26244_v20  ;;  %v9854_v20 = vld [vmem:[#allocation2 + $0x229] sm:$0xff] }
 0x7a1   :  { %20128 = vmatmul.mubr.msk.f32.gmra.mrb[82].mxu1 %vm148_vm1, %v26248_v59  ;;  %v9855_v59 = vld [vmem:[#allocation2 + $0x231] sm:$0xff] }
 0x7a2   :  { %20130 = vmatprep.mubr.msk.f32.mxu1 %vm148_vm1, %v26252_v58  ;;  %v9856_v58 = vld [vmem:[#allocation2 + $0x241] sm:$0xff] }
 0x7a5   :  { %20131 = vmatmul.mubr.msk.f32.gmra.mrb[84].mxu1 %vm148_vm1, %v26256_v56  ;;  %v9857_v56 = vld [vmem:[#allocation2 + $0x249] sm:$0xff] }
 0x7a6   :  { %20133 = vmatprep.mubr.msk.f32.mxu1 %vm148_vm1, %v26260_v2  ;;  %v9858_v2 = vld [vmem:[#allocation2 + $0x259] sm:$0xff] }
 0x7a9   :  { %20134 = vmatmul.mubr.msk.f32.gmra.mrb[86].mxu1 %vm148_vm1, %v26264_v24  ;;  %v9859_v24 = vld [vmem:[#allocation2 + $0x261] sm:$0xff] }
 0x7aa   :  { %20136 = vmatprep.mubr.msk.f32.mxu1 %vm148_vm1, %v26268_v41  ;;  %v9860_v41 = vld [vmem:[#allocation2 + $0x271] sm:$0xff] }
 0x7ad   :  { %20137 = vmatmul.mubr.msk.f32.gmra.mrb[88].mxu1 %vm148_vm1, %v26272_v13  ;;  %v9861_v13 = vld [vmem:[#allocation2 + $0x279] sm:$0xff] }
 0x7ae   :  { %20139 = vmatprep.mubr.msk.f32.mxu1 %vm148_vm1, %v26276_v55  ;;  %v9862_v55 = vld [vmem:[#allocation2 + $0x289] sm:$0xff] }
 0x7b1   :  { %20140 = vmatmul.mubr.msk.f32.gmra.mrb[90].mxu1 %vm148_vm1, %v31028_v39  ;;  %v9865_v39 = vld [vmem:[#allocation2 + $0x2a9] sm:$0xff] }
 0x7b2   :  { %20142 = vmatprep.mubr.msk.f32.mxu1 %vm148_vm1, %v31029_v62  ;;  %v9866_v62 = vld [vmem:[#allocation2 + $0x2b9] sm:$0xff] }
 0x7b5   :  { %20143 = vmatmul.mubr.msk.f32.gmra.mrb[92].mxu1 %vm148_vm1, %v31030_v1  ;;  %v9867_v1 = vld [vmem:[#allocation2 + $0x2c1] sm:$0xff] }
 0x7b6   :  { %20145 = vmatprep.mubr.msk.f32.mxu1 %vm148_vm1, %v26682_v54 }
 0x7b9   :  { %20146 = vmatmul.mubr.msk.f32.gmra.mrb[94].mxu1 %vm148_vm1, %v26686_v43 }
 0x7ba   :  { %20150 = vmatprep.mubr.msk.f32.mxu1 %vm148_vm1, %v9814_v6  ;;  %v9868_v6 = vld [vmem:[#allocation2 + $0x2d1] sm:$0xff] }
 0x7bd   :  { %20151 = vmatmul.mubr.msk.f32.vlgmr.msra.gmra.mrb[32].mxu1 %vm148_vm1, %v9815_v51  ;;  %v9869_v51 = vld [vmem:[#allocation2 + $0x2d9] sm:$0xff] }
 0x7be   :  { %20153 = vmatprep.mubr.msk.f32.mxu1 %vm148_vm1, %v26692_v3  ;;  %20247 = vmatpush3.msk.msra.mxu1 %vm31031_vm2, %v26552_v49  ;;  %v9864_v49 = vld [vmem:[#allocation2 + $0x2a1] sm:$0xff] }
 0x7bf   :  { %20344 = vmatprep.subr.msk.mxu1 %vm31032_vm10, %v26697_v30 }
 0x7c1   :  { %20154 = vmatmul.mubr.msk.f32.gmra.mrb[34].mxu1 %vm148_vm1, %v26705_v42 }
 0x7c2   :  { %20156 = vmatprep.mubr.msk.f32.mxu1 %vm148_vm1, %v26709_v60 }
 0x7c5   :  { %20157 = vmatmul.mubr.msk.f32.gmra.mrb[36].mxu1 %vm148_vm1, %v26713_v25 }
 0x7c6   :  { %20159 = vmatprep.mubr.msk.f32.mxu1 %vm148_vm1, %v26717_v8 }
 0x7c9   :  { %20160 = vmatmul.mubr.msk.f32.gmra.mrb[38].mxu1 %vm148_vm1, %v26721_v0 }
 0x7ca   :  { %20162 = vmatprep.mubr.msk.f32.mxu1 %vm148_vm1, %v26725_v48 }
 0x7cd   :  { %20163 = vmatmul.mubr.msk.f32.gmra.mrb[40].mxu1 %vm148_vm1, %v26729_v26 }
 0x7ce   :  { %20165 = vmatprep.mubr.msk.f32.mxu1 %vm148_vm1, %v26733_v16 }
 0x7d1   :  { %20166 = vmatmul.mubr.msk.f32.gmra.mrb[42].mxu1 %vm148_vm1, %v26737_v9 }
 0x7d2   :  { %20168 = vmatprep.mubr.msk.f32.mxu1 %vm148_vm1, %v26741_v63 }
 0x7d5   :  { %20169 = vmatmul.mubr.msk.f32.gmra.mrb[44].mxu1 %vm148_vm1, %v26745_v37 }
 0x7d6   :  { %20171 = vmatprep.mubr.msk.f32.mxu1 %vm148_vm1, %v26749_v22 }
 0x7d9   :  { %20172 = vmatmul.mubr.msk.f32.gmra.mrb[46].mxu1 %vm148_vm1, %v26753_v33 }
 0x7da   :  { %20174 = vmatprep.mubr.msk.f32.mxu1 %vm148_vm1, %v26757_v34 }
 0x7dd   :  { %20175 = vmatmul.mubr.msk.f32.gmra.mrb[48].mxu1 %vm148_vm1, %v26761_v4 }
 0x7de   :  { %20177 = vmatprep.mubr.msk.f32.mxu1 %vm148_vm1, %v26765_v57 }
 0x7e1   :  { %20178 = vmatmul.mubr.msk.f32.gmra.mrb[50].mxu1 %vm148_vm1, %v26769_v18 }
 0x7e2   :  { %20180 = vmatprep.mubr.msk.f32.mxu1 %vm148_vm1, %v26773_v17 }
 0x7e5   :  { %20181 = vmatmul.mubr.msk.f32.gmra.mrb[52].mxu1 %vm148_vm1, %v26777_v32 }
 0x7e6   :  { %20183 = vmatprep.mubr.msk.f32.mxu1 %vm148_vm1, %v26781_v38 }
 0x7e9   :  { %20184 = vmatmul.mubr.msk.f32.gmra.mrb[54].mxu1 %vm148_vm1, %v26785_v46 }
 0x7ea   :  { %20186 = vmatprep.mubr.msk.f32.mxu1 %vm148_vm1, %v26789_v31 }
 0x7ed   :  { %20187 = vmatmul.mubr.msk.f32.gmra.mrb[56].mxu1 %vm148_vm1, %v26793_v53 }
 0x7ee   :  { %20189 = vmatprep.mubr.msk.f32.mxu1 %vm148_vm1, %v26797_v35 }
 0x7f1   :  { %20190 = vmatmul.mubr.msk.f32.gmra.mrb[58].mxu1 %vm148_vm1, %v26801_v23 }
 0x7f2   :  { %20192 = vmatprep.mubr.msk.f32.mxu1 %vm148_vm1, %v26805_v10 }
 0x7f5   :  { %20193 = vmatmul.mubr.msk.f32.gmra.mrb[60].mxu1 %vm148_vm1, %v26809_v15 }
 0x7f6   :  { %20195 = vmatprep.mubr.msk.f32.mxu1 %vm148_vm1, %v26813_v47 }
 0x7f9   :  { %20196 = vmatmul.mubr.msk.f32.gmra.mrb[62].mxu1 %vm148_vm1, %v26817_v27 }
 0x7fa   :  { %20198 = vmatprep.mubr.msk.f32.mxu1 %vm148_vm1, %v9846_v61  ;;  %v9870_v61 = vld [vmem:[#allocation2 + $0x2e9] sm:$0xff] }
 0x7fd   :  { %20199 = vmatmul.mubr.msk.f32.gmra.mrb[64].mxu1 %vm148_vm1, %v9847_v11  ;;  %v9871_v11 = vld [vmem:[#allocation2 + $0x2f1] sm:$0xff] }
 0x7fe   :  { %20201 = vmatprep.mubr.msk.f32.mxu1 %vm148_vm1, %v26823_v40 }
 0x801   :  { %20202 = vmatmul.mubr.msk.f32.gmra.mrb[66].mxu1 %vm148_vm1, %v26827_v21 }
 0x802   :  { %20204 = vmatprep.mubr.msk.f32.mxu1 %vm148_vm1, %v26831_v52 }
 0x805   :  { %20205 = vmatmul.mubr.msk.f32.gmra.mrb[68].mxu1 %vm148_vm1, %v26835_v12 }
 0x806   :  { %20207 = vmatprep.mubr.msk.f32.mxu1 %vm148_vm1, %v9852_v14  ;;  %v9872_v14 = vld [vmem:[#allocation2 + $0x301] sm:$0xff] }
 0x809   :  { %20208 = vmatmul.mubr.msk.f32.gmra.mrb[70].mxu1 %vm148_vm1, %v9853_v5  ;;  %v9873_v5 = vld [vmem:[#allocation2 + $0x309] sm:$0xff] }
 0x80a   :  { %20210 = vmatprep.mubr.msk.f32.mxu1 %vm148_vm1, %v9854_v20  ;;  %v9874_v20 = vld [vmem:[#allocation2 + $0x319] sm:$0xff] }
 0x80d   :  { %20211 = vmatmul.mubr.msk.f32.gmra.mrb[72].mxu1 %vm148_vm1, %v9855_v59  ;;  %v9875_v59 = vld [vmem:[#allocation2 + $0x321] sm:$0xff] }
 0x80e   :  { %20213 = vmatprep.mubr.msk.f32.mxu1 %vm148_vm1, %v9856_v58  ;;  %v9876_v58 = vld [vmem:[#allocation2 + $0x331] sm:$0xff] }
 0x811   :  { %20214 = vmatmul.mubr.msk.f32.gmra.mrb[74].mxu1 %vm148_vm1, %v9857_v56  ;;  %v9877_v56 = vld [vmem:[#allocation2 + $0x339] sm:$0xff] }
 0x812   :  { %20216 = vmatprep.mubr.msk.f32.mxu1 %vm148_vm1, %v9858_v2  ;;  %v31033_v2 = vld [vmem:[#allocation63_spill] sm:$0xff] }
 0x815   :  { %20217 = vmatmul.mubr.msk.f32.gmra.mrb[76].mxu1 %vm148_vm1, %v9859_v24  ;;  %v31034_v24 = vld [vmem:[#allocation64_spill] sm:$0xff] }
 0x816   :  { %20219 = vmatprep.mubr.msk.f32.mxu1 %vm148_vm1, %v9860_v41  ;;  %v26872_v41 = vld [vmem:[%s30329_s2 + $0x1c] sm:$0xf] }
 0x819   :  { %20220 = vmatmul.mubr.msk.f32.gmra.mrb[78].mxu1 %vm148_vm1, %v9861_v13  ;;  %v31035_v13 = vld [vmem:[#allocation65_spill] sm:$0xff] }
 0x81a   :  { %20222 = vmatprep.mubr.msk.f32.mxu1 %vm148_vm1, %v9862_v55  ;;  %v31038_v55 = vld [vmem:[#allocation66_spill] sm:$0xff] }
 0x81d   :  { %20223 = vmatmul.mubr.msk.f32.gmra.mrb[80].mxu1 %vm148_vm1, %v9863_v50  ;;  %v31039_v50 = vld [vmem:[#allocation67_spill] sm:$0xff] }
 0x81e   :  { %20225 = vmatprep.mubr.msk.f32.mxu1 %vm148_vm1, %v9864_v49  ;;  %v31040_v49 = vld [vmem:[#allocation68_spill] sm:$0xff] }
 0x821   :  { %20226 = vmatmul.mubr.msk.f32.gmra.mrb[82].mxu1 %vm148_vm1, %v9865_v39  ;;  %v31041_v39 = vld [vmem:[#allocation69_spill] sm:$0xff] }
 0x822   :  { %20228 = vmatprep.mubr.msk.f32.mxu1 %vm148_vm1, %v9866_v62  ;;  %v31042_v62 = vld [vmem:[#allocation70_spill] sm:$0xff] }
 0x825   :  { %20229 = vmatmul.mubr.msk.f32.gmra.mrb[84].mxu1 %vm148_vm1, %v9867_v1  ;;  %v31043_v1 = vld [vmem:[#allocation71_spill] sm:$0xff] }
 0x826   :  { %20231 = vmatprep.mubr.msk.f32.mxu1 %vm148_vm1, %v9868_v6  ;;  %v31045_v6 = vld [vmem:[#allocation73_spill] sm:$0xff] }
 0x829   :  { %20232 = vmatmul.mubr.msk.f32.gmra.mrb[86].mxu1 %vm148_vm1, %v9869_v51  ;;  %v31046_v51 = vld [vmem:[#allocation74_spill] sm:$0xff] }
 0x82a   :  { %20234 = vmatprep.mubr.msk.f32.mxu1 %vm148_vm1, %v9870_v61  ;;  %v31047_v61 = vld [vmem:[#allocation75_spill] sm:$0xff] }
 0x82d   :  { %20235 = vmatmul.mubr.msk.f32.gmra.mrb[88].mxu1 %vm148_vm1, %v9871_v11  ;;  %v31048_v11 = vld [vmem:[#allocation76_spill] sm:$0xff] }
 0x82e   :  { %20237 = vmatprep.mubr.msk.f32.mxu1 %vm148_vm1, %v9872_v14  ;;  %v31049_v14 = vld [vmem:[#allocation77_spill] sm:$0xff] }
 0x831   :  { %20238 = vmatmul.mubr.msk.f32.gmra.mrb[90].mxu1 %vm148_vm1, %v9873_v5  ;;  %v31050_v5 = vld [vmem:[#allocation78_spill] sm:$0xff] }
 0x832   :  { %20240 = vmatprep.mubr.msk.f32.mxu1 %vm148_vm1, %v9874_v20  ;;  %v31051_v20 = vld [vmem:[#allocation79_spill] sm:$0xff] }
 0x835   :  { %20241 = vmatmul.mubr.msk.f32.gmra.mrb[92].mxu1 %vm148_vm1, %v9875_v59  ;;  %v31052_v59 = vld [vmem:[#allocation80_spill] sm:$0xff] }
 0x836   :  { %20243 = vmatprep.mubr.msk.f32.mxu1 %vm148_vm1, %v9876_v58  ;;  %v31053_v58 = vld [vmem:[#allocation81_spill] sm:$0xff] }
 0x839   :  { %20244 = vmatmul.mubr.msk.f32.gmra.mrb[94].mxu1 %vm148_vm1, %v9877_v56  ;;  %v31054_v56 = vld [vmem:[#allocation82_spill] sm:$0xff] }
 0x83a   :  { %20248 = vmatprep.mubr.msk.f32.mxu1 %vm148_vm1, %v31033_v2  ;;  %v31055_v2 = vld [vmem:[#allocation83_spill] sm:$0xff] }
 0x83d   :  { %20249 = vmatmul.mubr.msk.f32.vlgmr.msra.gmra.mrb[32].mxu1 %vm148_vm1, %v31034_v24  ;;  %v31056_v24 = vld [vmem:[#allocation84_spill] sm:$0xff] }
 0x83e   :  { %20251 = vmatprep.mubr.msk.f32.mxu1 %vm148_vm1, %v31035_v13  ;;  %20345 = vmatpush3.msk.msra.mxu1 %vm31036_vm11, %v26697_v30  ;;  %v31044_v30 = vld [vmem:[#allocation72_spill] sm:$0xff]  ;;  %v31057_v13 = vld [vmem:[#allocation85_spill] sm:$0xff] }
 0x83f   :  { %20442 = vmatprep.subr.msk.mxu1 %vm31037_vm3, %v26872_v41 }
 0x841   :  { %20252 = vmatmul.mubr.msk.f32.gmra.mrb[34].mxu1 %vm148_vm1, %v31038_v55  ;;  %v31058_v55 = vld [vmem:[#allocation86_spill] sm:$0xff] }
 0x842   :  { %20254 = vmatprep.mubr.msk.f32.mxu1 %vm148_vm1, %v31039_v50  ;;  %v31059_v50 = vld [vmem:[#allocation87_spill] sm:$0xff] }
 0x845   :  { %20255 = vmatmul.mubr.msk.f32.gmra.mrb[36].mxu1 %vm148_vm1, %v31040_v49  ;;  %v31060_v49 = vld [vmem:[#allocation88_spill] sm:$0xff] }
 0x846   :  { %20257 = vmatprep.mubr.msk.f32.mxu1 %vm148_vm1, %v31041_v39  ;;  %v31061_v39 = vld [vmem:[#allocation89_spill] sm:$0xff] }
 0x849   :  { %20258 = vmatmul.mubr.msk.f32.gmra.mrb[38].mxu1 %vm148_vm1, %v31042_v62  ;;  %v31062_v62 = vld [vmem:[#allocation90_spill] sm:$0xff] }
 0x84a   :  { %20260 = vmatprep.mubr.msk.f32.mxu1 %vm148_vm1, %v31043_v1  ;;  %v31063_v1 = vld [vmem:[#allocation91_spill] sm:$0xff] }
 0x84d   :  { %20261 = vmatmul.mubr.msk.f32.gmra.mrb[40].mxu1 %vm148_vm1, %v31044_v30  ;;  %v31064_v30 = vld [vmem:[#allocation92_spill] sm:$0xff] }
 0x84e   :  { %20263 = vmatprep.mubr.msk.f32.mxu1 %vm148_vm1, %v31045_v6  ;;  %v10554_v6 = vld [vmem:[#allocation2 + $0x182] sm:$0xff] }
 0x851   :  { %20264 = vmatmul.mubr.msk.f32.gmra.mrb[42].mxu1 %vm148_vm1, %v31046_v51  ;;  %v10555_v51 = vld [vmem:[#allocation2 + $0x18a] sm:$0xff] }
 0x852   :  { %20266 = vmatprep.mubr.msk.f32.mxu1 %vm148_vm1, %v31047_v61  ;;  %v31065_v61 = vld [vmem:[#allocation35_spill] sm:$0xff] }
 0x855   :  { %20267 = vmatmul.mubr.msk.f32.gmra.mrb[44].mxu1 %vm148_vm1, %v31048_v11  ;;  %v31066_v11 = vld [vmem:[#allocation5_spill] sm:$0xff] }
 0x856   :  { %20269 = vmatprep.mubr.msk.f32.mxu1 %vm148_vm1, %v31049_v14  ;;  %v31067_v14 = vld [vmem:[#allocation6_spill] sm:$0xff] }
 0x859   :  { %20270 = vmatmul.mubr.msk.f32.gmra.mrb[46].mxu1 %vm148_vm1, %v31050_v5  ;;  %v31068_v5 = vld [vmem:[#allocation7_spill] sm:$0xff] }
 0x85a   :  { %20272 = vmatprep.mubr.msk.f32.mxu1 %vm148_vm1, %v31051_v20  ;;  %v31069_v20 = vld [vmem:[#allocation8_spill] sm:$0xff] }
 0x85d   :  { %20273 = vmatmul.mubr.msk.f32.gmra.mrb[48].mxu1 %vm148_vm1, %v31052_v59  ;;  %v31070_v59 = vld [vmem:[#allocation9_spill] sm:$0xff] }
 0x85e   :  { %20275 = vmatprep.mubr.msk.f32.mxu1 %vm148_vm1, %v31053_v58  ;;  %v31071_v58 = vld [vmem:[#allocation10_spill] sm:$0xff] }
 0x861   :  { %20276 = vmatmul.mubr.msk.f32.gmra.mrb[50].mxu1 %vm148_vm1, %v31054_v56  ;;  %v17478_v56 = vld [vmem:[%s30328_s0 + $0x19] sm:$0xff] }
 0x862   :  { %20278 = vmatprep.mubr.msk.f32.mxu1 %vm148_vm1, %v31055_v2  ;;  %v14351_v2 = vld [vmem:[%s30330_s3] sm:$0xf]  ;;  %20640 = vmatprep.mubr.msk.f32.mxu0 %vm148_vm1, %v17478_v56  ;;  %v17488_v56 = vld [vmem:[%s30328_s0 + $0x91] sm:$0xff] }
 0x863   :  { %20638 = vmatprep.subr.msk.mxu0 %vm31073_vm8, %v14351_v2 }
 0x864   :  { %20639 = vmatpush3.msk.msra.mxu0 %vm31075_vm7, %v14351_v2  ;;  %v31085_v2 = vld [vmem:[#allocation19_spill] sm:$0xff] }
 0x865   :  { %20279 = vmatmul.mubr.msk.f32.gmra.mrb[52].mxu1 %vm148_vm1, %v31056_v24  ;;  %v31074_v24 = vld [vmem:[#allocation12_spill] sm:$0xff] }
 0x866   :  { %20281 = vmatprep.mubr.msk.f32.mxu1 %vm148_vm1, %v31057_v13  ;;  %v17479_v13 = vld [vmem:[%s30328_s0 + $0x21] sm:$0xff] }
 0x867   :  { %20641 = vmatmul.mubr.msk.f32.vlgmr.msra.gmra.mrb[64].mxu0 %vm148_vm1, %v17479_v13  ;;  %v31086_v13 = vld [vmem:[#allocation27_spill] sm:$0xff] }
 0x869   :  { %20282 = vmatmul.mubr.msk.f32.gmra.mrb[54].mxu1 %vm148_vm1, %v31058_v55  ;;  %v31076_v55 = vld [vmem:[#allocation13_spill] sm:$0xff] }
 0x86a   :  { %20284 = vmatprep.mubr.msk.f32.mxu1 %vm148_vm1, %v31059_v50  ;;  %v17480_v50 = vld [vmem:[%s30328_s0 + $0x31] sm:$0xff] }
 0x86b   :  { %20643 = vmatprep.mubr.msk.f32.mxu0 %vm148_vm1, %v17480_v50  ;;  %v31087_v50 = vld [vmem:[#allocation22_spill] sm:$0xff] }
 0x86d   :  { %20285 = vmatmul.mubr.msk.f32.gmra.mrb[56].mxu1 %vm148_vm1, %v31060_v49  ;;  %v31077_v49 = vld [vmem:[#allocation14_spill] sm:$0xff] }
 0x86e   :  { %20287 = vmatprep.mubr.msk.f32.mxu1 %vm148_vm1, %v31061_v39  ;;  %v17481_v39 = vld [vmem:[%s30328_s0 + $0x39] sm:$0xff] }
 0x86f   :  { %20644 = vmatmul.mubr.msk.f32.gmra.mrb[66].mxu0 %vm148_vm1, %v17481_v39  ;;  %v31088_v39 = vld [vmem:[#allocation21_spill] sm:$0xff] }
 0x871   :  { %20288 = vmatmul.mubr.msk.f32.gmra.mrb[58].mxu1 %vm148_vm1, %v31062_v62  ;;  %v31078_v62 = vld [vmem:[#allocation15_spill] sm:$0xff] }
 0x872   :  { %20290 = vmatprep.mubr.msk.f32.mxu1 %vm148_vm1, %v31063_v1  ;;  %v17482_v1 = vld [vmem:[%s30328_s0 + $0x49] sm:$0xff] }
 0x873   :  { %20646 = vmatprep.mubr.msk.f32.mxu0 %vm148_vm1, %v17482_v1  ;;  %v31089_v1 = vld [vmem:[#allocation28_spill] sm:$0xff] }
 0x875   :  { %20291 = vmatmul.mubr.msk.f32.gmra.mrb[60].mxu1 %vm148_vm1, %v31064_v30  ;;  %v31079_v30 = vld [vmem:[#allocation16_spill] sm:$0xff] }
 0x876   :  { %20293 = vmatprep.mubr.msk.f32.mxu1 %vm148_vm1, %v10554_v6  ;;  %v17483_v6 = vld [vmem:[%s30328_s0 + $0x51] sm:$0xff] }
 0x877   :  { %20647 = vmatmul.mubr.msk.f32.gmra.mrb[68].mxu0 %vm148_vm1, %v17483_v6  ;;  %v31090_v6 = vld [vmem:[#allocation29_spill] sm:$0xff] }
 0x879   :  { %20294 = vmatmul.mubr.msk.f32.gmra.mrb[62].mxu1 %vm148_vm1, %v10555_v51  ;;  %v31080_v51 = vld [vmem:[#allocation17_spill] sm:$0xff] }
 0x87a   :  { %20296 = vmatprep.mubr.msk.f32.mxu1 %vm148_vm1, %v26425_v44  ;;  %v31072_v44 = vld [vmem:[#allocation11_spill] sm:$0xff] }
 0x87d   :  { %20297 = vmatmul.mubr.msk.f32.gmra.mrb[64].mxu1 %vm148_vm1, %v31065_v61  ;;  %v17484_v61 = vld [vmem:[%s30328_s0 + $0x61] sm:$0xff] }
 0x87e   :  { %20299 = vmatprep.mubr.msk.f32.mxu1 %vm148_vm1, %v31066_v11  ;;  %20649 = vmatprep.mubr.msk.f32.mxu0 %vm148_vm1, %v17484_v61  ;;  %v31081_v11 = vld [vmem:[#allocation18_spill] sm:$0xff] }
 0x87f   :  { %v17495_v61 = vld [vmem:[%s30328_s0 + $0xe1] sm:$0xff] }
 0x881   :  { %20300 = vmatmul.mubr.msk.f32.gmra.mrb[66].mxu1 %vm148_vm1, %v31067_v14  ;;  %v17485_v14 = vld [vmem:[%s30328_s0 + $0x69] sm:$0xff] }
 0x882   :  { %20302 = vmatprep.mubr.msk.f32.mxu1 %vm148_vm1, %v31068_v5  ;;  %v31082_v5 = vld [vmem:[#allocation38_spill] sm:$0xff]  ;;  %20650 = vmatmul.mubr.msk.f32.gmra.mrb[70].mxu0 %vm148_vm1, %v17485_v14 }
 0x883   :  { %v31091_v14 = vld [vmem:[#allocation30_spill] sm:$0xff] }
 0x885   :  { %20303 = vmatmul.mubr.msk.f32.gmra.mrb[68].mxu1 %vm148_vm1, %v31069_v20  ;;  %v17486_v20 = vld [vmem:[%s30328_s0 + $0x79] sm:$0xff] }
 0x886   :  { %20305 = vmatprep.mubr.msk.f32.mxu1 %vm148_vm1, %v31070_v59  ;;  %20652 = vmatprep.mubr.msk.f32.mxu0 %vm148_vm1, %v17486_v20  ;;  %v31083_v59 = vld [vmem:[#allocation39_spill] sm:$0xff] }
 0x887   :  { %v17499_v20 = vld [vmem:[%s30328_s0 + $0x111] sm:$0xff] }
 0x889   :  { %20306 = vmatmul.mubr.msk.f32.gmra.mrb[70].mxu1 %vm148_vm1, %v31071_v58  ;;  %v17487_v58 = vld [vmem:[%s30328_s0 + $0x81] sm:$0xff] }
 0x88a   :  { %20308 = vmatprep.mubr.msk.f32.mxu1 %vm148_vm1, %v31072_v44  ;;  %v31084_v44 = vld [vmem:[#allocation20_spill] sm:$0xff]  ;;  %20653 = vmatmul.mubr.msk.f32.gmra.mrb[72].mxu0 %vm148_vm1, %v17487_v58  ;;  %v11235_v58 = vld [vmem:[#allocation2 + $0x30] sm:$0xff] }
 0x88b   :  { %20655 = vmatprep.mubr.msk.f32.mxu0 %vm148_vm1, %v17488_v56  ;;  %v11236_v56 = vld [vmem:[#allocation2 + $0x38] sm:$0xff] }
 0x88d   :  { %20309 = vmatmul.mubr.msk.f32.gmra.mrb[72].mxu1 %vm148_vm1, %v31074_v24  ;;  %v17489_v24 = vld [vmem:[%s30328_s0 + $0x99] sm:$0xff] }
 0x88e   :  { %20311 = vmatprep.mubr.msk.f32.mxu1 %vm148_vm1, %v31076_v55  ;;  %20656 = vmatmul.mubr.msk.f32.gmra.mrb[74].mxu0 %vm148_vm1, %v17489_v24  ;;  %v17490_v55 = vld [vmem:[%s30328_s0 + $0xa9] sm:$0xff]  ;;  %v27108_v24 = vld [vmem:[%s30329_s2 + $0x20] sm:$0xf] }
 0x88f   :  { %20658 = vmatprep.mubr.msk.f32.mxu0 %vm148_vm1, %v17490_v55  ;;  %v17504_v55 = vld [vmem:[%s30328_s0 + $0x151] sm:$0xff] }
 0x891   :  { %20312 = vmatmul.mubr.msk.f32.gmra.mrb[74].mxu1 %vm148_vm1, %v31077_v49  ;;  %v17491_v49 = vld [vmem:[%s30328_s0 + $0xb1] sm:$0xff] }
 0x892   :  { %20314 = vmatprep.mubr.msk.f32.mxu1 %vm148_vm1, %v31078_v62  ;;  %20659 = vmatmul.mubr.msk.f32.gmra.mrb[76].mxu0 %vm148_vm1, %v17491_v49  ;;  %v17492_v62 = vld [vmem:[%s30328_s0 + $0xc1] sm:$0xff] }
 0x893   :  { %20661 = vmatprep.mubr.msk.f32.mxu0 %vm148_vm1, %v17492_v62  ;;  %v11239_v49 = vld [vmem:[#allocation2 + $0x60] sm:$0xff]  ;;  %v11240_v62 = vld [vmem:[#allocation2 + $0x68] sm:$0xff] }
 0x895   :  { %20315 = vmatmul.mubr.msk.f32.gmra.mrb[76].mxu1 %vm148_vm1, %v31079_v30  ;;  %v17493_v30 = vld [vmem:[%s30328_s0 + $0xc9] sm:$0xff] }
 0x896   :  { %20317 = vmatprep.mubr.msk.f32.mxu1 %vm148_vm1, %v31080_v51  ;;  %20662 = vmatmul.mubr.msk.f32.gmra.mrb[78].mxu0 %vm148_vm1, %v17493_v30  ;;  %v17494_v51 = vld [vmem:[%s30328_s0 + $0xd9] sm:$0xff]  ;;  %v17507_v30 = vld [vmem:[%s30328_s0 + $0x171] sm:$0xff] }
 0x897   :  { %20664 = vmatprep.mubr.msk.f32.mxu0 %vm148_vm1, %v17494_v51  ;;  %v11242_v51 = vld [vmem:[#allocation2 + $0x80] sm:$0xff] }
 0x899   :  { %20318 = vmatmul.mubr.msk.f32.gmra.mrb[78].mxu1 %vm148_vm1, %v31081_v11  ;;  %v17496_v11 = vld [vmem:[%s30328_s0 + $0xf1] sm:$0xff] }
 0x89a   :  { %20320 = vmatprep.mubr.msk.f32.mxu1 %vm148_vm1, %v31082_v5  ;;  %20665 = vmatmul.mubr.msk.f32.gmra.mrb[80].mxu0 %vm148_vm1, %v17495_v61  ;;  %v10586_v5 = vld [vmem:[#allocation2 + $0x332] sm:$0xff] }
 0x89b   :  { %20667 = vmatprep.mubr.msk.f32.mxu0 %vm148_vm1, %v17496_v11  ;;  %v11243_v61 = vld [vmem:[#allocation2 + $0x90] sm:$0xff] }
 0x89c   :  { %v17509_v11 = vld [vmem:[%s30328_s0 + $0x189] sm:$0xff] }
 0x89d   :  { %20321 = vmatmul.mubr.msk.f32.gmra.mrb[80].mxu1 %vm148_vm1, %v31083_v59  ;;  %v10587_v59 = vld [vmem:[#allocation2 + $0x33a] sm:$0xff] }
 0x89e   :  { %20323 = vmatprep.mubr.msk.f32.mxu1 %vm148_vm1, %v31084_v44  ;;  %v17502_v44 = vld [vmem:[%s30328_s0 + $0x139] sm:$0xff] }
 0x8a1   :  { %20324 = vmatmul.mubr.msk.f32.gmra.mrb[82].mxu1 %vm148_vm1, %v31085_v2  ;;  %v11237_v2 = vld [vmem:[#allocation2 + $0x48] sm:$0xff] }
 0x8a2   :  { %20326 = vmatprep.mubr.msk.f32.mxu1 %vm148_vm1, %v31086_v13  ;;  %v17503_v13 = vld [vmem:[%s30328_s0 + $0x141] sm:$0xff] }
 0x8a5   :  { %20327 = vmatmul.mubr.msk.f32.gmra.mrb[84].mxu1 %vm148_vm1, %v31087_v50  ;;  %v11238_v50 = vld [vmem:[#allocation2 + $0x50] sm:$0xff] }
 0x8a6   :  { %20329 = vmatprep.mubr.msk.f32.mxu1 %vm148_vm1, %v31088_v39  ;;  %v17505_v39 = vld [vmem:[%s30328_s0 + $0x159] sm:$0xff] }
 0x8a9   :  { %20330 = vmatmul.mubr.msk.f32.gmra.mrb[86].mxu1 %vm148_vm1, %v31089_v1  ;;  %v11241_v1 = vld [vmem:[#allocation2 + $0x78] sm:$0xff] }
 0x8aa   :  { %20332 = vmatprep.mubr.msk.f32.mxu1 %vm148_vm1, %v31090_v6  ;;  %v17508_v6 = vld [vmem:[%s30328_s0 + $0x181] sm:$0xff] }
 0x8ad   :  { %20333 = vmatmul.mubr.msk.f32.gmra.mrb[88].mxu1 %vm148_vm1, %v26525_v7  ;;  %v17497_v7 = vld [vmem:[%s30328_s0 + $0xf9] sm:$0xff] }
 0x8ae   :  { %20335 = vmatprep.mubr.msk.f32.mxu1 %vm148_vm1, %v26529_v29  ;;  %20668 = vmatmul.mubr.msk.f32.gmra.mrb[82].mxu0 %vm148_vm1, %v17497_v7  ;;  %v17498_v29 = vld [vmem:[%s30328_s0 + $0x109] sm:$0xff]  ;;  %v11244_v7 = vld [vmem:[#allocation2 + $0x98] sm:$0xff] }
 0x8af   :  { %20670 = vmatprep.mubr.msk.f32.mxu0 %vm148_vm1, %v17498_v29  ;;  %v11245_v29 = vld [vmem:[#allocation2 + $0xa8] sm:$0xff] }
 0x8b1   :  { %20336 = vmatmul.mubr.msk.f32.gmra.mrb[90].mxu1 %vm148_vm1, %v31091_v14  ;;  %v17510_v14 = vld [vmem:[%s30328_s0 + $0x1c9] sm:$0xff] }
 0x8b2   :  { %20338 = vmatprep.mubr.msk.f32.mxu1 %vm148_vm1, %v26537_v45  ;;  %20671 = vmatmul.mubr.msk.f32.gmra.mrb[84].mxu0 %vm148_vm1, %v17499_v20  ;;  %v17500_v45 = vld [vmem:[%s30328_s0 + $0x121] sm:$0xff] }
 0x8b3   :  { %20673 = vmatprep.mubr.msk.f32.mxu0 %vm148_vm1, %v17500_v45  ;;  %v17512_v20 = vld [vmem:[%s30328_s0 + $0x1e1] sm:$0xff]  ;;  %v11246_v45 = vld [vmem:[#allocation2 + $0xb0] sm:$0xff] }
 0x8b5   :  { %20339 = vmatmul.mubr.msk.f32.gmra.mrb[92].mxu1 %vm148_vm1, %v26541_v19  ;;  %v17501_v19 = vld [vmem:[%s30328_s0 + $0x129] sm:$0xff] }
 0x8b6   :  { %20341 = vmatprep.mubr.msk.f32.mxu1 %vm148_vm1, %v10586_v5  ;;  %20674 = vmatmul.mubr.msk.f32.gmra.mrb[86].mxu0 %vm148_vm1, %v17501_v19  ;;  %v17511_v5 = vld [vmem:[%s30328_s0 + $0x1d1] sm:$0xff]  ;;  %v17514_v19 = vld [vmem:[%s30328_s0 + $0x1f9] sm:$0xff] }
 0x8b7   :  { %20676 = vmatprep.mubr.msk.f32.mxu0 %vm148_vm1, %v17502_v44  ;;  %v11248_v44 = vld [vmem:[#allocation2 + $0xc8] sm:$0xff] }
 0x8b9   :  { %20342 = vmatmul.mubr.msk.f32.gmra.mrb[94].mxu1 %vm148_vm1, %v10587_v59  ;;  %v11247_v59 = vld [vmem:[#allocation2 + $0xc0] sm:$0xff] }
 0x8ba   :  { %20346 = vmatprep.mubr.msk.f32.mxu1 %vm148_vm1, %v11235_v58  ;;  %20677 = vmatmul.mubr.msk.f32.gmra.mrb[88].mxu0 %vm148_vm1, %v17503_v13  ;;  %v17513_v58 = vld [vmem:[%s30328_s0 + $0x1e9] sm:$0xff]  ;;  %v17516_v13 = vld [vmem:[%s30328_s0 + $0x211] sm:$0xff] }
 0x8bb   :  { %20679 = vmatprep.mubr.msk.f32.mxu0 %vm148_vm1, %v17504_v55  ;;  %v11250_v55 = vld [vmem:[#allocation2 + $0xe0] sm:$0xff] }
 0x8bd   :  { %20347 = vmatmul.mubr.msk.f32.vlgmr.msra.gmra.mrb[32].mxu1 %vm148_vm1, %v11236_v56  ;;  %v11249_v56 = vld [vmem:[#allocation2 + $0xd8] sm:$0xff] }
 0x8be   :  { %20349 = vmatprep.mubr.msk.f32.mxu1 %vm148_vm1, %v11237_v2  ;;  %20443 = vmatpush3.msk.msra.mxu1 %vm31092_vm14, %v26872_v41  ;;  %v17506_v41 = vld [vmem:[%s30328_s0 + $0x169] sm:$0xff]  ;;  %v17515_v2 = vld [vmem:[%s30328_s0 + $0x201] sm:$0xff] }
 0x8bf   :  { %20540 = vmatprep.subr.msk.mxu1 %vm31093_vm12, %v27108_v24  ;;  %20680 = vmatmul.mubr.msk.f32.gmra.mrb[90].mxu0 %vm148_vm1, %v17505_v39  ;;  %v17518_v39 = vld [vmem:[%s30328_s0 + $0x229] sm:$0xff] }
 0x8c0   :  { %20682 = vmatprep.mubr.msk.f32.mxu0 %vm148_vm1, %v17506_v41  ;;  %v11252_v41 = vld [vmem:[#allocation2 + $0xf8] sm:$0xff] }
 0x8c1   :  { %20350 = vmatmul.mubr.msk.f32.gmra.mrb[34].mxu1 %vm148_vm1, %v11238_v50  ;;  %v11251_v50 = vld [vmem:[#allocation2 + $0xf0] sm:$0xff] }
 0x8c2   :  { %20352 = vmatprep.mubr.msk.f32.mxu1 %vm148_vm1, %v11239_v49  ;;  %v17517_v49 = vld [vmem:[%s30328_s0 + $0x219] sm:$0xff] }
 0x8c3   :  { %20683 = vmatmul.mubr.msk.f32.gmra.mrb[92].mxu0 %vm148_vm1, %v17507_v30  ;;  %v17520_v30 = vld [vmem:[%s30328_s0 + $0x241] sm:$0xff] }
 0x8c4   :  { %20685 = vmatprep.mubr.msk.f32.mxu0 %vm148_vm1, %v17508_v6  ;;  %v11254_v6 = vld [vmem:[#allocation2 + $0x110] sm:$0xff] }
 0x8c5   :  { %20353 = vmatmul.mubr.msk.f32.gmra.mrb[36].mxu1 %vm148_vm1, %v11240_v62  ;;  %v11253_v62 = vld [vmem:[#allocation2 + $0x108] sm:$0xff] }
 0x8c6   :  { %20355 = vmatprep.mubr.msk.f32.mxu1 %vm148_vm1, %v11241_v1  ;;  %v17519_v1 = vld [vmem:[%s30328_s0 + $0x231] sm:$0xff] }
 0x8c7   :  { %20686 = vmatmul.mubr.msk.f32.gmra.mrb[94].mxu0 %vm148_vm1, %v17509_v11  ;;  %v17522_v11 = vld [vmem:[%s30328_s0 + $0x259] sm:$0xff] }
 0x8c8   :  { %20688 = vmatprep.mubr.msk.f32.mxu0 %vm148_vm1, %v17510_v14  ;;  %v11256_v14 = vld [vmem:[#allocation2 + $0x128] sm:$0xff] }
 0x8c9   :  { %20356 = vmatmul.mubr.msk.f32.gmra.mrb[38].mxu1 %vm148_vm1, %v11242_v51  ;;  %v11255_v51 = vld [vmem:[#allocation2 + $0x120] sm:$0xff] }
 0x8ca   :  { %20358 = vmatprep.mubr.msk.f32.mxu1 %vm148_vm1, %v11243_v61  ;;  %v17521_v61 = vld [vmem:[%s30328_s0 + $0x249] sm:$0xff] }
 0x8cb   :  { %20689 = vmatmul.mubr.msk.f32.gmra.mrb[96].mxu0 %vm148_vm1, %v17511_v5  ;;  %v17524_v5 = vld [vmem:[%s30328_s0 + $0x271] sm:$0xff] }
 0x8cc   :  { %20691 = vmatprep.mubr.msk.f32.mxu0 %vm148_vm1, %v17512_v20  ;;  %v11258_v20 = vld [vmem:[#allocation2 + $0x140] sm:$0xff] }
 0x8cd   :  { %20359 = vmatmul.mubr.msk.f32.gmra.mrb[40].mxu1 %vm148_vm1, %v11244_v7  ;;  %v11257_v7 = vld [vmem:[#allocation2 + $0x138] sm:$0xff] }
 0x8ce   :  { %20361 = vmatprep.mubr.msk.f32.mxu1 %vm148_vm1, %v11245_v29  ;;  %v17523_v29 = vld [vmem:[%s30328_s0 + $0x261] sm:$0xff] }
 0x8cf   :  { %20692 = vmatmul.mubr.msk.f32.gmra.mrb[98].mxu0 %vm148_vm1, %v17513_v58  ;;  %v17526_v58 = vld [vmem:[%s30328_s0 + $0x289] sm:$0xff] }
 0x8d0   :  { %20694 = vmatprep.mubr.msk.f32.mxu0 %vm148_vm1, %v17514_v19  ;;  %v11260_v19 = vld [vmem:[#allocation2 + $0x158] sm:$0xff] }
 0x8d1   :  { %20362 = vmatmul.mubr.msk.f32.gmra.mrb[42].mxu1 %vm148_vm1, %v11246_v45  ;;  %v11259_v45 = vld [vmem:[#allocation2 + $0x150] sm:$0xff] }
 0x8d2   :  { %20364 = vmatprep.mubr.msk.f32.mxu1 %vm148_vm1, %v11247_v59  ;;  %v17525_v59 = vld [vmem:[%s30328_s0 + $0x279] sm:$0xff] }
 0x8d3   :  { %20695 = vmatmul.mubr.msk.f32.gmra.mrb[100].mxu0 %vm148_vm1, %v17515_v2  ;;  %v17528_v2 = vld [vmem:[%s30328_s0 + $0x2a1] sm:$0xff] }
 0x8d4   :  { %20697 = vmatprep.mubr.msk.f32.mxu0 %vm148_vm1, %v17516_v13  ;;  %v11262_v13 = vld [vmem:[#allocation2 + $0x170] sm:$0xff] }
 0x8d5   :  { %20365 = vmatmul.mubr.msk.f32.gmra.mrb[44].mxu1 %vm148_vm1, %v11248_v44  ;;  %v11261_v44 = vld [vmem:[#allocation2 + $0x168] sm:$0xff] }
 0x8d6   :  { %20367 = vmatprep.mubr.msk.f32.mxu1 %vm148_vm1, %v11249_v56  ;;  %v17527_v56 = vld [vmem:[%s30328_s0 + $0x291] sm:$0xff] }
 0x8d7   :  { %20698 = vmatmul.mubr.msk.f32.gmra.mrb[102].mxu0 %vm148_vm1, %v17517_v49  ;;  %v11265_v49 = vld [vmem:[#allocation2 + $0x198] sm:$0xff] }
 0x8d8   :  { %20700 = vmatprep.mubr.msk.f32.mxu0 %vm148_vm1, %v17518_v39  ;;  %v17531_v39 = vld [vmem:[%s30328_s0 + $0x2c1] sm:$0xff] }
 0x8d9   :  { %20368 = vmatmul.mubr.msk.f32.gmra.mrb[46].mxu1 %vm148_vm1, %v11250_v55  ;;  %v17529_v55 = vld [vmem:[%s30328_s0 + $0x2a9] sm:$0xff] }
 0x8da   :  { %20370 = vmatprep.mubr.msk.f32.mxu1 %vm148_vm1, %v11251_v50  ;;  %v17530_v50 = vld [vmem:[%s30328_s0 + $0x2b9] sm:$0xff] }
 0x8db   :  { %20701 = vmatmul.mubr.msk.f32.gmra.mrb[104].mxu0 %vm148_vm1, %v17519_v1  ;;  %v17534_v1 = vld [vmem:[%s30328_s0 + $0x2e9] sm:$0xff] }
 0x8dc   :  { %20703 = vmatprep.mubr.msk.f32.mxu0 %vm148_vm1, %v17520_v30  ;;  %v11268_v30 = vld [vmem:[#allocation2 + $0x1e8] sm:$0xff] }
 0x8dd   :  { %20371 = vmatmul.mubr.msk.f32.gmra.mrb[48].mxu1 %vm148_vm1, %v11252_v41  ;;  %v11266_v41 = vld [vmem:[#allocation2 + $0x1a0] sm:$0xff] }
 0x8de   :  { %20373 = vmatprep.mubr.msk.f32.mxu1 %vm148_vm1, %v11253_v62  ;;  %v11267_v62 = vld [vmem:[#allocation2 + $0x1e0] sm:$0xff] }
 0x8df   :  { %20704 = vmatmul.mubr.msk.f32.gmra.mrb[106].mxu0 %vm148_vm1, %v17521_v61  ;;  %v17536_v61 = vld [vmem:[%s30328_s0 + $0x301] sm:$0xff] }
 0x8e0   :  { %20706 = vmatprep.mubr.msk.f32.mxu0 %vm148_vm1, %v17522_v11  ;;  %v11270_v11 = vld [vmem:[#allocation2 + $0x200] sm:$0xff] }
 0x8e1   :  { %20374 = vmatmul.mubr.msk.f32.gmra.mrb[50].mxu1 %vm148_vm1, %v11254_v6  ;;  %v11269_v6 = vld [vmem:[#allocation2 + $0x1f8] sm:$0xff] }
 0x8e2   :  { %20376 = vmatprep.mubr.msk.f32.mxu1 %vm148_vm1, %v11255_v51  ;;  %v17535_v51 = vld [vmem:[%s30328_s0 + $0x2f1] sm:$0xff] }
 0x8e3   :  { %20707 = vmatmul.mubr.msk.f32.gmra.mrb[108].mxu0 %vm148_vm1, %v17523_v29  ;;  %v17538_v29 = vld [vmem:[%s30328_s0 + $0x319] sm:$0xff] }
 0x8e4   :  { %20709 = vmatprep.mubr.msk.f32.mxu0 %vm148_vm1, %v17524_v5  ;;  %v11272_v5 = vld [vmem:[#allocation2 + $0x218] sm:$0xff] }
 0x8e5   :  { %20377 = vmatmul.mubr.msk.f32.gmra.mrb[52].mxu1 %vm148_vm1, %v11256_v14  ;;  %v11271_v14 = vld [vmem:[#allocation2 + $0x210] sm:$0xff] }
 0x8e6   :  { %20379 = vmatprep.mubr.msk.f32.mxu1 %vm148_vm1, %v11257_v7  ;;  %v17537_v7 = vld [vmem:[%s30328_s0 + $0x309] sm:$0xff] }
 0x8e7   :  { %20710 = vmatmul.mubr.msk.f32.gmra.mrb[110].mxu0 %vm148_vm1, %v17525_v59  ;;  %v17540_v59 = vld [vmem:[%s30328_s0 + $0x331] sm:$0xff] }
 0x8e8   :  { %20712 = vmatprep.mubr.msk.f32.mxu0 %vm148_vm1, %v17526_v58  ;;  %v11274_v58 = vld [vmem:[#allocation2 + $0x230] sm:$0xff] }
 0x8e9   :  { %20380 = vmatmul.mubr.msk.f32.gmra.mrb[54].mxu1 %vm148_vm1, %v11258_v20  ;;  %v11273_v20 = vld [vmem:[#allocation2 + $0x228] sm:$0xff] }
 0x8ea   :  { %20382 = vmatprep.mubr.msk.f32.mxu1 %vm148_vm1, %v11259_v45  ;;  %v17539_v45 = vld [vmem:[%s30328_s0 + $0x321] sm:$0xff] }
 0x8eb   :  { %20713 = vmatmul.mubr.msk.f32.gmra.mrb[112].mxu0 %vm148_vm1, %v17527_v56  ;;  %v11276_v56 = vld [vmem:[#allocation2 + $0x248] sm:$0xff] }
 0x8ec   :  { %20715 = vmatprep.mubr.msk.f32.mxu0 %vm148_vm1, %v17528_v2  ;;  %v11277_v2 = vld [vmem:[#allocation2 + $0x258] sm:$0xff] }
 0x8ed   :  { %20383 = vmatmul.mubr.msk.f32.gmra.mrb[56].mxu1 %vm148_vm1, %v11260_v19  ;;  %v11275_v19 = vld [vmem:[#allocation2 + $0x240] sm:$0xff] }
 0x8ee   :  { %20385 = vmatprep.mubr.msk.f32.mxu1 %vm148_vm1, %v11261_v44  ;;  %v17541_v44 = vld [vmem:[%s30328_s0 + $0x339] sm:$0xff] }
 0x8ef   :  { %20716 = vmatmul.mubr.msk.f32.gmra.mrb[114].mxu0 %vm148_vm1, %v17529_v55  ;;  %v11279_v55 = vld [vmem:[#allocation2 + $0x270] sm:$0xff] }
 0x8f0   :  { %20718 = vmatprep.mubr.msk.f32.mxu0 %vm148_vm1, %v17530_v50  ;;  %v11280_v50 = vld [vmem:[#allocation2 + $0x278] sm:$0xff] }
 0x8f1   :  { %20386 = vmatmul.mubr.msk.f32.gmra.mrb[58].mxu1 %vm148_vm1, %v11262_v13  ;;  %v11278_v13 = vld [vmem:[#allocation2 + $0x260] sm:$0xff] }
 0x8f2   :  { %20388 = vmatprep.mubr.msk.f32.mxu1 %vm148_vm1, %v26614_v36  ;;  %v17532_v36 = vld [vmem:[%s30328_s0 + $0x2d1] sm:$0xff] }
 0x8f3   :  { %20719 = vmatmul.mubr.msk.f32.gmra.mrb[116].mxu0 %vm148_vm1, %v17531_v39  ;;  %v11282_v39 = vld [vmem:[#allocation2 + $0x290] sm:$0xff] }
 0x8f4   :  { %20721 = vmatprep.mubr.msk.f32.mxu0 %vm148_vm1, %v17532_v36  ;;  %v11284_v36 = vld [vmem:[#allocation2 + $0x2a8] sm:$0xff] }
 0x8f5   :  { %20389 = vmatmul.mubr.msk.f32.gmra.mrb[60].mxu1 %vm148_vm1, %v26618_v28  ;;  %v17533_v28 = vld [vmem:[%s30328_s0 + $0x2d9] sm:$0xff] }
 0x8f6   :  { %20391 = vmatprep.mubr.msk.f32.mxu1 %vm148_vm1, %v11265_v49  ;;  %v11281_v49 = vld [vmem:[#allocation2 + $0x288] sm:$0xff] }
 0x8f7   :  { %20722 = vmatmul.mubr.msk.f32.gmra.mrb[118].mxu0 %vm148_vm1, %v17533_v28  ;;  %v11286_v28 = vld [vmem:[#allocation2 + $0x2c0] sm:$0xff] }
 0x8f8   :  { %20724 = vmatprep.mubr.msk.f32.mxu0 %vm148_vm1, %v17534_v1  ;;  %v11287_v1 = vld [vmem:[#allocation2 + $0x2d0] sm:$0xff] }
 0x8f9   :  { %20392 = vmatmul.mubr.msk.f32.gmra.mrb[62].mxu1 %vm148_vm1, %v11266_v41  ;;  %v11283_v41 = vld [vmem:[#allocation2 + $0x2a0] sm:$0xff] }
 0x8fa   :  { %20394 = vmatprep.mubr.msk.f32.mxu1 %vm148_vm1, %v11267_v62  ;;  %v11285_v62 = vld [vmem:[#allocation2 + $0x2b8] sm:$0xff] }
 0x8fb   :  { %20725 = vmatmul.mubr.msk.f32.gmra.mrb[120].mxu0 %vm148_vm1, %v17535_v51  ;;  %v11290_v51 = vld [vmem:[#allocation2 + $0x2f0] sm:$0xff] }
 0x8fc   :  { %20727 = vmatprep.mubr.msk.f32.mxu0 %vm148_vm1, %v17536_v61  ;;  %v11291_v61 = vld [vmem:[#allocation2 + $0x300] sm:$0xff] }
 0x8fd   :  { %20395 = vmatmul.mubr.msk.f32.gmra.mrb[64].mxu1 %vm148_vm1, %v11268_v30  ;;  %v11288_v30 = vld [vmem:[#allocation2 + $0x2d8] sm:$0xff] }
 0x8fe   :  { %20397 = vmatprep.mubr.msk.f32.mxu1 %vm148_vm1, %v11269_v6  ;;  %v11289_v6 = vld [vmem:[#allocation2 + $0x2e8] sm:$0xff] }
 0x8ff   :  { %20728 = vmatmul.mubr.msk.f32.gmra.mrb[122].mxu0 %vm148_vm1, %v17537_v7  ;;  %v11294_v7 = vld [vmem:[#allocation2 + $0x320] sm:$0xff] }
 0x900   :  { %20730 = vmatprep.mubr.msk.f32.mxu0 %vm148_vm1, %v17538_v29  ;;  %v11297_v29 = vld [vmem:[#allocation2 + $0x348] sm:$0xff] }
 0x901   :  { %20398 = vmatmul.mubr.msk.f32.gmra.mrb[66].mxu1 %vm148_vm1, %v11270_v11  ;;  %v11292_v11 = vld [vmem:[#allocation2 + $0x308] sm:$0xff] }
 0x902   :  { %20400 = vmatprep.mubr.msk.f32.mxu1 %vm148_vm1, %v11271_v14  ;;  %v11293_v14 = vld [vmem:[#allocation2 + $0x318] sm:$0xff] }
 0x903   :  { %20731 = vmatmul.mubr.msk.f32.gmra.mrb[124].mxu0 %vm148_vm1, %v17539_v45 }
 0x904   :  { %20733 = vmatprep.mubr.msk.f32.mxu0 %vm148_vm1, %v17540_v59 }
 0x905   :  { %20401 = vmatmul.mubr.msk.f32.gmra.mrb[68].mxu1 %vm148_vm1, %v11272_v5  ;;  %v11298_v5 = vld [vmem:[#allocation2 + $0x350] sm:$0xff] }
 0x906   :  { %20403 = vmatprep.mubr.msk.f32.mxu1 %vm148_vm1, %v11273_v20 }
 0x907   :  { %20734 = vmatmul.mubr.msk.f32.gmra.mrb[126].mxu0 %vm148_vm1, %v17541_v44 }
 0x909   :  { %20404 = vmatmul.mubr.msk.f32.gmra.mrb[70].mxu1 %vm148_vm1, %v11274_v58 }
 0x90a   :  { %20406 = vmatprep.mubr.msk.f32.mxu1 %vm148_vm1, %v11275_v19 }
 0x90d   :  { %20407 = vmatmul.mubr.msk.f32.gmra.mrb[72].mxu1 %vm148_vm1, %v11276_v56 }
 0x90e   :  { %20409 = vmatprep.mubr.msk.f32.mxu1 %vm148_vm1, %v11277_v2 }
 0x911   :  { %20410 = vmatmul.mubr.msk.f32.gmra.mrb[74].mxu1 %vm148_vm1, %v11278_v13 }
 0x912   :  { %20412 = vmatprep.mubr.msk.f32.mxu1 %vm148_vm1, %v11279_v55 }
 0x915   :  { %20413 = vmatmul.mubr.msk.f32.gmra.mrb[76].mxu1 %vm148_vm1, %v11280_v50 }
 0x916   :  { %20415 = vmatprep.mubr.msk.f32.mxu1 %vm148_vm1, %v11281_v49 }
 0x919   :  { %20416 = vmatmul.mubr.msk.f32.gmra.mrb[78].mxu1 %vm148_vm1, %v11282_v39 }
 0x91a   :  { %20418 = vmatprep.mubr.msk.f32.mxu1 %vm148_vm1, %v11283_v41 }
 0x91d   :  { %20419 = vmatmul.mubr.msk.f32.gmra.mrb[80].mxu1 %vm148_vm1, %v11284_v36  ;;  %v11981_v36 = vld [vmem:[#allocation2 + $0x211] sm:$0xff] }
 0x91e   :  { %20421 = vmatprep.mubr.msk.f32.mxu1 %vm148_vm1, %v11285_v62 }
 0x921   :  { %20422 = vmatmul.mubr.msk.f32.gmra.mrb[82].mxu1 %vm148_vm1, %v11286_v28 }
 0x922   :  { %20424 = vmatprep.mubr.msk.f32.mxu1 %vm148_vm1, %v11287_v1 }
 0x925   :  { %20425 = vmatmul.mubr.msk.f32.gmra.mrb[84].mxu1 %vm148_vm1, %v11288_v30  ;;  %v11982_v30 = vld [vmem:[#allocation2 + $0x219] sm:$0xff] }
 0x926   :  { %20427 = vmatprep.mubr.msk.f32.mxu1 %vm148_vm1, %v11289_v6 }
 0x929   :  { %20428 = vmatmul.mubr.msk.f32.gmra.mrb[86].mxu1 %vm148_vm1, %v11290_v51  ;;  %v11983_v51 = vld [vmem:[#allocation2 + $0x229] sm:$0xff] }
 0x92a   :  { %20430 = vmatprep.mubr.msk.f32.mxu1 %vm148_vm1, %v11291_v61 }
 0x92d   :  { %20431 = vmatmul.mubr.msk.f32.gmra.mrb[88].mxu1 %vm148_vm1, %v11292_v11 }
 0x92e   :  { %20433 = vmatprep.mubr.msk.f32.mxu1 %vm148_vm1, %v11293_v14 }
 0x931   :  { %20434 = vmatmul.mubr.msk.f32.gmra.mrb[90].mxu1 %vm148_vm1, %v11294_v7 }
 0x932   :  { %20436 = vmatprep.mubr.msk.f32.mxu1 %vm148_vm1, %v26682_v54 }
 0x935   :  { %20437 = vmatmul.mubr.msk.f32.gmra.mrb[92].mxu1 %vm148_vm1, %v26686_v43 }
 0x936   :  { %20439 = vmatprep.mubr.msk.f32.mxu1 %vm148_vm1, %v11297_v29  ;;  %v11984_v29 = vld [vmem:[#allocation2 + $0x231] sm:$0xff] }
 0x939   :  { %20440 = vmatmul.mubr.msk.f32.gmra.mrb[94].mxu1 %vm148_vm1, %v11298_v5 }
 0x93a   :  { %20444 = vmatprep.mubr.msk.f32.mxu1 %vm148_vm1, %v26692_v3  ;;  %v27380_v54 = vpop.f32.mrb[64].mxu0 }
 0x93b   :  { %v14933_v43 = vsel %vm30632_vm9, %v27380_v54, 0.0  ;;  %v27384_v3 = vpop.f32.mrb[65].mxu0 }
 0x93d   :  { %20445 = vmatmul.mubr.msk.f32.vlgmr.msra.gmra.mrb[32].mxu1 %vm148_vm1, %v26705_v42  ;;  %v14932_v42 = vsel %vm30632_vm9, %v27384_v3, 0.0 }
 0x93e   :  { %20447 = vmatprep.mubr.msk.f32.mxu1 %vm148_vm1, %v26709_v60  ;;  %20541 = vmatpush3.msk.msra.mxu1 %vm31094_vm15, %v27108_v24  ;;  %v14934_v60 = vadd.f32 %v14933_v43, %v14932_v42  ;;  %v11976_v24 = vld [vmem:[#allocation2 + $0x1a1] sm:$0xff] }
 0x93f   :  { %v11985_v43 = vld [vmem:[#allocation2 + $0x241] sm:$0xff] }
 0x941   :  { %20448 = vmatmul.mubr.msk.f32.gmra.mrb[34].mxu1 %vm148_vm1, %v26713_v25 }
 0x942   :  { %20450 = vmatprep.mubr.msk.f32.mxu1 %vm148_vm1, %v26717_v8  ;;  %v27390_v25 = vpop.f32.mrb[66].mxu0 }
 0x943   :  { %v27394_v8 = vpop.f32.mrb[67].mxu0 }
 0x945   :  { %20451 = vmatmul.mubr.msk.f32.gmra.mrb[36].mxu1 %vm148_vm1, %v26721_v0  ;;  %v14937_v0 = vsel %vm30632_vm9, %v27390_v25, 0.0 }
 0x946   :  { %20453 = vmatprep.mubr.msk.f32.mxu1 %vm148_vm1, %v26725_v48  ;;  %v14935_v48 = vsel %vm30632_vm9, %v27394_v8, 0.0 }
 0x949   :  { %20454 = vmatmul.mubr.msk.f32.gmra.mrb[38].mxu1 %vm148_vm1, %v26729_v26  ;;  %v14936_v26 = vadd.f32 %v14935_v48, %v14934_v60 }
 0x94a   :  { %20456 = vmatprep.mubr.msk.f32.mxu1 %vm148_vm1, %v26733_v16  ;;  %v27402_v16 = vpop.f32.mrb[68].mxu0 }
 0x94d   :  { %20457 = vmatmul.mubr.msk.f32.gmra.mrb[40].mxu1 %vm148_vm1, %v26737_v9  ;;  %v27406_v9 = vpop.f32.mrb[69].mxu0 }
 0x94e   :  { %20459 = vmatprep.mubr.msk.f32.mxu1 %vm148_vm1, %v26741_v63  ;;  %v14938_v63 = vadd.f32 %v14937_v0, %v14936_v26 }
 0x951   :  { %20460 = vmatmul.mubr.msk.f32.gmra.mrb[42].mxu1 %vm148_vm1, %v26745_v37  ;;  %v14941_v37 = vsel %vm30632_vm9, %v27402_v16, 0.0 }
 0x952   :  { %20462 = vmatprep.mubr.msk.f32.mxu1 %vm148_vm1, %v26749_v22  ;;  %v14939_v22 = vsel %vm30632_vm9, %v27406_v9, 0.0 }
 0x955   :  { %20463 = vmatmul.mubr.msk.f32.gmra.mrb[44].mxu1 %vm148_vm1, %v26753_v33  ;;  %v14940_v33 = vadd.f32 %v14939_v22, %v14938_v63  ;;  %v11986_v63 = vld [vmem:[#allocation2 + $0x249] sm:$0xff]  ;;  %v11987_v22 = vld [vmem:[#allocation2 + $0x259] sm:$0xff] }
 0x956   :  { %20465 = vmatprep.mubr.msk.f32.mxu1 %vm148_vm1, %v26757_v34  ;;  %v27414_v34 = vpop.f32.mrb[70].mxu0 }
 0x959   :  { %20466 = vmatmul.mubr.msk.f32.gmra.mrb[46].mxu1 %vm148_vm1, %v26761_v4  ;;  %v27418_v4 = vpop.f32.mrb[71].mxu0 }
 0x95a   :  { %20468 = vmatprep.mubr.msk.f32.mxu1 %vm148_vm1, %v26765_v57  ;;  %v14942_v57 = vadd.f32 %v14941_v37, %v14940_v33 }
 0x95d   :  { %20469 = vmatmul.mubr.msk.f32.gmra.mrb[48].mxu1 %vm148_vm1, %v26769_v18  ;;  %v14945_v18 = vsel %vm30632_vm9, %v27414_v34, 0.0 }
 0x95e   :  { %20471 = vmatprep.mubr.msk.f32.mxu1 %vm148_vm1, %v26773_v17  ;;  %v14943_v17 = vsel %vm30632_vm9, %v27418_v4, 0.0 }
 0x961   :  { %20472 = vmatmul.mubr.msk.f32.gmra.mrb[50].mxu1 %vm148_vm1, %v26777_v32  ;;  %v14944_v32 = vadd.f32 %v14943_v17, %v14942_v57 }
 0x962   :  { %20474 = vmatprep.mubr.msk.f32.mxu1 %vm148_vm1, %v26781_v38  ;;  %v27426_v38 = vpop.f32.mrb[72].mxu0 }
 0x965   :  { %20475 = vmatmul.mubr.msk.f32.gmra.mrb[52].mxu1 %vm148_vm1, %v26785_v46  ;;  %v27430_v46 = vpop.f32.mrb[73].mxu0 }
 0x966   :  { %20477 = vmatprep.mubr.msk.f32.mxu1 %vm148_vm1, %v26789_v31  ;;  %v14946_v31 = vadd.f32 %v14945_v18, %v14944_v32 }
 0x969   :  { %20478 = vmatmul.mubr.msk.f32.gmra.mrb[54].mxu1 %vm148_vm1, %v26793_v53  ;;  %v11975_v53 = vld [vmem:[#allocation2 + $0x199] sm:$0xff] }
 0x96a   :  { %20480 = vmatprep.mubr.msk.f32.mxu1 %vm148_vm1, %v26797_v35  ;;  %v14949_v35 = vsel %vm30632_vm9, %v27426_v38, 0.0 }
 0x96d   :  { %20481 = vmatmul.mubr.msk.f32.gmra.mrb[56].mxu1 %vm148_vm1, %v26801_v23  ;;  %v14947_v23 = vsel %vm30632_vm9, %v27430_v46, 0.0 }
 0x96e   :  { %20483 = vmatprep.mubr.msk.f32.mxu1 %vm148_vm1, %v26805_v10  ;;  %v14948_v10 = vadd.f32 %v14947_v23, %v14946_v31  ;;  %v11988_v31 = vld [vmem:[#allocation2 + $0x261] sm:$0xff] }
 0x970   :  { %v14950_v20 = vadd.f32 %v14949_v35, %v14948_v10  ;;  %v11989_v35 = vld [vmem:[#allocation2 + $0x271] sm:$0xff] }
 0x971   :  { %20484 = vmatmul.mubr.msk.f32.gmra.mrb[58].mxu1 %vm148_vm1, %v26809_v15  ;;  %v27438_v15 = vpop.f32.mrb[74].mxu0 }
 0x972   :  { %20486 = vmatprep.mubr.msk.f32.mxu1 %vm148_vm1, %v26813_v47  ;;  %v27441_v47 = vpop.f32.mrb[75].mxu0  ;;  %v14953_v45 = vsel %vm30632_vm9, %v27438_v15, 0.0 }
 0x973   :  { %v14951_v59 = vsel %vm30632_vm9, %v27441_v47, 0.0  ;;  %v27448_v19 = vpop.f32.mrb[76].mxu0 }
 0x974   :  { %v14952_v58 = vadd.f32 %v14951_v59, %v14950_v20  ;;  %v14957_v56 = vsel %vm30632_vm9, %v27448_v19, 0.0  ;;  %v11990_v20 = vld [vmem:[#allocation2 + $0x279] sm:$0xff] }
 0x975   :  { %20487 = vmatmul.mubr.msk.f32.gmra.mrb[60].mxu1 %vm148_vm1, %v26817_v27  ;;  %v27452_v27 = vpop.f32.mrb[77].mxu0 }
 0x976   :  { %20489 = vmatprep.mubr.msk.f32.mxu1 %vm148_vm1, %v11975_v53  ;;  %v14954_v44 = vadd.f32 %v14953_v45, %v14952_v58  ;;  %v14955_v2 = vsel %vm30632_vm9, %v27452_v27, 0.0  ;;  %v27460_v55 = vpop.f32.mrb[78].mxu0  ;;  %v11991_v58 = vld [vmem:[#allocation2 + $0x289] sm:$0xff] }
 0x977   :  { %v27464_v50 = vpop.f32.mrb[79].mxu0  ;;  %v14961_v49 = vsel %vm30632_vm9, %v27460_v55, 0.0 }
 0x978   :  { %v14956_v13 = vadd.f32 %v14955_v2, %v14954_v44  ;;  %v14959_v39 = vsel %vm30632_vm9, %v27464_v50, 0.0 }
 0x979   :  { %20490 = vmatmul.mubr.msk.f32.gmra.mrb[62].mxu1 %vm148_vm1, %v11976_v24 }
 0x97a   :  { %20492 = vmatprep.mubr.msk.f32.mxu1 %vm148_vm1, %v26823_v40  ;;  %v14958_v40 = vadd.f32 %v14957_v56, %v14956_v13 }
 0x97c   :  { %v14960_v41 = vadd.f32 %v14959_v39, %v14958_v40  ;;  %v11992_v40 = vld [vmem:[#allocation2 + $0x291] sm:$0xff] }
 0x97d   :  { %20493 = vmatmul.mubr.msk.f32.gmra.mrb[64].mxu1 %vm148_vm1, %v26827_v21  ;;  %v27472_v21 = vpop.f32.mrb[80].mxu0 }
 0x97e   :  { %20495 = vmatprep.mubr.msk.f32.mxu1 %vm148_vm1, %v26831_v52  ;;  %v27475_v62 = vpop.f32.mrb[81].mxu0  ;;  %v14962_v52 = vadd.f32 %v14961_v49, %v14960_v41  ;;  %v14965_v28 = vsel %vm30632_vm9, %v27472_v21, 0.0  ;;  %v11993_v41 = vld [vmem:[#allocation2 + $0x2a1] sm:$0xff] }
 0x97f   :  { %v14963_v1 = vsel %vm30632_vm9, %v27475_v62, 0.0 }
 0x980   :  { %v14964_v6 = vadd.f32 %v14963_v1, %v14962_v52 }
 0x981   :  { %20496 = vmatmul.mubr.msk.f32.gmra.mrb[66].mxu1 %vm148_vm1, %v26835_v12  ;;  %v27482_v12 = vpop.f32.mrb[82].mxu0 }
 0x982   :  { %20498 = vmatprep.mubr.msk.f32.mxu1 %vm148_vm1, %v11981_v36  ;;  %v27485_v61 = vpop.f32.mrb[83].mxu0  ;;  %v14966_v11 = vadd.f32 %v14965_v28, %v14964_v6  ;;  %v14969_v14 = vsel %vm30632_vm9, %v27482_v12, 0.0 }
 0x983   :  { %v14967_v7 = vsel %vm30632_vm9, %v27485_v61, 0.0 }
 0x984   :  { %v14968_v5 = vadd.f32 %v14967_v7, %v14966_v11  ;;  %v11995_v11 = vld [vmem:[#allocation2 + $0x2b9] sm:$0xff] }
 0x985   :  { %20499 = vmatmul.mubr.msk.f32.gmra.mrb[68].mxu1 %vm148_vm1, %v11982_v30  ;;  %v27492_v42 = vpop.f32.mrb[84].mxu0  ;;  %v11994_v30 = vld [vmem:[#allocation2 + $0x2a9] sm:$0xff] }
 0x986   :  { %20501 = vmatprep.mubr.msk.f32.mxu1 %vm148_vm1, %v11983_v51  ;;  %v27495_v60 = vpop.f32.mrb[85].mxu0  ;;  %v14970_v0 = vadd.f32 %v14969_v14, %v14968_v5  ;;  %v14973_v48 = vsel %vm30632_vm9, %v27492_v42, 0.0 }
 0x987   :  { %v14971_v26 = vsel %vm30632_vm9, %v27495_v60, 0.0 }
 0x988   :  { %v14972_v37 = vadd.f32 %v14971_v26, %v14970_v0  ;;  %v11996_v0 = vld [vmem:[#allocation2 + $0x2c1] sm:$0xff] }
 0x989   :  { %20502 = vmatmul.mubr.msk.f32.gmra.mrb[70].mxu1 %vm148_vm1, %v11984_v29  ;;  %v27502_v33 = vpop.f32.mrb[86].mxu0  ;;  %v31095_v29 = vmov 0.0  }
 0x98a   :  { %20504 = vmatprep.mubr.msk.f32.mxu1 %vm148_vm1, %v11985_v43  ;;  %v27505_v57 = vpop.f32.mrb[87].mxu0  ;;  %v14974_v18 = vadd.f32 %v14973_v48, %v14972_v37  ;;  %v14977_v17 = vsel %vm30632_vm9, %v27502_v33, 0.0  ;;  %15477 = vst.msk [vmem:[#allocation4 + $0x88] sm:$0x1] %vm14094_vm13, %v31095_v29  ;;  %15478 = vst.msk [vmem:[#allocation4 + $0xa0] sm:$0x1] %vm14094_vm13, %v31095_v29 }
 0x98b   :  { %v14975_v32 = vsel %vm30632_vm9, %v27505_v57, 0.0  ;;  %15479 = vst.msk [vmem:[#allocation4 + $0xb8] sm:$0x1] %vm14094_vm13, %v31095_v29  ;;  %15472 = vst.msk [vmem:[#allocation4 + $0x10] sm:$0x1] %vm14094_vm13, %v31095_v29 }
 0x98c   :  { %v14976_v53 = vadd.f32 %v14975_v32, %v14974_v18  ;;  %15473 = vst.msk [vmem:[#allocation4 + $0x28] sm:$0x1] %vm14094_vm13, %v31095_v29  ;;  %15474 = vst.msk [vmem:[#allocation4 + $0x40] sm:$0x1] %vm14094_vm13, %v31095_v29  ;;  %v11998_v18 = vld [vmem:[#allocation2 + $0x2d9] sm:$0xff] }
 0x98d   :  { %20505 = vmatmul.mubr.msk.f32.gmra.mrb[72].mxu1 %vm148_vm1, %v11986_v63  ;;  %v27513_v23 = vpop.f32.mrb[88].mxu0  ;;  %15475 = vst.msk [vmem:[#allocation4 + $0x58] sm:$0x1] %vm14094_vm13, %v31095_v29  ;;  %15476 = vst.msk [vmem:[#allocation4 + $0x70] sm:$0x1] %vm14094_vm13, %v31095_v29  ;;  %v11997_v63 = vld [vmem:[#allocation2 + $0x2d1] sm:$0xff] }
 0x98e   :  { %20507 = vmatprep.mubr.msk.f32.mxu1 %vm148_vm1, %v11987_v22  ;;  %v14978_v10 = vadd.f32 %v14977_v17, %v14976_v53  ;;  %v27515_v24 = vpop.f32.mrb[89].mxu0  ;;  %v14981_v45 = vsel %vm30632_vm9, %v27513_v23, 0.0  ;;  %15480 = vst.msk [vmem:[#allocation4 + $0xd0] sm:$0x1] %vm14094_vm13, %v31095_v29  ;;  %15481 = vst.msk [vmem:[#allocation4 + $0xe8] sm:$0x1] %vm14094_vm13, %v31095_v29 }
 0x98f   :  { %v14979_v59 = vsel %vm30632_vm9, %v27515_v24, 0.0  ;;  %15482 = vst.msk [vmem:[#allocation4 + $0x100] sm:$0x1] %vm14094_vm13, %v31095_v29  ;;  %15483 = vst.msk [vmem:[#allocation4 + $0x118] sm:$0x1] %vm14094_vm13, %v31095_v29  ;;  %v11999_v17 = vld [vmem:[#allocation2 + $0x2e9] sm:$0xff] }
 0x990   :  { %v14980_v44 = vadd.f32 %v14979_v59, %v14978_v10  ;;  %15484 = vst.msk [vmem:[#allocation4 + $0x130] sm:$0x1] %vm14094_vm13, %v31095_v29  ;;  %15485 = vst.msk [vmem:[#allocation4 + $0x148] sm:$0x1] %vm14094_vm13, %v31095_v29  ;;  %v12000_v53 = vld [vmem:[#allocation2 + $0x2f1] sm:$0xff]  ;;  %v12003_v59 = vld [vmem:[#allocation2 + $0x319] sm:$0xff] }
 0x991   :  { %20508 = vmatmul.mubr.msk.f32.gmra.mrb[74].mxu1 %vm148_vm1, %v11988_v31  ;;  %15486 = vst.msk [vmem:[#allocation4 + $0x160] sm:$0x1] %vm14094_vm13, %v31095_v29  ;;  %15487 = vst.msk [vmem:[#allocation4 + $0x178] sm:$0x1] %vm14094_vm13, %v31095_v29  ;;  %v12006_v29 = vld [vmem:[#allocation2 + $0x339] sm:$0xff] }
 0x992   :  { %20510 = vmatprep.mubr.msk.f32.mxu1 %vm148_vm1, %v11989_v35  ;;  %v27523_v56 = vpop.f32.mrb[90].mxu0  ;;  %v14982_v13 = vadd.f32 %v14981_v45, %v14980_v44  ;;  %v12001_v35 = vld [vmem:[#allocation2 + $0x301] sm:$0xff]  ;;  %v12002_v45 = vld [vmem:[#allocation2 + $0x309] sm:$0xff] }
 0x993   :  { %v27525_v2 = vpop.f32.mrb[91].mxu0  ;;  %v14985_v49 = vsel %vm30632_vm9, %v27523_v56, 0.0 }
 0x994   :  { %v14983_v39 = vsel %vm30632_vm9, %v27525_v2, 0.0 }
 0x995   :  { %20511 = vmatmul.mubr.msk.f32.gmra.mrb[76].mxu1 %vm148_vm1, %v11990_v20  ;;  %v14984_v36 = vadd.f32 %v14983_v39, %v14982_v13  ;;  %v12004_v13 = vld [vmem:[#allocation2 + $0x321] sm:$0xff] }
 0x996   :  { %20513 = vmatprep.mubr.msk.f32.mxu1 %vm148_vm1, %v11991_v58  ;;  %v27533_v52 = vpop.f32.mrb[92].mxu0 }
 0x997   :  { %v27535_v28 = vpop.f32.mrb[93].mxu0  ;;  %v14986_v1 = vadd.f32 %v14985_v49, %v14984_v36  ;;  %v14989_v6 = vsel %vm30632_vm9, %v27533_v52, 0.0  ;;  %v12005_v49 = vld [vmem:[#allocation2 + $0x331] sm:$0xff] }
 0x998   :  { %v14987_v51 = vsel %vm30632_vm9, %v27535_v28, 0.0 }
 0x999   :  { %20514 = vmatmul.mubr.msk.f32.gmra.mrb[78].mxu1 %vm148_vm1, %v11992_v40  ;;  %v14988_v14 = vadd.f32 %v14987_v51, %v14986_v1  ;;  %v12007_v1 = vld [vmem:[#allocation2 + $0x349] sm:$0xff] }
 0x99a   :  { %20516 = vmatprep.mubr.msk.f32.mxu1 %vm148_vm1, %v11993_v41  ;;  %v27543_v7 = vpop.f32.mrb[94].mxu0 }
 0x99b   :  { %v27577_v5 = vpop.f32.mrb[95].mxu0  ;;  %v14990_v43 = vadd.f32 %v14989_v6, %v14988_v14  ;;  %v14993_v48 = vsel %vm30632_vm9, %v27543_v7, 0.0 }
 0x99c   :  { %v14991_v26 = vsel %vm30632_vm9, %v27577_v5, 0.0 }
 0x99d   :  { %20517 = vmatmul.mubr.msk.f32.gmra.mrb[80].mxu1 %vm148_vm1, %v11994_v30  ;;  %v14992_v37 = vadd.f32 %v14991_v26, %v14990_v43 }
 0x99e   :  { %20519 = vmatprep.mubr.msk.f32.mxu1 %vm148_vm1, %v11995_v11  ;;  %v27591_v40 = vpop.f32.mrb[96].mxu0 }
 0x99f   :  { %v14994_v22 = vadd.f32 %v14993_v48, %v14992_v37  ;;  %v27594_v41 = vpop.f32.mrb[97].mxu0 }
 0x9a1   :  { %20520 = vmatmul.mubr.msk.f32.gmra.mrb[82].mxu1 %vm148_vm1, %v11996_v0  ;;  %v14995_v32 = vrot.slane %v14994_v22, 4 }
 0x9a2   :  { %20522 = vmatprep.mubr.msk.f32.mxu1 %vm148_vm1, %v11997_v63  ;;  %v27597_v36 = vpop.f32.mrb[98].mxu0 }
 0x9a3   :  { %v14996_v31 = vadd.f32 %v14995_v32, %v14994_v22  ;;  %v27611_v14 = vpop.f32.mrb[99].mxu0 }
 0x9a5   :  { %20523 = vmatmul.mubr.msk.f32.gmra.mrb[84].mxu1 %vm148_vm1, %v11998_v18  ;;  %v14997_v10 = vrot.slane %v14996_v31, 2 }
 0x9a6   :  { %20525 = vmatprep.mubr.msk.f32.mxu1 %vm148_vm1, %v11999_v17 }
 0x9a7   :  { %v14998_v20 = vadd.f32 %v14997_v10, %v14996_v31  ;;  %v12656_v31 = vld [vmem:[#allocation2 + $0x3a] sm:$0xff] }
 0x9a9   :  { %20526 = vmatmul.mubr.msk.f32.gmra.mrb[86].mxu1 %vm148_vm1, %v12000_v53  ;;  %v14999_v58 = vrot.slane %v14998_v20, 1 }
 0x9aa   :  { %20528 = vmatprep.mubr.msk.f32.mxu1 %vm148_vm1, %v12001_v35 }
 0x9ab   :  { %v15000_v44 = vadd.f32 %v14999_v58, %v14998_v20 }
 0x9ad   :  { %20529 = vmatmul.mubr.msk.f32.gmra.mrb[88].mxu1 %vm148_vm1, %v12002_v45  ;;  %v15070_v39 = vmul.f32 0.00390625, %v15000_v44  ;;  %v12658_v45 = vld [vmem:[#allocation2 + $0x52] sm:$0xff] }
 0x9ae   :  { %20531 = vmatprep.mubr.msk.f32.mxu1 %vm148_vm1, %v12003_v59  ;;  %v12659_v59 = vld [vmem:[#allocation2 + $0x62] sm:$0xff] }
 0x9af   :  { %v27600_v30 = vsub.f32 %v27384_v3, %v15070_v39  ;;  %v27603_v6 = vsub.f32 %v27380_v54, %v15070_v39  ;;  %v27606_v51 = vsub.f32 %v27394_v8, %v15070_v39  ;;  %v27609_v11 = vsub.f32 %v27390_v25, %v15070_v39  ;;  %v27625_v8 = vpop.f32.mrb[100].mxu0 }
 0x9b0   :  { %v27614_v43 = vsub.f32 %v27406_v9, %v15070_v39  ;;  %v27617_v0 = vsub.f32 %v27402_v16, %v15070_v39  ;;  %v27620_v3 = vsub.f32 %v27418_v4, %v15070_v39  ;;  %v27623_v54 = vsub.f32 %v27414_v34, %v15070_v39  ;;  %v27640_v4 = vpop.f32.mrb[101].mxu0  ;;  %v12008_v34 = vld [vmem:[#allocation2 + $0x351] sm:$0xff] }
 0x9b1   :  { %20532 = vmatmul.mubr.msk.f32.gmra.mrb[90].mxu1 %vm148_vm1, %v12004_v13  ;;  %31096 = vst [vmem:[#allocation31_spill] sm:$0xff] %v27600_v30  ;;  %31097 = vst [vmem:[#allocation32_spill] sm:$0xff] %v27603_v6  ;;  %v27629_v25 = vsub.f32 %v27430_v46, %v15070_v39  ;;  %v27632_v48 = vsub.f32 %v27426_v38, %v15070_v39  ;;  %v27635_v9 = vsub.f32 %v27441_v47, %v15070_v39  ;;  %v27655_v63 = vpop.f32.mrb[102].mxu0 }
 0x9b2   :  { %20534 = vmatprep.mubr.msk.f32.mxu1 %vm148_vm1, %v12005_v49  ;;  %31098 = vst [vmem:[#allocation33_spill] sm:$0xff] %v27606_v51  ;;  %31099 = vst [vmem:[#allocation34_spill] sm:$0xff] %v27609_v11  ;;  %v27638_v16 = vsub.f32 %v27438_v15, %v15070_v39  ;;  %v27644_v26 = vsub.f32 %v27452_v27, %v15070_v39  ;;  %v27647_v46 = vsub.f32 %v27448_v19, %v15070_v39  ;;  %v27669_v22 = vpop.f32.mrb[103].mxu0 }
 0x9b3   :  { %31100 = vst [vmem:[#allocation36_spill] sm:$0xff] %v27614_v43  ;;  %31101 = vst [vmem:[#allocation37_spill] sm:$0xff] %v27617_v0  ;;  %v27650_v38 = vsub.f32 %v27464_v50, %v15070_v39  ;;  %v27653_v47 = vsub.f32 %v27460_v55, %v15070_v39  ;;  %v27658_v15 = vsub.f32 %v27475_v62, %v15070_v39  ;;  %v27683_v18 = vpop.f32.mrb[104].mxu0 }
 0x9b4   :  { %31102 = vst [vmem:[#allocation24_spill] sm:$0xff] %v27620_v3  ;;  %31103 = vst [vmem:[#allocation23_spill] sm:$0xff] %v27623_v54  ;;  %v27661_v37 = vsub.f32 %v27472_v21, %v15070_v39  ;;  %v27664_v27 = vsub.f32 %v27485_v61, %v15070_v39  ;;  %v27667_v19 = vsub.f32 %v27482_v12, %v15070_v39  ;;  %v12655_v12 = vld [vmem:[#allocation2 + $0x32] sm:$0xff]  ;;  %v27698_v17 = vpop.f32.mrb[105].mxu0 }
 0x9b5   :  { %20535 = vmatmul.mubr.msk.f32.gmra.mrb[92].mxu1 %vm148_vm1, %v12006_v29  ;;  %31104 = vst [vmem:[#allocation26_spill] sm:$0xff] %v27629_v25  ;;  %31105 = vst [vmem:[#allocation25_spill] sm:$0xff] %v27632_v48  ;;  %v27672_v50 = vsub.f32 %v27495_v60, %v15070_v39  ;;  %v27675_v55 = vsub.f32 %v27492_v42, %v15070_v39  ;;  %v27678_v62 = vsub.f32 %v27505_v57, %v15070_v39 }
 0x9b6   :  { %31106 = vst [vmem:[#allocation41_spill] sm:$0xff] %v27635_v9  ;;  %31107 = vst [vmem:[#allocation40_spill] sm:$0xff] %v27638_v16  ;;  %20537 = vmatprep.mubr.msk.f32.mxu1 %vm148_vm1, %v12007_v1  ;;  %v27681_v21 = vsub.f32 %v27502_v33, %v15070_v39  ;;  %v27687_v61 = vsub.f32 %v27515_v24, %v15070_v39  ;;  %v27690_v60 = vsub.f32 %v27513_v23, %v15070_v39 }
 0x9b7   :  { %31108 = vst [vmem:[#allocation43_spill] sm:$0xff] %v27644_v26  ;;  %31109 = vst [vmem:[#allocation42_spill] sm:$0xff] %v27647_v46  ;;  %v27693_v42 = vsub.f32 %v27525_v2, %v15070_v39  ;;  %v27696_v57 = vsub.f32 %v27523_v56, %v15070_v39  ;;  %v27702_v33 = vsub.f32 %v27535_v28, %v15070_v39  ;;  %v27713_v2 = vpop.f32.mrb[106].mxu0  ;;  %v12657_v28 = vld [vmem:[#allocation2 + $0x4a] sm:$0xff] }
 0x9b8   :  { %31110 = vst [vmem:[#allocation45_spill] sm:$0xff] %v27650_v38  ;;  %31111 = vst [vmem:[#allocation44_spill] sm:$0xff] %v27653_v47  ;;  %v27705_v32 = vsub.f32 %v27533_v52, %v15070_v39  ;;  %v27708_v24 = vsub.f32 %v27577_v5, %v15070_v39  ;;  %v27711_v23 = vsub.f32 %v27543_v7, %v15070_v39  ;;  %v27715_v56 = vpop.f32.mrb[107].mxu0 }
 0x9b9   :  { %31112 = vst [vmem:[#allocation46_spill] sm:$0xff] %v27658_v15  ;;  %31113 = vst [vmem:[#allocation47_spill] sm:$0xff] %v27664_v27  ;;  %20538 = vmatmul.mubr.msk.f32.gmra.mrb[94].mxu1 %vm148_vm1, %v12008_v34  ;;  %v27717_v53 = vpop.f32.mrb[108].mxu0  ;;  %v15136_v7 = vmul.f32 %v27600_v30, %v27600_v30  ;;  %v15137_v5 = vmul.f32 %v27603_v6, %v27603_v6  ;;  %v15138_v10 = vmul.f32 %v27606_v51, %v27606_v51  ;;  %v12660_v34 = vld [vmem:[#allocation2 + $0x6a] sm:$0xff] }
 0x9ba   :  { %31114 = vst [vmem:[#allocation48_spill] sm:$0xff] %v27667_v19  ;;  %20542 = vmatprep.mubr.msk.f32.mxu1 %vm148_vm1, %v12655_v12  ;;  %v27720_v35 = vpop.f32.mrb[109].mxu0  ;;  %v15139_v58 = vmul.f32 %v27609_v11, %v27609_v11  ;;  %v15140_v13 = vmul.f32 %v27614_v43, %v27614_v43  ;;  %v15004_v11 = vsel %vm30632_vm9, %v27611_v14, 0.0  ;;  %v12665_v51 = vld [vmem:[#allocation2 + $0xaa] sm:$0xff] }
 0x9bb   :  { %v27723_v52 = vpop.f32.mrb[110].mxu0  ;;  %v15200_v49 = vsel %vm30632_vm9, %v15136_v7, 0.0  ;;  %v15201_v39 = vsel %vm30632_vm9, %v15137_v5, 0.0  ;;  %v15203_v1 = vsel %vm30632_vm9, %v15138_v10, 0.0  ;;  %v15142_v5 = vmul.f32 %v27620_v3, %v27620_v3 }
 0x9bc   :  { %v27731_v20 = vpop.f32.mrb[111].mxu0  ;;  %v15202_v12 = vadd.f32 %v15201_v39, %v15200_v49  ;;  %v15207_v10 = vsel %vm30632_vm9, %v15140_v13, 0.0  ;;  %v12662_v49 = vld [vmem:[#allocation2 + $0x82] sm:$0xff] }
 0x9bd   :  { %20543 = vmatmul.mubr.msk.f32.vlgmr.msra.gmra.mrb[32].mxu1 %vm148_vm1, %v12656_v31  ;;  %v12661_v31 = vld [vmem:[#allocation2 + $0x7a] sm:$0xff] }
 0x9be   :  { %20545 = vmatprep.mubr.msk.f32.mxu1 %vm148_vm1, %v12657_v28  ;;  %v27737_v44 = vpop.f32.mrb[112].mxu0  ;;  %v15141_v28 = vmul.f32 %v27617_v0, %v27617_v0 }
 0x9bf   :  { %v27744_v29 = vpop.f32.mrb[113].mxu0 }
 0x9c1   :  { %20546 = vmatmul.mubr.msk.f32.gmra.mrb[34].mxu1 %vm148_vm1, %v12658_v45  ;;  %v15205_v45 = vsel %vm30632_vm9, %v15139_v58, 0.0  ;;  %v15143_v58 = vmul.f32 %v27623_v54, %v27623_v54  ;;  %v12664_v54 = vld [vmem:[#allocation2 + $0x9a] sm:$0xff] }
 0x9c2   :  { %20548 = vmatprep.mubr.msk.f32.mxu1 %vm148_vm1, %v12659_v59  ;;  %v15204_v59 = vadd.f32 %v15203_v1, %v15202_v12  ;;  %v27751_v7 = vpop.f32.mrb[114].mxu0  ;;  %v15002_v1 = vsel %vm30632_vm9, %v27591_v40, 0.0  ;;  %v15001_v12 = vsel %vm30632_vm9, %v27594_v41, 0.0 }
 0x9c3   :  { %v27756_v43 = vpop.f32.mrb[115].mxu0  ;;  %v15003_v0 = vadd.f32 %v15002_v1, %v15001_v12  ;;  %v15146_v1 = vmul.f32 %v27635_v9, %v27635_v9  ;;  %v15008_v12 = vsel %vm30632_vm9, %v27640_v4, 0.0 }
 0x9c4   :  { %v15206_v39 = vadd.f32 %v15205_v45, %v15204_v59  ;;  %v15144_v45 = vmul.f32 %v27629_v25, %v27629_v25  ;;  %v15211_v59 = vsel %vm30632_vm9, %v15142_v5, 0.0 }
 0x9c5   :  { %20549 = vmatmul.mubr.msk.f32.gmra.mrb[36].mxu1 %vm148_vm1, %v12660_v34  ;;  %v12663_v34 = vld [vmem:[#allocation2 + $0x92] sm:$0xff]  ;;  %v15005_v25 = vadd.f32 %v15004_v11, %v15003_v0  ;;  %v15147_v11 = vmul.f32 %v27638_v16, %v27638_v16 }
 0x9c6   :  { %20551 = vmatprep.mubr.msk.f32.mxu1 %vm148_vm1, %v12661_v31  ;;  %v15209_v31 = vsel %vm30632_vm9, %v15141_v28, 0.0  ;;  %v15208_v13 = vadd.f32 %v15207_v10, %v15206_v39  ;;  %v27767_v3 = vpop.f32.mrb[116].mxu0  ;;  %v15145_v10 = vmul.f32 %v27632_v48, %v27632_v48  ;;  %v15213_v39 = vsel %vm30632_vm9, %v15143_v58, 0.0  ;;  %v12666_v58 = vld [vmem:[#allocation2 + $0xb2] sm:$0xff] }
 0x9c8   :  { %v15210_v28 = vadd.f32 %v15209_v31, %v15208_v13  ;;  %v15217_v0 = vsel %vm30632_vm9, %v15145_v10, 0.0  ;;  %v12668_v10 = vld [vmem:[#allocation2 + $0xca] sm:$0xff] }
 0x9c9   :  { %20552 = vmatmul.mubr.msk.f32.gmra.mrb[38].mxu1 %vm148_vm1, %v12662_v49  ;;  %v27772_v49 = vpop.f32.mrb[117].mxu0 }
 0x9ca   :  { %20554 = vmatprep.mubr.msk.f32.mxu1 %vm148_vm1, %v12663_v34  ;;  %v15006_v34 = vsel %vm30632_vm9, %v27597_v36, 0.0  ;;  %v15212_v5 = vadd.f32 %v15211_v59, %v15210_v28  ;;  %v27783_v31 = vpop.f32.mrb[118].mxu0  ;;  %v15010_v59 = vsel %vm30632_vm9, %v27625_v8, 0.0 }
 0x9cb   :  { %v27790_v13 = vpop.f32.mrb[119].mxu0  ;;  %v15007_v6 = vadd.f32 %v15006_v34, %v15005_v25  ;;  %v15148_v25 = vmul.f32 %v27644_v26, %v27644_v26  ;;  %v15012_v34 = vsel %vm30632_vm9, %v27669_v22, 0.0 }
 0x9cc   :  { %v15214_v48 = vadd.f32 %v15213_v39, %v15212_v5  ;;  %v15219_v39 = vsel %vm30632_vm9, %v15146_v1, 0.0 }
 0x9cd   :  { %20555 = vmatmul.mubr.msk.f32.gmra.mrb[40].mxu1 %vm148_vm1, %v12664_v54  ;;  %v15215_v54 = vsel %vm30632_vm9, %v15144_v45, 0.0  ;;  %v15009_v28 = vadd.f32 %v15008_v12, %v15007_v6  ;;  %v15149_v6 = vmul.f32 %v27647_v46, %v27647_v46 }
 0x9ce   :  { %20557 = vmatprep.mubr.msk.f32.mxu1 %vm148_vm1, %v12665_v51  ;;  %v12667_v51 = vld [vmem:[#allocation2 + $0xc2] sm:$0xff]  ;;  %v15216_v45 = vadd.f32 %v15215_v54, %v15214_v48  ;;  %v27799_v9 = vpop.f32.mrb[120].mxu0  ;;  %v15221_v48 = vsel %vm30632_vm9, %v15147_v11, 0.0  ;;  %v15014_v54 = vsel %vm30632_vm9, %v27655_v63, 0.0 }
 0x9cf   :  { %v27806_v5 = vpop.f32.mrb[121].mxu0  ;;  %v15011_v16 = vadd.f32 %v15010_v59, %v15009_v28  ;;  %v15223_v59 = vsel %vm30632_vm9, %v15148_v25, 0.0  ;;  %v12670_v11 = vld [vmem:[#allocation2 + $0xe2] sm:$0xff] }
 0x9d1   :  { %20558 = vmatmul.mubr.msk.f32.gmra.mrb[42].mxu1 %vm148_vm1, %v12666_v58  ;;  %v15218_v58 = vadd.f32 %v15217_v0, %v15216_v45  ;;  %v15013_v12 = vadd.f32 %v15012_v34, %v15011_v16  ;;  %v15150_v0 = vmul.f32 %v27650_v38, %v27650_v38  ;;  %v15016_v45 = vsel %vm30632_vm9, %v27698_v17, 0.0 }
 0x9d2   :  { %20560 = vmatprep.mubr.msk.f32.mxu1 %vm148_vm1, %v12667_v51  ;;  %v12669_v51 = vld [vmem:[#allocation2 + $0xda] sm:$0xff]  ;;  %v27815_v26 = vpop.f32.mrb[122].mxu0  ;;  %v15151_v16 = vmul.f32 %v27653_v47, %v27653_v47  ;;  %v15018_v34 = vsel %vm30632_vm9, %v27683_v18, 0.0 }
 0x9d3   :  { %v15220_v1 = vadd.f32 %v15219_v39, %v15218_v58  ;;  %v27822_v28 = vpop.f32.mrb[123].mxu0  ;;  %v15015_v46 = vadd.f32 %v15014_v54, %v15013_v12  ;;  %v15225_v39 = vsel %vm30632_vm9, %v15149_v6, 0.0  ;;  %v15227_v54 = vsel %vm30632_vm9, %v15150_v0, 0.0  ;;  %v12672_v6 = vld [vmem:[#allocation2 + $0xfa] sm:$0xff] }
 0x9d5   :  { %20561 = vmatmul.mubr.msk.f32.gmra.mrb[44].mxu1 %vm148_vm1, %v12668_v10  ;;  %v15222_v10 = vadd.f32 %v15221_v48, %v15220_v1  ;;  %v15017_v58 = vadd.f32 %v15016_v45, %v15015_v46  ;;  %v15152_v48 = vmul.f32 %v27658_v15, %v27658_v15  ;;  %v15020_v1 = vsel %vm30632_vm9, %v27715_v56, 0.0 }
 0x9d6   :  { %20563 = vmatprep.mubr.msk.f32.mxu1 %vm148_vm1, %v12669_v51  ;;  %v12671_v51 = vld [vmem:[#allocation2 + $0xf2] sm:$0xff]  ;;  %v27831_v38 = vpop.f32.mrb[124].mxu0  ;;  %v15153_v46 = vmul.f32 %v27661_v37, %v27661_v37  ;;  %v15022_v45 = vsel %vm30632_vm9, %v27713_v2, 0.0 }
 0x9d7   :  { %v15224_v25 = vadd.f32 %v15223_v59, %v15222_v10  ;;  %v27838_v12 = vpop.f32.mrb[125].mxu0  ;;  %v15019_v47 = vadd.f32 %v15018_v34, %v15017_v58  ;;  %v15229_v59 = vsel %vm30632_vm9, %v15151_v16, 0.0  ;;  %v15231_v34 = vsel %vm30632_vm9, %v15152_v48, 0.0  ;;  %v12674_v16 = vld [vmem:[#allocation2 + $0x112] sm:$0xff] }
 0x9d9   :  { %20564 = vmatmul.mubr.msk.f32.gmra.mrb[46].mxu1 %vm148_vm1, %v12670_v11  ;;  %v15226_v11 = vadd.f32 %v15225_v39, %v15224_v25  ;;  %v15021_v10 = vadd.f32 %v15020_v1, %v15019_v47  ;;  %v15154_v39 = vmul.f32 %v27664_v27, %v27664_v27  ;;  %v15024_v25 = vsel %vm30632_vm9, %v27720_v35, 0.0 }
 0x9da   :  { %20566 = vmatprep.mubr.msk.f32.mxu1 %vm148_vm1, %v12671_v51  ;;  %v12673_v51 = vld [vmem:[#allocation2 + $0x10a] sm:$0xff]  ;;  %v27847_v15 = vpop.f32.mrb[126].mxu0  ;;  %v15155_v47 = vmul.f32 %v27667_v19, %v27667_v19  ;;  %v15026_v1 = vsel %vm30632_vm9, %v27717_v53, 0.0  ;;  %v15156_v27 = vmul.f32 %v27672_v50, %v27672_v50  ;;  %v15157_v19 = vmul.f32 %v27675_v55, %v27675_v55 }
 0x9db   :  { %v15228_v0 = vadd.f32 %v15227_v54, %v15226_v11  ;;  %v27854_v58 = vpop.f32.mrb[127].mxu0  ;;  %v15023_v30 = vadd.f32 %v15022_v45, %v15021_v10  ;;  %v15233_v54 = vsel %vm30632_vm9, %v15153_v46, 0.0  ;;  %v15028_v45 = vsel %vm30632_vm9, %v27731_v20, 0.0  ;;  %v12677_v46 = vld [vmem:[#allocation2 + $0x13a] sm:$0xff] }
 0x9dd   :  { %20567 = vmatmul.mubr.msk.f32.gmra.mrb[48].mxu1 %vm148_vm1, %v12672_v6  ;;  %v15230_v6 = vadd.f32 %v15229_v59, %v15228_v0  ;;  %v15025_v11 = vadd.f32 %v15024_v25, %v15023_v30  ;;  %v15235_v59 = vsel %vm30632_vm9, %v15154_v39, 0.0  ;;  %v12676_v0 = vld [vmem:[#allocation2 + $0x12a] sm:$0xff]  ;;  %v15030_v30 = vsel %vm30632_vm9, %v27723_v52, 0.0 }
 0x9de   :  { %20569 = vmatprep.mubr.msk.f32.mxu1 %vm148_vm1, %v12673_v51  ;;  %v12675_v51 = vld [vmem:[#allocation2 + $0x122] sm:$0xff] }
 0x9df   :  { %v15232_v48 = vadd.f32 %v15231_v34, %v15230_v6  ;;  %v15237_v34 = vsel %vm30632_vm9, %v15155_v47, 0.0  ;;  %v15158_v6 = vmul.f32 %v27678_v62, %v27678_v62  ;;  %v12679_v47 = vld [vmem:[#allocation2 + $0x152] sm:$0xff] }
 0x9e1   :  { %20570 = vmatmul.mubr.msk.f32.gmra.mrb[50].mxu1 %vm148_vm1, %v12674_v16  ;;  %v15234_v10 = vadd.f32 %v15233_v54, %v15232_v48  ;;  %v15027_v16 = vadd.f32 %v15026_v1, %v15025_v11  ;;  %v15032_v54 = vsel %vm30632_vm9, %v27744_v29, 0.0  ;;  %v12678_v1 = vld [vmem:[#allocation2 + $0x142] sm:$0xff] }
 0x9e2   :  { %20572 = vmatprep.mubr.msk.f32.mxu1 %vm148_vm1, %v12675_v51  ;;  %v15239_v51 = vsel %vm30632_vm9, %v15156_v27, 0.0 }
 0x9e3   :  { %v15236_v39 = vadd.f32 %v15235_v59, %v15234_v10  ;;  %v15029_v25 = vadd.f32 %v15028_v45, %v15027_v16  ;;  %v15241_v59 = vsel %vm30632_vm9, %v15157_v19, 0.0  ;;  %v15034_v45 = vsel %vm30632_vm9, %v27737_v44, 0.0  ;;  %v12681_v19 = vld [vmem:[#allocation2 + $0x16a] sm:$0xff] }
 0x9e4   :  { %v15160_v16 = vmul.f32 %v27687_v61, %v27687_v61 }
 0x9e5   :  { %20573 = vmatmul.mubr.msk.f32.gmra.mrb[52].mxu1 %vm148_vm1, %v12676_v0  ;;  %v15238_v48 = vadd.f32 %v15237_v34, %v15236_v39  ;;  %v15031_v11 = vadd.f32 %v15030_v30, %v15029_v25  ;;  %v15159_v0 = vmul.f32 %v27681_v21, %v27681_v21  ;;  %v15036_v34 = vsel %vm30632_vm9, %v27756_v43, 0.0  ;;  %v12680_v30 = vld [vmem:[#allocation2 + $0x15a] sm:$0xff] }
 0x9e6   :  { %20575 = vmatprep.mubr.msk.f32.mxu1 %vm148_vm1, %v12677_v46  ;;  %v15243_v46 = vsel %vm30632_vm9, %v15158_v6, 0.0 }
 0x9e7   :  { %v15240_v27 = vadd.f32 %v15239_v51, %v15238_v48  ;;  %v15033_v10 = vadd.f32 %v15032_v54, %v15031_v11  ;;  %v15245_v51 = vsel %vm30632_vm9, %v15159_v0, 0.0  ;;  %v15038_v54 = vsel %vm30632_vm9, %v27751_v7, 0.0  ;;  %v12683_v0 = vld [vmem:[#allocation2 + $0x182] sm:$0xff] }
 0x9e8   :  { %v15162_v11 = vmul.f32 %v27693_v42, %v27693_v42 }
 0x9e9   :  { %20576 = vmatmul.mubr.msk.f32.gmra.mrb[54].mxu1 %vm148_vm1, %v12678_v1  ;;  %v15242_v39 = vadd.f32 %v15241_v59, %v15240_v27  ;;  %v15035_v25 = vadd.f32 %v15034_v45, %v15033_v10  ;;  %v15161_v1 = vmul.f32 %v27690_v60, %v27690_v60  ;;  %v15040_v59 = vsel %vm30632_vm9, %v27772_v49, 0.0  ;;  %v12682_v45 = vld [vmem:[#allocation2 + $0x172] sm:$0xff] }
 0x9ea   :  { %20578 = vmatprep.mubr.msk.f32.mxu1 %vm148_vm1, %v12679_v47  ;;  %v15247_v47 = vsel %vm30632_vm9, %v15160_v16, 0.0 }
 0x9eb   :  { %v15244_v6 = vadd.f32 %v15243_v46, %v15242_v39  ;;  %v15037_v48 = vadd.f32 %v15036_v34, %v15035_v25  ;;  %v15249_v46 = vsel %vm30632_vm9, %v15161_v1, 0.0  ;;  %v15042_v34 = vsel %vm30632_vm9, %v27767_v3, 0.0  ;;  %v12685_v25 = vld [vmem:[#allocation2 + $0x19a] sm:$0xff] }
 0x9ec   :  { %v15165_v1 = vmul.f32 %v27705_v32, %v27705_v32 }
 0x9ed   :  { %20579 = vmatmul.mubr.msk.f32.gmra.mrb[56].mxu1 %vm148_vm1, %v12680_v30  ;;  %v15246_v27 = vadd.f32 %v15245_v51, %v15244_v6  ;;  %v15039_v10 = vadd.f32 %v15038_v54, %v15037_v48  ;;  %v15163_v30 = vmul.f32 %v27696_v57, %v27696_v57  ;;  %v15251_v51 = vsel %vm30632_vm9, %v15162_v11, 0.0  ;;  %v12684_v6 = vld [vmem:[#allocation2 + $0x18a] sm:$0xff] }
 0x9ee   :  { %20581 = vmatprep.mubr.msk.f32.mxu1 %vm148_vm1, %v12681_v19  ;;  %v15164_v19 = vmul.f32 %v27702_v33, %v27702_v33  ;;  %v15044_v54 = vsel %vm30632_vm9, %v27790_v13, 0.0 }
 0x9ef   :  { %v15248_v16 = vadd.f32 %v15247_v47, %v15246_v27  ;;  %v15041_v39 = vadd.f32 %v15040_v59, %v15039_v10  ;;  %v15253_v47 = vsel %vm30632_vm9, %v15163_v30, 0.0  ;;  %v15046_v59 = vsel %vm30632_vm9, %v27783_v31, 0.0  ;;  %v12686_v27 = vld [vmem:[#allocation2 + $0x1a2] sm:$0xff] }
 0x9f0   :  { %v12687_v30 = vld [vmem:[#allocation2 + $0x1e2] sm:$0xff] }
 0x9f1   :  { %20582 = vmatmul.mubr.msk.f32.gmra.mrb[58].mxu1 %vm148_vm1, %v12682_v45  ;;  %v15250_v48 = vadd.f32 %v15249_v46, %v15248_v16  ;;  %v15043_v45 = vadd.f32 %v15042_v34, %v15041_v39  ;;  %v15255_v46 = vsel %vm30632_vm9, %v15164_v19, 0.0  ;;  %v15048_v34 = vsel %vm30632_vm9, %v27806_v5, 0.0 }
 0x9f2   :  { %20584 = vmatprep.mubr.msk.f32.mxu1 %vm148_vm1, %v12683_v0  ;;  %v15166_v0 = vmul.f32 %v27708_v24, %v27708_v24 }
 0x9f3   :  { %v15252_v11 = vadd.f32 %v15251_v51, %v15250_v48  ;;  %v15045_v10 = vadd.f32 %v15044_v54, %v15043_v45  ;;  %v15050_v51 = vsel %vm30632_vm9, %v27799_v9, 0.0  ;;  %v15052_v45 = vsel %vm30632_vm9, %v27822_v28, 0.0 }
 0x9f4   :  { %v15259_v48 = vsel %vm30632_vm9, %v15166_v0, 0.0  ;;  %v15056_v0 = vsel %vm30632_vm9, %v27838_v12, 0.0 }
 0x9f5   :  { %20585 = vmatmul.mubr.msk.f32.gmra.mrb[60].mxu1 %vm148_vm1, %v12684_v6  ;;  %v15254_v16 = vadd.f32 %v15253_v47, %v15252_v11  ;;  %v15047_v39 = vadd.f32 %v15046_v59, %v15045_v10  ;;  %v15167_v6 = vmul.f32 %v27711_v23, %v27711_v23  ;;  %v12688_v47 = vld [vmem:[#allocation2 + $0x1ea] sm:$0xff]  ;;  %v12689_v11 = vld [vmem:[#allocation2 + $0x1fa] sm:$0xff]  ;;  %v15054_v10 = vsel %vm30632_vm9, %v27815_v26, 0.0 }
 0x9f6   :  { %20587 = vmatprep.mubr.msk.f32.mxu1 %vm148_vm1, %v12685_v25  ;;  %v15257_v25 = vsel %vm30632_vm9, %v15165_v1, 0.0 }
 0x9f7   :  { %v15256_v54 = vadd.f32 %v15255_v46, %v15254_v16  ;;  %v15049_v19 = vadd.f32 %v15048_v34, %v15047_v39  ;;  %v15261_v1 = vsel %vm30632_vm9, %v15167_v6, 0.0  ;;  %v12690_v16 = vld [vmem:[#allocation2 + $0x202] sm:$0xff] }
 0x9f9   :  { %20588 = vmatmul.mubr.msk.f32.gmra.mrb[62].mxu1 %vm148_vm1, %v12686_v27  ;;  %v15258_v59 = vadd.f32 %v15257_v25, %v15256_v54  ;;  %v15051_v27 = vadd.f32 %v15050_v51, %v15049_v19  ;;  %v12691_v25 = vld [vmem:[#allocation2 + $0x212] sm:$0xff]  ;;  %v15058_v51 = vsel %vm30632_vm9, %v27831_v38, 0.0  ;;  %v15060_v19 = vsel %vm30632_vm9, %v27854_v58, 0.0 }
 0x9fa   :  { %20590 = vmatprep.mubr.msk.f32.mxu1 %vm148_vm1, %v12687_v30 }
 0x9fb   :  { %v15260_v46 = vadd.f32 %v15259_v48, %v15258_v59  ;;  %v15053_v34 = vadd.f32 %v15052_v45, %v15051_v27  ;;  %v12692_v48 = vld [vmem:[#allocation2 + $0x21a] sm:$0xff]  ;;  %v12693_v59 = vld [vmem:[#allocation2 + $0x22a] sm:$0xff]  ;;  %v15062_v27 = vsel %vm30632_vm9, %v27847_v15, 0.0 }
 0x9fd   :  { %20591 = vmatmul.mubr.msk.f32.gmra.mrb[64].mxu1 %vm148_vm1, %v12688_v47  ;;  %v15262_v39 = vadd.f32 %v15261_v1, %v15260_v46  ;;  %v15055_v30 = vadd.f32 %v15054_v10, %v15053_v34  ;;  %v12694_v10 = vld [vmem:[#allocation2 + $0x232] sm:$0xff] }
 0x9fe   :  { %20593 = vmatprep.mubr.msk.f32.mxu1 %vm148_vm1, %v12689_v11 }
 0x9ff   :  { %v15263_v6 = vrot.slane %v15262_v39, 4  ;;  %v15057_v54 = vadd.f32 %v15056_v0, %v15055_v30  ;;  %v12695_v0 = vld [vmem:[#allocation2 + $0x242] sm:$0xff]  ;;  %v12696_v30 = vld [vmem:[#allocation2 + $0x24a] sm:$0xff] }
 0xa01   :  { %20594 = vmatmul.mubr.msk.f32.gmra.mrb[66].mxu1 %vm148_vm1, %v12690_v16  ;;  %v15264_v45 = vadd.f32 %v15263_v6, %v15262_v39  ;;  %v15059_v47 = vadd.f32 %v15058_v51, %v15057_v54  ;;  %v12697_v6 = vld [vmem:[#allocation2 + $0x25a] sm:$0xff] }
 0xa02   :  { %20596 = vmatprep.mubr.msk.f32.mxu1 %vm148_vm1, %v12691_v25 }
 0xa03   :  { %v15265_v11 = vrot.slane %v15264_v45, 2  ;;  %v15061_v1 = vadd.f32 %v15060_v19, %v15059_v47 }
 0xa05   :  { %20597 = vmatmul.mubr.msk.f32.gmra.mrb[68].mxu1 %vm148_vm1, %v12692_v48  ;;  %v15266_v46 = vadd.f32 %v15265_v11, %v15264_v45  ;;  %v15063_v34 = vadd.f32 %v15062_v27, %v15061_v1  ;;  %v12698_v48 = vld [vmem:[#allocation2 + $0x262] sm:$0xff]  ;;  %v12700_v11 = vld [vmem:[#allocation2 + $0x27a] sm:$0xff] }
 0xa06   :  { %20599 = vmatprep.mubr.msk.f32.mxu1 %vm148_vm1, %v12693_v59  ;;  %v12699_v59 = vld [vmem:[#allocation2 + $0x272] sm:$0xff] }
 0xa07   :  { %v15267_v16 = vrot.slane %v15266_v46, 1  ;;  %v15064_v39 = vrot.slane %v15063_v34, 4 }
 0xa09   :  { %20600 = vmatmul.mubr.msk.f32.gmra.mrb[70].mxu1 %vm148_vm1, %v12694_v10  ;;  %v15268_v25 = vadd.f32 %v15267_v16, %v15266_v46  ;;  %v15065_v51 = vadd.f32 %v15064_v39, %v15063_v34  ;;  %v12701_v10 = vld [vmem:[#allocation2 + $0x28a] sm:$0xff]  ;;  %v12702_v34 = vld [vmem:[#allocation2 + $0x292] sm:$0xff] }
 0xa0a   :  { %20602 = vmatprep.mubr.msk.f32.mxu1 %vm148_vm1, %v12695_v0 }
 0xa0b   :  { %v15338_v54 = vmul.f32 0.00390625, %v15268_v25  ;;  %v15066_v19 = vrot.slane %v15065_v51, 2  ;;  %v12703_v25 = vld [vmem:[#allocation2 + $0x2a2] sm:$0xff] }
 0xa0d   :  { %20603 = vmatmul.mubr.msk.f32.gmra.mrb[72].mxu1 %vm148_vm1, %v12696_v30  ;;  %v15340_v45 = vadd.f32 1e-05, %v15338_v54  ;;  %v15067_v47 = vadd.f32 %v15066_v19, %v15065_v51  ;;  %v12705_v19 = vld [vmem:[#allocation2 + $0x2ba] sm:$0xff] }
 0xa0e   :  { %20605 = vmatprep.mubr.msk.f32.mxu1 %vm148_vm1, %v12697_v6 }
 0xa0f   :  { %21768 = vrsqrt.f32 %v15340_v45  ;;  %v15068_v27 = vrot.slane %v15067_v47, 1 }
 0xa11   :  { %20606 = vmatmul.mubr.msk.f32.gmra.mrb[74].mxu1 %vm148_vm1, %v12698_v48  ;;  %v15069_v1 = vadd.f32 %v15068_v27, %v15067_v47 }
 0xa12   :  { %20608 = vmatprep.mubr.msk.f32.mxu1 %vm148_vm1, %v12699_v59  ;;  %v12706_v59 = vld [vmem:[#allocation2 + $0x2c2] sm:$0xff] }
 0xa13   :  { %v27963_v46 = vmul.f32 0.00390625, %v15069_v1 }
 0xa15   :  { %20609 = vmatmul.mubr.msk.f32.gmra.mrb[76].mxu1 %vm148_vm1, %v12700_v11  ;;  %v27967_v0 = vsub.f32 %v27594_v41, %v27963_v46  ;;  %v27971_v16 = vsub.f32 %v27591_v40, %v27963_v46  ;;  %v27975_v39 = vsub.f32 %v27611_v14, %v27963_v46  ;;  %v27979_v30 = vsub.f32 %v27597_v36, %v27963_v46 }
 0xa16   :  { %20611 = vmatprep.mubr.msk.f32.mxu1 %vm148_vm1, %v12701_v10  ;;  %v27984_v51 = vsub.f32 %v27640_v4, %v27963_v46  ;;  %v27988_v41 = vsub.f32 %v27625_v8, %v27963_v46  ;;  %v27992_v40 = vsub.f32 %v27669_v22, %v27963_v46  ;;  %v27996_v14 = vsub.f32 %v27655_v63, %v27963_v46 }
 0xa17   :  { %v28001_v36 = vsub.f32 %v27698_v17, %v27963_v46  ;;  %v28005_v4 = vsub.f32 %v27683_v18, %v27963_v46  ;;  %v28009_v8 = vsub.f32 %v27715_v56, %v27963_v46  ;;  %v28013_v22 = vsub.f32 %v27713_v2, %v27963_v46  ;;  %v12704_v2 = vld [vmem:[#allocation2 + $0x2aa] sm:$0xff] }
 0xa18   :  { %v28017_v63 = vsub.f32 %v27720_v35, %v27963_v46  ;;  %v28021_v17 = vsub.f32 %v27717_v53, %v27963_v46  ;;  %v28025_v18 = vsub.f32 %v27731_v20, %v27963_v46  ;;  %v28029_v56 = vsub.f32 %v27723_v52, %v27963_v46 }
 0xa19   :  { %20612 = vmatmul.mubr.msk.f32.gmra.mrb[78].mxu1 %vm148_vm1, %v12702_v34  ;;  %31115 = vst [vmem:[#allocation49_spill] sm:$0xff] %v28001_v36  ;;  %31116 = vst [vmem:[#allocation50_spill] sm:$0xff] %v28005_v4  ;;  %v28031_v6 = vpop.eup %21768  ;;  %v28035_v54 = vsub.f32 %v27744_v29, %v27963_v46  ;;  %v28039_v35 = vsub.f32 %v27737_v44, %v27963_v46  ;;  %v28043_v53 = vsub.f32 %v27756_v43, %v27963_v46  ;;  %v31122_v29 = vld [vmem:[#allocation48_spill] sm:$0xff] }
 0xa1a   :  { %20614 = vmatprep.mubr.msk.f32.mxu1 %vm148_vm1, %v12703_v25  ;;  %31117 = vst [vmem:[#allocation51_spill] sm:$0xff] %v28009_v8  ;;  %31118 = vst [vmem:[#allocation52_spill] sm:$0xff] %v28017_v63  ;;  %v28047_v20 = vsub.f32 %v27751_v7, %v27963_v46  ;;  %v15361_v52 = vmul.f32 %v28031_v6, %v27661_v37  ;;  %v15363_v48 = vmul.f32 %v28031_v6, %v31122_v29 }
 0xa1b   :  { %31119 = vst [vmem:[#allocation53_spill] sm:$0xff] %v28025_v18  ;;  %31120 = vst [vmem:[#allocation54_spill] sm:$0xff] %v28035_v54  ;;  %v15365_v44 = vmul.f32 %v28031_v6, %v27675_v55  ;;  %v15367_v43 = vmul.f32 %v28031_v6, %v27681_v21  ;;  %v15369_v7 = vmul.f32 %v28031_v6, %v27690_v60  ;;  %v12707_v60 = vld [vmem:[#allocation2 + $0x2d2] sm:$0xff] }
 0xa1c   :  { %31121 = vst [vmem:[#allocation55_spill] sm:$0xff] %v28043_v53  ;;  %v15371_v45 = vmul.f32 %v28031_v6, %v27696_v57  ;;  %v15372_v37 = vmul.f32 %v28031_v6, %v27702_v33  ;;  %v15373_v47 = vmul.f32 %v28031_v6, %v27705_v32  ;;  %v15374_v55 = vmul.f32 %v28031_v6, %v27708_v24 }
 0xa1d   :  { %20615 = vmatmul.mubr.msk.f32.gmra.mrb[80].mxu1 %vm148_vm1, %v12704_v2  ;;  %v15375_v21 = vmul.f32 %v28031_v6, %v27711_v23  ;;  %v15417_v27 = vadd.f32 %v15363_v48, %v15361_v52  ;;  %v15419_v11 = vadd.f32 %v15367_v43, %v15365_v44  ;;  %v28075_v33 = vsub.f32 %v27772_v49, %v27963_v46  ;;  %v12708_v49 = vld [vmem:[#allocation2 + $0x2da] sm:$0xff]  ;;  %v12710_v44 = vld [vmem:[#allocation2 + $0x2f2] sm:$0xff]  ;;  %v12711_v43 = vld [vmem:[#allocation2 + $0x302] sm:$0xff] }
 0xa1e   :  { %20617 = vmatprep.mubr.msk.f32.mxu1 %vm148_vm1, %v12705_v19  ;;  %v15421_v1 = vadd.f32 %v15371_v45, %v15369_v7  ;;  %v15422_v57 = vadd.f32 %v15374_v55, %v15372_v37  ;;  %v28083_v23 = vsub.f32 %v27767_v3, %v27963_v46  ;;  %v28087_v34 = vsub.f32 %v27790_v13, %v27963_v46  ;;  %v12709_v3 = vld [vmem:[#allocation2 + $0x2ea] sm:$0xff]  ;;  %v12713_v7 = vld [vmem:[#allocation2 + $0x31a] sm:$0xff]  ;;  %v12714_v45 = vld [vmem:[#allocation2 + $0x322] sm:$0xff] }
 0xa1f   :  { %v15423_v10 = vadd.f32 %v15375_v21, %v15373_v47  ;;  %31123 = vst [vmem:[#allocation56_spill] sm:$0xff] %v28075_v33  ;;  %v28077_v32 = vmul.f32 0.5, %v15417_v27  ;;  %v28079_v24 = vmul.f32 0.5, %v15419_v11  ;;  %v28097_v19 = vsub.f32 %v27783_v31, %v27963_v46  ;;  %v12715_v37 = vld [vmem:[#allocation2 + $0x332] sm:$0xff]  ;;  %v12717_v11 = vld [vmem:[#allocation2 + $0x34a] sm:$0xff] }
 0xa20   :  { %v28089_v25 = vmul.f32 0.5, %v15421_v1  ;;  %v28091_v2 = vmul.f32 0.5, %v15422_v57  ;;  %v28106_v13 = vsub.f32 %v27806_v5, %v27963_v46  ;;  %v28110_v29 = vsub.f32 %v27799_v9, %v27963_v46  ;;  %v12716_v57 = vld [vmem:[#allocation2 + $0x33a] sm:$0xff] }
 0xa21   :  { %20618 = vmatmul.mubr.msk.f32.gmra.mrb[82].mxu1 %vm148_vm1, %v12706_v59  ;;  %31124 = vst [vmem:[#allocation57_spill] sm:$0xff] %v28077_v32  ;;  %31125 = vst [vmem:[#allocation58_spill] sm:$0xff] %v28079_v24  ;;  %v28093_v52 = vmul.f32 0.5, %v15423_v10  ;;  %v28114_v31 = vsub.f32 %v27822_v28, %v27963_v46  ;;  %v28118_v48 = vsub.f32 %v27815_v26, %v27963_v46 }
 0xa22   :  { %20620 = vmatprep.mubr.msk.f32.mxu1 %vm148_vm1, %v12707_v60  ;;  %31126 = vst [vmem:[#allocation59_spill] sm:$0xff] %v28089_v25  ;;  %31127 = vst [vmem:[#allocation60_spill] sm:$0xff] %v28091_v2  ;;  %v28129_v9 = vsub.f32 %v27838_v12, %v27963_v46  ;;  %v28133_v5 = vsub.f32 %v27831_v38, %v27963_v46  ;;  %v28137_v26 = vsub.f32 %v27854_v58, %v27963_v46  ;;  %v12712_v12 = vld [vmem:[#allocation2 + $0x30a] sm:$0xff] }
 0xa23   :  { %31128 = vst [vmem:[#allocation61_spill] sm:$0xff] %v28093_v52  ;;  %15497 = vst.msk [vmem:[#allocation4 + $0x68] sm:$0xff] %vm30632_vm9, %v28077_v32  ;;  %v28141_v28 = vsub.f32 %v27847_v15, %v27963_v46  ;;  %v15168_v38 = vmul.f32 %v27967_v0, %v27967_v0  ;;  %v15169_v58 = vmul.f32 %v27971_v16, %v27971_v16  ;;  %v31141_v32 = vld [vmem:[#allocation40_spill] sm:$0xff] }
 0xa24   :  { %15499 = vst.msk [vmem:[#allocation4 + $0x80] sm:$0xff] %vm30632_vm9, %v28079_v24  ;;  %15501 = vst.msk [vmem:[#allocation4 + $0x98] sm:$0xff] %vm30632_vm9, %v28089_v25  ;;  %v15170_v15 = vmul.f32 %v27975_v39, %v27975_v39  ;;  %v15171_v46 = vmul.f32 %v27979_v30, %v27979_v30  ;;  %v15172_v47 = vmul.f32 %v27984_v51, %v27984_v51 }
 0xa25   :  { %20621 = vmatmul.mubr.msk.f32.gmra.mrb[84].mxu1 %vm148_vm1, %v12708_v49  ;;  %15502 = vst.msk [vmem:[#allocation4 + $0xa8] sm:$0xff] %vm30632_vm9, %v28091_v2  ;;  %15503 = vst.msk [vmem:[#allocation4 + $0xb0] sm:$0xff] %vm30632_vm9, %v28093_v52  ;;  %v15269_v55 = vsel %vm30632_vm9, %v15168_v38, 0.0  ;;  %v15270_v21 = vsel %vm30632_vm9, %v15169_v58, 0.0  ;;  %v15173_v60 = vmul.f32 %v27988_v41, %v27988_v41  ;;  %v15174_v49 = vmul.f32 %v27992_v40, %v27992_v40 }
 0xa26   :  { %20623 = vmatprep.mubr.msk.f32.mxu1 %vm148_vm1, %v12709_v3  ;;  %v15272_v59 = vsel %vm30632_vm9, %v15170_v15, 0.0  ;;  %v15271_v27 = vadd.f32 %v15270_v21, %v15269_v55  ;;  %v15274_v1 = vsel %vm30632_vm9, %v15171_v46, 0.0  ;;  %v15276_v3 = vsel %vm30632_vm9, %v15172_v47, 0.0 }
 0xa27   :  { %v15176_v58 = vmul.f32 %v28001_v36, %v28001_v36  ;;  %v15280_v15 = vsel %vm30632_vm9, %v15174_v49, 0.0  ;;  %v15178_v55 = vmul.f32 %v28009_v8, %v28009_v8  ;;  %v15181_v49 = vmul.f32 %v28021_v17, %v28021_v17 }
 0xa28   :  { %v15273_v10 = vadd.f32 %v15272_v59, %v15271_v27  ;;  %v15179_v27 = vmul.f32 %v28013_v22, %v28013_v22 }
 0xa29   :  { %20624 = vmatmul.mubr.msk.f32.gmra.mrb[86].mxu1 %vm148_vm1, %v12710_v44  ;;  %v12718_v44 = vld [vmem:[#allocation2 + $0x352] sm:$0xff]  ;;  %v15284_v21 = vsel %vm30632_vm9, %v15176_v58, 0.0  ;;  %v15294_v58 = vsel %vm30632_vm9, %v15181_v49, 0.0 }
 0xa2a   :  { %20626 = vmatprep.mubr.msk.f32.mxu1 %vm148_vm1, %v12711_v43  ;;  %v15275_v43 = vadd.f32 %v15274_v1, %v15273_v10  ;;  %v15180_v1 = vmul.f32 %v28017_v63, %v28017_v63 }
 0xa2c   :  { %v15277_v38 = vadd.f32 %v15276_v3, %v15275_v43  ;;  %v15290_v3 = vsel %vm30632_vm9, %v15179_v27, 0.0  ;;  %v15182_v43 = vmul.f32 %v28025_v18, %v28025_v18 }
 0xa2d   :  { %20627 = vmatmul.mubr.msk.f32.gmra.mrb[88].mxu1 %vm148_vm1, %v12712_v12  ;;  %v15175_v12 = vmul.f32 %v27996_v14, %v27996_v14 }
 0xa2e   :  { %20629 = vmatprep.mubr.msk.f32.mxu1 %vm148_vm1, %v12713_v7  ;;  %v15278_v7 = vsel %vm30632_vm9, %v15173_v60, 0.0 }
 0xa2f   :  { %v15279_v46 = vadd.f32 %v15278_v7, %v15277_v38  ;;  %v15183_v38 = vmul.f32 %v28029_v56, %v28029_v56 }
 0xa31   :  { %20630 = vmatmul.mubr.msk.f32.gmra.mrb[90].mxu1 %vm148_vm1, %v12714_v45  ;;  %v15177_v45 = vmul.f32 %v28005_v4, %v28005_v4  ;;  %v15281_v47 = vadd.f32 %v15280_v15, %v15279_v46  ;;  %v15184_v46 = vmul.f32 %v28035_v54, %v28035_v54 }
 0xa32   :  { %20632 = vmatprep.mubr.msk.f32.mxu1 %vm148_vm1, %v12715_v37  ;;  %v15282_v37 = vsel %vm30632_vm9, %v15175_v12, 0.0  ;;  %v15292_v12 = vsel %vm30632_vm9, %v15180_v1, 0.0 }
 0xa33   :  { %v15283_v59 = vadd.f32 %v15282_v37, %v15281_v47  ;;  %v15185_v47 = vmul.f32 %v28039_v35, %v28039_v35  ;;  %v15300_v27 = vsel %vm30632_vm9, %v15184_v46, 0.0  ;;  %v31131_v46 = vld [vmem:[#allocation33_spill] sm:$0xff] }
 0xa35   :  { %20633 = vmatmul.mubr.msk.f32.gmra.mrb[92].mxu1 %vm148_vm1, %v12716_v57  ;;  %v15285_v60 = vadd.f32 %v15284_v21, %v15283_v59  ;;  %v15288_v57 = vsel %vm30632_vm9, %v15178_v55, 0.0  ;;  %v15298_v55 = vsel %vm30632_vm9, %v15183_v38, 0.0  ;;  %v15186_v59 = vmul.f32 %v28043_v53, %v28043_v53 }
 0xa36   :  { %20635 = vmatprep.mubr.msk.f32.mxu1 %vm148_vm1, %v12717_v11  ;;  %v15286_v11 = vsel %vm30632_vm9, %v15177_v45, 0.0  ;;  %v15296_v45 = vsel %vm30632_vm9, %v15182_v43, 0.0  ;;  %v15302_v1 = vsel %vm30632_vm9, %v15185_v47, 0.0 }
 0xa37   :  { %v15287_v10 = vadd.f32 %v15286_v11, %v15285_v60  ;;  %v15187_v60 = vmul.f32 %v28047_v20, %v28047_v20  ;;  %v15304_v49 = vsel %vm30632_vm9, %v15186_v59, 0.0 }
 0xa39   :  { %20636 = vmatmul.mubr.msk.f32.gmra.mrb[94].mxu1 %vm148_vm1, %v12718_v44  ;;  %v15289_v44 = vadd.f32 %v15288_v57, %v15287_v10  ;;  %v15188_v10 = vmul.f32 %v28075_v33, %v28075_v33  ;;  %v15306_v43 = vsel %vm30632_vm9, %v15187_v60, 0.0 }
 0xa3b   :  { %v15291_v7 = vadd.f32 %v15290_v3, %v15289_v44  ;;  %v15189_v44 = vmul.f32 %v28083_v23, %v28083_v23  ;;  %v15308_v47 = vsel %vm30632_vm9, %v15188_v10, 0.0 }
 0xa3d   :  { %v15293_v15 = vadd.f32 %v15292_v12, %v15291_v7  ;;  %v31129_v7 = vld [vmem:[#allocation31_spill] sm:$0xff]  ;;  %v15310_v60 = vsel %vm30632_vm9, %v15189_v44, 0.0 }
 0xa3e   :  { %v15344_v38 = vmul.f32 %v28031_v6, %v31129_v7 }
 0xa3f   :  { %v15295_v37 = vadd.f32 %v15294_v58, %v15293_v15  ;;  %v31130_v58 = vld [vmem:[#allocation32_spill] sm:$0xff] }
 0xa40   :  { %v15345_v15 = vmul.f32 %v28031_v6, %v31130_v58 }
 0xa41   :  { %v15297_v21 = vadd.f32 %v15296_v45, %v15295_v37  ;;  %v15346_v45 = vmul.f32 %v28031_v6, %v31131_v46  ;;  %v15190_v37 = vmul.f32 %v28087_v34, %v28087_v34  ;;  %v31136_v46 = vld [vmem:[#allocation37_spill] sm:$0xff] }
 0xa43   :  { %v15299_v11 = vadd.f32 %v15298_v55, %v15297_v21  ;;  %v31132_v55 = vld [vmem:[#allocation34_spill] sm:$0xff]  ;;  %v15312_v7 = vsel %vm30632_vm9, %v15190_v37, 0.0  ;;  %v31137_v37 = vld [vmem:[#allocation24_spill] sm:$0xff] }
 0xa44   :  { %v15347_v21 = vmul.f32 %v28031_v6, %v31132_v55  ;;  %v15194_v55 = vmul.f32 %v28114_v31, %v28114_v31 }
 0xa45   :  { %v15301_v57 = vadd.f32 %v15300_v27, %v15299_v11  ;;  %v15408_v27 = vadd.f32 %v15346_v45, %v15344_v38  ;;  %v15191_v11 = vmul.f32 %v28097_v19, %v28097_v19  ;;  %v31135_v38 = vld [vmem:[#allocation36_spill] sm:$0xff]  ;;  %v15349_v45 = vmul.f32 %v28031_v6, %v31136_v46 }
 0xa46   :  { %v15196_v46 = vmul.f32 %v28129_v9, %v28129_v9 }
 0xa47   :  { %v15303_v3 = vadd.f32 %v15302_v1, %v15301_v57  ;;  %v15409_v1 = vadd.f32 %v15347_v21, %v15345_v15  ;;  %v15314_v44 = vsel %vm30632_vm9, %v15191_v11, 0.0  ;;  %v15348_v15 = vmul.f32 %v28031_v6, %v31135_v38 }
 0xa49   :  { %v15305_v12 = vadd.f32 %v15304_v49, %v15303_v3  ;;  %v28230_v49 = vmul.f32 0.5, %v15408_v27  ;;  %v15192_v3 = vmul.f32 %v28106_v13, %v28106_v13  ;;  %v28235_v10 = vmul.f32 0.5, %v15409_v1 }
 0xa4a   :  { %v15195_v1 = vmul.f32 %v28118_v48, %v28118_v48 }
 0xa4b   :  { %v15307_v59 = vadd.f32 %v15306_v43, %v15305_v12  ;;  %31133 = vst [vmem:[#allocation62_spill] sm:$0xff] %v28230_v49  ;;  %31134 = vst [vmem:[#allocation63_spill] sm:$0xff] %v28235_v10  ;;  %v15193_v43 = vmul.f32 %v28110_v29, %v28110_v29  ;;  %v15316_v21 = vsel %vm30632_vm9, %v15192_v3, 0.0 }
 0xa4c   :  { %15488 = vst.msk [vmem:[#allocation4] sm:$0xff] %vm30632_vm9, %v28230_v49  ;;  %15489 = vst.msk [vmem:[#allocation4 + $0x8] sm:$0xff] %vm30632_vm9, %v28235_v10 }
 0xa4d   :  { %v15309_v57 = vadd.f32 %v15308_v47, %v15307_v59  ;;  %v15350_v47 = vmul.f32 %v28031_v6, %v31137_v37  ;;  %v31138_v59 = vld [vmem:[#allocation23_spill] sm:$0xff]  ;;  %v15320_v37 = vsel %vm30632_vm9, %v15194_v55, 0.0 }
 0xa4e   :  { %v15351_v27 = vmul.f32 %v28031_v6, %v31138_v59 }
 0xa4f   :  { %v15311_v58 = vadd.f32 %v15310_v60, %v15309_v57  ;;  %v15410_v60 = vadd.f32 %v15350_v47, %v15348_v15  ;;  %v15318_v57 = vsel %vm30632_vm9, %v15193_v43, 0.0  ;;  %v15197_v43 = vmul.f32 %v28133_v5, %v28133_v5  ;;  %v31142_v47 = vld [vmem:[#allocation26_spill] sm:$0xff] }
 0xa50   :  { %v15322_v15 = vsel %vm30632_vm9, %v15195_v1, 0.0  ;;  %v15352_v55 = vmul.f32 %v28031_v6, %v31142_v47 }
 0xa51   :  { %v15313_v12 = vadd.f32 %v15312_v7, %v15311_v58  ;;  %v15411_v7 = vadd.f32 %v15351_v27, %v15349_v45  ;;  %v28258_v38 = vmul.f32 0.5, %v15410_v60  ;;  %v15324_v60 = vsel %vm30632_vm9, %v15196_v46, 0.0 }
 0xa52   :  { %v15326_v47 = vsel %vm30632_vm9, %v15197_v43, 0.0 }
 0xa53   :  { %v15315_v11 = vadd.f32 %v15314_v44, %v15313_v12  ;;  %31139 = vst [vmem:[#allocation64_spill] sm:$0xff] %v28258_v38  ;;  %v28263_v3 = vmul.f32 0.5, %v15411_v7  ;;  %v15355_v44 = vmul.f32 %v28031_v6, %v31141_v32  ;;  %15490 = vst.msk [vmem:[#allocation4 + $0x18] sm:$0xff] %vm30632_vm9, %v28258_v38  ;;  %v31144_v32 = vld [vmem:[#allocation41_spill] sm:$0xff] }
 0xa54   :  { %v15354_v27 = vmul.f32 %v28031_v6, %v31144_v32 }
 0xa55   :  { %v15317_v58 = vadd.f32 %v15316_v21, %v15315_v11  ;;  %31140 = vst [vmem:[#allocation65_spill] sm:$0xff] %v28263_v3  ;;  %15491 = vst.msk [vmem:[#allocation4 + $0x20] sm:$0xff] %vm30632_vm9, %v28263_v3  ;;  %v31143_v21 = vld [vmem:[#allocation25_spill] sm:$0xff]  ;;  %v15198_v11 = vmul.f32 %v28137_v26, %v28137_v26 }
 0xa56   :  { %v15353_v59 = vmul.f32 %v28031_v6, %v31143_v21  ;;  %v15412_v1 = vadd.f32 %v15354_v27, %v15352_v55  ;;  %v31146_v21 = vld [vmem:[#allocation44_spill] sm:$0xff]  ;;  %v31149_v55 = vld [vmem:[#allocation43_spill] sm:$0xff]  ;;  %v31150_v27 = vld [vmem:[#allocation45_spill] sm:$0xff] }
 0xa57   :  { %v15319_v12 = vadd.f32 %v15318_v57, %v15317_v58  ;;  %v31145_v58 = vld [vmem:[#allocation42_spill] sm:$0xff]  ;;  %v15359_v3 = vmul.f32 %v28031_v6, %v31146_v21  ;;  %v15328_v46 = vsel %vm30632_vm9, %v15198_v11, 0.0  ;;  %v31154_v21 = vld [vmem:[#allocation47_spill] sm:$0xff] }
 0xa58   :  { %v15413_v7 = vadd.f32 %v15355_v44, %v15353_v59  ;;  %v28290_v38 = vmul.f32 0.5, %v15412_v1  ;;  %v15356_v59 = vmul.f32 %v28031_v6, %v31149_v55 }
 0xa59   :  { %v15321_v45 = vadd.f32 %v15320_v37, %v15319_v12  ;;  %v15357_v37 = vmul.f32 %v28031_v6, %v31145_v58  ;;  %v15199_v12 = vmul.f32 %v28141_v28, %v28141_v28 }
 0xa5a   :  { %31147 = vst [vmem:[#allocation66_spill] sm:$0xff] %v28290_v38  ;;  %v28292_v10 = vmul.f32 0.5, %v15413_v7  ;;  %15492 = vst.msk [vmem:[#allocation4 + $0x30] sm:$0xff] %vm30632_vm9, %v28290_v38 }
 0xa5b   :  { %v15323_v57 = vadd.f32 %v15322_v15, %v15321_v45  ;;  %v15330_v44 = vsel %vm30632_vm9, %v15199_v12, 0.0  ;;  %v15415_v43 = vadd.f32 %v15359_v3, %v15357_v37  ;;  %v31153_v37 = vld [vmem:[#allocation46_spill] sm:$0xff] }
 0xa5c   :  { %31148 = vst [vmem:[#allocation67_spill] sm:$0xff] %v28292_v10  ;;  %15493 = vst.msk [vmem:[#allocation4 + $0x38] sm:$0xff] %vm30632_vm9, %v28292_v10  ;;  %v15360_v12 = vmul.f32 %v28031_v6, %v31153_v37 }
 0xa5d   :  { %v15325_v32 = vadd.f32 %v15324_v60, %v15323_v57  ;;  %v15358_v60 = vmul.f32 %v28031_v6, %v31150_v27  ;;  %v28306_v58 = vmul.f32 0.5, %v15415_v43  ;;  %v15366_v43 = vmul.f32 %v28031_v6, %v27678_v62 }
 0xa5e   :  { %v15364_v27 = vmul.f32 %v28031_v6, %v27672_v50 }
 0xa5f   :  { %v15327_v15 = vadd.f32 %v15326_v47, %v15325_v32  ;;  %v15414_v1 = vadd.f32 %v15358_v60, %v15356_v59  ;;  %31152 = vst [vmem:[#allocation69_spill] sm:$0xff] %v28306_v58  ;;  %15495 = vst.msk [vmem:[#allocation4 + $0x50] sm:$0xff] %vm30632_vm9, %v28306_v58  ;;  %v15362_v32 = vmul.f32 %v28031_v6, %v31154_v21 }
 0xa61   :  { %v15329_v45 = vadd.f32 %v15328_v46, %v15327_v15  ;;  %v28304_v7 = vmul.f32 0.5, %v15414_v1  ;;  %v15416_v15 = vadd.f32 %v15362_v32, %v15360_v12  ;;  %v15368_v1 = vmul.f32 %v28031_v6, %v27687_v61 }
 0xa63   :  { %v15331_v57 = vadd.f32 %v15330_v44, %v15329_v45  ;;  %31151 = vst [vmem:[#allocation68_spill] sm:$0xff] %v28304_v7  ;;  %15494 = vst.msk [vmem:[#allocation4 + $0x48] sm:$0xff] %vm30632_vm9, %v28304_v7  ;;  %v28316_v45 = vmul.f32 0.5, %v15416_v15 }
 0xa65   :  { %v15332_v11 = vrot.slane %v15331_v57, 4  ;;  %31155 = vst [vmem:[#allocation70_spill] sm:$0xff] %v28316_v45  ;;  %15496 = vst.msk [vmem:[#allocation4 + $0x60] sm:$0xff] %vm30632_vm9, %v28316_v45 }
 0xa67   :  { %v15333_v47 = vadd.f32 %v15332_v11, %v15331_v57  ;;  %v15418_v57 = vadd.f32 %v15366_v43, %v15364_v27  ;;  %v15370_v11 = vmul.f32 %v28031_v6, %v27693_v42 }
 0xa69   :  { %v15334_v3 = vrot.slane %v15333_v47, 2  ;;  %v15420_v62 = vadd.f32 %v15370_v11, %v15368_v1 }
 0xa6b   :  { %v15335_v46 = vadd.f32 %v15334_v3, %v15333_v47  ;;  %v28328_v47 = vmul.f32 0.5, %v15418_v57  ;;  %v28332_v3 = vmul.f32 0.5, %v15420_v62 }
 0xa6d   :  { %v15336_v44 = vrot.slane %v15335_v46, 1  ;;  %31156 = vst [vmem:[#allocation71_spill] sm:$0xff] %v28328_v47  ;;  %15498 = vst.msk [vmem:[#allocation4 + $0x78] sm:$0xff] %vm30632_vm9, %v28328_v47 }
 0xa6e   :  { %31157 = vst [vmem:[#allocation72_spill] sm:$0xff] %v28332_v3  ;;  %15500 = vst.msk [vmem:[#allocation4 + $0x90] sm:$0xff] %vm30632_vm9, %v28332_v3 }
 0xa6f   :  { %v15337_v55 = vadd.f32 %v15336_v44, %v15335_v46 }
 0xa71   :  { %v15339_v59 = vmul.f32 0.00390625, %v15337_v55 }
 0xa73   :  { %v15341_v60 = vadd.f32 1e-05, %v15339_v59 }
 0xa75   :  { %21770 = vrsqrt.f32 %v15341_v60 }
 0xa7f   :  { %v28334_v37 = vpop.eup %21770 }
 0xa80   :  { %v15393_v50 = vmul.f32 %v28334_v37, %v28039_v35  ;;  %v15395_v61 = vmul.f32 %v28334_v37, %v28047_v20  ;;  %v15397_v42 = vmul.f32 %v28334_v37, %v28083_v23  ;;  %v15399_v6 = vmul.f32 %v28334_v37, %v28097_v19 }
 0xa81   :  { %v15401_v12 = vmul.f32 %v28334_v37, %v28110_v29  ;;  %v15403_v21 = vmul.f32 %v28334_v37, %v28118_v48  ;;  %v15404_v32 = vmul.f32 %v28334_v37, %v28129_v9  ;;  %v15405_v35 = vmul.f32 %v28334_v37, %v28133_v5 }
 0xa82   :  { %v15406_v20 = vmul.f32 %v28334_v37, %v28137_v26  ;;  %v15407_v23 = vmul.f32 %v28334_v37, %v28141_v28  ;;  %v15433_v46 = vadd.f32 %v15395_v61, %v15393_v50  ;;  %v15435_v19 = vadd.f32 %v15399_v6, %v15397_v42 }
 0xa83   :  { %v15437_v15 = vadd.f32 %v15403_v21, %v15401_v12 }
 0xa84   :  { %v15438_v44 = vadd.f32 %v15406_v20, %v15404_v32  ;;  %v15439_v29 = vadd.f32 %v15407_v23, %v15405_v35  ;;  %v28360_v48 = vmul.f32 0.5, %v15433_v46  ;;  %v28362_v55 = vmul.f32 0.5, %v15435_v19 }
 0xa85   :  { %v28368_v26 = vmul.f32 0.5, %v15437_v15 }
 0xa86   :  { %31158 = vst [vmem:[#allocation73_spill] sm:$0xff] %v28360_v48  ;;  %31159 = vst [vmem:[#allocation74_spill] sm:$0xff] %v28362_v55  ;;  %v28370_v59 = vmul.f32 0.5, %v15438_v44  ;;  %v28372_v28 = vmul.f32 0.5, %v15439_v29 }
 0xa87   :  { %31160 = vst [vmem:[#allocation75_spill] sm:$0xff] %v28368_v26  ;;  %15513 = vst.msk [vmem:[#allocation4 + $0x128] sm:$0xff] %vm30632_vm9, %v28360_v48 }
 0xa88   :  { %31161 = vst [vmem:[#allocation76_spill] sm:$0xff] %v28370_v59  ;;  %31162 = vst [vmem:[#allocation77_spill] sm:$0xff] %v28372_v28 }
 0xa89   :  { %15515 = vst.msk [vmem:[#allocation4 + $0x140] sm:$0xff] %vm30632_vm9, %v28362_v55  ;;  %15517 = vst.msk [vmem:[#allocation4 + $0x158] sm:$0xff] %vm30632_vm9, %v28368_v26 }
 0xa8a   :  { %15518 = vst.msk [vmem:[#allocation4 + $0x168] sm:$0xff] %vm30632_vm9, %v28370_v59  ;;  %15519 = vst.msk [vmem:[#allocation4 + $0x170] sm:$0xff] %vm30632_vm9, %v28372_v28 }
 0xa90   :  { %v28358_v43 = vpop.f32.mrb[32].mxu1 }
 0xa91   :  { %v13367_v9 = vsel %vm30632_vm9, %v28358_v43, 0.0  ;;  %v28366_v5 = vpop.f32.mrb[33].mxu1 }
 0xa92   :  { %v13366_v27 = vsel %vm30632_vm9, %v28366_v5, 0.0 }
 0xa93   :  { %v13368_v60 = vadd.f32 %v13367_v9, %v13366_v27 }
 0xa94   :  { %v28386_v57 = vpop.f32.mrb[34].mxu1 }
 0xa95   :  { %v28388_v1 = vpop.f32.mrb[35].mxu1  ;;  %v13371_v50 = vsel %vm30632_vm9, %v28386_v57, 0.0 }
 0xa96   :  { %v13369_v11 = vsel %vm30632_vm9, %v28388_v1, 0.0 }
 0xa97   :  { %v13370_v62 = vadd.f32 %v13369_v11, %v13368_v60 }
 0xa98   :  { %v28394_v61 = vpop.f32.mrb[36].mxu1 }
 0xa99   :  { %v28396_v42 = vpop.f32.mrb[37].mxu1  ;;  %v13372_v6 = vadd.f32 %v13371_v50, %v13370_v62  ;;  %v13375_v32 = vsel %vm30632_vm9, %v28394_v61, 0.0 }
 0xa9a   :  { %v13373_v12 = vsel %vm30632_vm9, %v28396_v42, 0.0 }
 0xa9b   :  { %v13374_v21 = vadd.f32 %v13373_v12, %v13372_v6 }
 0xa9c   :  { %v28402_v35 = vpop.f32.mrb[38].mxu1 }
 0xa9d   :  { %v28404_v20 = vpop.f32.mrb[39].mxu1  ;;  %v13376_v23 = vadd.f32 %v13375_v32, %v13374_v21  ;;  %v13379_v15 = vsel %vm30632_vm9, %v28402_v35, 0.0 }
 0xa9e   :  { %v13377_v46 = vsel %vm30632_vm9, %v28404_v20, 0.0 }
 0xa9f   :  { %v13378_v19 = vadd.f32 %v13377_v46, %v13376_v23 }
 0xaa0   :  { %v28410_v44 = vpop.f32.mrb[40].mxu1 }
 0xaa1   :  { %v28412_v29 = vpop.f32.mrb[41].mxu1  ;;  %v13380_v9 = vadd.f32 %v13379_v15, %v13378_v19  ;;  %v13383_v11 = vsel %vm30632_vm9, %v28410_v44, 0.0 }
 0xaa2   :  { %v13381_v27 = vsel %vm30632_vm9, %v28412_v29, 0.0 }
 0xaa3   :  { %v13382_v60 = vadd.f32 %v13381_v27, %v13380_v9 }
 0xaa4   :  { %v28418_v62 = vpop.f32.mrb[42].mxu1 }
 0xaa5   :  { %v28420_v50 = vpop.f32.mrb[43].mxu1  ;;  %v13384_v6 = vadd.f32 %v13383_v11, %v13382_v60  ;;  %v13387_v32 = vsel %vm30632_vm9, %v28418_v62, 0.0 }
 0xaa6   :  { %v13385_v12 = vsel %vm30632_vm9, %v28420_v50, 0.0 }
 0xaa7   :  { %v13386_v21 = vadd.f32 %v13385_v12, %v13384_v6 }
 0xaa8   :  { %v28426_v23 = vpop.f32.mrb[44].mxu1 }
 0xaa9   :  { %v28428_v46 = vpop.f32.mrb[45].mxu1  ;;  %v13388_v19 = vadd.f32 %v13387_v32, %v13386_v21  ;;  %v13391_v27 = vsel %vm30632_vm9, %v28426_v23, 0.0 }
 0xaaa   :  { %v13389_v15 = vsel %vm30632_vm9, %v28428_v46, 0.0 }
 0xaab   :  { %v13390_v9 = vadd.f32 %v13389_v15, %v13388_v19 }
 0xaac   :  { %v28434_v60 = vpop.f32.mrb[46].mxu1 }
 0xaad   :  { %v28436_v11 = vpop.f32.mrb[47].mxu1  ;;  %v13392_v6 = vadd.f32 %v13391_v27, %v13390_v9  ;;  %v13395_v28 = vsel %vm30632_vm9, %v28434_v60, 0.0 }
 0xaae   :  { %v13393_v12 = vsel %vm30632_vm9, %v28436_v11, 0.0 }
 0xaaf   :  { %v13394_v48 = vadd.f32 %v13393_v12, %v13392_v6 }
 0xab0   :  { %v28442_v21 = vpop.f32.mrb[48].mxu1 }
 0xab1   :  { %v28444_v32 = vpop.f32.mrb[49].mxu1  ;;  %v13396_v19 = vadd.f32 %v13395_v28, %v13394_v48  ;;  %v13399_v26 = vsel %vm30632_vm9, %v28442_v21, 0.0 }
 0xab2   :  { %v13397_v15 = vsel %vm30632_vm9, %v28444_v32, 0.0 }
 0xab3   :  { %v13398_v59 = vadd.f32 %v13397_v15, %v13396_v19 }
 0xab4   :  { %v28450_v9 = vpop.f32.mrb[50].mxu1 }
 0xab5   :  { %v28452_v27 = vpop.f32.mrb[51].mxu1  ;;  %v13400_v6 = vadd.f32 %v13399_v26, %v13398_v59  ;;  %v13403_v3 = vsel %vm30632_vm9, %v28450_v9, 0.0 }
 0xab6   :  { %v13401_v12 = vsel %vm30632_vm9, %v28452_v27, 0.0 }
 0xab7   :  { %v13402_v55 = vadd.f32 %v13401_v12, %v13400_v6 }
 0xab8   :  { %v28458_v48 = vpop.f32.mrb[52].mxu1 }
 0xab9   :  { %v28460_v28 = vpop.f32.mrb[53].mxu1  ;;  %v13404_v19 = vadd.f32 %v13403_v3, %v13402_v55  ;;  %v13407_v45 = vsel %vm30632_vm9, %v28458_v48, 0.0 }
 0xaba   :  { %v13405_v15 = vsel %vm30632_vm9, %v28460_v28, 0.0 }
 0xabb   :  { %v13406_v47 = vadd.f32 %v13405_v15, %v13404_v19 }
 0xabc   :  { %v28466_v26 = vpop.f32.mrb[54].mxu1 }
 0xabd   :  { %v28468_v59 = vpop.f32.mrb[55].mxu1  ;;  %v13408_v6 = vadd.f32 %v13407_v45, %v13406_v47  ;;  %v13411_v7 = vsel %vm30632_vm9, %v28466_v26, 0.0 }
 0xabe   :  { %v13409_v12 = vsel %vm30632_vm9, %v28468_v59, 0.0 }
 0xabf   :  { %v13410_v58 = vadd.f32 %v13409_v12, %v13408_v6 }
 0xac0   :  { %v28474_v3 = vpop.f32.mrb[56].mxu1 }
 0xac1   :  { %v28476_v55 = vpop.f32.mrb[57].mxu1  ;;  %v13412_v19 = vadd.f32 %v13411_v7, %v13410_v58  ;;  %v13415_v38 = vsel %vm30632_vm9, %v28474_v3, 0.0 }
 0xac2   :  { %v13413_v15 = vsel %vm30632_vm9, %v28476_v55, 0.0 }
 0xac3   :  { %v13414_v10 = vadd.f32 %v13413_v15, %v13412_v19 }
 0xac4   :  { %v28482_v45 = vpop.f32.mrb[58].mxu1 }
 0xac5   :  { %v28484_v47 = vpop.f32.mrb[59].mxu1  ;;  %v13416_v6 = vadd.f32 %v13415_v38, %v13414_v10  ;;  %v13419_v52 = vsel %vm30632_vm9, %v28482_v45, 0.0 }
 0xac6   :  { %v13417_v12 = vsel %vm30632_vm9, %v28484_v47, 0.0 }
 0xac7   :  { %v13418_v49 = vadd.f32 %v13417_v12, %v13416_v6 }
 0xac8   :  { %v28490_v7 = vpop.f32.mrb[60].mxu1 }
 0xac9   :  { %v28492_v58 = vpop.f32.mrb[61].mxu1  ;;  %v13420_v19 = vadd.f32 %v13419_v52, %v13418_v49  ;;  %v13423_v25 = vsel %vm30632_vm9, %v28490_v7, 0.0 }
 0xaca   :  { %v13421_v15 = vsel %vm30632_vm9, %v28492_v58, 0.0 }
 0xacb   :  { %v13422_v2 = vadd.f32 %v13421_v15, %v13420_v19 }
 0xacc   :  { %v28498_v10 = vpop.f32.mrb[62].mxu1 }
 0xacd   :  { %v28500_v38 = vpop.f32.mrb[63].mxu1  ;;  %v13424_v6 = vadd.f32 %v13423_v25, %v13422_v2  ;;  %v13427_v33 = vsel %vm30632_vm9, %v28498_v10, 0.0 }
 0xace   :  { %v13425_v12 = vsel %vm30632_vm9, %v28500_v38, 0.0 }
 0xacf   :  { %v13426_v24 = vadd.f32 %v13425_v12, %v13424_v6 }
 0xad0   :  { %v28506_v52 = vpop.f32.mrb[64].mxu1 }
 0xad1   :  { %31163 = vst [vmem:[#allocation78_spill] sm:$0xff] %v28506_v52  ;;  %v13428_v49 = vadd.f32 %v13427_v33, %v13426_v24  ;;  %v13436_v19 = vsel %vm30632_vm9, %v28506_v52, 0.0  ;;  %v28510_v15 = vpop.f32.mrb[65].mxu1 }
 0xad2   :  { %31164 = vst [vmem:[#allocation79_spill] sm:$0xff] %v28510_v15  ;;  %v13435_v53 = vsel %vm30632_vm9, %v28510_v15, 0.0 }
 0xad3   :  { %v13429_v54 = vrot.slane %v13428_v49, 4  ;;  %v13437_v25 = vadd.f32 %v13436_v19, %v13435_v53 }
 0xad4   :  { %v28514_v2 = vpop.f32.mrb[66].mxu1 }
 0xad5   :  { %31165 = vst [vmem:[#allocation80_spill] sm:$0xff] %v28514_v2  ;;  %v13430_v18 = vadd.f32 %v13429_v54, %v13428_v49  ;;  %v28516_v6 = vpop.f32.mrb[67].mxu1  ;;  %v13440_v24 = vsel %vm30632_vm9, %v28514_v2, 0.0 }
 0xad6   :  { %31166 = vst [vmem:[#allocation81_spill] sm:$0xff] %v28516_v6  ;;  %v13438_v12 = vsel %vm30632_vm9, %v28516_v6, 0.0 }
 0xad7   :  { %v13431_v63 = vrot.slane %v13430_v18, 2  ;;  %v13439_v33 = vadd.f32 %v13438_v12, %v13437_v25  ;;  %v15376_v25 = vmul.f32 %v28334_v37, %v27967_v0  ;;  %v15377_v12 = vmul.f32 %v28334_v37, %v27971_v16 }
 0xad8   :  { %v28522_v52 = vpop.f32.mrb[68].mxu1 }
 0xad9   :  { %31167 = vst [vmem:[#allocation82_spill] sm:$0xff] %v28522_v52  ;;  %v13432_v8 = vadd.f32 %v13431_v63, %v13430_v18  ;;  %v28524_v4 = vpop.f32.mrb[69].mxu1  ;;  %v13441_v15 = vadd.f32 %v13440_v24, %v13439_v33  ;;  %v13444_v49 = vsel %vm30632_vm9, %v28522_v52, 0.0  ;;  %v15378_v63 = vmul.f32 %v28334_v37, %v27975_v39 }
 0xada   :  { %31168 = vst [vmem:[#allocation83_spill] sm:$0xff] %v28524_v4  ;;  %v13442_v53 = vsel %vm30632_vm9, %v28524_v4, 0.0  ;;  %v15379_v18 = vmul.f32 %v28334_v37, %v27979_v30 }
 0xadb   :  { %v13433_v54 = vrot.slane %v13432_v8, 1  ;;  %v13443_v19 = vadd.f32 %v13442_v53, %v13441_v15  ;;  %v15424_v53 = vadd.f32 %v15378_v63, %v15376_v25 }
 0xadc   :  { %v28530_v6 = vpop.f32.mrb[70].mxu1  ;;  %v15425_v52 = vadd.f32 %v15379_v18, %v15377_v12 }
 0xadd   :  { %31169 = vst [vmem:[#allocation84_spill] sm:$0xff] %v28530_v6  ;;  %v13434_v33 = vadd.f32 %v13433_v54, %v13432_v8  ;;  %v28540_v24 = vpop.f32.mrb[71].mxu1  ;;  %v13445_v4 = vadd.f32 %v13444_v49, %v13443_v19  ;;  %v28548_v16 = vmul.f32 0.5, %v15424_v53 }
 0xade   :  { %31170 = vst [vmem:[#allocation85_spill] sm:$0xff] %v28540_v24  ;;  %v13446_v15 = vsel %vm30632_vm9, %v28540_v24, 0.0  ;;  %v28550_v39 = vmul.f32 0.5, %v15425_v52 }
 0xadf   :  { %v13504_v2 = vmul.f32 0.00390625, %v13434_v33  ;;  %v28544_v0 = vadd.f32 %v13446_v15, %v13445_v4  ;;  %31172 = vst [vmem:[#allocation87_spill] sm:$0xff] %v28548_v16  ;;  %15504 = vst.msk [vmem:[#allocation4 + $0xc0] sm:$0xff] %vm30632_vm9, %v28548_v16  ;;  %v15389_v16 = vmul.f32 %v28334_v37, %v28021_v17  ;;  %v28696_v17 = vmul.f32 %v28334_v37, %v28013_v22 }
 0xae0   :  { %v28546_v36 = vpop.f32.mrb[72].mxu1  ;;  %31173 = vst [vmem:[#allocation88_spill] sm:$0xff] %v28550_v39  ;;  %15505 = vst.msk [vmem:[#allocation4 + $0xc8] sm:$0xff] %vm30632_vm9, %v28550_v39 }
 0xae1   :  { %31171 = vst [vmem:[#allocation86_spill] sm:$0xff] %v28546_v36  ;;  %v28553_v30 = vsub.f32 %v28366_v5, %v13504_v2  ;;  %v28556_v8 = vsub.f32 %v28358_v43, %v13504_v2  ;;  %v28559_v54 = vsub.f32 %v28388_v1, %v13504_v2  ;;  %v28562_v49 = vsub.f32 %v28386_v57, %v13504_v2  ;;  %v28564_v4 = vpop.f32.mrb[73].mxu1 }
 0xae2   :  { %31178 = vst [vmem:[#allocation35_spill] sm:$0xff] %v28564_v4  ;;  %v28567_v19 = vsub.f32 %v28396_v42, %v13504_v2  ;;  %v28570_v52 = vsub.f32 %v28394_v61, %v13504_v2  ;;  %v28573_v5 = vsub.f32 %v28404_v20, %v13504_v2  ;;  %v28576_v43 = vsub.f32 %v28402_v35, %v13504_v2 }
 0xae3   :  { %31174 = vst [vmem:[#allocation89_spill] sm:$0xff] %v28553_v30  ;;  %31175 = vst [vmem:[#allocation90_spill] sm:$0xff] %v28556_v8  ;;  %v28583_v57 = vsub.f32 %v28412_v29, %v13504_v2  ;;  %v28586_v1 = vsub.f32 %v28410_v44, %v13504_v2  ;;  %v28589_v61 = vsub.f32 %v28420_v50, %v13504_v2 }
 0xae4   :  { %31176 = vst [vmem:[#allocation91_spill] sm:$0xff] %v28559_v54  ;;  %31177 = vst [vmem:[#allocation92_spill] sm:$0xff] %v28562_v49  ;;  %v28592_v42 = vsub.f32 %v28418_v62, %v13504_v2  ;;  %v28595_v35 = vsub.f32 %v28428_v46, %v13504_v2  ;;  %v28598_v20 = vsub.f32 %v28426_v23, %v13504_v2  ;;  %v28606_v44 = vpop.f32.mrb[74].mxu1 }
 0xae5   :  { %31179 = vst [vmem:[#allocation5_spill] sm:$0xff] %v28567_v19  ;;  %31180 = vst [vmem:[#allocation6_spill] sm:$0xff] %v28570_v52  ;;  %v28601_v25 = vsub.f32 %v28436_v11, %v13504_v2  ;;  %v28604_v29 = vsub.f32 %v28434_v60, %v13504_v2  ;;  %v28609_v50 = vsub.f32 %v28444_v32, %v13504_v2  ;;  %v28620_v12 = vpop.f32.mrb[75].mxu1 }
 0xae6   :  { %31181 = vst [vmem:[#allocation7_spill] sm:$0xff] %v28573_v5  ;;  %31182 = vst [vmem:[#allocation8_spill] sm:$0xff] %v28576_v43  ;;  %v28612_v62 = vsub.f32 %v28442_v21, %v13504_v2  ;;  %v28615_v46 = vsub.f32 %v28452_v27, %v13504_v2  ;;  %v28618_v23 = vsub.f32 %v28450_v9, %v13504_v2 }
 0xae7   :  { %31183 = vst [vmem:[#allocation9_spill] sm:$0xff] %v28583_v57  ;;  %31184 = vst [vmem:[#allocation10_spill] sm:$0xff] %v28586_v1  ;;  %v28623_v11 = vsub.f32 %v28460_v28, %v13504_v2  ;;  %v28626_v60 = vsub.f32 %v28458_v48, %v13504_v2  ;;  %v28629_v32 = vsub.f32 %v28468_v59, %v13504_v2 }
 0xae8   :  { %31185 = vst [vmem:[#allocation11_spill] sm:$0xff] %v28589_v61  ;;  %31186 = vst [vmem:[#allocation12_spill] sm:$0xff] %v28592_v42  ;;  %v28632_v21 = vsub.f32 %v28466_v26, %v13504_v2  ;;  %v28635_v27 = vsub.f32 %v28476_v55, %v13504_v2  ;;  %v28638_v9 = vsub.f32 %v28474_v3, %v13504_v2  ;;  %v28658_v3 = vpop.f32.mrb[76].mxu1 }
 0xae9   :  { %31187 = vst [vmem:[#allocation13_spill] sm:$0xff] %v28595_v35  ;;  %31188 = vst [vmem:[#allocation14_spill] sm:$0xff] %v28598_v20  ;;  %v28641_v63 = vsub.f32 %v28484_v47, %v13504_v2  ;;  %v28644_v28 = vsub.f32 %v28482_v45, %v13504_v2  ;;  %v28647_v48 = vsub.f32 %v28492_v58, %v13504_v2  ;;  %v28660_v18 = vpop.f32.mrb[77].mxu1 }
 0xaea   :  { %31189 = vst [vmem:[#allocation15_spill] sm:$0xff] %v28601_v25  ;;  %31190 = vst [vmem:[#allocation16_spill] sm:$0xff] %v28604_v29  ;;  %v28650_v59 = vsub.f32 %v28490_v7, %v13504_v2  ;;  %v28653_v26 = vsub.f32 %v28500_v38, %v13504_v2  ;;  %v28656_v55 = vsub.f32 %v28498_v10, %v13504_v2 }
 0xaeb   :  { %31191 = vst [vmem:[#allocation17_spill] sm:$0xff] %v28606_v44  ;;  %31192 = vst [vmem:[#allocation18_spill] sm:$0xff] %v28620_v12  ;;  %v13570_v45 = vmul.f32 %v28553_v30, %v28553_v30  ;;  %v13571_v58 = vmul.f32 %v28556_v8, %v28556_v8  ;;  %v13572_v38 = vmul.f32 %v28559_v54, %v28559_v54 }
 0xaec   :  { %31193 = vst [vmem:[#allocation38_spill] sm:$0xff] %v28647_v48  ;;  %31194 = vst [vmem:[#allocation39_spill] sm:$0xff] %v28650_v59  ;;  %v28662_v47 = vpop.f32.mrb[78].mxu1  ;;  %v13573_v10 = vmul.f32 %v28562_v49, %v28562_v49  ;;  %v15391_v8 = vmul.f32 %v28334_v37, %v28029_v56  ;;  %v13574_v54 = vmul.f32 %v28567_v19, %v28567_v19 }
 0xaed   :  { %31195 = vst [vmem:[#allocation20_spill] sm:$0xff] %v28653_v26  ;;  %31196 = vst [vmem:[#allocation19_spill] sm:$0xff] %v28656_v55  ;;  %v28668_v7 = vpop.f32.mrb[79].mxu1  ;;  %v13634_v2 = vsel %vm30632_vm9, %v13570_v45, 0.0  ;;  %v13635_v15 = vsel %vm30632_vm9, %v13571_v58, 0.0  ;;  %v13637_v30 = vsel %vm30632_vm9, %v13572_v38, 0.0  ;;  %v13575_v45 = vmul.f32 %v28570_v52, %v28570_v52 }
 0xaee   :  { %31197 = vst [vmem:[#allocation27_spill] sm:$0xff] %v28658_v3  ;;  %31198 = vst [vmem:[#allocation22_spill] sm:$0xff] %v28660_v18  ;;  %v13636_v39 = vadd.f32 %v13635_v15, %v13634_v2  ;;  %v13639_v58 = vsel %vm30632_vm9, %v13573_v10, 0.0  ;;  %v28700_v56 = vmul.f32 %v28334_v37, %v28087_v34  ;;  %v28708_v38 = vmul.f32 %v28334_v37, %v28114_v31  ;;  %v31206_v55 = vld [vmem:[#allocation55_spill] sm:$0xff] }
 0xaef   :  { %31199 = vst [vmem:[#allocation21_spill] sm:$0xff] %v28668_v7  ;;  %v28710_v10 = vadd.f32 %v15391_v8, %v15389_v16  ;;  %v13576_v15 = vmul.f32 %v28573_v5, %v28573_v5  ;;  %v13641_v22 = vsel %vm30632_vm9, %v13574_v54, 0.0  ;;  %v13577_v34 = vmul.f32 %v28576_v43, %v28576_v43 }
 0xaf0   :  { %v28672_v33 = vpop.f32.mrb[80].mxu1  ;;  %v13638_v24 = vadd.f32 %v13637_v30, %v13636_v39  ;;  %v28704_v39 = vmul.f32 %v28334_v37, %v28106_v13  ;;  %v13578_v52 = vmul.f32 %v28583_v57, %v28583_v57  ;;  %v13579_v31 = vmul.f32 %v28586_v1, %v28586_v1 }
 0xaf1   :  { %v28678_v53 = vpop.f32.mrb[81].mxu1  ;;  %v13580_v16 = vmul.f32 %v28589_v61, %v28589_v61  ;;  %v13581_v8 = vmul.f32 %v28592_v42, %v28592_v42  ;;  %v13643_v54 = vsel %vm30632_vm9, %v13575_v45, 0.0  ;;  %v13583_v5 = vmul.f32 %v28598_v20, %v28598_v20 }
 0xaf2   :  { %v13640_v30 = vadd.f32 %v13639_v58, %v13638_v24  ;;  %v13448_v24 = vsel %vm30632_vm9, %v28530_v6, 0.0  ;;  %v28739_v1 = vmul.f32 %v28601_v25, %v28601_v25  ;;  %v13645_v61 = vsel %vm30632_vm9, %v13576_v15, 0.0  ;;  %v31205_v6 = vld [vmem:[#allocation54_spill] sm:$0xff] }
 0xaf3   :  { %v13449_v57 = vadd.f32 %v13448_v24, %v28544_v0  ;;  %v21841_v42 = vmov -inf   ;;  %v13450_v0 = vsel %vm30632_vm9, %v28564_v4, 0.0  ;;  %v28778_v45 = vmul.f32 %v28604_v29, %v28604_v29 }
 0xaf4   :  { %v28687_v49 = vpop.f32.mrb[82].mxu1  ;;  %v13642_v13 = vadd.f32 %v13641_v22, %v13640_v30  ;;  %v13582_v30 = vmul.f32 %v28595_v35, %v28595_v35  ;;  %14095 = vst.msk [vmem:[#allocation3] sm:$0x1] %vm14094_vm13, %v21841_v42  ;;  %14096 = vst.msk [vmem:[#allocation3 + $0x18] sm:$0x1] %vm14094_vm13, %v21841_v42  ;;  %v13649_v25 = vsel %vm30632_vm9, %v13578_v52, 0.0 }
 0xaf5   :  { %v28692_v2 = vpop.f32.mrb[83].mxu1  ;;  %14097 = vst.msk [vmem:[#allocation3 + $0x30] sm:$0x1] %vm14094_vm13, %v21841_v42  ;;  %14098 = vst.msk [vmem:[#allocation3 + $0x48] sm:$0x1] %vm14094_vm13, %v21841_v42  ;;  %v13451_v24 = vadd.f32 %v13450_v0, %v13449_v57  ;;  %v13651_v20 = vsel %vm30632_vm9, %v13579_v31, 0.0 }
 0xaf6   :  { %v13644_v22 = vadd.f32 %v13643_v54, %v13642_v13  ;;  %14099 = vst.msk [vmem:[#allocation3 + $0x60] sm:$0x1] %vm14094_vm13, %v21841_v42  ;;  %14100 = vst.msk [vmem:[#allocation3 + $0x78] sm:$0x1] %vm14094_vm13, %v21841_v42  ;;  %v13647_v13 = vsel %vm30632_vm9, %v13577_v34, 0.0  ;;  %v13454_v35 = vsel %vm30632_vm9, %v28620_v12, 0.0 }
 0xaf7   :  { %14101 = vst.msk [vmem:[#allocation3 + $0x90] sm:$0x1] %vm14094_vm13, %v21841_v42  ;;  %14102 = vst.msk [vmem:[#allocation3 + $0xa8] sm:$0x1] %vm14094_vm13, %v21841_v42  ;;  %v13655_v34 = vsel %vm30632_vm9, %v13581_v8, 0.0  ;;  %v13659_v52 = vsel %vm30632_vm9, %v13583_v5, 0.0  ;;  %v15382_v8 = vmul.f32 %v28334_v37, %v27992_v40  ;;  %v15381_v5 = vmul.f32 %v28334_v37, %v27988_v41 }
 0xaf8   :  { %v28721_v58 = vpop.f32.mrb[84].mxu1  ;;  %14111 = vst.msk [vmem:[#allocation3 + $0x11] sm:$0x1] %vm14094_vm13, %v21841_v42  ;;  %14112 = vst.msk [vmem:[#allocation3 + $0x29] sm:$0x1] %vm14094_vm13, %v21841_v42  ;;  %v13646_v15 = vadd.f32 %v13645_v61, %v13644_v22  ;;  %v13653_v61 = vsel %vm30632_vm9, %v13580_v16, 0.0  ;;  %v15380_v16 = vmul.f32 %v28334_v37, %v27984_v51 }
 0xaf9   :  { %v28730_v43 = vpop.f32.mrb[85].mxu1  ;;  %14113 = vst.msk [vmem:[#allocation3 + $0x41] sm:$0x1] %vm14094_vm13, %v21841_v42  ;;  %14114 = vst.msk [vmem:[#allocation3 + $0x59] sm:$0x1] %vm14094_vm13, %v21841_v42  ;;  %v13657_v22 = vsel %vm30632_vm9, %v13582_v30, 0.0  ;;  %v15383_v30 = vmul.f32 %v28334_v37, %v27996_v14 }
 0xafa   :  { %14115 = vst.msk [vmem:[#allocation3 + $0x71] sm:$0x1] %vm14094_vm13, %v21841_v42  ;;  %14116 = vst.msk [vmem:[#allocation3 + $0x89] sm:$0x1] %vm14094_vm13, %v21841_v42  ;;  %v13648_v29 = vadd.f32 %v13647_v13, %v13646_v15  ;;  %v13456_v31 = vsel %vm30632_vm9, %v28606_v44, 0.0  ;;  %v13458_v0 = vsel %vm30632_vm9, %v28660_v18, 0.0 }
 0xafb   :  { %14117 = vst.msk [vmem:[#allocation3 + $0xa1] sm:$0x1] %vm14094_vm13, %v21841_v42  ;;  %14118 = vst.msk [vmem:[#allocation3 + $0xb9] sm:$0x1] %vm14094_vm13, %v21841_v42  ;;  %v31200_v13 = vld [vmem:[#allocation49_spill] sm:$0xff]  ;;  %v13460_v51 = vsel %vm30632_vm9, %v28658_v3, 0.0 }
 0xafc   :  { %14103 = vst.msk [vmem:[#allocation3 + $0xc0] sm:$0x1] %vm14094_vm13, %v21841_v42  ;;  %14104 = vst.msk [vmem:[#allocation3 + $0xd8] sm:$0x1] %vm14094_vm13, %v21841_v42  ;;  %v28781_v54 = vpop.f32.mrb[86].mxu1  ;;  %v31202_v40 = vld [vmem:[#allocation51_spill] sm:$0xff] }
 0xafd   :  { %14105 = vst.msk [vmem:[#allocation3 + $0xf0] sm:$0x1] %vm14094_vm13, %v21841_v42  ;;  %14106 = vst.msk [vmem:[#allocation3 + $0x108] sm:$0x1] %vm14094_vm13, %v21841_v42  ;;  %v28789_v19 = vpop.f32.mrb[87].mxu1  ;;  %v31203_v18 = vld [vmem:[#allocation52_spill] sm:$0xff] }
 0xafe   :  { %14107 = vst.msk [vmem:[#allocation3 + $0x120] sm:$0x1] %vm14094_vm13, %v21841_v42  ;;  %14108 = vst.msk [vmem:[#allocation3 + $0x138] sm:$0x1] %vm14094_vm13, %v21841_v42  ;;  %v15388_v41 = vmul.f32 %v28334_v37, %v31203_v18  ;;  %v31204_v44 = vld [vmem:[#allocation53_spill] sm:$0xff]  ;;  %v13462_v18 = vsel %vm30632_vm9, %v28668_v7, 0.0 }
 0xaff   :  { %14109 = vst.msk [vmem:[#allocation3 + $0x150] sm:$0x1] %vm14094_vm13, %v21841_v42  ;;  %14110 = vst.msk [vmem:[#allocation3 + $0x168] sm:$0x1] %vm14094_vm13, %v21841_v42  ;;  %v15390_v14 = vmul.f32 %v28334_v37, %v31204_v44  ;;  %v15427_v44 = vadd.f32 %v15383_v30, %v15381_v5 }
 0xb00   :  { %14119 = vst.msk [vmem:[#allocation3 + $0xd1] sm:$0x1] %vm14094_vm13, %v21841_v42  ;;  %14120 = vst.msk [vmem:[#allocation3 + $0xe9] sm:$0x1] %vm14094_vm13, %v21841_v42  ;;  %v28799_v4 = vpop.f32.mrb[88].mxu1 }
 0xb01   :  { %14121 = vst.msk [vmem:[#allocation3 + $0x101] sm:$0x1] %vm14094_vm13, %v21841_v42  ;;  %14122 = vst.msk [vmem:[#allocation3 + $0x119] sm:$0x1] %vm14094_vm13, %v21841_v42  ;;  %v28805_v15 = vpop.f32.mrb[89].mxu1 }
 0xb02   :  { %14123 = vst.msk [vmem:[#allocation3 + $0x131] sm:$0x1] %vm14094_vm13, %v21841_v42  ;;  %14124 = vst.msk [vmem:[#allocation3 + $0x149] sm:$0x1] %vm14094_vm13, %v21841_v42 }
 0xb03   :  { %14125 = vst.msk [vmem:[#allocation3 + $0x161] sm:$0x1] %vm14094_vm13, %v21841_v42  ;;  %14126 = vst.msk [vmem:[#allocation3 + $0x179] sm:$0x1] %vm14094_vm13, %v21841_v42  ;;  %v13452_v42 = vsel %vm30632_vm9, %v28546_v36, 0.0  ;;  %v13650_v36 = vadd.f32 %v13649_v25, %v13648_v29  ;;  %v15384_v25 = vmul.f32 %v28334_v37, %v31200_v13  ;;  %v15392_v13 = vmul.f32 %v28334_v37, %v31205_v6 }
 0xb04   :  { %v13453_v57 = vadd.f32 %v13452_v42, %v13451_v24  ;;  %v28827_v26 = vpop.f32.mrb[90].mxu1 }
 0xb05   :  { %v13652_v24 = vadd.f32 %v13651_v20, %v13650_v36  ;;  %v28833_v3 = vpop.f32.mrb[91].mxu1 }
 0xb06   :  { %v13455_v12 = vadd.f32 %v13454_v35, %v13453_v57  ;;  %v31201_v35 = vld [vmem:[#allocation50_spill] sm:$0xff]  ;;  %v15386_v57 = vmul.f32 %v28334_v37, %v31202_v40  ;;  %v15426_v40 = vadd.f32 %v15382_v8, %v15380_v16  ;;  %v28841_v16 = vmul.f32 0.5, %v15427_v44 }
 0xb07   :  { %v15385_v29 = vmul.f32 %v28334_v37, %v31201_v35  ;;  %v15394_v35 = vmul.f32 %v28334_v37, %v31206_v55  ;;  %v13654_v36 = vadd.f32 %v13653_v61, %v13652_v24  ;;  %v13464_v55 = vsel %vm30632_vm9, %v28662_v47, 0.0 }
 0xb08   :  { %v13457_v42 = vadd.f32 %v13456_v31, %v13455_v12  ;;  %v31207_v12 = vld [vmem:[#allocation56_spill] sm:$0xff]  ;;  %v15428_v59 = vadd.f32 %v15386_v57, %v15384_v25  ;;  %31209 = vst [vmem:[#allocation29_spill] sm:$0xff] %v28841_v16  ;;  %v28843_v7 = vpop.f32.mrb[92].mxu1  ;;  %15507 = vst.msk [vmem:[#allocation4 + $0xe0] sm:$0xff] %vm30632_vm9, %v28841_v16 }
 0xb09   :  { %v15396_v31 = vmul.f32 %v28334_v37, %v31207_v12  ;;  %v15429_v6 = vadd.f32 %v28696_v17, %v15385_v29  ;;  %v13656_v48 = vadd.f32 %v13655_v34, %v13654_v36  ;;  %v15432_v24 = vadd.f32 %v15394_v35, %v15392_v13  ;;  %v28851_v30 = vpop.f32.mrb[93].mxu1 }
 0xb0a   :  { %v13459_v20 = vadd.f32 %v13458_v0, %v13457_v42  ;;  %v15430_v0 = vadd.f32 %v15390_v14, %v15388_v41  ;;  %v28839_v37 = vmul.f32 0.5, %v15426_v40  ;;  %v28845_v5 = vmul.f32 0.5, %v15428_v59 }
 0xb0b   :  { %v15434_v42 = vadd.f32 %v28700_v56, %v15396_v31  ;;  %v13658_v8 = vadd.f32 %v13657_v22, %v13656_v48  ;;  %v28847_v17 = vmul.f32 0.5, %v15429_v6  ;;  %v13466_v34 = vsel %vm30632_vm9, %v28678_v53, 0.0 }
 0xb0c   :  { %v13461_v61 = vadd.f32 %v13460_v51, %v13459_v20  ;;  %31208 = vst [vmem:[#allocation28_spill] sm:$0xff] %v28839_v37  ;;  %31210 = vst [vmem:[#allocation30_spill] sm:$0xff] %v28845_v5  ;;  %v28853_v25 = vmul.f32 0.5, %v15430_v0  ;;  %v28856_v56 = vmul.f32 0.5, %v28710_v10  ;;  %v28858_v29 = vmul.f32 0.5, %v15432_v24  ;;  %v28882_v14 = vpop.f32.mrb[94].mxu1 }
 0xb0d   :  { %31211 = vst [vmem:[#allocation48_spill] sm:$0xff] %v28847_v17  ;;  %15506 = vst.msk [vmem:[#allocation4 + $0xd8] sm:$0xff] %vm30632_vm9, %v28839_v37  ;;  %v13660_v48 = vadd.f32 %v13659_v52, %v13658_v8  ;;  %v28864_v22 = vmul.f32 0.5, %v15434_v42  ;;  %v13586_v10 = vmul.f32 %v28609_v50, %v28609_v50  ;;  %v13661_v51 = vsel %vm30632_vm9, %v28739_v1, 0.0  ;;  %v15520_v37 = vld [vmem:[#allocation4 + $0x1] sm:$0xff] }
 0xb0e   :  { %v13463_v12 = vadd.f32 %v13462_v18, %v13461_v61  ;;  %31212 = vst [vmem:[#allocation31_spill] sm:$0xff] %v28853_v25  ;;  %31213 = vst [vmem:[#allocation32_spill] sm:$0xff] %v28856_v56  ;;  %v15436_v52 = vadd.f32 %v28708_v38, %v28704_v39  ;;  %v13587_v1 = vmul.f32 %v28612_v62, %v28612_v62  ;;  %v13663_v13 = vsel %vm30632_vm9, %v28778_v45, 0.0  ;;  %v28894_v39 = vpop.f32.mrb[95].mxu1 }
 0xb0f   :  { %31214 = vst [vmem:[#allocation33_spill] sm:$0xff] %v28858_v29  ;;  %31215 = vst [vmem:[#allocation34_spill] sm:$0xff] %v28864_v22  ;;  %v13662_v57 = vadd.f32 %v13661_v51, %v13660_v48  ;;  %v13468_v35 = vsel %vm30632_vm9, %v28672_v33, 0.0  ;;  %v13470_v36 = vsel %vm30632_vm9, %v28692_v2, 0.0  ;;  %v13588_v31 = vmul.f32 %v28615_v46, %v28615_v46 }
 0xb10   :  { %v13465_v59 = vadd.f32 %v13464_v55, %v13463_v12  ;;  %15508 = vst.msk [vmem:[#allocation4 + $0xf0] sm:$0xff] %vm30632_vm9, %v28845_v5  ;;  %15509 = vst.msk [vmem:[#allocation4 + $0xf8] sm:$0xff] %vm30632_vm9, %v28847_v17  ;;  %v13665_v40 = vsel %vm30632_vm9, %v13586_v10, 0.0  ;;  %v28899_v6 = vmul.f32 0.5, %v15436_v52  ;;  %v13589_v45 = vmul.f32 %v28618_v23, %v28618_v23  ;;  %v31268_v17 = vld [vmem:[#allocation59_spill] sm:$0xff] }
 0xb11   :  { %15510 = vst.msk [vmem:[#allocation4 + $0x108] sm:$0xff] %vm30632_vm9, %v28853_v25  ;;  %15511 = vst.msk [vmem:[#allocation4 + $0x110] sm:$0xff] %vm30632_vm9, %v28856_v56  ;;  %v13664_v38 = vadd.f32 %v13663_v13, %v13662_v57  ;;  %v13667_v55 = vsel %vm30632_vm9, %v13587_v1, 0.0  ;;  %v13472_v61 = vsel %vm30632_vm9, %v28687_v49, 0.0  ;;  %v13474_v0 = vsel %vm30632_vm9, %v28730_v43, 0.0  ;;  %v15535_v56 = vld [vmem:[#allocation4 + $0xb1] sm:$0xff] }
 0xb12   :  { %15512 = vst.msk [vmem:[#allocation4 + $0x120] sm:$0xff] %vm30632_vm9, %v28858_v29  ;;  %v13467_v41 = vadd.f32 %v13466_v34, %v13465_v59  ;;  %15514 = vst.msk [vmem:[#allocation4 + $0x138] sm:$0xff] %vm30632_vm9, %v28864_v22  ;;  %v13590_v8 = vmul.f32 %v28623_v11, %v28623_v11  ;;  %v13669_v12 = vsel %vm30632_vm9, %v13588_v31, 0.0  ;;  %v13591_v59 = vmul.f32 %v28626_v60, %v28626_v60  ;;  %v31267_v25 = vld [vmem:[#allocation58_spill] sm:$0xff] }
 0xb13   :  { %v13666_v18 = vadd.f32 %v13665_v40, %v13664_v38  ;;  %31216 = vst [vmem:[#allocation36_spill] sm:$0xff] %v28899_v6  ;;  %15516 = vst.msk [vmem:[#allocation4 + $0x150] sm:$0xff] %vm30632_vm9, %v28899_v6  ;;  %v13671_v10 = vsel %vm30632_vm9, %v13589_v45, 0.0  ;;  %v13476_v51 = vsel %vm30632_vm9, %v28721_v58, 0.0  ;;  %v13478_v52 = vsel %vm30632_vm9, %v28789_v19, 0.0 }
 0xb14   :  { %v13469_v20 = vadd.f32 %v13468_v35, %v13467_v41  ;;  %v13592_v1 = vmul.f32 %v28629_v32, %v28629_v32  ;;  %v13673_v13 = vsel %vm30632_vm9, %v13590_v8, 0.0  ;;  %v13593_v38 = vmul.f32 %v28632_v21, %v28632_v21 }
 0xb15   :  { %v13668_v24 = vadd.f32 %v13667_v55, %v13666_v18  ;;  %v13480_v31 = vsel %vm30632_vm9, %v28781_v54, 0.0  ;;  %v13482_v40 = vsel %vm30632_vm9, %v28805_v15, 0.0  ;;  %v13594_v45 = vmul.f32 %v28635_v27, %v28635_v27 }
 0xb16   :  { %v13471_v44 = vadd.f32 %v13470_v36, %v13469_v20  ;;  %v13675_v20 = vsel %vm30632_vm9, %v13591_v59, 0.0  ;;  %v13677_v55 = vsel %vm30632_vm9, %v13592_v1, 0.0  ;;  %v13484_v8 = vsel %vm30632_vm9, %v28799_v4, 0.0 }
 0xb17   :  { %v13670_v34 = vadd.f32 %v13669_v12, %v13668_v24  ;;  %v13595_v24 = vmul.f32 %v28638_v9, %v28638_v9  ;;  %v13486_v12 = vsel %vm30632_vm9, %v28833_v3, 0.0  ;;  %v13596_v59 = vmul.f32 %v28641_v63, %v28641_v63 }
 0xb18   :  { %v13473_v42 = vadd.f32 %v13472_v61, %v13471_v44  ;;  %v13488_v1 = vsel %vm30632_vm9, %v28827_v26, 0.0 }
 0xb19   :  { %v13672_v57 = vadd.f32 %v13671_v10, %v13670_v34  ;;  %v13681_v10 = vsel %vm30632_vm9, %v13594_v45, 0.0 }
 0xb1a   :  { %v13475_v48 = vadd.f32 %v13474_v0, %v13473_v42  ;;  %v13679_v42 = vsel %vm30632_vm9, %v13593_v38, 0.0  ;;  %v31217_v38 = vld [vmem:[#allocation38_spill] sm:$0xff] }
 0xb1b   :  { %v13674_v35 = vadd.f32 %v13673_v13, %v13672_v57  ;;  %v13597_v57 = vmul.f32 %v28644_v28, %v28644_v28  ;;  %v13490_v13 = vsel %vm30632_vm9, %v28851_v30, 0.0 }
 0xb1c   :  { %v13477_v41 = vadd.f32 %v13476_v51, %v13475_v48 }
 0xb1d   :  { %v13676_v18 = vadd.f32 %v13675_v20, %v13674_v35  ;;  %v13598_v20 = vmul.f32 %v31217_v38, %v31217_v38 }
 0xb1e   :  { %v13479_v36 = vadd.f32 %v13478_v52, %v13477_v41  ;;  %v13683_v41 = vsel %vm30632_vm9, %v13595_v24, 0.0 }
 0xb1f   :  { %v13678_v61 = vadd.f32 %v13677_v55, %v13676_v18  ;;  %v13687_v55 = vsel %vm30632_vm9, %v13597_v57, 0.0  ;;  %v13496_v57 = vsel %vm30632_vm9, %v28882_v14, 0.0 }
 0xb20   :  { %v13481_v44 = vadd.f32 %v13480_v31, %v13479_v36  ;;  %v13685_v31 = vsel %vm30632_vm9, %v13596_v59, 0.0 }
 0xb21   :  { %v13680_v34 = vadd.f32 %v13679_v42, %v13678_v61  ;;  %v13492_v61 = vsel %vm30632_vm9, %v28843_v7, 0.0 }
 0xb22   :  { %v13483_v0 = vadd.f32 %v13482_v40, %v13481_v44  ;;  %v31218_v44 = vld [vmem:[#allocation39_spill] sm:$0xff] }
 0xb23   :  { %v13682_v51 = vadd.f32 %v13681_v10, %v13680_v34  ;;  %v13599_v45 = vmul.f32 %v31218_v44, %v31218_v44  ;;  %v13689_v34 = vsel %vm30632_vm9, %v13598_v20, 0.0  ;;  %v31220_v10 = vld [vmem:[#allocation19_spill] sm:$0xff] }
 0xb24   :  { %v13485_v48 = vadd.f32 %v13484_v8, %v13483_v0  ;;  %v13494_v0 = vsel %vm30632_vm9, %v28894_v39, 0.0  ;;  %v31219_v8 = vld [vmem:[#allocation20_spill] sm:$0xff] }
 0xb25   :  { %v13684_v35 = vadd.f32 %v13683_v41, %v13682_v51  ;;  %v13601_v51 = vmul.f32 %v31220_v10, %v31220_v10 }
 0xb26   :  { %v13487_v52 = vadd.f32 %v13486_v12, %v13485_v48  ;;  %v13600_v12 = vmul.f32 %v31219_v8, %v31219_v8 }
 0xb27   :  { %v13686_v40 = vadd.f32 %v13685_v31, %v13684_v35  ;;  %v13695_v31 = vsel %vm30632_vm9, %v13601_v51, 0.0  ;;  %v31225_v51 = vld [vmem:[#allocation81_spill] sm:$0xff] }
 0xb28   :  { %v13489_v36 = vadd.f32 %v13488_v1, %v13487_v52  ;;  %v13691_v52 = vsel %vm30632_vm9, %v13599_v45, 0.0 }
 0xb29   :  { %v13688_v24 = vadd.f32 %v13687_v55, %v13686_v40 }
 0xb2a   :  { %v13491_v18 = vadd.f32 %v13490_v13, %v13489_v36  ;;  %v13693_v13 = vsel %vm30632_vm9, %v13600_v12, 0.0  ;;  %v31223_v12 = vld [vmem:[#allocation78_spill] sm:$0xff] }
 0xb2b   :  { %v13690_v48 = vadd.f32 %v13689_v34, %v13688_v24 }
 0xb2c   :  { %v13493_v42 = vadd.f32 %v13492_v61, %v13491_v18 }
 0xb2d   :  { %v13692_v41 = vadd.f32 %v13691_v52, %v13690_v48 }
 0xb2e   :  { %v13495_v59 = vadd.f32 %v13494_v0, %v13493_v42 }
 0xb2f   :  { %v13694_v35 = vadd.f32 %v13693_v13, %v13692_v41 }
 0xb30   :  { %v13497_v1 = vadd.f32 %v13496_v57, %v13495_v59  ;;  %v31221_v59 = vld [vmem:[#allocation79_spill] sm:$0xff] }
 0xb31   :  { %v13696_v40 = vadd.f32 %v13695_v31, %v13694_v35  ;;  %v31228_v35 = vld [vmem:[#allocation83_spill] sm:$0xff]  ;;  %v31230_v31 = vld [vmem:[#allocation82_spill] sm:$0xff] }
 0xb32   :  { %v13498_v36 = vrot.slane %v13497_v1, 4 }
 0xb33   :  { %v13697_v18 = vrot.slane %v13696_v40, 4 }
 0xb34   :  { %v13499_v20 = vadd.f32 %v13498_v36, %v13497_v1  ;;  %v31227_v1 = vld [vmem:[#allocation80_spill] sm:$0xff] }
 0xb35   :  { %v13698_v61 = vadd.f32 %v13697_v18, %v13696_v40 }
 0xb36   :  { %v13500_v55 = vrot.slane %v13499_v20, 2 }
 0xb37   :  { %v13699_v24 = vrot.slane %v13698_v61, 2 }
 0xb38   :  { %v13501_v0 = vadd.f32 %v13500_v55, %v13499_v20  ;;  %v31232_v20 = vld [vmem:[#allocation85_spill] sm:$0xff]  ;;  %v31234_v55 = vld [vmem:[#allocation84_spill] sm:$0xff] }
 0xb39   :  { %v13700_v45 = vadd.f32 %v13699_v24, %v13698_v61 }
 0xb3a   :  { %v13502_v42 = vrot.slane %v13501_v0, 1 }
 0xb3b   :  { %v13701_v6 = vrot.slane %v13700_v45, 1 }
 0xb3c   :  { %v13503_v34 = vadd.f32 %v13502_v42, %v13501_v0  ;;  %v31236_v0 = vld [vmem:[#allocation35_spill] sm:$0xff]  ;;  %v31238_v42 = vld [vmem:[#allocation86_spill] sm:$0xff] }
 0xb3d   :  { %v13702_v48 = vadd.f32 %v13701_v6, %v13700_v45 }
 0xb3e   :  { %v13505_v22 = vmul.f32 0.00390625, %v13503_v34  ;;  %v31240_v34 = vld [vmem:[#allocation18_spill] sm:$0xff] }
 0xb3f   :  { %v13772_v18 = vmul.f32 0.00390625, %v13702_v48 }
 0xb40   :  { %v28971_v52 = vsub.f32 %v31221_v59, %v13505_v22  ;;  %v28974_v57 = vsub.f32 %v31223_v12, %v13505_v22  ;;  %v28977_v41 = vsub.f32 %v31225_v51, %v13505_v22  ;;  %v28980_v13 = vsub.f32 %v31227_v1, %v13505_v22  ;;  %v31242_v12 = vld [vmem:[#allocation17_spill] sm:$0xff]  ;;  %v31244_v1 = vld [vmem:[#allocation22_spill] sm:$0xff] }
 0xb41   :  { %v28983_v36 = vsub.f32 %v31228_v35, %v13505_v22  ;;  %v28986_v40 = vsub.f32 %v31230_v31, %v13505_v22  ;;  %v28989_v6 = vsub.f32 %v31232_v20, %v13505_v22  ;;  %v28992_v61 = vsub.f32 %v31234_v55, %v13505_v22  ;;  %v31246_v31 = vld [vmem:[#allocation27_spill] sm:$0xff]  ;;  %v31248_v55 = vld [vmem:[#allocation21_spill] sm:$0xff] }
 0xb42   :  { %31222 = vst [vmem:[#allocation37_spill] sm:$0xff] %v28971_v52  ;;  %31224 = vst [vmem:[#allocation24_spill] sm:$0xff] %v28974_v57  ;;  %v28995_v24 = vsub.f32 %v31236_v0, %v13505_v22  ;;  %v28998_v45 = vsub.f32 %v31238_v42, %v13505_v22  ;;  %v29001_v59 = vsub.f32 %v31240_v34, %v13505_v22  ;;  %v13774_v20 = vadd.f32 1e-05, %v13772_v18 }
 0xb43   :  { %31226 = vst [vmem:[#allocation23_spill] sm:$0xff] %v28977_v41  ;;  %31229 = vst [vmem:[#allocation40_spill] sm:$0xff] %v28983_v36  ;;  %v29004_v51 = vsub.f32 %v31242_v12, %v13505_v22  ;;  %v29007_v35 = vsub.f32 %v31244_v1, %v13505_v22  ;;  %v29010_v48 = vsub.f32 %v31246_v31, %v13505_v22 }
 0xb44   :  { %31231 = vst [vmem:[#allocation26_spill] sm:$0xff] %v28986_v40  ;;  %31233 = vst [vmem:[#allocation25_spill] sm:$0xff] %v28989_v6  ;;  %v29013_v29 = vsub.f32 %v31248_v55, %v13505_v22  ;;  %v29016_v0 = vsub.f32 %v28662_v47, %v13505_v22  ;;  %v29019_v42 = vsub.f32 %v28678_v53, %v13505_v22  ;;  %21772 = vrsqrt.f32 %v13774_v20  ;;  %v15533_v20 = vld [vmem:[#allocation4 + $0x99] sm:$0xff]  ;;  %v15534_v55 = vld [vmem:[#allocation4 + $0xa9] sm:$0xff] }
 0xb45   :  { %31235 = vst [vmem:[#allocation41_spill] sm:$0xff] %v28992_v61  ;;  %31237 = vst [vmem:[#allocation42_spill] sm:$0xff] %v28995_v24  ;;  %v29022_v34 = vsub.f32 %v28672_v33, %v13505_v22  ;;  %v29025_v12 = vsub.f32 %v28692_v2, %v13505_v22  ;;  %v29028_v1 = vsub.f32 %v28687_v49, %v13505_v22 }
 0xb46   :  { %31239 = vst [vmem:[#allocation44_spill] sm:$0xff] %v28998_v45  ;;  %31241 = vst [vmem:[#allocation43_spill] sm:$0xff] %v29001_v59  ;;  %v29031_v18 = vsub.f32 %v28730_v43, %v13505_v22  ;;  %v29034_v31 = vsub.f32 %v28721_v58, %v13505_v22  ;;  %v29037_v47 = vsub.f32 %v28789_v19, %v13505_v22 }
 0xb47   :  { %31243 = vst [vmem:[#allocation45_spill] sm:$0xff] %v29004_v51  ;;  %31245 = vst [vmem:[#allocation46_spill] sm:$0xff] %v29007_v35  ;;  %v29040_v53 = vsub.f32 %v28781_v54, %v13505_v22  ;;  %v29043_v33 = vsub.f32 %v28805_v15, %v13505_v22  ;;  %v29046_v2 = vsub.f32 %v28799_v4, %v13505_v22  ;;  %v15531_v4 = vld [vmem:[#allocation4 + $0x81] sm:$0xff] }
 0xb48   :  { %31247 = vst [vmem:[#allocation47_spill] sm:$0xff] %v29010_v48  ;;  %31249 = vst [vmem:[#allocation49_spill] sm:$0xff] %v29013_v29  ;;  %v29049_v49 = vsub.f32 %v28833_v3, %v13505_v22  ;;  %v29052_v43 = vsub.f32 %v28827_v26, %v13505_v22  ;;  %v29055_v58 = vsub.f32 %v28851_v30, %v13505_v22  ;;  %v31269_v30 = vld [vmem:[#allocation60_spill] sm:$0xff] }
 0xb49   :  { %31250 = vst [vmem:[#allocation50_spill] sm:$0xff] %v29016_v0  ;;  %31251 = vst [vmem:[#allocation51_spill] sm:$0xff] %v29019_v42  ;;  %v29058_v19 = vsub.f32 %v28843_v7, %v13505_v22  ;;  %v29061_v54 = vsub.f32 %v28894_v39, %v13505_v22  ;;  %v29064_v15 = vsub.f32 %v28882_v14, %v13505_v22  ;;  %v31270_v7 = vld [vmem:[#allocation61_spill] sm:$0xff]  ;;  %v31274_v14 = vld [vmem:[#allocation62_spill] sm:$0xff] }
 0xb4a   :  { %31252 = vst [vmem:[#allocation52_spill] sm:$0xff] %v29022_v34  ;;  %31253 = vst [vmem:[#allocation53_spill] sm:$0xff] %v29025_v12  ;;  %v15563_v26 = vadd.f32 %v15531_v4, %v31267_v25  ;;  %v15565_v5 = vadd.f32 %v15533_v20, %v31268_v17  ;;  %v15566_v16 = vadd.f32 %v15534_v55, %v31269_v30  ;;  %v15523_v20 = vld [vmem:[#allocation4 + $0x21] sm:$0xff] }
 0xb4b   :  { %31254 = vst [vmem:[#allocation54_spill] sm:$0xff] %v29028_v1  ;;  %31255 = vst [vmem:[#allocation55_spill] sm:$0xff] %v29031_v18 }
 0xb4c   :  { %31256 = vst [vmem:[#allocation56_spill] sm:$0xff] %v29034_v31  ;;  %31257 = vst [vmem:[#allocation38_spill] sm:$0xff] %v29037_v47  ;;  %v29072_v39 = vmul.f32 0.5, %v15565_v5  ;;  %v29074_v22 = vmul.f32 0.5, %v15566_v16  ;;  %v15522_v5 = vld [vmem:[#allocation4 + $0x19] sm:$0xff] }
 0xb4d   :  { %31258 = vst [vmem:[#allocation39_spill] sm:$0xff] %v29040_v53  ;;  %31259 = vst [vmem:[#allocation20_spill] sm:$0xff] %v29043_v33 }
 0xb4e   :  { %31260 = vst [vmem:[#allocation19_spill] sm:$0xff] %v29046_v2  ;;  %31261 = vst [vmem:[#allocation79_spill] sm:$0xff] %v29049_v49  ;;  %v21773_v3 = vpop.eup %21772  ;;  %v31283_v49 = vld [vmem:[#allocation65_spill] sm:$0xff] }
 0xb4f   :  { %31262 = vst [vmem:[#allocation78_spill] sm:$0xff] %v29052_v43  ;;  %31263 = vst [vmem:[#allocation81_spill] sm:$0xff] %v29055_v58  ;;  %v29070_v58 = vmul.f32 0.5, %v15563_v26  ;;  %v29081_v25 = vmul.f32 %v21773_v3, %v28612_v62  ;;  %v29084_v17 = vmul.f32 %v21773_v3, %v28615_v46  ;;  %v29087_v4 = vmul.f32 %v21773_v3, %v28618_v23  ;;  %v15521_v62 = vld [vmem:[#allocation4 + $0x9] sm:$0xff] }
 0xb50   :  { %31264 = vst [vmem:[#allocation80_spill] sm:$0xff] %v29058_v19  ;;  %31265 = vst [vmem:[#allocation83_spill] sm:$0xff] %v29061_v54  ;;  %v15567_v19 = vadd.f32 %v15535_v56, %v31270_v7  ;;  %v29078_v54 = vmul.f32 %v21773_v3, %v28609_v50  ;;  %v29090_v56 = vmul.f32 %v21773_v3, %v28623_v11 }
 0xb51   :  { %31266 = vst [vmem:[#allocation82_spill] sm:$0xff] %v29064_v15  ;;  %31271 = vst [vmem:[#allocation85_spill] sm:$0xff] %v29070_v58  ;;  %v15552_v15 = vadd.f32 %v15520_v37, %v31274_v14  ;;  %v29093_v16 = vmul.f32 %v21773_v3, %v28626_v60  ;;  %v29096_v37 = vmul.f32 %v21773_v3, %v28629_v32  ;;  %v13923_v61 = vmul.f32 0.01, %v29081_v25 }
 0xb52   :  { %31272 = vst [vmem:[#allocation84_spill] sm:$0xff] %v29072_v39  ;;  %31273 = vst [vmem:[#allocation35_spill] sm:$0xff] %v29074_v22  ;;  %v29099_v50 = vmul.f32 %v21773_v3, %v28632_v21  ;;  %v29102_v46 = vmul.f32 %v21773_v3, %v28635_v27  ;;  %v29105_v23 = vmul.f32 %v21773_v3, %v28638_v9  ;;  %v29125_v9 = vmul.f32 0.5, %v15567_v19  ;;  %v31285_v19 = vld [vmem:[#allocation91_spill] sm:$0xff] }
 0xb53   :  { %v29108_v11 = vmul.f32 %v21773_v3, %v28641_v63  ;;  %v29111_v60 = vmul.f32 %v21773_v3, %v28644_v28  ;;  %v29114_v32 = vmul.f32 %v21773_v3, %v31217_v38  ;;  %v29117_v21 = vmul.f32 %v21773_v3, %v31218_v44  ;;  %v31276_v63 = vld [vmem:[#allocation63_spill] sm:$0xff]  ;;  %v31278_v28 = vld [vmem:[#allocation64_spill] sm:$0xff]  ;;  %v31281_v38 = vld [vmem:[#allocation89_spill] sm:$0xff] }
 0xb54   :  { %v29120_v55 = vmul.f32 %v21773_v3, %v31219_v8  ;;  %v29123_v27 = vmul.f32 %v21773_v3, %v31220_v10  ;;  %31275 = vst [vmem:[#allocation86_spill] sm:$0xff] %v29125_v9  ;;  %v29128_v26 = vadd.f32 %v15521_v62, %v31276_v63  ;;  %v29131_v30 = vadd.f32 %v15522_v5, %v31278_v28  ;;  %v31282_v44 = vld [vmem:[#allocation90_spill] sm:$0xff]  ;;  %v31286_v62 = vld [vmem:[#allocation92_spill] sm:$0xff]  ;;  %v31287_v5 = vld [vmem:[#allocation5_spill] sm:$0xff] }
 0xb55   :  { %v29133_v7 = vmul.f32 0.5, %v15552_v15  ;;  %v13778_v14 = vmul.f32 %v21773_v3, %v31281_v38  ;;  %v13779_v43 = vmul.f32 %v21773_v3, %v31282_v44  ;;  %v29138_v8 = vadd.f32 %v15523_v20, %v31283_v49  ;;  %v31288_v28 = vld [vmem:[#allocation6_spill] sm:$0xff]  ;;  %v31289_v44 = vld [vmem:[#allocation7_spill] sm:$0xff]  ;;  %v31290_v49 = vld [vmem:[#allocation8_spill] sm:$0xff] }
 0xb56   :  { %31277 = vst [vmem:[#allocation18_spill] sm:$0xff] %v29128_v26  ;;  %31279 = vst [vmem:[#allocation17_spill] sm:$0xff] %v29131_v30  ;;  %v29142_v10 = vmul.f32 %v28971_v52, %v28971_v52  ;;  %v29145_v2 = vmul.f32 %v21773_v3, %v31285_v19  ;;  %v29148_v63 = vmul.f32 %v21773_v3, %v31286_v62  ;;  %v31291_v52 = vld [vmem:[#allocation9_spill] sm:$0xff]  ;;  %v31292_v19 = vld [vmem:[#allocation10_spill] sm:$0xff]  ;;  %vm13862_vm9 = vcmp.gt.f32.partialorder %v29090_v56, 0.0 }
 0xb57   :  { %31280 = vst [vmem:[#allocation22_spill] sm:$0xff] %v29133_v7  ;;  %31284 = vst [vmem:[#allocation27_spill] sm:$0xff] %v29138_v8  ;;  %v29151_v15 = vmul.f32 %v21773_v3, %v31287_v5  ;;  %v29154_v38 = vmul.f32 %v21773_v3, %v31288_v28  ;;  %v29157_v33 = vmul.f32 %v21773_v3, %v31289_v44  ;;  %v31293_v62 = vld [vmem:[#allocation11_spill] sm:$0xff]  ;;  %v31294_v5 = vld [vmem:[#allocation12_spill] sm:$0xff]  ;;  %vm13842_vm1 = vcmp.gt.f32.partialorder %v13778_v14, 0.0 }
 0xb58   :  { %v29160_v20 = vmul.f32 %v21773_v3, %v31290_v49  ;;  %v29163_v53 = vmul.f32 %v21773_v3, %v31291_v52  ;;  %v29166_v47 = vmul.f32 %v21773_v3, %v31292_v19  ;;  %v29169_v31 = vmul.f32 %v21773_v3, %v31293_v62  ;;  %v31295_v28 = vld [vmem:[#allocation13_spill] sm:$0xff]  ;;  %v31296_v44 = vld [vmem:[#allocation14_spill] sm:$0xff]  ;;  %v31297_v49 = vld [vmem:[#allocation15_spill] sm:$0xff] }
 0xb59   :  { %v29172_v18 = vmul.f32 %v21773_v3, %v31294_v5  ;;  %v29175_v1 = vmul.f32 %v21773_v3, %v31295_v28  ;;  %v29178_v12 = vmul.f32 %v21773_v3, %v31296_v44  ;;  %v29181_v34 = vmul.f32 %v21773_v3, %v31297_v49  ;;  %v31298_v52 = vld [vmem:[#allocation16_spill] sm:$0xff] }
 0xb5a   :  { %v29184_v42 = vmul.f32 %v21773_v3, %v31298_v52  ;;  %vm13843_vm5 = vcmp.gt.f32.partialorder %v13779_v43, 0.0  ;;  %vm13844_vm0 = vcmp.gt.f32.partialorder %v29145_v2, 0.0  ;;  %vm13845_vm4 = vcmp.gt.f32.partialorder %v29148_v63, 0.0 }
 0xb5b   :  { %vm13846_vm6 = vcmp.gt.f32.partialorder %v29151_v15, 0.0  ;;  %vm13847_vm2 = vcmp.gt.f32.partialorder %v29154_v38, 0.0  ;;  %vm13848_vm10 = vcmp.gt.f32.partialorder %v29157_v33, 0.0  ;;  %vm13849_vm11 = vcmp.gt.f32.partialorder %v29160_v20, 0.0 }
 0xb5c   :  { %vm13850_vm3 = vcmp.gt.f32.partialorder %v29163_v53, 0.0  ;;  %vm13851_vm8 = vcmp.gt.f32.partialorder %v29166_v47, 0.0  ;;  %v13906_v3 = vmul.f32 0.01, %v13778_v14  ;;  %v13907_v19 = vmul.f32 0.01, %v13779_v43 }
 0xb5d   :  { %v13908_v62 = vmul.f32 0.01, %v29145_v2  ;;  %v29201_v5 = vmul.f32 %v28974_v57, %v28974_v57  ;;  %v13909_v28 = vmul.f32 0.01, %v29148_v63  ;;  %v13910_v44 = vmul.f32 0.01, %v29151_v15 }
 0xb5e   :  { %v13911_v49 = vmul.f32 0.01, %v29154_v38  ;;  %v29212_v52 = vmul.f32 %v28977_v41, %v28977_v41  ;;  %v13912_v57 = vmul.f32 0.01, %v29157_v33  ;;  %v13913_v0 = vmul.f32 0.01, %v29160_v20 }
 0xb5f   :  { %v13914_v29 = vmul.f32 0.01, %v29163_v53  ;;  %v29222_v48 = vsel %vm13842_vm1, %v13778_v14, %v13906_v3  ;;  %vm13866_vm15 = vcmp.gt.f32.partialorder %v29102_v46, 0.0  ;;  %vm13867_vm13 = vcmp.gt.f32.partialorder %v29105_v23, 0.0 }
 0xb60   :  { %31299 = vst [vmem:[#allocation21_spill] sm:$0xff] %v29212_v52  ;;  %v13915_v41 = vmul.f32 0.01, %v29166_v47  ;;  %v13916_v35 = vmul.f32 0.01, %v29169_v31  ;;  %v29232_v59 = vsel %vm13843_vm5, %v13779_v43, %v13907_v19  ;;  %vm13869_vm7 = vcmp.gt.f32.partialorder %v29111_v60, 0.0 }
 0xb61   :  { %v13917_v51 = vmul.f32 0.01, %v29172_v18  ;;  %vm13870_vm14 = vcmp.gt.f32.partialorder %v29114_v32, 0.0  ;;  %vm13871_vm12 = vcmp.gt.f32.partialorder %v29117_v21, 0.0  ;;  %v13918_v14 = vmul.f32 0.01, %v29175_v1 }
 0xb62   :  { %v13919_v3 = vmul.f32 0.01, %v29178_v12  ;;  %v13920_v45 = vmul.f32 0.01, %v29181_v34  ;;  %v29244_v24 = vsel %vm13844_vm0, %v29145_v2, %v13908_v62  ;;  %vm13872_vm5 = vcmp.gt.f32.partialorder %v29120_v55, 0.0 }
 0xb63   :  { %vm13873_vm1 = vcmp.gt.f32.partialorder %v29123_v27, 0.0  ;;  %v13921_v43 = vmul.f32 0.01, %v29184_v42  ;;  %v13922_v19 = vmul.f32 0.01, %v29078_v54  ;;  %v13973_v9 = vsel %vm13845_vm4, %v29148_v63, %v13909_v28 }
 0xb64   :  { %v13924_v22 = vmul.f32 0.01, %v29084_v17  ;;  %v13925_v39 = vmul.f32 0.01, %v29087_v4  ;;  %v13926_v2 = vmul.f32 0.01, %v29090_v56  ;;  %v13974_v62 = vsel %vm13846_vm6, %v29151_v15, %v13910_v44 }
 0xb65   :  { %v13927_v58 = vmul.f32 0.01, %v29093_v16  ;;  %v13928_v7 = vmul.f32 0.01, %v29096_v37  ;;  %v13929_v6 = vmul.f32 0.01, %v29099_v50  ;;  %v13975_v63 = vsel %vm13847_vm2, %v29154_v38, %v13911_v49 }
 0xb66   :  { %v13930_v28 = vmul.f32 0.01, %v29102_v46  ;;  %v13931_v40 = vmul.f32 0.01, %v29105_v23  ;;  %v13932_v8 = vmul.f32 0.01, %v29108_v11  ;;  %v13976_v15 = vsel %vm13848_vm10, %v29157_v33, %v13912_v57 }
 0xb67   :  { %v13933_v44 = vmul.f32 0.01, %v29111_v60  ;;  %v13934_v36 = vmul.f32 0.01, %v29114_v32  ;;  %v13935_v30 = vmul.f32 0.01, %v29117_v21  ;;  %v13977_v38 = vsel %vm13849_vm11, %v29160_v20, %v13913_v0 }
 0xb68   :  { %v13936_v49 = vmul.f32 0.01, %v29120_v55  ;;  %v13937_v26 = vmul.f32 0.01, %v29123_v27  ;;  %v13978_v52 = vsel %vm13850_vm3, %v29163_v53, %v13914_v29  ;;  %v13979_v57 = vsel %vm13851_vm8, %v29166_v47, %v13915_v41 }
 0xb69   :  { %vm31300_vm0 = vcmp.gt.f32.partialorder %v29169_v31, 0.0  ;;  %vm31301_vm4 = vcmp.gt.f32.partialorder %v29172_v18, 0.0  ;;  %vm31302_vm6 = vcmp.gt.f32.partialorder %v29175_v1, 0.0  ;;  %vm31303_vm2 = vcmp.gt.f32.partialorder %v29178_v12, 0.0 }
 0xb6a   :  { %v13980_v33 = vsel %vm31300_vm0, %v29169_v31, %v13916_v35  ;;  %v13981_v0 = vsel %vm31301_vm4, %v29172_v18, %v13917_v51  ;;  %v13982_v20 = vsel %vm31302_vm6, %v29175_v1, %v13918_v14  ;;  %v13983_v29 = vsel %vm31303_vm2, %v29178_v12, %v13919_v3  ;;  %v15524_v14 = vld [vmem:[#allocation4 + $0x31] sm:$0xff] }
 0xb6b   :  { %vm31304_vm10 = vcmp.gt.f32.partialorder %v29181_v34, 0.0  ;;  %vm31305_vm11 = vcmp.gt.f32.partialorder %v29184_v42, 0.0  ;;  %vm31306_vm3 = vcmp.gt.f32.partialorder %v29078_v54, 0.0  ;;  %vm31307_vm8 = vcmp.gt.f32.partialorder %v29081_v25, 0.0 }
 0xb6c   :  { %v13984_v41 = vsel %vm31304_vm10, %v29181_v34, %v13920_v45  ;;  %v13985_v35 = vsel %vm31305_vm11, %v29184_v42, %v13921_v43  ;;  %v13986_v51 = vsel %vm31306_vm3, %v29078_v54, %v13922_v19  ;;  %v13987_v1 = vsel %vm31307_vm8, %v29081_v25, %v13923_v61  ;;  %v15526_v43 = vld [vmem:[#allocation4 + $0x49] sm:$0xff]  ;;  %v15527_v19 = vld [vmem:[#allocation4 + $0x51] sm:$0xff] }
 0xb6d   :  { %vm31308_vm0 = vcmp.gt.f32.partialorder %v29084_v17, 0.0  ;;  %vm31309_vm4 = vcmp.gt.f32.partialorder %v29087_v4, 0.0  ;;  %v13990_v42 = vsel %vm13862_vm9, %v29090_v56, %v13926_v2  ;;  %vm31310_vm6 = vcmp.gt.f32.partialorder %v29093_v16, 0.0 }
 0xb6e   :  { %v13988_v12 = vsel %vm31308_vm0, %v29084_v17, %v13924_v22  ;;  %v13989_v45 = vsel %vm31309_vm4, %v29087_v4, %v13925_v39  ;;  %v13991_v34 = vsel %vm31310_vm6, %v29093_v16, %v13927_v58  ;;  %vm31311_vm2 = vcmp.gt.f32.partialorder %v29096_v37, 0.0 }
 0xb6f   :  { %v13992_v61 = vsel %vm31311_vm2, %v29096_v37, %v13928_v7  ;;  %vm31312_vm10 = vcmp.gt.f32.partialorder %v29099_v50, 0.0  ;;  %v13994_v31 = vsel %vm13866_vm15, %v29102_v46, %v13930_v28  ;;  %v13995_v47 = vsel %vm13867_vm13, %v29105_v23, %v13931_v40 }
 0xb70   :  { %v13993_v18 = vsel %vm31312_vm10, %v29099_v50, %v13929_v6  ;;  %vm31313_vm9 = vcmp.gt.f32.partialorder %v29108_v11, 0.0  ;;  %v13997_v58 = vsel %vm13869_vm7, %v29111_v60, %v13933_v44  ;;  %v13998_v6 = vsel %vm13870_vm14, %v29114_v32, %v13934_v36  ;;  %v15530_v44 = vld [vmem:[#allocation4 + $0x79] sm:$0xff] }
 0xb71   :  { %v13996_v53 = vsel %vm31313_vm9, %v29108_v11, %v13932_v8  ;;  %v13999_v54 = vsel %vm13871_vm12, %v29117_v21, %v13935_v30  ;;  %v14000_v40 = vsel %vm13872_vm5, %v29120_v55, %v13936_v49  ;;  %v14001_v39 = vsel %vm13873_vm1, %v29123_v27, %v13937_v26  ;;  %v31326_v49 = vld [vmem:[#allocation66_spill] sm:$0xff] }
 0xb72   :  { %v14034_v22 = vmax.f32 %v29244_v24, %v13974_v62  ;;  %v14035_v25 = vmax.f32 %v13973_v9, %v13975_v63  ;;  %v14036_v17 = vmax.f32 %v13976_v15, %v13978_v52  ;;  %v14037_v4 = vmax.f32 %v13977_v38, %v13979_v57 }
 0xb73   :  { %v14038_v56 = vmax.f32 %v13980_v33, %v13982_v20  ;;  %v14039_v16 = vmax.f32 %v13981_v0, %v13983_v29  ;;  %v14040_v36 = vmax.f32 %v13984_v41, %v13986_v51  ;;  %v14041_v37 = vmax.f32 %v13985_v35, %v13987_v1  ;;  %v31333_v29 = vld [vmem:[#allocation67_spill] sm:$0xff] }
 0xb74   :  { %v14042_v50 = vmax.f32 %v13988_v12, %v13990_v42  ;;  %v14043_v46 = vmax.f32 %v13989_v45, %v13991_v34  ;;  %v14044_v23 = vmax.f32 %v13992_v61, %v13994_v31  ;;  %v14045_v11 = vmax.f32 %v13993_v18, %v13995_v47  ;;  %v31337_v42 = vld [vmem:[#allocation71_spill] sm:$0xff]  ;;  %v31339_v31 = vld [vmem:[#allocation21_spill] sm:$0xff] }
 0xb75   :  { %v14046_v60 = vmax.f32 %v13996_v53, %v13998_v6  ;;  %v14047_v32 = vmax.f32 %v13997_v58, %v13999_v54  ;;  %v29355_v21 = vmax.f32 %v29222_v48, %v29244_v24  ;;  %v29358_v55 = vmax.f32 %v29232_v59, %v13973_v9  ;;  %v15525_v9 = vld [vmem:[#allocation4 + $0x39] sm:$0xff] }
 0xb76   :  { %v29360_v27 = vmax.f32 %v14034_v22, %v13976_v15  ;;  %v29362_v26 = vmax.f32 %v14035_v25, %v13977_v38  ;;  %v29364_v30 = vmax.f32 %v14036_v17, %v13980_v33  ;;  %v29366_v7 = vmax.f32 %v14037_v4, %v13981_v0  ;;  %v15528_v15 = vld [vmem:[#allocation4 + $0x61] sm:$0xff]  ;;  %v15532_v38 = vld [vmem:[#allocation4 + $0x91] sm:$0xff] }
 0xb77   :  { %v29368_v8 = vmax.f32 %v14038_v56, %v13984_v41  ;;  %v29370_v52 = vmax.f32 %v14039_v16, %v13985_v35  ;;  %v29372_v3 = vmax.f32 %v14040_v36, %v13988_v12  ;;  %v29374_v24 = vmax.f32 %v14041_v37, %v13989_v45  ;;  %v31334_v35 = vld [vmem:[#allocation68_spill] sm:$0xff]  ;;  %v31342_v54 = vld [vmem:[#allocation17_spill] sm:$0xff]  ;;  %v31344_v17 = vld [vmem:[#allocation27_spill] sm:$0xff] }
 0xb78   :  { %v29376_v48 = vmax.f32 %v14042_v50, %v13992_v61  ;;  %v29378_v59 = vmax.f32 %v14043_v46, %v13993_v18  ;;  %vm31314_vm7 = vcmask 64512   ;;  %v29388_v2 = vmax.f32 %v14044_v23, %v13996_v53  ;;  %v31338_v61 = vld [vmem:[#allocation72_spill] sm:$0xff]  ;;  %v15529_v53 = vld [vmem:[#allocation4 + $0x69] sm:$0xff] }
 0xb79   :  { %14127 = vst.msk [vmem:[#allocation3 + $0x1] sm:$0xff] %vm31314_vm7, %v29355_v21  ;;  %vm31315_vm14 = vmmov %vm31314_vm7  ;;  %v29390_v62 = vmax.f32 %v14045_v11, %v13997_v58  ;;  %v29392_v63 = vmax.f32 %v14046_v60, %v14000_v40  ;;  %v29394_v28 = vmax.f32 %v14047_v32, %v14001_v39  ;;  %v15556_v57 = vadd.f32 %v15524_v14, %v31326_v49  ;;  %v31341_v58 = vld [vmem:[#allocation18_spill] sm:$0xff]  ;;  %v31343_v39 = vld [vmem:[#allocation40_spill] sm:$0xff] }
 0xb7a   :  { %14128 = vst.msk [vmem:[#allocation3 + $0x9] sm:$0xff] %vm31315_vm14, %v29358_v55  ;;  %vm31316_vm12 = vmmov %vm31314_vm7  ;;  %v13605_v33 = vmul.f32 %v28980_v13, %v28980_v13  ;;  %v15557_v41 = vadd.f32 %v15525_v9, %v31333_v29  ;;  %v15558_v51 = vadd.f32 %v15526_v43, %v31334_v35  ;;  %v15562_v34 = vadd.f32 %v15530_v44, %v31337_v42  ;;  %v31345_v16 = vld [vmem:[#allocation26_spill] sm:$0xff]  ;;  %v31348_v35 = vld [vmem:[#allocation25_spill] sm:$0xff] }
 0xb7b   :  { %14129 = vst.msk [vmem:[#allocation3 + $0x19] sm:$0xff] %vm31316_vm12, %v29360_v27  ;;  %vm31317_vm15 = vmmov %vm31314_vm7  ;;  %v15564_v18 = vadd.f32 %v15532_v38, %v31338_v61  ;;  %v29436_v6 = vmul.f32 0.5, %v31341_v58  ;;  %v29439_v40 = vmul.f32 0.5, %v31342_v54  ;;  %v13606_v22 = vmul.f32 %v31343_v39, %v31343_v39 }
 0xb7c   :  { %14130 = vst.msk [vmem:[#allocation3 + $0x21] sm:$0xff] %vm31317_vm15, %v29362_v26  ;;  %vm31318_vm13 = vmmov %vm31314_vm7  ;;  %v29444_v4 = vmul.f32 0.5, %v31344_v17  ;;  %v29446_v56 = vmul.f32 0.5, %v15556_v57  ;;  %v13607_v36 = vmul.f32 %v31345_v16, %v31345_v16  ;;  %v29451_v11 = vmul.f32 0.5, %v15557_v41 }
 0xb7d   :  { %14131 = vst.msk [vmem:[#allocation3 + $0x31] sm:$0xff] %vm31318_vm13, %v29364_v30  ;;  %vm31319_vm1 = vmmov %vm31314_vm7  ;;  %v29453_v60 = vmul.f32 0.5, %v15558_v51  ;;  %v29462_v49 = vmul.f32 0.5, %v15562_v34  ;;  %v29464_v57 = vmul.f32 0.5, %v15564_v18  ;;  %v29470_v51 = vmul.f32 %v31348_v35, %v31348_v35 }
 0xb7e   :  { %14132 = vst.msk [vmem:[#allocation3 + $0x39] sm:$0xff] %vm31319_vm1, %v29366_v7  ;;  %vm31320_vm5 = vmmov %vm31319_vm1 }
 0xb7f   :  { %14133 = vst.msk [vmem:[#allocation3 + $0x49] sm:$0xff] %vm31320_vm5, %v29368_v8  ;;  %vm31321_vm11 = vmmov %vm31319_vm1 }
 0xb80   :  { %14134 = vst.msk [vmem:[#allocation3 + $0x51] sm:$0xff] %vm31321_vm11, %v29370_v52  ;;  %vm31322_vm3 = vmmov %vm31319_vm1  ;;  %v14159_v50 = vld [vmem:[#allocation3] sm:$0xff] }
 0xb81   :  { %14135 = vst.msk [vmem:[#allocation3 + $0x61] sm:$0xff] %vm31322_vm3, %v29372_v3  ;;  %vm31323_vm8 = vmmov %vm31319_vm1  ;;  %v14160_v46 = vld [vmem:[#allocation3 + $0x8] sm:$0xff]  ;;  %v14191_v29 = vmax.f32 %v14159_v50, %v29355_v21 }
 0xb82   :  { %14136 = vst.msk [vmem:[#allocation3 + $0x69] sm:$0xff] %vm31323_vm8, %v29374_v24  ;;  %vm31324_vm0 = vmmov %vm31319_vm1  ;;  %v14161_v23 = vld [vmem:[#allocation3 + $0x18] sm:$0xff]  ;;  %v14192_v41 = vmax.f32 %v14160_v46, %v29358_v55 }
 0xb83   :  { %14137 = vst.msk [vmem:[#allocation3 + $0x79] sm:$0xff] %vm31324_vm0, %v29376_v48  ;;  %vm31325_vm4 = vmmov %vm31324_vm0  ;;  %v14162_v9 = vld [vmem:[#allocation3 + $0x20] sm:$0xff] }
 0xb84   :  { %14138 = vst.msk [vmem:[#allocation3 + $0x81] sm:$0xff] %vm31325_vm4, %v29378_v59  ;;  %vm31327_vm6 = vmmov %vm31324_vm0  ;;  %v14163_v43 = vld [vmem:[#allocation3 + $0x30] sm:$0xff] }
 0xb85   :  { %v13703_v0 = vsel %vm31327_vm6, %v29142_v10, 0.0  ;;  %vm31328_vm2 = vmmov %vm31324_vm0  ;;  %v31335_v10 = vld [vmem:[#allocation69_spill] sm:$0xff]  ;;  %v14195_v42 = vmax.f32 %v14163_v43, %v29364_v30 }
 0xb86   :  { %v13704_v20 = vsel %vm31328_vm2, %v29201_v5, 0.0  ;;  %vm31329_vm10 = vmmov %vm31324_vm0  ;;  %v15559_v1 = vadd.f32 %v15527_v19, %v31335_v10  ;;  %v31336_v5 = vld [vmem:[#allocation70_spill] sm:$0xff]  ;;  %v14164_v19 = vld [vmem:[#allocation3 + $0x38] sm:$0xff] }
 0xb87   :  { %14139 = vst.msk [vmem:[#allocation3 + $0x91] sm:$0xff] %vm31329_vm10, %v29388_v2  ;;  %vm31330_vm9 = vmmov %vm31324_vm0  ;;  %v13705_v12 = vadd.f32 %v13704_v20, %v13703_v0  ;;  %v15560_v45 = vadd.f32 %v15528_v15, %v31336_v5  ;;  %v31347_v15 = vld [vmem:[#allocation57_spill] sm:$0xff]  ;;  %v14166_v0 = vld [vmem:[#allocation3 + $0x50] sm:$0xff]  ;;  %v14193_v5 = vmax.f32 %v14161_v23, %v29360_v27  ;;  %v14196_v55 = vmax.f32 %v14164_v19, %v29366_v7 }
 0xb88   :  { %14140 = vst.msk [vmem:[#allocation3 + $0x99] sm:$0xff] %vm31330_vm9, %v29390_v62  ;;  %vm31331_vm7 = vmmov %vm31324_vm0  ;;  %v29455_v32 = vmul.f32 0.5, %v15559_v1  ;;  %v29458_v44 = vadd.f32 %v15529_v53, %v31347_v15  ;;  %v14167_v20 = vld [vmem:[#allocation3 + $0x60] sm:$0xff]  ;;  %v14229_v23 = vld [vmem:[#allocation3 + $0x4a] sm:$0xff] }
 0xb89   :  { %14141 = vst.msk [vmem:[#allocation3 + $0xa9] sm:$0xff] %vm31331_vm7, %v29392_v63  ;;  %vm31332_vm14 = vmmov %vm31324_vm0  ;;  %v29460_v38 = vmul.f32 0.5, %v15560_v45  ;;  %v14194_v45 = vmax.f32 %v14162_v9, %v29362_v26  ;;  %v14199_v54 = vmax.f32 %v14167_v20, %v29372_v3  ;;  %v14228_v3 = vld [vmem:[#allocation3 + $0x3a] sm:$0xff] }
 0xb8a   :  { %14142 = vst.msk [vmem:[#allocation3 + $0xb1] sm:$0xff] %vm31332_vm14, %v29394_v28  ;;  %vm31340_vm12 = vmmov %vm31324_vm0  ;;  %v14169_v1 = vld [vmem:[#allocation3 + $0x78] sm:$0xff]  ;;  %v14260_v19 = vmax.f32 %v14196_v55, %v14228_v3 }
 0xb8b   :  { %v13706_v47 = vsel %vm31340_vm12, %v31339_v31, 0.0  ;;  %vm31346_vm15 = vmmov %vm31324_vm0  ;;  %v14201_v27 = vmax.f32 %v14169_v1, %v29376_v48  ;;  %v14230_v48 = vld [vmem:[#allocation3 + $0x52] sm:$0xff]  ;;  %v14233_v43 = vld [vmem:[#allocation3 + $0x7a] sm:$0xff] }
 0xb8c   :  { %v13707_v25 = vadd.f32 %v13706_v47, %v13705_v12  ;;  %v13708_v37 = vsel %vm31346_vm15, %v13605_v33, 0.0  ;;  %v14165_v33 = vld [vmem:[#allocation3 + $0x48] sm:$0xff]  ;;  %vm31349_vm13 = vmmov %vm31324_vm0  ;;  %v14170_v12 = vld [vmem:[#allocation3 + $0x80] sm:$0xff]  ;;  %v14198_v47 = vmax.f32 %v14166_v0, %v29370_v52 }
 0xb8d   :  { %v13710_v10 = vsel %vm31349_vm13, %v13606_v22, 0.0  ;;  %vm31350_vm1 = vmmov %vm31324_vm0  ;;  %v14197_v31 = vmax.f32 %v14165_v33, %v29368_v8  ;;  %v14202_v26 = vmax.f32 %v14170_v12, %v29378_v59  ;;  %v14223_v22 = vld [vmem:[#allocation3 + $0x2] sm:$0xff] }
 0xb8e   :  { %v13709_v14 = vadd.f32 %v13708_v37, %v13707_v25  ;;  %v13712_v34 = vsel %vm31350_vm1, %v13607_v36, 0.0  ;;  %v14171_v61 = vld [vmem:[#allocation3 + $0x90] sm:$0xff]  ;;  %v14225_v36 = vld [vmem:[#allocation3 + $0x1a] sm:$0xff]  ;;  %v14226_v8 = vld [vmem:[#allocation3 + $0x22] sm:$0xff]  ;;  %v14255_v52 = vmax.f32 %v14191_v29, %v14223_v22 }
 0xb8f   :  { %v14172_v21 = vld [vmem:[#allocation3 + $0x98] sm:$0xff]  ;;  %v14203_v30 = vmax.f32 %v14171_v61, %v29388_v2  ;;  %v14224_v25 = vld [vmem:[#allocation3 + $0xa] sm:$0xff]  ;;  %v14258_v59 = vmax.f32 %v14194_v45, %v14226_v8  ;;  %v14231_v2 = vld [vmem:[#allocation3 + $0x62] sm:$0xff]  ;;  %v14261_v15 = vmax.f32 %v14197_v31, %v14229_v23 }
 0xb90   :  { %v14173_v18 = vld [vmem:[#allocation3 + $0xa8] sm:$0xff]  ;;  %v13711_v53 = vadd.f32 %v13710_v10, %v13709_v14  ;;  %v14204_v17 = vmax.f32 %v14172_v21, %v29390_v62  ;;  %v14227_v37 = vld [vmem:[#allocation3 + $0x32] sm:$0xff]  ;;  %v14256_v50 = vmax.f32 %v14192_v41, %v14224_v25  ;;  %v14257_v14 = vmax.f32 %v14193_v5, %v14225_v36  ;;  %v14236_v29 = vld [vmem:[#allocation3 + $0x9a] sm:$0xff] }
 0xb91   :  { %v14174_v58 = vld [vmem:[#allocation3 + $0xb0] sm:$0xff]  ;;  %v14205_v7 = vmax.f32 %v14173_v18, %v29392_v63  ;;  %v14259_v9 = vmax.f32 %v14195_v42, %v14227_v37  ;;  %v14262_v62 = vmax.f32 %v14198_v47, %v14230_v48  ;;  %v31351_v33 = vld [vmem:[#allocation22_spill] sm:$0xff]  ;;  %v14263_v41 = vmax.f32 %v14199_v54, %v14231_v2  ;;  %v31356_v25 = vld [vmem:[#allocation41_spill] sm:$0xff] }
 0xb92   :  { %v14206_v46 = vmax.f32 %v14174_v58, %v29394_v28  ;;  %v29488_v63 = vadd.f32 %v31351_v33, %v14255_v52  ;;  %v14234_v0 = vld [vmem:[#allocation3 + $0x82] sm:$0xff]  ;;  %v14235_v20 = vld [vmem:[#allocation3 + $0x92] sm:$0xff]  ;;  %v14265_v10 = vmax.f32 %v14201_v27, %v14233_v43  ;;  %v29491_v28 = vadd.f32 %v29436_v6, %v14256_v50  ;;  %v14237_v5 = vld [vmem:[#allocation3 + $0xaa] sm:$0xff] }
 0xb93   :  { %v13713_v1 = vadd.f32 %v13712_v34, %v13711_v53  ;;  %v14168_v12 = vld [vmem:[#allocation3 + $0x68] sm:$0xff]  ;;  %v14238_v45 = vld [vmem:[#allocation3 + $0xb2] sm:$0xff]  ;;  %v14266_v42 = vmax.f32 %v14202_v26, %v14234_v0  ;;  %v14267_v61 = vmax.f32 %v14203_v30, %v14235_v20  ;;  %v14268_v21 = vmax.f32 %v14204_v17, %v14236_v29  ;;  %v31352_v27 = vld [vmem:[#allocation85_spill] sm:$0xff] }
 0xb94   :  { %v29494_v18 = vadd.f32 %v29439_v40, %v14257_v14  ;;  %v14269_v55 = vmax.f32 %v14205_v7, %v14237_v5  ;;  %v14270_v31 = vmax.f32 %v14206_v46, %v14238_v45  ;;  %v29497_v47 = vadd.f32 %v29444_v4, %v14258_v59  ;;  %v31353_v26 = vld [vmem:[#allocation84_spill] sm:$0xff]  ;;  %v31354_v30 = vld [vmem:[#allocation35_spill] sm:$0xff]  ;;  %v31355_v22 = vld [vmem:[#allocation86_spill] sm:$0xff] }
 0xb95   :  { %v29500_v58 = vadd.f32 %v29446_v56, %v14259_v9  ;;  %v29503_v6 = vadd.f32 %v29451_v11, %v14260_v19  ;;  %v29506_v34 = vadd.f32 %v29453_v60, %v14261_v15  ;;  %v29509_v53 = vadd.f32 %v29455_v32, %v14262_v62  ;;  %vm31357_vm5 = vmmov %vm31324_vm0  ;;  %v14232_v17 = vld [vmem:[#allocation3 + $0x6a] sm:$0xff]  ;;  %v31359_v52 = vld [vmem:[#allocation44_spill] sm:$0xff] }
 0xb96   :  { %v29512_v40 = vadd.f32 %v29460_v38, %v14263_v41  ;;  %v14200_v54 = vmax.f32 %v14168_v12, %v29374_v24  ;;  %v29516_v4 = vadd.f32 %v29462_v49, %v14265_v10  ;;  %v29519_v56 = vadd.f32 %v31352_v27, %v14266_v42  ;;  %v31360_v46 = vld [vmem:[#allocation43_spill] sm:$0xff]  ;;  %v31361_v23 = vld [vmem:[#allocation45_spill] sm:$0xff]  ;;  %vm31364_vm11 = vmmov %vm31324_vm0 }
 0xb97   :  { %v29522_v11 = vadd.f32 %v29464_v57, %v14267_v61  ;;  %v29525_v60 = vadd.f32 %v31353_v26, %v14268_v21  ;;  %v29528_v32 = vadd.f32 %v31354_v30, %v14269_v55  ;;  %v29531_v38 = vadd.f32 %v31355_v22, %v14270_v31  ;;  %v31358_v57 = vld [vmem:[#allocation42_spill] sm:$0xff]  ;;  %v31365_v62 = vld [vmem:[#allocation49_spill] sm:$0xff]  ;;  %v31367_v12 = vld [vmem:[#allocation51_spill] sm:$0xff] }
 0xb98   :  { %v13609_v24 = vmul.f32 %v31356_v25, %v31356_v25  ;;  %v13714_v49 = vsel %vm31357_vm5, %v29470_v51, 0.0  ;;  %v15593_v7 = vmul.f32 0.5, %v29458_v44  ;;  %v13610_v36 = vmul.f32 %v31358_v57, %v31358_v57  ;;  %v31362_v51 = vld [vmem:[#allocation46_spill] sm:$0xff]  ;;  %v31363_v44 = vld [vmem:[#allocation47_spill] sm:$0xff]  ;;  %v31368_v42 = vld [vmem:[#allocation52_spill] sm:$0xff] }
 0xb99   :  { %v13715_v8 = vadd.f32 %v13714_v49, %v13713_v1  ;;  %v14264_v37 = vmax.f32 %v14200_v54, %v14232_v17  ;;  %v13611_v50 = vmul.f32 %v31359_v52, %v31359_v52  ;;  %v13612_v3 = vmul.f32 %v31360_v46, %v31360_v46  ;;  %v31366_v20 = vld [vmem:[#allocation50_spill] sm:$0xff]  ;;  %vm31369_vm3 = vmmov %vm31324_vm0 }
 0xb9a   :  { %v13613_v48 = vmul.f32 %v31361_v23, %v31361_v23  ;;  %v15680_v14 = vmul.f32 1.442695, %v29488_v63  ;;  %v13614_v59 = vmul.f32 %v31362_v51, %v31362_v51  ;;  %v13615_v9 = vmul.f32 %v31363_v44, %v31363_v44  ;;  %vm31370_vm8 = vmmov %vm31324_vm0 }
 0xb9b   :  { %v13716_v2 = vsel %vm31364_vm11, %v13609_v24, 0.0  ;;  %v15682_v43 = vmul.f32 1.442695, %v29491_v28  ;;  %v15684_v19 = vmul.f32 1.442695, %v29494_v18  ;;  %v13616_v33 = vmul.f32 %v31365_v62, %v31365_v62  ;;  %vm31371_vm4 = vmmov %vm31324_vm0 }
 0xb9c   :  { %v15686_v15 = vmul.f32 1.442695, %v29497_v47  ;;  %21774 = vpow2.f32 %v15680_v14  ;;  %v15688_v0 = vmul.f32 1.442695, %v29500_v58  ;;  %v13617_v29 = vmul.f32 %v31366_v20, %v31366_v20  ;;  %vm31372_vm6 = vmmov %vm31324_vm0 }
 0xb9d   :  { %v13717_v41 = vadd.f32 %v13716_v2, %v13715_v8  ;;  %v29560_v10 = vadd.f32 %v15593_v7, %v14264_v37  ;;  %21776 = vpow2.f32 %v15682_v43  ;;  %v15690_v1 = vmul.f32 1.442695, %v29503_v6  ;;  %vm31373_vm2 = vmmov %vm31324_vm0 }
 0xb9e   :  { %v29565_v5 = vmul.f32 %v31367_v12, %v31367_v12  ;;  %21778 = vpow2.f32 %v15684_v19  ;;  %v15692_v45 = vmul.f32 1.442695, %v29506_v34  ;;  %v29570_v61 = vmul.f32 %v31368_v42, %v31368_v42  ;;  %vm31374_vm10 = vmmov %vm31324_vm0 }
 0xb9f   :  { %v13718_v21 = vsel %vm31369_vm3, %v13610_v36, 0.0  ;;  %21780 = vpow2.f32 %v15686_v15  ;;  %v15694_v55 = vmul.f32 1.442695, %v29509_v53  ;;  %v13720_v31 = vsel %vm31370_vm8, %v13611_v50, 0.0  ;;  %vm31375_vm7 = vmmov %vm31324_vm0 }
 0xba0   :  { %v13722_v54 = vsel %vm31324_vm0, %v13612_v3, 0.0  ;;  %21782 = vpow2.f32 %v15688_v0  ;;  %v15696_v27 = vmul.f32 1.442695, %v29512_v40  ;;  %v13719_v26 = vadd.f32 %v13718_v21, %v13717_v41 }
 0xba1   :  { %v13724_v30 = vsel %vm31371_vm4, %v13613_v48, 0.0  ;;  %21784 = vpow2.f32 %v15690_v1  ;;  %v15698_v22 = vmul.f32 1.442695, %v29560_v10  ;;  %v13726_v24 = vsel %vm31372_vm6, %v13614_v59, 0.0 }
 0xba2   :  { %v13728_v49 = vsel %vm31373_vm2, %v13615_v9, 0.0  ;;  %21786 = vpow2.f32 %v15692_v45  ;;  %v15700_v17 = vmul.f32 1.442695, %v29516_v4  ;;  %v13721_v7 = vadd.f32 %v13720_v31, %v13719_v26 }
 0xba3   :  { %v29583_v36 = vsel %vm31374_vm10, %v13616_v33, 0.0  ;;  %vm15648_vm9 = vcmp.gt.f32.partialorder %v29488_v63, 0.0  ;;  %21788 = vpow2.f32 %v15694_v55  ;;  %v15702_v8 = vmul.f32 1.442695, %v29519_v56 }
 0xba4   :  { %v29588_v37 = vsel %vm31375_vm7, %v13617_v29, 0.0  ;;  %vm15649_vm14 = vcmp.gt.f32.partialorder %v29491_v28, 0.0  ;;  %21790 = vpow2.f32 %v15696_v27  ;;  %v15704_v50 = vmul.f32 1.442695, %v29522_v11  ;;  %vm31377_vm7 = vmmov %vm31373_vm2 }
 0xba5   :  { %v13723_v3 = vadd.f32 %v13722_v54, %v13721_v7  ;;  %vm15650_vm12 = vcmp.gt.f32.partialorder %v29494_v18, 0.0  ;;  %vm15651_vm15 = vcmp.gt.f32.partialorder %v29497_v47, 0.0  ;;  %21792 = vpow2.f32 %v15698_v22 }
 0xba6   :  { %v15706_v48 = vmul.f32 1.442695, %v29525_v60  ;;  %v21775_v14 = vpop.eup %21774  ;;  %vm15652_vm13 = vcmp.gt.f32.partialorder %v29500_v58, 0.0  ;;  %21794 = vpow2.f32 %v15700_v17  ;;  %v15708_v59 = vmul.f32 1.442695, %v29528_v32 }
 0xba7   :  { %v13725_v9 = vadd.f32 %v13724_v30, %v13723_v3  ;;  %v21777_v2 = vpop.eup %21776  ;;  %vm15653_vm1 = vcmp.gt.f32.partialorder %v29503_v6, 0.0  ;;  %21796 = vpow2.f32 %v15702_v8  ;;  %v15710_v43 = vmul.f32 1.442695, %v29531_v38 }
 0xba8   :  { %v17607_v19 = vadd.f32 -1.0, %v21775_v14  ;;  %v21779_v15 = vpop.eup %21778  ;;  %vm15654_vm5 = vcmp.gt.f32.partialorder %v29506_v34, 0.0  ;;  %21798 = vpow2.f32 %v15704_v50  ;;  %v17608_v33 = vadd.f32 -1.0, %v21777_v2 }
 0xba9   :  { %v13727_v0 = vadd.f32 %v13726_v24, %v13725_v9  ;;  %v21781_v29 = vpop.eup %21780  ;;  %vm15655_vm11 = vcmp.gt.f32.partialorder %v29509_v53, 0.0  ;;  %21800 = vpow2.f32 %v15706_v48  ;;  %v17609_v41 = vadd.f32 -1.0, %v21779_v15 }
 0xbaa   :  { %v15776_v1 = vmul.f32 1.6732632, %v17607_v19  ;;  %v21783_v45 = vpop.eup %21782  ;;  %vm15656_vm3 = vcmp.gt.f32.partialorder %v29512_v40, 0.0  ;;  %21802 = vpow2.f32 %v15708_v59  ;;  %v17610_v21 = vadd.f32 -1.0, %v21781_v29 }
 0xbab   :  { %v15777_v55 = vmul.f32 1.6732632, %v17608_v33  ;;  %v29602_v31 = vadd.f32 %v13728_v49, %v13727_v0  ;;  %v21785_v54 = vpop.eup %21784  ;;  %vm15657_vm8 = vcmp.gt.f32.partialorder %v29560_v10, 0.0  ;;  %21804 = vpow2.f32 %v15710_v43 }
 0xbac   :  { %v17611_v27 = vadd.f32 -1.0, %v21783_v45  ;;  %v15778_v26 = vmul.f32 1.6732632, %v17609_v41  ;;  %v15808_v30 = vsel %vm15648_vm9, %v29488_v63, %v15776_v1  ;;  %v21787_v22 = vpop.eup %21786  ;;  %vm15658_vm0 = vcmp.gt.f32.partialorder %v29516_v4, 0.0  ;;  %vm31376_vm9 = vmmov %vm31373_vm2 }
 0xbad   :  { %v17612_v24 = vadd.f32 -1.0, %v21785_v54  ;;  %v15779_v17 = vmul.f32 1.6732632, %v17610_v21  ;;  %v15809_v49 = vsel %vm15649_vm14, %v29491_v28, %v15777_v55  ;;  %v15840_v7 = vmul.f32 1.050701, %v15808_v30  ;;  %v21789_v8 = vpop.eup %21788  ;;  %vm31378_vm14 = vmmov %vm31373_vm2 }
 0xbae   :  { %vm15659_vm4 = vcmp.gt.f32.partialorder %v29519_v56, 0.0  ;;  %v17613_v50 = vadd.f32 -1.0, %v21787_v22  ;;  %v15780_v3 = vmul.f32 1.6732632, %v17611_v27  ;;  %v15810_v48 = vsel %vm15650_vm12, %v29494_v18, %v15778_v26  ;;  %v21791_v14 = vpop.eup %21790  ;;  %vm31379_vm12 = vmmov %vm31373_vm2 }
 0xbaf   :  { %v15841_v63 = vmul.f32 1.050701, %v15809_v49  ;;  %vm15660_vm6 = vcmp.gt.f32.partialorder %v29522_v11, 0.0  ;;  %v17614_v59 = vadd.f32 -1.0, %v21789_v8  ;;  %v15781_v9 = vmul.f32 1.6732632, %v17612_v24  ;;  %v21793_v43 = vpop.eup %21792 }
 0xbb0   :  { %v15811_v28 = vsel %vm15651_vm15, %v29497_v47, %v15779_v17  ;;  %v15842_v2 = vmul.f32 1.050701, %v15810_v48  ;;  %15872 = vst.msk [vmem:[%s30331_s4] sm:$0xff] %vm31373_vm2, %v15840_v7  ;;  %vm15661_vm10 = vcmp.gt.f32.partialorder %v29525_v60, 0.0  ;;  %v17615_v18 = vadd.f32 -1.0, %v21791_v14  ;;  %v21795_v47 = vpop.eup %21794  ;;  %vm31380_vm15 = vmmov %vm31373_vm2 }
 0xbb1   :  { %v15782_v19 = vmul.f32 1.6732632, %v17613_v50  ;;  %v15812_v15 = vsel %vm15652_vm13, %v29500_v58, %v15780_v3  ;;  %v15843_v33 = vmul.f32 1.050701, %v15811_v28  ;;  %15873 = vst.msk [vmem:[%s30331_s4 + $0x8] sm:$0xff] %vm31376_vm9, %v15841_v63  ;;  %v17616_v0 = vadd.f32 -1.0, %v21793_v43  ;;  %v21797_v58 = vpop.eup %21796  ;;  %vm31381_vm13 = vmmov %vm31373_vm2 }
 0xbb2   :  { %v15783_v29 = vmul.f32 1.6732632, %v17614_v59  ;;  %v15813_v41 = vsel %vm15653_vm1, %v29503_v6, %v15781_v9  ;;  %v15844_v1 = vmul.f32 1.050701, %v15812_v15  ;;  %15874 = vst.msk [vmem:[%s30331_s4 + $0x10] sm:$0xff] %vm31377_vm7, %v15842_v2  ;;  %v17617_v45 = vadd.f32 -1.0, %v21795_v47  ;;  %v21799_v6 = vpop.eup %21798  ;;  %vm31382_vm1 = vmmov %vm31373_vm2 }
 0xbb3   :  { %v15784_v21 = vmul.f32 1.6732632, %v17615_v18  ;;  %v15814_v55 = vsel %vm15654_vm5, %v29506_v34, %v15782_v19  ;;  %v15845_v54 = vmul.f32 1.050701, %v15813_v41  ;;  %15875 = vst.msk [vmem:[%s30331_s4 + $0x18] sm:$0xff] %vm31378_vm14, %v15843_v33  ;;  %v17618_v27 = vadd.f32 -1.0, %v21797_v58  ;;  %v21801_v34 = vpop.eup %21800  ;;  %vm31383_vm5 = vmmov %vm31382_vm1 }
 0xbb4   :  { %v15785_v26 = vmul.f32 1.6732632, %v17616_v0  ;;  %v15815_v30 = vsel %vm15655_vm11, %v29509_v53, %v15783_v29  ;;  %v15846_v22 = vmul.f32 1.050701, %v15814_v55  ;;  %15876 = vst.msk [vmem:[%s30331_s4 + $0x20] sm:$0xff] %vm31379_vm12, %v15844_v1  ;;  %v17619_v24 = vadd.f32 -1.0, %v21799_v6  ;;  %v21803_v53 = vpop.eup %21802  ;;  %vm31384_vm11 = vmmov %vm31382_vm1 }
 0xbb5   :  { %v15786_v17 = vmul.f32 1.6732632, %v17617_v45  ;;  %v15816_v49 = vsel %vm15656_vm3, %v29512_v40, %v15784_v21  ;;  %v15847_v7 = vmul.f32 1.050701, %v15815_v30  ;;  %15877 = vst.msk [vmem:[%s30331_s4 + $0x28] sm:$0xff] %vm31380_vm15, %v15845_v54  ;;  %v17620_v8 = vadd.f32 -1.0, %v21801_v34  ;;  %v21805_v40 = vpop.eup %21804  ;;  %vm31389_vm2 = vmmov %vm31382_vm1 }
 0xbb6   :  { %v15787_v50 = vmul.f32 1.6732632, %v17618_v27  ;;  %v15817_v3 = vsel %vm15657_vm8, %v29560_v10, %v15785_v26  ;;  %v15848_v48 = vmul.f32 1.050701, %v15816_v49  ;;  %15878 = vst.msk [vmem:[%s30331_s4 + $0x30] sm:$0xff] %vm31381_vm13, %v15846_v22  ;;  %v17621_v63 = vadd.f32 -1.0, %v21803_v53  ;;  %vm31385_vm8 = vmmov %vm31382_vm1 }
 0xbb7   :  { %v15788_v14 = vmul.f32 1.6732632, %v17619_v24  ;;  %v15818_v59 = vsel %vm15658_vm0, %v29516_v4, %v15786_v17  ;;  %v15849_v9 = vmul.f32 1.050701, %v15817_v3  ;;  %15879 = vst.msk [vmem:[%s30331_s4 + $0x38] sm:$0xff] %vm31382_vm1, %v15847_v7  ;;  %v17622_v10 = vadd.f32 -1.0, %v21805_v40  ;;  %vm31391_vm9 = vmmov %vm31382_vm1 }
 0xbb8   :  { %v15789_v28 = vmul.f32 1.6732632, %v17620_v8  ;;  %v15819_v2 = vsel %vm15659_vm4, %v29519_v56, %v15787_v50  ;;  %v15850_v43 = vmul.f32 1.050701, %v15818_v59  ;;  %15880 = vst.msk [vmem:[%s30331_s4 + $0x40] sm:$0xff] %vm31383_vm5, %v15848_v48  ;;  %v13731_v56 = vadd.f32 %v29583_v36, %v29602_v31  ;;  %vm31386_vm4 = vmmov %vm31382_vm1  ;;  %v31388_v29 = vld [vmem:[#allocation53_spill] sm:$0xff] }
 0xbb9   :  { %v15790_v18 = vmul.f32 1.6732632, %v17621_v63  ;;  %v15820_v4 = vsel %vm15660_vm6, %v29522_v11, %v15788_v14  ;;  %v15851_v19 = vmul.f32 1.050701, %v15819_v2  ;;  %15881 = vst.msk [vmem:[%s30331_s4 + $0x48] sm:$0xff] %vm31384_vm11, %v15849_v9  ;;  %vm15662_vm3 = vcmp.gt.f32.partialorder %v29528_v32, 0.0  ;;  %vm31387_vm6 = vmmov %vm31382_vm1 }
 0xbba   :  { %v15791_v15 = vmul.f32 1.6732632, %v17622_v10  ;;  %v15821_v33 = vsel %vm15661_vm10, %v29525_v60, %v15789_v28  ;;  %v15852_v47 = vmul.f32 1.050701, %v15820_v4  ;;  %15882 = vst.msk [vmem:[%s30331_s4 + $0x50] sm:$0xff] %vm31385_vm8, %v15850_v43  ;;  %vm15663_vm0 = vcmp.gt.f32.partialorder %v29531_v38, 0.0  ;;  %vm31390_vm10 = vmmov %vm31382_vm1 }
 0xbbb   :  { %v15822_v11 = vsel %vm15662_vm3, %v29528_v32, %v15790_v18  ;;  %v15853_v0 = vmul.f32 1.050701, %v15821_v33  ;;  %15883 = vst.msk [vmem:[%s30331_s4 + $0x58] sm:$0xff] %vm31386_vm4, %v15851_v19  ;;  %v13733_v36 = vadd.f32 %v29588_v37, %v13731_v56  ;;  %v13620_v41 = vmul.f32 %v31388_v29, %v31388_v29  ;;  %vm31393_vm7 = vmmov %vm31382_vm1  ;;  %v31395_v21 = vld [vmem:[#allocation55_spill] sm:$0xff]  ;;  %v31397_v27 = vld [vmem:[#allocation56_spill] sm:$0xff] }
 0xbbc   :  { %v15823_v60 = vsel %vm15663_vm0, %v29531_v38, %v15791_v15  ;;  %v15854_v31 = vmul.f32 1.050701, %v15822_v11  ;;  %15884 = vst.msk [vmem:[%s30331_s4 + $0x60] sm:$0xff] %vm31387_vm6, %v15852_v47  ;;  %v13734_v32 = vsel %vm31389_vm2, %v29565_v5, 0.0  ;;  %v31392_v38 = vld [vmem:[#allocation54_spill] sm:$0xff]  ;;  %v13736_v45 = vsel %vm31393_vm7, %v29570_v61, 0.0  ;;  %vm31394_vm14 = vmmov %vm31382_vm1 }
 0xbbd   :  { %v15855_v1 = vmul.f32 1.050701, %v15823_v60  ;;  %15885 = vst.msk [vmem:[%s30331_s4 + $0x68] sm:$0xff] %vm31390_vm10, %v15853_v0  ;;  %v13735_v37 = vadd.f32 %v13734_v32, %v13733_v36  ;;  %v13621_v58 = vmul.f32 %v31392_v38, %v31392_v38  ;;  %v13622_v55 = vmul.f32 %v31395_v21, %v31395_v21  ;;  %vm31396_vm12 = vmmov %vm31382_vm1  ;;  %v31399_v34 = vld [vmem:[#allocation38_spill] sm:$0xff]  ;;  %v31401_v49 = vld [vmem:[#allocation39_spill] sm:$0xff] }
 0xbbe   :  { %15886 = vst.msk [vmem:[%s30331_s4 + $0x70] sm:$0xff] %vm31391_vm9, %v15854_v31  ;;  %v13738_v54 = vsel %vm31396_vm12, %v13620_v41, 0.0  ;;  %v13623_v26 = vmul.f32 %v31397_v27, %v31397_v27  ;;  %vm31398_vm15 = vmmov %vm31382_vm1  ;;  %v13624_v61 = vmul.f32 %v31399_v34, %v31399_v34  ;;  %v13625_v7 = vmul.f32 %v31401_v49, %v31401_v49  ;;  %v31402_v50 = vld [vmem:[#allocation20_spill] sm:$0xff]  ;;  %v31404_v63 = vld [vmem:[#allocation19_spill] sm:$0xff] }
 0xbbf   :  { %15887 = vst.msk [vmem:[%s30331_s4 + $0x78] sm:$0xff] %vm31394_vm14, %v15855_v1  ;;  %v13737_v5 = vadd.f32 %v13736_v45, %v13735_v37  ;;  %v13740_v30 = vsel %vm31398_vm15, %v13621_v58, 0.0  ;;  %vm31400_vm13 = vmmov %vm31382_vm1  ;;  %v13626_v3 = vmul.f32 %v31402_v50, %v31402_v50  ;;  %v13627_v14 = vmul.f32 %v31404_v63, %v31404_v63  ;;  %v31406_v10 = vld [vmem:[#allocation79_spill] sm:$0xff]  ;;  %v31408_v18 = vld [vmem:[#allocation78_spill] sm:$0xff] }
 0xbc0   :  { %v13742_v24 = vsel %vm31400_vm13, %v13622_v55, 0.0  ;;  %v13744_v53 = vsel %vm31382_vm1, %v13623_v26, 0.0  ;;  %vm31403_vm5 = vmmov %vm31382_vm1  ;;  %v13628_v28 = vmul.f32 %v31406_v10, %v31406_v10  ;;  %v13629_v4 = vmul.f32 %v31408_v18, %v31408_v18  ;;  %v31410_v15 = vld [vmem:[#allocation81_spill] sm:$0xff]  ;;  %v31412_v0 = vld [vmem:[#allocation80_spill] sm:$0xff] }
 0xbc1   :  { %v13739_v6 = vadd.f32 %v13738_v54, %v13737_v5  ;;  %v13746_v48 = vsel %vm31403_vm5, %v13624_v61, 0.0  ;;  %vm31405_vm11 = vmmov %vm31382_vm1  ;;  %v13630_v33 = vmul.f32 %v31410_v15, %v31410_v15  ;;  %v13631_v36 = vmul.f32 %v31412_v0, %v31412_v0  ;;  %v31414_v41 = vld [vmem:[#allocation83_spill] sm:$0xff]  ;;  %v31416_v58 = vld [vmem:[#allocation82_spill] sm:$0xff] }
 0xbc2   :  { %v13748_v59 = vsel %vm31405_vm11, %v13625_v7, 0.0  ;;  %vm31407_vm3 = vmmov %vm31382_vm1  ;;  %v13632_v32 = vmul.f32 %v31414_v41, %v31414_v41  ;;  %v13633_v45 = vmul.f32 %v31416_v58, %v31416_v58 }
 0xbc3   :  { %v13741_v22 = vadd.f32 %v13740_v30, %v13739_v6  ;;  %v13750_v2 = vsel %vm31407_vm3, %v13626_v3, 0.0  ;;  %vm31409_vm8 = vmmov %vm31382_vm1 }
 0xbc4   :  { %v13752_v19 = vsel %vm31409_vm8, %v13627_v14, 0.0  ;;  %vm31411_vm0 = vmmov %vm31382_vm1 }
 0xbc5   :  { %v13743_v17 = vadd.f32 %v13742_v24, %v13741_v22  ;;  %v13754_v47 = vsel %vm31411_vm0, %v13628_v28, 0.0  ;;  %vm31413_vm4 = vmmov %vm31411_vm0 }
 0xbc6   :  { %v13756_v60 = vsel %vm31413_vm4, %v13629_v4, 0.0  ;;  %vm31415_vm6 = vmmov %vm31411_vm0 }
 0xbc7   :  { %v13745_v8 = vadd.f32 %v13744_v53, %v13743_v17  ;;  %v13758_v1 = vsel %vm31415_vm6, %v13630_v33, 0.0  ;;  %vm31417_vm2 = vmmov %vm31411_vm0 }
 0xbc8   :  { %v13760_v5 = vsel %vm31417_vm2, %v13631_v36, 0.0  ;;  %vm31418_vm10 = vmmov %vm31411_vm0 }
 0xbc9   :  { %v13747_v40 = vadd.f32 %v13746_v48, %v13745_v8  ;;  %v13762_v54 = vsel %vm31418_vm10, %v13632_v32, 0.0  ;;  %vm31419_vm9 = vmmov %vm31411_vm0 }
 0xbca   :  { %v13764_v26 = vsel %vm31419_vm9, %v13633_v45, 0.0 }
 0xbcb   :  { %v13749_v9 = vadd.f32 %v13748_v59, %v13747_v40 }
 0xbcd   :  { %v13751_v43 = vadd.f32 %v13750_v2, %v13749_v9 }
 0xbcf   :  { %v13753_v56 = vadd.f32 %v13752_v19, %v13751_v43  ;;  %v31421_v19 = vld [vmem:[#allocation24_spill] sm:$0xff] }
 0xbd1   :  { %v13755_v11 = vadd.f32 %v13754_v47, %v13753_v56  ;;  %v31422_v56 = vld [vmem:[#allocation23_spill] sm:$0xff] }
 0xbd3   :  { %v13757_v31 = vadd.f32 %v13756_v60, %v13755_v11 }
 0xbd5   :  { %v13759_v37 = vadd.f32 %v13758_v1, %v13757_v31 }
 0xbd7   :  { %v13761_v55 = vadd.f32 %v13760_v5, %v13759_v37 }
 0xbd9   :  { %v13763_v6 = vadd.f32 %v13762_v54, %v13761_v55 }
 0xbdb   :  { %v13765_v30 = vadd.f32 %v13764_v26, %v13763_v6 }
 0xbdd   :  { %v13766_v22 = vrot.slane %v13765_v30, 4 }
 0xbdf   :  { %v13767_v61 = vadd.f32 %v13766_v22, %v13765_v30 }
 0xbe1   :  { %v13768_v24 = vrot.slane %v13767_v61, 2 }
 0xbe3   :  { %v13769_v17 = vadd.f32 %v13768_v24, %v13767_v61 }
 0xbe5   :  { %v13770_v7 = vrot.slane %v13769_v17, 1 }
 0xbe7   :  { %v13771_v53 = vadd.f32 %v13770_v7, %v13769_v17 }
 0xbe9   :  { %v13773_v8 = vmul.f32 0.00390625, %v13771_v53 }
 0xbeb   :  { %v13775_v3 = vadd.f32 1e-05, %v13773_v8 }
 0xbed   :  { %21806 = vrsqrt.f32 %v13775_v3 }
 0xbf7   :  { %v21807_v48 = vpop.eup %21806 }
 0xbf8   :  { %v29769_v40 = vmul.f32 %v21807_v48, %v31367_v12  ;;  %v29772_v14 = vmul.f32 %v21807_v48, %v31368_v42  ;;  %v29775_v59 = vmul.f32 %v21807_v48, %v31388_v29  ;;  %v29778_v9 = vmul.f32 %v21807_v48, %v31392_v38 }
 0xbf9   :  { %v29781_v28 = vmul.f32 %v21807_v48, %v31395_v21  ;;  %v29784_v2 = vmul.f32 %v21807_v48, %v31397_v27  ;;  %v29787_v43 = vmul.f32 %v21807_v48, %v31399_v34  ;;  %v29790_v12 = vmul.f32 %v21807_v48, %v31401_v49 }
 0xbfa   :  { %v29793_v42 = vmul.f32 %v21807_v48, %v31402_v50  ;;  %v29796_v29 = vmul.f32 %v21807_v48, %v31404_v63  ;;  %v29799_v38 = vmul.f32 %v21807_v48, %v31406_v10  ;;  %v29802_v21 = vmul.f32 %v21807_v48, %v31408_v18  ;;  %v31420_v63 = vld [vmem:[#allocation37_spill] sm:$0xff] }
 0xbfb   :  { %v29805_v27 = vmul.f32 %v21807_v48, %v31410_v15  ;;  %v29808_v34 = vmul.f32 %v21807_v48, %v31412_v0  ;;  %v29811_v49 = vmul.f32 %v21807_v48, %v31414_v41  ;;  %v29814_v50 = vmul.f32 %v21807_v48, %v31416_v58 }
 0xbfc   :  { %v13810_v4 = vmul.f32 %v21807_v48, %v31420_v63  ;;  %v13811_v10 = vmul.f32 %v21807_v48, %v31421_v19  ;;  %v29819_v33 = vmul.f32 %v21807_v48, %v31422_v56  ;;  %v29822_v18 = vmul.f32 %v21807_v48, %v28980_v13 }
 0xbfd   :  { %v29825_v15 = vmul.f32 %v21807_v48, %v31343_v39  ;;  %v29828_v47 = vmul.f32 %v21807_v48, %v31345_v16  ;;  %v29831_v11 = vmul.f32 %v21807_v48, %v31348_v35  ;;  %v29834_v0 = vmul.f32 %v21807_v48, %v31356_v25  ;;  %v15547_v25 = vld [vmem:[#allocation4 + $0x141] sm:$0xff] }
 0xbfe   :  { %v29837_v36 = vmul.f32 %v21807_v48, %v31358_v57  ;;  %v29840_v60 = vmul.f32 %v21807_v48, %v31359_v52  ;;  %v29843_v13 = vmul.f32 %v21807_v48, %v31360_v46  ;;  %v29846_v39 = vmul.f32 %v21807_v48, %v31361_v23  ;;  %v15549_v52 = vld [vmem:[#allocation4 + $0x159] sm:$0xff]  ;;  %v31423_v46 = vld [vmem:[#allocation74_spill] sm:$0xff] }
 0xbff   :  { %v29849_v16 = vmul.f32 %v21807_v48, %v31362_v51  ;;  %v29852_v35 = vmul.f32 %v21807_v48, %v31363_v44  ;;  %v29855_v31 = vmul.f32 %v21807_v48, %v31365_v62  ;;  %v29858_v57 = vmul.f32 %v21807_v48, %v31366_v20  ;;  %v31424_v20 = vld [vmem:[#allocation75_spill] sm:$0xff] }
 0xc00   :  { %vm13874_vm7 = vcmp.gt.f32.partialorder %v13810_v4, 0.0  ;;  %vm13875_vm14 = vcmp.gt.f32.partialorder %v13811_v10, 0.0  ;;  %vm13876_vm12 = vcmp.gt.f32.partialorder %v29819_v33, 0.0  ;;  %vm13877_vm15 = vcmp.gt.f32.partialorder %v29822_v18, 0.0 }
 0xc01   :  { %vm13878_vm13 = vcmp.gt.f32.partialorder %v29825_v15, 0.0  ;;  %vm13879_vm1 = vcmp.gt.f32.partialorder %v29828_v47, 0.0  ;;  %vm13880_vm5 = vcmp.gt.f32.partialorder %v29831_v11, 0.0  ;;  %vm13881_vm11 = vcmp.gt.f32.partialorder %v29834_v0, 0.0 }
 0xc02   :  { %vm13882_vm3 = vcmp.gt.f32.partialorder %v29837_v36, 0.0  ;;  %v29869_v23 = vadd.f32 %v15547_v25, %v31423_v46  ;;  %v13938_v51 = vmul.f32 0.01, %v13810_v4  ;;  %v13939_v44 = vmul.f32 0.01, %v13811_v10 }
 0xc03   :  { %v13940_v62 = vmul.f32 0.01, %v29819_v33  ;;  %v29877_v41 = vadd.f32 %v15549_v52, %v31424_v20  ;;  %vm13889_vm9 = vcmp.gt.f32.partialorder %v29858_v57, 0.0  ;;  %v13941_v32 = vmul.f32 0.01, %v29822_v18 }
 0xc04   :  { %v13942_v1 = vmul.f32 0.01, %v29825_v15  ;;  %v13943_v37 = vmul.f32 0.01, %v29828_v47  ;;  %vm13894_vm4 = vcmp.gt.f32.partialorder %v29781_v28, 0.0  ;;  %v29894_v55 = vsel %vm13874_vm7, %v13810_v4, %v13938_v51 }
 0xc05   :  { %v13944_v58 = vmul.f32 0.01, %v29831_v11  ;;  %v13945_v45 = vmul.f32 0.01, %v29834_v0  ;;  %v13946_v5 = vmul.f32 0.01, %v29837_v36  ;;  %v29904_v30 = vsel %vm13875_vm14, %v13811_v10, %v13939_v44 }
 0xc06   :  { %vm13898_vm2 = vcmp.gt.f32.partialorder %v29793_v42, 0.0  ;;  %vm13899_vm6 = vcmp.gt.f32.partialorder %v29796_v29, 0.0  ;;  %v13947_v54 = vmul.f32 0.01, %v29840_v60  ;;  %v13948_v6 = vmul.f32 0.01, %v29843_v13 }
 0xc07   :  { %v13949_v26 = vmul.f32 0.01, %v29846_v39  ;;  %vm13901_vm10 = vcmp.gt.f32.partialorder %v29802_v21, 0.0  ;;  %vm13902_vm0 = vcmp.gt.f32.partialorder %v29805_v27, 0.0  ;;  %vm13903_vm8 = vcmp.gt.f32.partialorder %v29808_v34, 0.0 }
 0xc08   :  { %v13950_v22 = vmul.f32 0.01, %v29849_v16  ;;  %v13951_v61 = vmul.f32 0.01, %v29852_v35  ;;  %v13952_v24 = vmul.f32 0.01, %v29855_v31  ;;  %v29916_v17 = vsel %vm13876_vm12, %v29819_v33, %v13940_v62 }
 0xc09   :  { %vm13904_vm14 = vcmp.gt.f32.partialorder %v29811_v49, 0.0  ;;  %vm13905_vm7 = vcmp.gt.f32.partialorder %v29814_v50, 0.0  ;;  %v13953_v7 = vmul.f32 0.01, %v29858_v57  ;;  %v13954_v53 = vmul.f32 0.01, %v29769_v40 }
 0xc0a   :  { %v13955_v8 = vmul.f32 0.01, %v29772_v14  ;;  %v14005_v3 = vsel %vm13877_vm15, %v29822_v18, %v13941_v32  ;;  %v13956_v48 = vmul.f32 0.01, %v29775_v59  ;;  %v13957_v63 = vmul.f32 0.01, %v29778_v9 }
 0xc0b   :  { %v13958_v4 = vmul.f32 0.01, %v29781_v28  ;;  %v14006_v19 = vsel %vm13878_vm13, %v29825_v15, %v13942_v1  ;;  %v13959_v10 = vmul.f32 0.01, %v29784_v2  ;;  %v13960_v56 = vmul.f32 0.01, %v29787_v43 }
 0xc0c   :  { %v13961_v33 = vmul.f32 0.01, %v29790_v12  ;;  %v14007_v18 = vsel %vm13879_vm1, %v29828_v47, %v13943_v37  ;;  %v13962_v25 = vmul.f32 0.01, %v29793_v42  ;;  %v13963_v52 = vmul.f32 0.01, %v29796_v29 }
 0xc0d   :  { %v13964_v46 = vmul.f32 0.01, %v29799_v38  ;;  %v14008_v15 = vsel %vm13880_vm5, %v29831_v11, %v13944_v58  ;;  %v13965_v51 = vmul.f32 0.01, %v29802_v21  ;;  %v13966_v44 = vmul.f32 0.01, %v29805_v27 }
 0xc0e   :  { %v13967_v62 = vmul.f32 0.01, %v29808_v34  ;;  %v14009_v47 = vsel %vm13881_vm11, %v29834_v0, %v13945_v45  ;;  %v13968_v20 = vmul.f32 0.01, %v29811_v49  ;;  %v13969_v32 = vmul.f32 0.01, %v29814_v50 }
 0xc0f   :  { %v14010_v1 = vsel %vm13882_vm3, %v29837_v36, %v13946_v5  ;;  %vm31425_vm12 = vcmp.gt.f32.partialorder %v29840_v60, 0.0  ;;  %vm31426_vm15 = vcmp.gt.f32.partialorder %v29843_v13, 0.0  ;;  %vm31427_vm13 = vcmp.gt.f32.partialorder %v29846_v39, 0.0 }
 0xc10   :  { %v14011_v11 = vsel %vm31425_vm12, %v29840_v60, %v13947_v54  ;;  %v14012_v37 = vsel %vm31426_vm15, %v29843_v13, %v13948_v6  ;;  %v14013_v0 = vsel %vm31427_vm13, %v29846_v39, %v13949_v26  ;;  %vm31428_vm1 = vcmp.gt.f32.partialorder %v29849_v16, 0.0 }
 0xc11   :  { %v14014_v58 = vsel %vm31428_vm1, %v29849_v16, %v13950_v22  ;;  %vm31429_vm5 = vcmp.gt.f32.partialorder %v29852_v35, 0.0  ;;  %vm31430_vm11 = vcmp.gt.f32.partialorder %v29855_v31, 0.0  ;;  %v14017_v13 = vsel %vm13889_vm9, %v29858_v57, %v13953_v7 }
 0xc12   :  { %v14015_v36 = vsel %vm31429_vm5, %v29852_v35, %v13951_v61  ;;  %v14016_v60 = vsel %vm31430_vm11, %v29855_v31, %v13952_v24  ;;  %vm31431_vm3 = vcmp.gt.f32.partialorder %v29769_v40, 0.0  ;;  %vm31432_vm12 = vcmp.gt.f32.partialorder %v29772_v14, 0.0 }
 0xc13   :  { %v14018_v39 = vsel %vm31431_vm3, %v29769_v40, %v13954_v53  ;;  %v14019_v16 = vsel %vm31432_vm12, %v29772_v14, %v13955_v8  ;;  %vm31433_vm15 = vcmp.gt.f32.partialorder %v29775_v59, 0.0  ;;  %vm31434_vm13 = vcmp.gt.f32.partialorder %v29778_v9, 0.0 }
 0xc14   :  { %v14020_v35 = vsel %vm31433_vm15, %v29775_v59, %v13956_v48  ;;  %v14021_v31 = vsel %vm31434_vm13, %v29778_v9, %v13957_v63  ;;  %v14022_v57 = vsel %vm13894_vm4, %v29781_v28, %v13958_v4  ;;  %vm31435_vm9 = vcmp.gt.f32.partialorder %v29784_v2, 0.0  ;;  %v15550_v4 = vld [vmem:[#allocation4 + $0x169] sm:$0xff] }
 0xc15   :  { %v14023_v40 = vsel %vm31435_vm9, %v29784_v2, %v13959_v10  ;;  %vm31436_vm1 = vcmp.gt.f32.partialorder %v29787_v43, 0.0  ;;  %vm31437_vm5 = vcmp.gt.f32.partialorder %v29790_v12, 0.0  ;;  %v14026_v9 = vsel %vm13898_vm2, %v29793_v42, %v13962_v25  ;;  %v15536_v25 = vld [vmem:[#allocation4 + $0xc1] sm:$0xff] }
 0xc16   :  { %v14024_v14 = vsel %vm31436_vm1, %v29787_v43, %v13960_v56  ;;  %v14025_v59 = vsel %vm31437_vm5, %v29790_v12, %v13961_v33  ;;  %v14027_v28 = vsel %vm13899_vm6, %v29796_v29, %v13963_v52  ;;  %vm31438_vm4 = vcmp.gt.f32.partialorder %v29799_v38, 0.0  ;;  %v15537_v52 = vld [vmem:[#allocation4 + $0xc9] sm:$0xff] }
 0xc17   :  { %v14028_v2 = vsel %vm31438_vm4, %v29799_v38, %v13964_v46  ;;  %v14029_v43 = vsel %vm13901_vm10, %v29802_v21, %v13965_v51  ;;  %v14030_v12 = vsel %vm13902_vm0, %v29805_v27, %v13966_v44  ;;  %v14031_v42 = vsel %vm13903_vm8, %v29808_v34, %v13967_v62  ;;  %v15538_v46 = vld [vmem:[#allocation4 + $0xd9] sm:$0xff] }
 0xc18   :  { %v14032_v29 = vsel %vm13904_vm14, %v29811_v49, %v13968_v20  ;;  %v14033_v38 = vsel %vm13905_vm7, %v29814_v50, %v13969_v32  ;;  %v14048_v45 = vmax.f32 %v29916_v17, %v14006_v19  ;;  %v14049_v5 = vmax.f32 %v14005_v3, %v14007_v18  ;;  %v15551_v19 = vld [vmem:[#allocation4 + $0x171] sm:$0xff]  ;;  %v15541_v32 = vld [vmem:[#allocation4 + $0xf9] sm:$0xff] }
 0xc19   :  { %v14050_v21 = vmax.f32 %v14008_v15, %v14010_v1  ;;  %v14051_v54 = vmax.f32 %v14009_v47, %v14011_v11  ;;  %v14052_v6 = vmax.f32 %v14012_v37, %v14014_v58  ;;  %v14053_v26 = vmax.f32 %v14013_v0, %v14015_v36  ;;  %v15540_v20 = vld [vmem:[#allocation4 + $0xf1] sm:$0xff]  ;;  %v15542_v1 = vld [vmem:[#allocation4 + $0x109] sm:$0xff] }
 0xc1a   :  { %v14054_v27 = vmax.f32 %v14016_v60, %v14018_v39  ;;  %v14055_v22 = vmax.f32 %v14017_v13, %v14019_v16  ;;  %v14056_v61 = vmax.f32 %v14020_v35, %v14022_v57  ;;  %v14057_v24 = vmax.f32 %v14021_v31, %v14023_v40  ;;  %v31447_v11 = vld [vmem:[#allocation76_spill] sm:$0xff] }
 0xc1b   :  { %v14058_v34 = vmax.f32 %v14024_v14, %v14026_v9  ;;  %v14059_v7 = vmax.f32 %v14025_v59, %v14027_v28  ;;  %v14060_v53 = vmax.f32 %v14028_v2, %v14030_v12  ;;  %v14061_v8 = vmax.f32 %v14029_v43, %v14031_v42  ;;  %v15543_v36 = vld [vmem:[#allocation4 + $0x111] sm:$0xff]  ;;  %v15546_v16 = vld [vmem:[#allocation4 + $0x139] sm:$0xff]  ;;  %v31461_v9 = vld [vmem:[#allocation30_spill] sm:$0xff] }
 0xc1c   :  { %v30027_v49 = vmax.f32 %v29894_v55, %v29916_v17  ;;  %v30030_v50 = vmax.f32 %v29904_v30, %v14005_v3  ;;  %v30032_v48 = vmax.f32 %v14048_v45, %v14008_v15  ;;  %v30034_v63 = vmax.f32 %v14049_v5, %v14009_v47  ;;  %v15539_v15 = vld [vmem:[#allocation4 + $0xe1] sm:$0xff]  ;;  %v31459_v57 = vld [vmem:[#allocation28_spill] sm:$0xff]  ;;  %v31463_v12 = vld [vmem:[#allocation31_spill] sm:$0xff] }
 0xc1d   :  { %v30036_v10 = vmax.f32 %v14050_v21, %v14012_v37  ;;  %v30038_v56 = vmax.f32 %v14051_v54, %v14013_v0  ;;  %v30040_v33 = vmax.f32 %v14052_v6, %v14016_v60  ;;  %v30042_v18 = vmax.f32 %v14053_v26, %v14017_v13  ;;  %v31448_v0 = vld [vmem:[#allocation77_spill] sm:$0xff]  ;;  %v31453_v13 = vld [vmem:[#allocation87_spill] sm:$0xff]  ;;  %v31464_v45 = vld [vmem:[#allocation32_spill] sm:$0xff] }
 0xc1e   :  { %v30044_v55 = vmax.f32 %v14054_v27, %v14020_v35  ;;  %v30046_v17 = vmax.f32 %v14055_v22, %v14021_v31  ;;  %v30048_v30 = vmax.f32 %v14056_v61, %v14024_v14  ;;  %v30050_v3 = vmax.f32 %v14057_v24, %v14025_v59  ;;  %v15544_v60 = vld [vmem:[#allocation4 + $0x121] sm:$0xff]  ;;  %v31458_v35 = vld [vmem:[#allocation88_spill] sm:$0xff] }
 0xc1f   :  { %vm31439_vm8 = vcmask 64512   ;;  %v30060_v51 = vmax.f32 %v14058_v34, %v14028_v2  ;;  %v30062_v44 = vmax.f32 %v14059_v7, %v14029_v43  ;;  %v30064_v62 = vmax.f32 %v14060_v53, %v14032_v29  ;;  %v31460_v14 = vld [vmem:[#allocation29_spill] sm:$0xff]  ;;  %v31462_v2 = vld [vmem:[#allocation48_spill] sm:$0xff]  ;;  %v31466_v22 = vld [vmem:[#allocation34_spill] sm:$0xff] }
 0xc20   :  { %14143 = vst.msk [vmem:[#allocation3 + $0xc1] sm:$0xff] %vm31439_vm8, %v30027_v49  ;;  %vm31440_vm0 = vmmov %vm31439_vm8  ;;  %v30066_v47 = vmax.f32 %v14061_v8, %v14033_v38  ;;  %v15582_v37 = vadd.f32 %v15550_v4, %v31447_v11  ;;  %v15583_v58 = vadd.f32 %v15551_v19, %v31448_v0  ;;  %v15568_v39 = vadd.f32 %v15536_v25, %v31453_v13  ;;  %v31465_v21 = vld [vmem:[#allocation33_spill] sm:$0xff]  ;;  %v15548_v27 = vld [vmem:[#allocation4 + $0x151] sm:$0xff] }
 0xc21   :  { %14144 = vst.msk [vmem:[#allocation3 + $0xc9] sm:$0xff] %vm31440_vm0, %v30030_v50  ;;  %vm31441_vm6 = vmmov %vm31440_vm0  ;;  %v15569_v31 = vadd.f32 %v15537_v52, %v31458_v35  ;;  %v15570_v40 = vadd.f32 %v15538_v46, %v31459_v57  ;;  %v15571_v59 = vadd.f32 %v15539_v15, %v31460_v14  ;;  %v15572_v28 = vadd.f32 %v15540_v20, %v31461_v9 }
 0xc22   :  { %14145 = vst.msk [vmem:[#allocation3 + $0xd9] sm:$0xff] %vm31441_vm6, %v30032_v48  ;;  %vm31442_vm2 = vmmov %vm31440_vm0  ;;  %v15573_v43 = vadd.f32 %v15541_v32, %v31462_v2  ;;  %v15574_v42 = vadd.f32 %v15542_v1, %v31463_v12  ;;  %v30102_v29 = vmul.f32 0.5, %v29869_v23  ;;  %v30105_v38 = vmul.f32 0.5, %v29877_v41 }
 0xc23   :  { %14146 = vst.msk [vmem:[#allocation3 + $0xe1] sm:$0xff] %vm31442_vm2, %v30034_v63  ;;  %vm31443_vm10 = vmmov %vm31440_vm0  ;;  %v15575_v5 = vadd.f32 %v15543_v36, %v31464_v45  ;;  %v15576_v54 = vadd.f32 %v15544_v60, %v31465_v21  ;;  %v30109_v6 = vmul.f32 0.5, %v15582_v37  ;;  %v30111_v26 = vmul.f32 0.5, %v15583_v58 }
 0xc24   :  { %14147 = vst.msk [vmem:[#allocation3 + $0xf1] sm:$0xff] %vm31443_vm10, %v30036_v10  ;;  %vm31444_vm7 = vmmov %vm31440_vm0  ;;  %v15578_v61 = vadd.f32 %v15546_v16, %v31466_v22  ;;  %v15600_v24 = vmul.f32 0.5, %v15568_v39  ;;  %v15601_v23 = vmul.f32 0.5, %v15569_v31  ;;  %v30114_v8 = vmul.f32 0.5, %v15570_v40 }
 0xc25   :  { %14148 = vst.msk [vmem:[#allocation3 + $0xf9] sm:$0xff] %vm31444_vm7, %v30038_v56  ;;  %vm31445_vm14 = vmmov %vm31440_vm0  ;;  %v30116_v41 = vmul.f32 0.5, %v15571_v59  ;;  %v30118_v52 = vmul.f32 0.5, %v15572_v28  ;;  %v30120_v46 = vmul.f32 0.5, %v15573_v43  ;;  %v30122_v15 = vmul.f32 0.5, %v15574_v42  ;;  %v31467_v59 = vld [vmem:[#allocation36_spill] sm:$0xff] }
 0xc26   :  { %14149 = vst.msk [vmem:[#allocation3 + $0x109] sm:$0xff] %vm31445_vm14, %v30040_v33  ;;  %vm31446_vm11 = vmmov %vm31440_vm0  ;;  %v30126_v0 = vmul.f32 0.5, %v15575_v5  ;;  %v30128_v58 = vmul.f32 0.5, %v15576_v54  ;;  %v15610_v35 = vmul.f32 0.5, %v15578_v61  ;;  %v15580_v9 = vadd.f32 %v15548_v27, %v31467_v59 }
 0xc27   :  { %14150 = vst.msk [vmem:[#allocation3 + $0x111] sm:$0xff] %vm31446_vm11, %v30042_v18  ;;  %vm31449_vm3 = vmmov %vm31440_vm0  ;;  %v14175_v34 = vld [vmem:[#allocation3 + $0xc0] sm:$0xff] }
 0xc28   :  { %14151 = vst.msk [vmem:[#allocation3 + $0x121] sm:$0xff] %vm31449_vm3, %v30044_v55  ;;  %vm31450_vm12 = vmmov %vm31440_vm0  ;;  %v14176_v7 = vld [vmem:[#allocation3 + $0xc8] sm:$0xff]  ;;  %v14207_v11 = vmax.f32 %v14175_v34, %v30027_v49 }
 0xc29   :  { %14152 = vst.msk [vmem:[#allocation3 + $0x129] sm:$0xff] %vm31450_vm12, %v30046_v17  ;;  %vm31451_vm15 = vmmov %vm31440_vm0  ;;  %v14177_v53 = vld [vmem:[#allocation3 + $0xd8] sm:$0xff]  ;;  %v14208_v37 = vmax.f32 %v14176_v7, %v30030_v50  ;;  %v14239_v43 = vld [vmem:[#allocation3 + $0xc2] sm:$0xff] }
 0xc2a   :  { %14153 = vst.msk [vmem:[#allocation3 + $0x139] sm:$0xff] %vm31451_vm15, %v30048_v30  ;;  %vm31452_vm13 = vmmov %vm31440_vm0  ;;  %v14178_v4 = vld [vmem:[#allocation3 + $0xe0] sm:$0xff]  ;;  %v14209_v13 = vmax.f32 %v14177_v53, %v30032_v48  ;;  %v14240_v12 = vld [vmem:[#allocation3 + $0xca] sm:$0xff]  ;;  %v14271_v5 = vmax.f32 %v14207_v11, %v14239_v43 }
 0xc2b   :  { %14154 = vst.msk [vmem:[#allocation3 + $0x141] sm:$0xff] %vm31452_vm13, %v30050_v3  ;;  %vm31454_vm9 = vmmov %vm31440_vm0  ;;  %v14179_v19 = vld [vmem:[#allocation3 + $0xf0] sm:$0xff]  ;;  %v14210_v39 = vmax.f32 %v14178_v4, %v30034_v63  ;;  %v14242_v45 = vld [vmem:[#allocation3 + $0xe2] sm:$0xff]  ;;  %v14272_v21 = vmax.f32 %v14208_v37, %v14240_v12 }
 0xc2c   :  { %14155 = vst.msk [vmem:[#allocation3 + $0x151] sm:$0xff] %vm31454_vm9, %v30060_v51  ;;  %vm31455_vm1 = vmmov %vm31440_vm0  ;;  %v14180_v25 = vld [vmem:[#allocation3 + $0xf8] sm:$0xff]  ;;  %v14211_v16 = vmax.f32 %v14179_v19, %v30036_v10  ;;  %v30144_v4 = vadd.f32 %v15600_v24, %v14271_v5 }
 0xc2d   :  { %14156 = vst.msk [vmem:[#allocation3 + $0x159] sm:$0xff] %vm31455_vm1, %v30062_v44  ;;  %vm31456_vm5 = vmmov %vm31440_vm0  ;;  %v14181_v20 = vld [vmem:[#allocation3 + $0x108] sm:$0xff]  ;;  %v14212_v49 = vmax.f32 %v14180_v25, %v30038_v56 }
 0xc2e   :  { %14157 = vst.msk [vmem:[#allocation3 + $0x169] sm:$0xff] %vm31456_vm5, %v30064_v62  ;;  %vm31457_vm4 = vmmov %vm31440_vm0  ;;  %v14182_v32 = vld [vmem:[#allocation3 + $0x110] sm:$0xff]  ;;  %v14213_v50 = vmax.f32 %v14181_v20, %v30040_v33  ;;  %v14241_v33 = vld [vmem:[#allocation3 + $0xda] sm:$0xff]  ;;  %vm15664_vm8 = vcmp.gt.f32.partialorder %v30144_v4, 0.0 }
 0xc2f   :  { %14158 = vst.msk [vmem:[#allocation3 + $0x171] sm:$0xff] %vm31457_vm4, %v30066_v47  ;;  %v14183_v1 = vld [vmem:[#allocation3 + $0x120] sm:$0xff]  ;;  %v14214_v14 = vmax.f32 %v14182_v32, %v30042_v18  ;;  %v14243_v18 = vld [vmem:[#allocation3 + $0xf2] sm:$0xff]  ;;  %v14245_v27 = vld [vmem:[#allocation3 + $0x10a] sm:$0xff]  ;;  %v14273_v22 = vmax.f32 %v14209_v13, %v14241_v33 }
 0xc30   :  { %v14215_v2 = vmax.f32 %v14183_v1, %v30044_v55  ;;  %v14244_v55 = vld [vmem:[#allocation3 + $0xfa] sm:$0xff]  ;;  %v14275_v61 = vmax.f32 %v14211_v16, %v14243_v18  ;;  %v14277_v53 = vmax.f32 %v14213_v50, %v14245_v27  ;;  %v15612_v1 = vmul.f32 0.5, %v15580_v9  ;;  %v14184_v11 = vld [vmem:[#allocation3 + $0x128] sm:$0xff]  ;;  %vm31469_vm5 = vmmov %vm31455_vm1 }
 0xc31   :  { %v14185_v36 = vld [vmem:[#allocation3 + $0x138] sm:$0xff]  ;;  %v14276_v7 = vmax.f32 %v14212_v49, %v14244_v55  ;;  %v30149_v16 = vadd.f32 %v30114_v8, %v14273_v22  ;;  %v14216_v59 = vmax.f32 %v14184_v11, %v30046_v17  ;;  %vm31470_vm4 = vmmov %vm31455_vm1 }
 0xc32   :  { %v14186_v60 = vld [vmem:[#allocation3 + $0x140] sm:$0xff]  ;;  %v14217_v48 = vmax.f32 %v14185_v36, %v30048_v30  ;;  %v14246_v30 = vld [vmem:[#allocation3 + $0x112] sm:$0xff]  ;;  %v30155_v49 = vadd.f32 %v30118_v52, %v14275_v61  ;;  %v30161_v50 = vadd.f32 %v30122_v15, %v14277_v53 }
 0xc33   :  { %v14187_v31 = vld [vmem:[#allocation3 + $0x150] sm:$0xff]  ;;  %v14218_v63 = vmax.f32 %v14186_v60, %v30050_v3  ;;  %v14274_v3 = vmax.f32 %v14210_v39, %v14242_v45  ;;  %v14249_v34 = vld [vmem:[#allocation3 + $0x13a] sm:$0xff]  ;;  %vm15666_vm6 = vcmp.gt.f32.partialorder %v30149_v16, 0.0 }
 0xc34   :  { %v14188_v57 = vld [vmem:[#allocation3 + $0x158] sm:$0xff]  ;;  %v14219_v10 = vmax.f32 %v14187_v31, %v30060_v51  ;;  %v14247_v51 = vld [vmem:[#allocation3 + $0x122] sm:$0xff]  ;;  %v14281_v32 = vmax.f32 %v14217_v48, %v14249_v34  ;;  %v15712_v48 = vmul.f32 1.442695, %v30144_v4  ;;  %vm15668_vm10 = vcmp.gt.f32.partialorder %v30155_v49, 0.0 }
 0xc35   :  { %v14189_v40 = vld [vmem:[#allocation3 + $0x168] sm:$0xff]  ;;  %v14220_v42 = vmax.f32 %v14188_v57, %v30062_v44  ;;  %v14278_v44 = vmax.f32 %v14214_v14, %v14246_v30  ;;  %v14251_v19 = vld [vmem:[#allocation3 + $0x152] sm:$0xff]  ;;  %v14252_v25 = vld [vmem:[#allocation3 + $0x15a] sm:$0xff]  ;;  %v14279_v20 = vmax.f32 %v14215_v2, %v14247_v51  ;;  %vm15670_vm14 = vcmp.gt.f32.partialorder %v30161_v50, 0.0 }
 0xc36   :  { %v14190_v28 = vld [vmem:[#allocation3 + $0x170] sm:$0xff]  ;;  %v14221_v56 = vmax.f32 %v14189_v40, %v30064_v62  ;;  %v14250_v62 = vld [vmem:[#allocation3 + $0x142] sm:$0xff]  ;;  %v14283_v13 = vmax.f32 %v14219_v10, %v14251_v19  ;;  %v30152_v40 = vadd.f32 %v30116_v41, %v14274_v3  ;;  %v30170_v9 = vadd.f32 %v15610_v35, %v14281_v32 }
 0xc37   :  { %v14222_v54 = vmax.f32 %v14190_v28, %v30066_v47  ;;  %v30146_v47 = vadd.f32 %v15601_v23, %v14272_v21  ;;  %v14253_v37 = vld [vmem:[#allocation3 + $0x16a] sm:$0xff]  ;;  %v14254_v36 = vld [vmem:[#allocation3 + $0x172] sm:$0xff]  ;;  %v14282_v60 = vmax.f32 %v14218_v63, %v14250_v62  ;;  %v14284_v39 = vmax.f32 %v14220_v42, %v14252_v25 }
 0xc38   :  { %v14285_v31 = vmax.f32 %v14221_v56, %v14253_v37  ;;  %v15545_v57 = vld [vmem:[#allocation4 + $0x129] sm:$0xff]  ;;  %v30158_v23 = vadd.f32 %v30120_v46, %v14276_v7  ;;  %v30164_v14 = vadd.f32 %v30126_v0, %v14278_v44  ;;  %v30167_v8 = vadd.f32 %v30128_v58, %v14279_v20  ;;  %v31468_v46 = vld [vmem:[#allocation73_spill] sm:$0xff] }
 0xc39   :  { %v14286_v24 = vmax.f32 %v14222_v54, %v14254_v36  ;;  %v30173_v41 = vadd.f32 %v30102_v29, %v14282_v60  ;;  %v30175_v52 = vadd.f32 %v15612_v1, %v14283_v13  ;;  %v15577_v28 = vadd.f32 %v15545_v57, %v31468_v46  ;;  %v14248_v2 = vld [vmem:[#allocation3 + $0x12a] sm:$0xff] }
 0xc3a   :  { %v30179_v15 = vadd.f32 %v30105_v38, %v14284_v39  ;;  %v30182_v0 = vadd.f32 %v30109_v6, %v14285_v31  ;;  %v14280_v17 = vmax.f32 %v14216_v59, %v14248_v2  ;;  %v15714_v29 = vmul.f32 1.442695, %v30146_v47 }
 0xc3b   :  { %v30185_v58 = vadd.f32 %v30111_v26, %v14286_v24  ;;  %v15609_v35 = vmul.f32 0.5, %v15577_v28  ;;  %v15716_v63 = vmul.f32 1.442695, %v30149_v16  ;;  %v15718_v10 = vmul.f32 1.442695, %v30152_v40 }
 0xc3c   :  { %21808 = vpow2.f32 %v15712_v48  ;;  %v15720_v38 = vmul.f32 1.442695, %v30155_v49  ;;  %v15722_v6 = vmul.f32 1.442695, %v30158_v23  ;;  %v15724_v26 = vmul.f32 1.442695, %v30161_v50 }
 0xc3d   :  { %v30192_v43 = vadd.f32 %v15609_v35, %v14280_v17  ;;  %21810 = vpow2.f32 %v15714_v29  ;;  %v15726_v12 = vmul.f32 1.442695, %v30164_v14  ;;  %v15728_v42 = vmul.f32 1.442695, %v30167_v8 }
 0xc3e   :  { %21812 = vpow2.f32 %v15716_v63  ;;  %v15732_v33 = vmul.f32 1.442695, %v30170_v9  ;;  %v15734_v45 = vmul.f32 1.442695, %v30173_v41  ;;  %v15736_v18 = vmul.f32 1.442695, %v30175_v52 }
 0xc3f   :  { %21814 = vpow2.f32 %v15718_v10  ;;  %v15730_v56 = vmul.f32 1.442695, %v30192_v43  ;;  %vm15665_vm0 = vcmp.gt.f32.partialorder %v30146_v47, 0.0  ;;  %v15738_v5 = vmul.f32 1.442695, %v30179_v15 }
 0xc40   :  { %21816 = vpow2.f32 %v15720_v38  ;;  %vm15667_vm2 = vcmp.gt.f32.partialorder %v30152_v40, 0.0  ;;  %v15740_v54 = vmul.f32 1.442695, %v30182_v0  ;;  %v15742_v27 = vmul.f32 1.442695, %v30185_v58 }
 0xc41   :  { %21818 = vpow2.f32 %v15722_v6  ;;  %vm15669_vm7 = vcmp.gt.f32.partialorder %v30158_v23, 0.0  ;;  %vm15671_vm11 = vcmp.gt.f32.partialorder %v30164_v14, 0.0  ;;  %vm15672_vm3 = vcmp.gt.f32.partialorder %v30167_v8, 0.0 }
 0xc42   :  { %21820 = vpow2.f32 %v15724_v26  ;;  %vm15673_vm12 = vcmp.gt.f32.partialorder %v30192_v43, 0.0  ;;  %vm15674_vm15 = vcmp.gt.f32.partialorder %v30170_v9, 0.0  ;;  %vm15675_vm13 = vcmp.gt.f32.partialorder %v30173_v41, 0.0 }
 0xc43   :  { %21822 = vpow2.f32 %v15726_v12  ;;  %vm15676_vm9 = vcmp.gt.f32.partialorder %v30175_v52, 0.0 }
 0xc44   :  { %21824 = vpow2.f32 %v15728_v42 }
 0xc45   :  { %21826 = vpow2.f32 %v15730_v56 }
 0xc46   :  { %v21809_v21 = vpop.eup %21808  ;;  %21828 = vpow2.f32 %v15732_v33 }
 0xc47   :  { %v21811_v55 = vpop.eup %21810  ;;  %21830 = vpow2.f32 %v15734_v45  ;;  %v17623_v30 = vadd.f32 -1.0, %v21809_v21 }
 0xc48   :  { %v21813_v22 = vpop.eup %21812  ;;  %21832 = vpow2.f32 %v15736_v18  ;;  %v17624_v3 = vadd.f32 -1.0, %v21811_v55 }
 0xc49   :  { %v21815_v61 = vpop.eup %21814  ;;  %21834 = vpow2.f32 %v15738_v5  ;;  %v17625_v51 = vadd.f32 -1.0, %v21813_v22  ;;  %v15792_v34 = vmul.f32 1.6732632, %v17623_v30 }
 0xc4a   :  { %v21817_v7 = vpop.eup %21816  ;;  %21836 = vpow2.f32 %v15740_v54  ;;  %v17626_v53 = vadd.f32 -1.0, %v21815_v61  ;;  %v15793_v44 = vmul.f32 1.6732632, %v17624_v3 }
 0xc4b   :  { %v21819_v62 = vpop.eup %21818  ;;  %21838 = vpow2.f32 %v15742_v27  ;;  %v17627_v19 = vadd.f32 -1.0, %v21817_v7  ;;  %v15794_v25 = vmul.f32 1.6732632, %v17625_v51  ;;  %v15824_v20 = vsel %vm15664_vm8, %v30144_v4, %v15792_v34  ;;  %vm31471_vm8 = vmmov %vm31455_vm1 }
 0xc4c   :  { %v21821_v32 = vpop.eup %21820  ;;  %v17628_v1 = vadd.f32 -1.0, %v21819_v62  ;;  %v15795_v11 = vmul.f32 1.6732632, %v17626_v53  ;;  %v15825_v37 = vsel %vm15665_vm0, %v30146_v47, %v15793_v44  ;;  %v15856_v36 = vmul.f32 1.050701, %v15824_v20  ;;  %vm31472_vm0 = vmmov %vm31455_vm1 }
 0xc4d   :  { %v21823_v60 = vpop.eup %21822  ;;  %v17629_v13 = vadd.f32 -1.0, %v21821_v32  ;;  %v15796_v39 = vmul.f32 1.6732632, %v17627_v19  ;;  %v15826_v31 = vsel %vm15666_vm6, %v30149_v16, %v15794_v25  ;;  %v15857_v4 = vmul.f32 1.050701, %v15825_v37  ;;  %vm31473_vm6 = vmmov %vm31472_vm0 }
 0xc4e   :  { %v21825_v24 = vpop.eup %21824  ;;  %v17630_v57 = vadd.f32 -1.0, %v21823_v60  ;;  %v15797_v59 = vmul.f32 1.6732632, %v17628_v1  ;;  %v15827_v47 = vsel %vm15667_vm2, %v30152_v40, %v15795_v11  ;;  %v15858_v46 = vmul.f32 1.050701, %v15826_v31  ;;  %15888 = vst.msk [vmem:[%s30331_s4 + $0x80] sm:$0xff] %vm31455_vm1, %v15856_v36  ;;  %vm31474_vm2 = vmmov %vm31472_vm0 }
 0xc4f   :  { %v21827_v28 = vpop.eup %21826  ;;  %v17631_v2 = vadd.f32 -1.0, %v21825_v24  ;;  %v15798_v17 = vmul.f32 1.6732632, %v17629_v13  ;;  %v15828_v16 = vsel %vm15668_vm10, %v30155_v49, %v15796_v39  ;;  %v15859_v35 = vmul.f32 1.050701, %v15827_v47  ;;  %15889 = vst.msk [vmem:[%s30331_s4 + $0x88] sm:$0xff] %vm31469_vm5, %v15857_v4  ;;  %vm31475_vm10 = vmmov %vm31472_vm0 }
 0xc50   :  { %v21829_v40 = vpop.eup %21828  ;;  %v17632_v48 = vadd.f32 -1.0, %v21827_v28  ;;  %v15799_v29 = vmul.f32 1.6732632, %v17630_v57  ;;  %v15829_v63 = vsel %vm15669_vm7, %v30158_v23, %v15797_v59  ;;  %v15860_v10 = vmul.f32 1.050701, %v15828_v16  ;;  %15890 = vst.msk [vmem:[%s30331_s4 + $0x90] sm:$0xff] %vm31470_vm4, %v15858_v46  ;;  %vm31476_vm7 = vmmov %vm31472_vm0 }
 0xc51   :  { %v21831_v49 = vpop.eup %21830  ;;  %v17633_v38 = vadd.f32 -1.0, %v21829_v40  ;;  %v15800_v6 = vmul.f32 1.6732632, %v17631_v2  ;;  %v15830_v26 = vsel %vm15670_vm14, %v30161_v50, %v15798_v17  ;;  %v15861_v12 = vmul.f32 1.050701, %v15829_v63  ;;  %15891 = vst.msk [vmem:[%s30331_s4 + $0x98] sm:$0xff] %vm31471_vm8, %v15859_v35  ;;  %vm31481_vm1 = vmmov %vm31472_vm0 }
 0xc52   :  { %v21833_v23 = vpop.eup %21832  ;;  %v17634_v42 = vadd.f32 -1.0, %v21831_v49  ;;  %v15801_v56 = vmul.f32 1.6732632, %v17632_v48  ;;  %v15831_v33 = vsel %vm15671_vm11, %v30164_v14, %v15799_v29  ;;  %v15862_v45 = vmul.f32 1.050701, %v15830_v26  ;;  %15892 = vst.msk [vmem:[%s30331_s4 + $0xa0] sm:$0xff] %vm31472_vm0, %v15860_v10  ;;  %vm31477_vm11 = vmmov %vm31472_vm0 }
 0xc53   :  { %v21835_v50 = vpop.eup %21834  ;;  %v17635_v18 = vadd.f32 -1.0, %v21833_v23  ;;  %v15802_v5 = vmul.f32 1.6732632, %v17633_v38  ;;  %v15832_v21 = vsel %vm15672_vm3, %v30167_v8, %v15800_v6  ;;  %v15863_v54 = vmul.f32 1.050701, %v15831_v33  ;;  %15893 = vst.msk [vmem:[%s30331_s4 + $0xa8] sm:$0xff] %vm31473_vm6, %v15861_v12  ;;  %vm31482_vm5 = vmmov %vm31472_vm0 }
 0xc54   :  { %v21837_v14 = vpop.eup %21836  ;;  %v17636_v55 = vadd.f32 -1.0, %v21835_v50  ;;  %v15803_v27 = vmul.f32 1.6732632, %v17634_v42  ;;  %v15833_v30 = vsel %vm15673_vm12, %v30192_v43, %v15801_v56  ;;  %v15864_v22 = vmul.f32 1.050701, %v15832_v21  ;;  %15894 = vst.msk [vmem:[%s30331_s4 + $0xb0] sm:$0xff] %vm31474_vm2, %v15862_v45  ;;  %vm31478_vm12 = vmmov %vm31472_vm0 }
 0xc55   :  { %v21839_v8 = vpop.eup %21838  ;;  %v17637_v3 = vadd.f32 -1.0, %v21837_v14  ;;  %v15804_v61 = vmul.f32 1.6732632, %v17635_v18  ;;  %v15834_v51 = vsel %vm15674_vm15, %v30170_v9, %v15802_v5  ;;  %v15865_v34 = vmul.f32 1.050701, %v15833_v30  ;;  %15895 = vst.msk [vmem:[%s30331_s4 + $0xb8] sm:$0xff] %vm31475_vm10, %v15863_v54  ;;  %vm31483_vm4 = vmmov %vm31472_vm0 }
 0xc56   :  { %v17638_v43 = vadd.f32 -1.0, %v21839_v8  ;;  %v15805_v7 = vmul.f32 1.6732632, %v17636_v55  ;;  %v15835_v53 = vsel %vm15675_vm13, %v30173_v41, %v15803_v27  ;;  %v15866_v44 = vmul.f32 1.050701, %v15834_v51  ;;  %15896 = vst.msk [vmem:[%s30331_s4 + $0xc0] sm:$0xff] %vm31476_vm7, %v15864_v22  ;;  %vm31479_vm13 = vmmov %vm31472_vm0 }
 0xc57   :  { %vm15677_vm14 = vcmp.gt.f32.partialorder %v30179_v15, 0.0  ;;  %v15806_v9 = vmul.f32 1.6732632, %v17637_v3  ;;  %v15836_v62 = vsel %vm15676_vm9, %v30175_v52, %v15804_v61  ;;  %v15867_v19 = vmul.f32 1.050701, %v15835_v53  ;;  %15897 = vst.msk [vmem:[%s30331_s4 + $0xc8] sm:$0xff] %vm31477_vm11, %v15865_v34  ;;  %vm31480_vm9 = vmmov %vm31472_vm0 }
 0xc58   :  { %vm15678_vm3 = vcmp.gt.f32.partialorder %v30182_v0, 0.0  ;;  %v15807_v41 = vmul.f32 1.6732632, %v17638_v43  ;;  %v15837_v25 = vsel %vm15677_vm14, %v30179_v15, %v15805_v7  ;;  %v15868_v20 = vmul.f32 1.050701, %v15836_v62  ;;  %15898 = vst.msk [vmem:[%s30331_s4 + $0xd0] sm:$0xff] %vm31478_vm12, %v15866_v44 }
 0xc59   :  { %vm15679_vm15 = vcmp.gt.f32.partialorder %v30185_v58, 0.0  ;;  %v15838_v52 = vsel %vm15678_vm3, %v30182_v0, %v15806_v9  ;;  %v15869_v32 = vmul.f32 1.050701, %v15837_v25  ;;  %15899 = vst.msk [vmem:[%s30331_s4 + $0xd8] sm:$0xff] %vm31479_vm13, %v15867_v19 }
 0xc5a   :  { %v15839_v1 = vsel %vm15679_vm15, %v30185_v58, %v15807_v41  ;;  %v15870_v11 = vmul.f32 1.050701, %v15838_v52  ;;  %15900 = vst.msk [vmem:[%s30331_s4 + $0xe0] sm:$0xff] %vm31480_vm9, %v15868_v20 }
 0xc5b   :  { %v15871_v15 = vmul.f32 1.050701, %v15839_v1  ;;  %15901 = vst.msk [vmem:[%s30331_s4 + $0xe8] sm:$0xff] %vm31481_vm1, %v15869_v32 }
 0xc5c   :  { %15902 = vst.msk [vmem:[%s30331_s4 + $0xf0] sm:$0xff] %vm31482_vm5, %v15870_v11 }
 0xc5d   :  { %15903 = vst.msk [vmem:[%s30331_s4 + $0xf8] sm:$0xff] %vm31483_vm4, %v15871_v15 }

</bundles_post_ra>
